<compile_context>
chip_gen: v7x
topology: tpu7x:2x2x1
jax: 0.10.0
libtpu: 0.0.40
codegen_flags: <defaults>
</compile_context>

<pallas_src>
import jax
import jax.numpy as jnp
from jax.experimental import pallas as pl
from jax.experimental.pallas import tpu as pltpu

NUM_CLASSES = 4


# ----------------------------------------------------------------------------
# Fused Pallas kernel: O = relu( (A @ B) + bias [+ residual] )
# A, B, residual are bf16; accumulation in f32; output cast to out dtype (bf16
# for conv layers, f32 for the fc head).
# ----------------------------------------------------------------------------
def _make_mm_kernel(relu: bool, has_res: bool, multi_k: bool):
    def epilogue(acc_f32, c_ref, r_ref):
        y = acc_f32 + c_ref[...]                     # bias (1, tn) broadcast
        if r_ref is not None:
            y = y + r_ref[...].astype(jnp.float32)
        if relu:
            y = jnp.maximum(y, 0.0)
        return y

    if not multi_k:
        # Single K step: write result directly (no accumulator round-trip).
        def kernel(*refs):
            if has_res:
                a_ref, b_ref, c_ref, r_ref, o_ref = refs
            else:
                a_ref, b_ref, c_ref, o_ref = refs
                r_ref = None
            acc = jnp.dot(a_ref[...], b_ref[...],
                          preferred_element_type=jnp.float32)
            o_ref[...] = epilogue(acc, c_ref, r_ref).astype(o_ref.dtype)
        return kernel

    def kernel(*refs):
        if has_res:
            a_ref, b_ref, c_ref, r_ref, o_ref, acc_ref = refs
        else:
            a_ref, b_ref, c_ref, o_ref, acc_ref = refs
            r_ref = None

        k = pl.program_id(2)

        @pl.when(k == 0)
        def _():
            acc_ref[...] = jnp.zeros_like(acc_ref)

        acc_ref[...] += jnp.dot(a_ref[...], b_ref[...],
                                preferred_element_type=jnp.float32)

        @pl.when(k == pl.num_programs(2) - 1)
        def _():
            o_ref[...] = epilogue(acc_ref[...], c_ref, r_ref).astype(o_ref.dtype)

    return kernel


def _round_up(x, m):
    return ((x + m - 1) // m) * m


def _pick_tiles(M, N, K):
    """Per-layer tile sizes: minimize padding, 256-friendly K tiles, tm<=512."""
    # --- M: one full tile up to 512, else tile with the cleanest divisor ---
    if M <= 512:
        Mp = _round_up(M, 16)
        tm = Mp
    else:
        tm = 512
        for cand in (512, 384, 256):
            if M % cand == 0:
                tm = cand
                break
        Mp = _round_up(M, tm)

    # --- N: full Cout width (lane-dense, no pad / slice) ---
    if N % 64 == 0:
        Np = N
        tn = N
        # v7x megacore: if M collapsed to a single tile, keep >=2 parallel blocks.
        if Mp == tm and N >= 256:
            tn = N // 2
    else:                                        # tiny fc head only
        Np = _round_up(N, 128)
        tn = Np

    # --- K: pad to 128-multiple only when needed; single step when it fits ---
    Kp = _round_up(K, 128)
    if Kp <= 1536:
        tk = Kp                                  # single K step
    else:
        tk = 128
        for cand in (768, 1152, 512, 384, 256):  # 768 divides 2304 & 4608
            if Kp % cand == 0:
                tk = cand
                break
    return tm, tn, tk, Mp, Np, Kp


def matmul_fused(A, Bm, bias, residual=None, relu=False, out_dtype=jnp.bfloat16):
    """A:(M,K)  Bm:(K,N) (BN scale pre-folded)  bias:(N,)  residual:(M,N)|None
    -> (M,N) out_dtype (bf16 for conv layers, f32 for logits)."""
    M, K = A.shape
    _, N = Bm.shape
    tm, tn, tk, Mp, Np, Kp = _pick_tiles(M, N, K)

    A_p = A.astype(jnp.bfloat16)
    if (Mp, Kp) != (M, K):
        A_p = jnp.pad(A_p, ((0, Mp - M), (0, Kp - K)))
    B_p = Bm.astype(jnp.bfloat16)
    if (Kp, Np) != (K, N):
        B_p = jnp.pad(B_p, ((0, Kp - K), (0, Np - N)))
    c_p = bias.astype(jnp.float32)
    if Np != N:
        c_p = jnp.pad(c_p, (0, Np - N))
    c_p = c_p.reshape(1, Np)

    has_res = residual is not None
    nk = Kp // tk
    multi_k = nk > 1

    if multi_k:
        grid = (Mp // tm, Np // tn, nk)
        a_spec = pl.BlockSpec((tm, tk), lambda i, j, k: (i, k))
        b_spec = pl.BlockSpec((tk, tn), lambda i, j, k: (k, j))
        c_spec = pl.BlockSpec((1, tn), lambda i, j, k: (0, j))
        r_spec = pl.BlockSpec((tm, tn), lambda i, j, k: (i, j))
        o_spec = pl.BlockSpec((tm, tn), lambda i, j, k: (i, j))
        dims = ("parallel", "parallel", "arbitrary")
        scratch = [pltpu.VMEM((tm, tn), jnp.float32)]
    else:
        grid = (Mp // tm, Np // tn)
        a_spec = pl.BlockSpec((tm, tk), lambda i, j: (i, 0))
        b_spec = pl.BlockSpec((tk, tn), lambda i, j: (0, j))
        c_spec = pl.BlockSpec((1, tn), lambda i, j: (0, j))
        r_spec = pl.BlockSpec((tm, tn), lambda i, j: (i, j))
        o_spec = pl.BlockSpec((tm, tn), lambda i, j: (i, j))
        dims = ("parallel", "parallel")
        scratch = []

    in_specs = [a_spec, b_spec, c_spec]
    args = [A_p, B_p, c_p]
    if has_res:
        r_p = residual.astype(jnp.bfloat16)
        if (Mp, Np) != (M, N):
            r_p = jnp.pad(r_p, ((0, Mp - M), (0, Np - N)))
        in_specs.append(r_spec)
        args.append(r_p)

    out_bytes = jnp.dtype(out_dtype).itemsize
    flops = 2 * Mp * Np * Kp
    bytes_accessed = (Mp * Kp * 2 + Kp * Np * 2 + Mp * Np * out_bytes + Np * 4
                      + (Mp * Np * 2 if has_res else 0))

    out = pl.pallas_call(
        _make_mm_kernel(relu, has_res, multi_k),
        out_shape=jax.ShapeDtypeStruct((Mp, Np), out_dtype),
        grid_spec=pltpu.PrefetchScalarGridSpec(
            num_scalar_prefetch=0,
            grid=grid,
            in_specs=in_specs,
            out_specs=o_spec,
            scratch_shapes=scratch,
        ),
        compiler_params=pltpu.CompilerParams(
            dimension_semantics=dims,
            vmem_limit_bytes=32 * 1024 * 1024,
        ),
        cost_estimate=pl.CostEstimate(
            flops=flops, transcendentals=0, bytes_accessed=bytes_accessed),
    )(*args)

    if (Mp, Np) != (M, N):
        out = out[:M, :N]
    return out


# ----------------------------------------------------------------------------
# Conv (im2col) + folded BN + optional residual + optional ReLU
# ----------------------------------------------------------------------------
def conv_bn_act(x, w_mat, bias, k, stride, pad, relu, residual=None):
    """x: (B,H,W,Cin) NHWC bf16.  w_mat: (k*k*Cin, Cout) with BN scale folded."""
    Bsz, H, W, Cin = x.shape
    _, Cout = w_mat.shape
    Hout = (H + 2 * pad - k) // stride + 1
    Wout = (W + 2 * pad - k) // stride + 1

    xb = x.astype(jnp.bfloat16)
    if k == 1 and pad == 0:
        A = xb[:, :stride * Hout:stride, :stride * Wout:stride, :]
        A = A.reshape(Bsz * Hout * Wout, Cin)
    else:
        # TODO(synk): im2col still materializes a k*k-expanded bf16 activation
        # copy in HBM; a Pallas conv streaming overlapping row-bands (pl.ANY +
        # manual DMA) would remove that traffic at 224x224 resolutions.
        xp = jnp.pad(xb, ((0, 0), (pad, pad), (pad, pad), (0, 0)))
        cols = []
        for i in range(k):
            for j in range(k):
                cols.append(xp[:, i: i + stride * Hout: stride,
                                  j: j + stride * Wout: stride, :])
        A = jnp.concatenate(cols, axis=-1).reshape(Bsz * Hout * Wout, k * k * Cin)

    res2d = None
    if residual is not None:
        res2d = residual.reshape(Bsz * Hout * Wout, Cout)

    out = matmul_fused(A, w_mat, bias, res2d, relu)      # bf16
    return out.reshape(Bsz, Hout, Wout, Cout)


def maxpool_3x3_s2(x):
    """3x3 max pool, stride 2, pad 1 (bf16).
    TODO(synk): could be fused into the conv1 epilogue / a small Pallas kernel
    to save one HBM round trip of the 64-channel map."""
    Bsz, H, W, C = x.shape
    Hout = (H + 2 - 3) // 2 + 1
    Wout = (W + 2 - 3) // 2 + 1
    xp = jnp.pad(x, ((0, 0), (1, 1), (1, 1), (0, 0)), constant_values=-jnp.inf)
    out = None
    for i in range(3):
        for j in range(3):
            s = xp[:, i: i + 2 * Hout: 2, j: j + 2 * Wout: 2, :]
            out = s if out is None else jnp.maximum(out, s)
    return out


# ----------------------------------------------------------------------------
# ResNet-18 structure
# ----------------------------------------------------------------------------
def basic_block(x, p, stride):
    if "down" in p:
        identity = conv_bn_act(x, *p["down"], k=1, stride=stride, pad=0,
                               relu=False)
    else:
        identity = x
    out = conv_bn_act(x, *p["conv1"], k=3, stride=stride, pad=1, relu=True)
    # conv2 -> bn2 -> add identity -> relu, all fused in the kernel epilogue
    out = conv_bn_act(out, *p["conv2"], k=3, stride=1, pad=1, relu=True,
                      residual=identity)
    return out


def run_layer(x, blocks, stride):
    x = basic_block(x, blocks[0], stride)
    x = basic_block(x, blocks[1], 1)
    return x


def resnet18_forward(x_nchw, fp):
    x = jnp.transpose(x_nchw, (0, 2, 3, 1)).astype(jnp.bfloat16)  # NCHW -> NHWC
    x = conv_bn_act(x, *fp["conv1"], k=7, stride=2, pad=3, relu=True)
    x = maxpool_3x3_s2(x)
    x = run_layer(x, fp["layer1"], stride=1)
    x = run_layer(x, fp["layer2"], stride=2)
    x = run_layer(x, fp["layer3"], stride=2)
    x = run_layer(x, fp["layer4"], stride=2)
    x = jnp.mean(x.astype(jnp.float32), axis=(1, 2))     # GAP -> (B, 512) f32
    out = matmul_fused(x, fp["fc_w"], fp["fc_b"], None, relu=False,
                       out_dtype=jnp.float32)
    return out                                            # (B, num_classes) f32


# ----------------------------------------------------------------------------
# Parameter preparation: fold BN scale into (pre-transposed, bf16) weights once,
# outside the per-forward jit path.
# ----------------------------------------------------------------------------
def fold_conv_bn(w, bn):
    gamma, beta, mean, var = bn
    scale = gamma / jnp.sqrt(var + 1e-5)
    bias = beta - mean * scale
    Cout, Cin, kh, kw = w.shape
    w_mat = jnp.transpose(w, (2, 3, 1, 0)).reshape(kh * kw * Cin, Cout)
    w_mat = (w_mat * scale[None, :]).astype(jnp.bfloat16)
    return w_mat, bias.astype(jnp.float32)


def prepare_params(params):
    def blk(p):
        q = {
            "conv1": fold_conv_bn(p["conv1_w"], p["bn1"]),
            "conv2": fold_conv_bn(p["conv2_w"], p["bn2"]),
        }
        if "down_w" in p:
            q["down"] = fold_conv_bn(p["down_w"], p["down_bn"])
        return q

    return {
        "conv1": fold_conv_bn(params["conv1_w"], params["bn1"]),
        "layer1": [blk(b) for b in params["layer1"]],
        "layer2": [blk(b) for b in params["layer2"]],
        "layer3": [blk(b) for b in params["layer3"]],
        "layer4": [blk(b) for b in params["layer4"]],
        "fc_w": params["fc_w"].T.astype(jnp.bfloat16),
        "fc_b": params["fc_b"].astype(jnp.float32),
    }


# ----------------------------------------------------------------------------
# Deterministic synthetic parameter init (correct ResNet-18 shapes)
# ----------------------------------------------------------------------------
def init_params(key):
    keys = iter(jax.random.split(key, 64))

    def conv_w(cout, cin, k):
        return jax.random.normal(next(keys), (cout, cin, k, k), jnp.float32) * 0.05

    def bn_p(c):
        return (jnp.ones((c,), jnp.float32),   # gamma
                jnp.zeros((c,), jnp.float32),  # beta
                jnp.zeros((c,), jnp.float32),  # running_mean
                jnp.ones((c,), jnp.float32))   # running_var

    def make_layer(cin, cout, downsample):
        b0 = {
            "conv1_w": conv_w(cout, cin, 3), "bn1": bn_p(cout),
            "conv2_w": conv_w(cout, cout, 3), "bn2": bn_p(cout),
        }
        if downsample:
            b0["down_w"] = conv_w(cout, cin, 1)
            b0["down_bn"] = bn_p(cout)
        b1 = {
            "conv1_w": conv_w(cout, cout, 3), "bn1": bn_p(cout),
            "conv2_w": conv_w(cout, cout, 3), "bn2": bn_p(cout),
        }
        return [b0, b1]

    return {
        "conv1_w": conv_w(64, 3, 7),
        "bn1": bn_p(64),
        "layer1": make_layer(64, 64, downsample=False),
        "layer2": make_layer(64, 128, downsample=True),
        "layer3": make_layer(128, 256, downsample=True),
        "layer4": make_layer(256, 512, downsample=True),
        "fc_w": jax.random.normal(next(keys), (NUM_CLASSES, 512), jnp.float32) * 0.05,
        "fc_b": jnp.zeros((NUM_CLASSES,), jnp.float32),
    }


if __name__ == "__main__":
    key = jax.random.PRNGKey(0)
    # Small spatial size (32x32) instead of 224x224; channels must be 3 for conv1.
    x = jax.random.normal(key, (2, 3, 32, 32), jnp.float32)
    params = init_params(jax.random.PRNGKey(42))
    fparams = prepare_params(params)     # BN-folded, bf16, pre-transposed weights

    fwd = jax.jit(resnet18_forward)
    out = fwd(x, fparams)
    jax.block_until_ready(out)
    assert out.shape == (2, NUM_CLASSES), out.shape
    assert out.dtype == jnp.float32
    print("KERNEL_OK")
</pallas_src>

<mosaic_0001>
module attributes {stable_mosaic.version = 11 : i64} {
  func.func @kernel(%arg0: i32, %arg1: i32, %arg2: memref<512x256xbf16, #tpu.memory_space<vmem>>, %arg3: memref<256x64xbf16, #tpu.memory_space<vmem>>, %arg4: memref<1x64xf32, #tpu.memory_space<vmem>>, %arg5: memref<512x64xbf16, #tpu.memory_space<vmem>>) attributes {dimension_semantics = [#tpu.dimension_semantics<parallel>, #tpu.dimension_semantics<parallel>], iteration_bounds = array<i64: 1, 1>, scalar_prefetch = 0 : i64, scratch_operands = 0 : i64, tpu.core_type = #tpu.core_type<tc>, window_params = [{transform_indices = @transform_0, window_bounds = array<i64: 512, 256>}, {transform_indices = @transform_1, window_bounds = array<i64: 256, 64>}, {transform_indices = @transform_2, window_bounds = array<i64: 1, 64>}, {transform_indices = @transform_3, window_bounds = array<i64: 512, 64>}]} {
    %c0 = arith.constant 0 : index
    %c0_0 = arith.constant 0 : index
    %0 = vector.load %arg2[%c0, %c0_0] : memref<512x256xbf16, #tpu.memory_space<vmem>>, vector<512x256xbf16>
    %c0_1 = arith.constant 0 : index
    %c0_2 = arith.constant 0 : index
    %1 = vector.load %arg3[%c0_1, %c0_2] : memref<256x64xbf16, #tpu.memory_space<vmem>>, vector<256x64xbf16>
    %cst = arith.constant dense<0.000000e+00> : vector<512x64xf32>
    %2 = tpu.matmul %0, %1, %cst {dimension_numbers = #tpu.dot_dimension_numbers<[1], [0], [0], [1], [0, 0, 1, 1], [], []>} : vector<512x256xbf16>, vector<256x64xbf16>, vector<512x64xf32> -> vector<512x64xf32>
    %c0_3 = arith.constant 0 : index
    %c0_4 = arith.constant 0 : index
    %3 = vector.load %arg4[%c0_3, %c0_4] : memref<1x64xf32, #tpu.memory_space<vmem>>, vector<1x64xf32>
    %4 = vector.broadcast %3 : vector<1x64xf32> to vector<512x64xf32>
    %5 = arith.addf %2, %4 : vector<512x64xf32>
    %cst_5 = arith.constant 0.000000e+00 : f32
    %6 = vector.broadcast %cst_5 : f32 to vector<512x64xf32>
    %7 = arith.maximumf %5, %6 : vector<512x64xf32>
    %8 = arith.truncf %7 : vector<512x64xf32> to vector<512x64xbf16>
    %c0_6 = arith.constant 0 : index
    %c0_7 = arith.constant 0 : index
    %9 = vector.load %arg5[%c0_6, %c0_7] : memref<512x64xbf16, #tpu.memory_space<vmem>>, vector<512x64xbf16>
    tpu.vector_store %arg5[%c0_6, %c0_7], %8 {strides = array<i32>} : memref<512x64xbf16, #tpu.memory_space<vmem>>, vector<512x64xbf16>,
    return
  }
  func.func @transform_0(%arg0: i32, %arg1: i32) -> (i32, i32) {
    %c0_i32 = arith.constant 0 : i32
    %c0_i32_0 = arith.constant 0 : i32
    return %arg0, %c0_i32 : i32, i32
  }
  func.func @transform_1(%arg0: i32, %arg1: i32) -> (i32, i32) {
    %c0_i32 = arith.constant 0 : i32
    %c0_i32_0 = arith.constant 0 : i32
    return %c0_i32, %arg1 : i32, i32
  }
  func.func @transform_2(%arg0: i32, %arg1: i32) -> (i32, i32) {
    %c0_i32 = arith.constant 0 : i32
    %c0_i32_0 = arith.constant 0 : i32
    return %c0_i32, %arg1 : i32, i32
  }
  func.func @transform_3(%arg0: i32, %arg1: i32) -> (i32, i32) {
    %c0_i32 = arith.constant 0 : i32
    return %arg0, %arg1 : i32, i32
  }
}

module attributes {stable_mosaic.version = 11 : i64} {
  func.func @kernel(%arg0: i32, %arg1: i32, %arg2: memref<128x640xbf16, #tpu.memory_space<vmem>>, %arg3: memref<640x64xbf16, #tpu.memory_space<vmem>>, %arg4: memref<1x64xf32, #tpu.memory_space<vmem>>, %arg5: memref<128x64xbf16, #tpu.memory_space<vmem>>) attributes {dimension_semantics = [#tpu.dimension_semantics<parallel>, #tpu.dimension_semantics<parallel>], iteration_bounds = array<i64: 1, 1>, scalar_prefetch = 0 : i64, scratch_operands = 0 : i64, tpu.core_type = #tpu.core_type<tc>, window_params = [{transform_indices = @transform_0, window_bounds = array<i64: 128, 640>}, {transform_indices = @transform_1, window_bounds = array<i64: 640, 64>}, {transform_indices = @transform_2, window_bounds = array<i64: 1, 64>}, {transform_indices = @transform_3, window_bounds = array<i64: 128, 64>}]} {
    %c0 = arith.constant 0 : index
    %c0_0 = arith.constant 0 : index
    %0 = vector.load %arg2[%c0, %c0_0] : memref<128x640xbf16, #tpu.memory_space<vmem>>, vector<128x640xbf16>
    %c0_1 = arith.constant 0 : index
    %c0_2 = arith.constant 0 : index
    %1 = vector.load %arg3[%c0_1, %c0_2] : memref<640x64xbf16, #tpu.memory_space<vmem>>, vector<640x64xbf16>
    %cst = arith.constant dense<0.000000e+00> : vector<128x64xf32>
    %2 = tpu.matmul %0, %1, %cst {dimension_numbers = #tpu.dot_dimension_numbers<[1], [0], [0], [1], [0, 0, 1, 1], [], []>} : vector<128x640xbf16>, vector<640x64xbf16>, vector<128x64xf32> -> vector<128x64xf32>
    %c0_3 = arith.constant 0 : index
    %c0_4 = arith.constant 0 : index
    %3 = vector.load %arg4[%c0_3, %c0_4] : memref<1x64xf32, #tpu.memory_space<vmem>>, vector<1x64xf32>
    %4 = vector.broadcast %3 : vector<1x64xf32> to vector<128x64xf32>
    %5 = arith.addf %2, %4 : vector<128x64xf32>
    %cst_5 = arith.constant 0.000000e+00 : f32
    %6 = vector.broadcast %cst_5 : f32 to vector<128x64xf32>
    %7 = arith.maximumf %5, %6 : vector<128x64xf32>
    %8 = arith.truncf %7 : vector<128x64xf32> to vector<128x64xbf16>
    %c0_6 = arith.constant 0 : index
    %c0_7 = arith.constant 0 : index
    %9 = vector.load %arg5[%c0_6, %c0_7] : memref<128x64xbf16, #tpu.memory_space<vmem>>, vector<128x64xbf16>
    tpu.vector_store %arg5[%c0_6, %c0_7], %8 {strides = array<i32>} : memref<128x64xbf16, #tpu.memory_space<vmem>>, vector<128x64xbf16>,
    return
  }
  func.func @transform_0(%arg0: i32, %arg1: i32) -> (i32, i32) {
    %c0_i32 = arith.constant 0 : i32
    %c0_i32_0 = arith.constant 0 : i32
    return %arg0, %c0_i32 : i32, i32
  }
  func.func @transform_1(%arg0: i32, %arg1: i32) -> (i32, i32) {
    %c0_i32 = arith.constant 0 : i32
    %c0_i32_0 = arith.constant 0 : i32
    return %c0_i32, %arg1 : i32, i32
  }
  func.func @transform_2(%arg0: i32, %arg1: i32) -> (i32, i32) {
    %c0_i32 = arith.constant 0 : i32
    %c0_i32_0 = arith.constant 0 : i32
    return %c0_i32, %arg1 : i32, i32
  }
  func.func @transform_3(%arg0: i32, %arg1: i32) -> (i32, i32) {
    %c0_i32 = arith.constant 0 : i32
    return %arg0, %arg1 : i32, i32
  }
}

module attributes {stable_mosaic.version = 11 : i64} {
  func.func @kernel(%arg0: i32, %arg1: i32, %arg2: memref<128x640xbf16, #tpu.memory_space<vmem>>, %arg3: memref<640x64xbf16, #tpu.memory_space<vmem>>, %arg4: memref<1x64xf32, #tpu.memory_space<vmem>>, %arg5: memref<128x64xbf16, #tpu.memory_space<vmem>>, %arg6: memref<128x64xbf16, #tpu.memory_space<vmem>>) attributes {dimension_semantics = [#tpu.dimension_semantics<parallel>, #tpu.dimension_semantics<parallel>], iteration_bounds = array<i64: 1, 1>, scalar_prefetch = 0 : i64, scratch_operands = 0 : i64, tpu.core_type = #tpu.core_type<tc>, window_params = [{transform_indices = @transform_0, window_bounds = array<i64: 128, 640>}, {transform_indices = @transform_1, window_bounds = array<i64: 640, 64>}, {transform_indices = @transform_2, window_bounds = array<i64: 1, 64>}, {transform_indices = @transform_3, window_bounds = array<i64: 128, 64>}, {transform_indices = @transform_4, window_bounds = array<i64: 128, 64>}]} {
    %c0 = arith.constant 0 : index
    %c0_0 = arith.constant 0 : index
    %0 = vector.load %arg2[%c0, %c0_0] : memref<128x640xbf16, #tpu.memory_space<vmem>>, vector<128x640xbf16>
    %c0_1 = arith.constant 0 : index
    %c0_2 = arith.constant 0 : index
    %1 = vector.load %arg3[%c0_1, %c0_2] : memref<640x64xbf16, #tpu.memory_space<vmem>>, vector<640x64xbf16>
    %cst = arith.constant dense<0.000000e+00> : vector<128x64xf32>
    %2 = tpu.matmul %0, %1, %cst {dimension_numbers = #tpu.dot_dimension_numbers<[1], [0], [0], [1], [0, 0, 1, 1], [], []>} : vector<128x640xbf16>, vector<640x64xbf16>, vector<128x64xf32> -> vector<128x64xf32>
    %c0_3 = arith.constant 0 : index
    %c0_4 = arith.constant 0 : index
    %3 = vector.load %arg4[%c0_3, %c0_4] : memref<1x64xf32, #tpu.memory_space<vmem>>, vector<1x64xf32>
    %4 = vector.broadcast %3 : vector<1x64xf32> to vector<128x64xf32>
    %5 = arith.addf %2, %4 : vector<128x64xf32>
    %c0_5 = arith.constant 0 : index
    %c0_6 = arith.constant 0 : index
    %6 = vector.load %arg5[%c0_5, %c0_6] : memref<128x64xbf16, #tpu.memory_space<vmem>>, vector<128x64xbf16>
    %7 = arith.extf %6 : vector<128x64xbf16> to vector<128x64xf32>
    %8 = arith.addf %5, %7 : vector<128x64xf32>
    %cst_7 = arith.constant 0.000000e+00 : f32
    %9 = vector.broadcast %cst_7 : f32 to vector<128x64xf32>
    %10 = arith.maximumf %8, %9 : vector<128x64xf32>
    %11 = arith.truncf %10 : vector<128x64xf32> to vector<128x64xbf16>
    %c0_8 = arith.constant 0 : index
    %c0_9 = arith.constant 0 : index
    %12 = vector.load %arg6[%c0_8, %c0_9] : memref<128x64xbf16, #tpu.memory_space<vmem>>, vector<128x64xbf16>
    tpu.vector_store %arg6[%c0_8, %c0_9], %11 {strides = array<i32>} : memref<128x64xbf16, #tpu.memory_space<vmem>>, vector<128x64xbf16>,
    return
  }
  func.func @transform_0(%arg0: i32, %arg1: i32) -> (i32, i32) {
    %c0_i32 = arith.constant 0 : i32
    %c0_i32_0 = arith.constant 0 : i32
    return %arg0, %c0_i32 : i32, i32
  }
  func.func @transform_1(%arg0: i32, %arg1: i32) -> (i32, i32) {
    %c0_i32 = arith.constant 0 : i32
    %c0_i32_0 = arith.constant 0 : i32
    return %c0_i32, %arg1 : i32, i32
  }
  func.func @transform_2(%arg0: i32, %arg1: i32) -> (i32, i32) {
    %c0_i32 = arith.constant 0 : i32
    %c0_i32_0 = arith.constant 0 : i32
    return %c0_i32, %arg1 : i32, i32
  }
  func.func @transform_3(%arg0: i32, %arg1: i32) -> (i32, i32) {
    %c0_i32 = arith.constant 0 : i32
    return %arg0, %arg1 : i32, i32
  }
  func.func @transform_4(%arg0: i32, %arg1: i32) -> (i32, i32) {
    %c0_i32 = arith.constant 0 : i32
    return %arg0, %arg1 : i32, i32
  }
}

module attributes {stable_mosaic.version = 11 : i64} {
  func.func @kernel(%arg0: i32, %arg1: i32, %arg2: memref<32x640xbf16, #tpu.memory_space<vmem>>, %arg3: memref<640x128xbf16, #tpu.memory_space<vmem>>, %arg4: memref<1x128xf32, #tpu.memory_space<vmem>>, %arg5: memref<32x128xbf16, #tpu.memory_space<vmem>>) attributes {dimension_semantics = [#tpu.dimension_semantics<parallel>, #tpu.dimension_semantics<parallel>], iteration_bounds = array<i64: 1, 1>, scalar_prefetch = 0 : i64, scratch_operands = 0 : i64, tpu.core_type = #tpu.core_type<tc>, window_params = [{transform_indices = @transform_0, window_bounds = array<i64: 32, 640>}, {transform_indices = @transform_1, window_bounds = array<i64: 640, 128>}, {transform_indices = @transform_2, window_bounds = array<i64: 1, 128>}, {transform_indices = @transform_3, window_bounds = array<i64: 32, 128>}]} {
    %c0 = arith.constant 0 : index
    %c0_0 = arith.constant 0 : index
    %0 = vector.load %arg2[%c0, %c0_0] : memref<32x640xbf16, #tpu.memory_space<vmem>>, vector<32x640xbf16>
    %c0_1 = arith.constant 0 : index
    %c0_2 = arith.constant 0 : index
    %1 = vector.load %arg3[%c0_1, %c0_2] : memref<640x128xbf16, #tpu.memory_space<vmem>>, vector<640x128xbf16>
    %cst = arith.constant dense<0.000000e+00> : vector<32x128xf32>
    %2 = tpu.matmul %0, %1, %cst {dimension_numbers = #tpu.dot_dimension_numbers<[1], [0], [0], [1], [0, 0, 1, 1], [], []>} : vector<32x640xbf16>, vector<640x128xbf16>, vector<32x128xf32> -> vector<32x128xf32>
    %c0_3 = arith.constant 0 : index
    %c0_4 = arith.constant 0 : index
    %3 = vector.load %arg4[%c0_3, %c0_4] : memref<1x128xf32, #tpu.memory_space<vmem>>, vector<1x128xf32>
    %4 = vector.broadcast %3 : vector<1x128xf32> to vector<32x128xf32>
    %5 = arith.addf %2, %4 : vector<32x128xf32>
    %cst_5 = arith.constant 0.000000e+00 : f32
    %6 = vector.broadcast %cst_5 : f32 to vector<32x128xf32>
    %7 = arith.maximumf %5, %6 : vector<32x128xf32>
    %8 = arith.truncf %7 : vector<32x128xf32> to vector<32x128xbf16>
    %c0_6 = arith.constant 0 : index
    %c0_7 = arith.constant 0 : index
    %9 = vector.load %arg5[%c0_6, %c0_7] : memref<32x128xbf16, #tpu.memory_space<vmem>>, vector<32x128xbf16>
    tpu.vector_store %arg5[%c0_6, %c0_7], %8 {strides = array<i32>} : memref<32x128xbf16, #tpu.memory_space<vmem>>, vector<32x128xbf16>,
    return
  }
  func.func @transform_0(%arg0: i32, %arg1: i32) -> (i32, i32) {
    %c0_i32 = arith.constant 0 : i32
    %c0_i32_0 = arith.constant 0 : i32
    return %arg0, %c0_i32 : i32, i32
  }
  func.func @transform_1(%arg0: i32, %arg1: i32) -> (i32, i32) {
    %c0_i32 = arith.constant 0 : i32
    %c0_i32_0 = arith.constant 0 : i32
    return %c0_i32, %arg1 : i32, i32
  }
  func.func @transform_2(%arg0: i32, %arg1: i32) -> (i32, i32) {
    %c0_i32 = arith.constant 0 : i32
    %c0_i32_0 = arith.constant 0 : i32
    return %c0_i32, %arg1 : i32, i32
  }
  func.func @transform_3(%arg0: i32, %arg1: i32) -> (i32, i32) {
    %c0_i32 = arith.constant 0 : i32
    return %arg0, %arg1 : i32, i32
  }
}

module attributes {stable_mosaic.version = 11 : i64} {
  func.func @kernel(%arg0: i32, %arg1: i32, %arg2: memref<32x1152xbf16, #tpu.memory_space<vmem>>, %arg3: memref<1152x128xbf16, #tpu.memory_space<vmem>>, %arg4: memref<1x128xf32, #tpu.memory_space<vmem>>, %arg5: memref<32x128xbf16, #tpu.memory_space<vmem>>) attributes {dimension_semantics = [#tpu.dimension_semantics<parallel>, #tpu.dimension_semantics<parallel>], iteration_bounds = array<i64: 1, 1>, scalar_prefetch = 0 : i64, scratch_operands = 0 : i64, tpu.core_type = #tpu.core_type<tc>, window_params = [{transform_indices = @transform_0, window_bounds = array<i64: 32, 1152>}, {transform_indices = @transform_1, window_bounds = array<i64: 1152, 128>}, {transform_indices = @transform_2, window_bounds = array<i64: 1, 128>}, {transform_indices = @transform_3, window_bounds = array<i64: 32, 128>}]} {
    %c0 = arith.constant 0 : index
    %c0_0 = arith.constant 0 : index
    %0 = vector.load %arg2[%c0, %c0_0] : memref<32x1152xbf16, #tpu.memory_space<vmem>>, vector<32x1152xbf16>
    %c0_1 = arith.constant 0 : index
    %c0_2 = arith.constant 0 : index
    %1 = vector.load %arg3[%c0_1, %c0_2] : memref<1152x128xbf16, #tpu.memory_space<vmem>>, vector<1152x128xbf16>
    %cst = arith.constant dense<0.000000e+00> : vector<32x128xf32>
    %2 = tpu.matmul %0, %1, %cst {dimension_numbers = #tpu.dot_dimension_numbers<[1], [0], [0], [1], [0, 0, 1, 1], [], []>} : vector<32x1152xbf16>, vector<1152x128xbf16>, vector<32x128xf32> -> vector<32x128xf32>
    %c0_3 = arith.constant 0 : index
    %c0_4 = arith.constant 0 : index
    %3 = vector.load %arg4[%c0_3, %c0_4] : memref<1x128xf32, #tpu.memory_space<vmem>>, vector<1x128xf32>
    %4 = vector.broadcast %3 : vector<1x128xf32> to vector<32x128xf32>
    %5 = arith.addf %2, %4 : vector<32x128xf32>
    %cst_5 = arith.constant 0.000000e+00 : f32
    %6 = vector.broadcast %cst_5 : f32 to vector<32x128xf32>
    %7 = arith.maximumf %5, %6 : vector<32x128xf32>
    %8 = arith.truncf %7 : vector<32x128xf32> to vector<32x128xbf16>
    %c0_6 = arith.constant 0 : index
    %c0_7 = arith.constant 0 : index
    %9 = vector.load %arg5[%c0_6, %c0_7] : memref<32x128xbf16, #tpu.memory_space<vmem>>, vector<32x128xbf16>
    tpu.vector_store %arg5[%c0_6, %c0_7], %8 {strides = array<i32>} : memref<32x128xbf16, #tpu.memory_space<vmem>>, vector<32x128xbf16>,
    return
  }
  func.func @transform_0(%arg0: i32, %arg1: i32) -> (i32, i32) {
    %c0_i32 = arith.constant 0 : i32
    %c0_i32_0 = arith.constant 0 : i32
    return %arg0, %c0_i32 : i32, i32
  }
  func.func @transform_1(%arg0: i32, %arg1: i32) -> (i32, i32) {
    %c0_i32 = arith.constant 0 : i32
    %c0_i32_0 = arith.constant 0 : i32
    return %c0_i32, %arg1 : i32, i32
  }
  func.func @transform_2(%arg0: i32, %arg1: i32) -> (i32, i32) {
    %c0_i32 = arith.constant 0 : i32
    %c0_i32_0 = arith.constant 0 : i32
    return %c0_i32, %arg1 : i32, i32
  }
  func.func @transform_3(%arg0: i32, %arg1: i32) -> (i32, i32) {
    %c0_i32 = arith.constant 0 : i32
    return %arg0, %arg1 : i32, i32
  }
}

module attributes {stable_mosaic.version = 11 : i64} {
  func.func @kernel(%arg0: i32, %arg1: i32, %arg2: memref<32x128xbf16, #tpu.memory_space<vmem>>, %arg3: memref<128x128xbf16, #tpu.memory_space<vmem>>, %arg4: memref<1x128xf32, #tpu.memory_space<vmem>>, %arg5: memref<32x128xbf16, #tpu.memory_space<vmem>>) attributes {dimension_semantics = [#tpu.dimension_semantics<parallel>, #tpu.dimension_semantics<parallel>], iteration_bounds = array<i64: 1, 1>, scalar_prefetch = 0 : i64, scratch_operands = 0 : i64, tpu.core_type = #tpu.core_type<tc>, window_params = [{transform_indices = @transform_0, window_bounds = array<i64: 32, 128>}, {transform_indices = @transform_1, window_bounds = array<i64: 128, 128>}, {transform_indices = @transform_2, window_bounds = array<i64: 1, 128>}, {transform_indices = @transform_3, window_bounds = array<i64: 32, 128>}]} {
    %c0 = arith.constant 0 : index
    %c0_0 = arith.constant 0 : index
    %0 = vector.load %arg2[%c0, %c0_0] : memref<32x128xbf16, #tpu.memory_space<vmem>>, vector<32x128xbf16>
    %c0_1 = arith.constant 0 : index
    %c0_2 = arith.constant 0 : index
    %1 = vector.load %arg3[%c0_1, %c0_2] : memref<128x128xbf16, #tpu.memory_space<vmem>>, vector<128x128xbf16>
    %cst = arith.constant dense<0.000000e+00> : vector<32x128xf32>
    %2 = tpu.matmul %0, %1, %cst {dimension_numbers = #tpu.dot_dimension_numbers<[1], [0], [0], [1], [0, 0, 1, 1], [], []>} : vector<32x128xbf16>, vector<128x128xbf16>, vector<32x128xf32> -> vector<32x128xf32>
    %c0_3 = arith.constant 0 : index
    %c0_4 = arith.constant 0 : index
    %3 = vector.load %arg4[%c0_3, %c0_4] : memref<1x128xf32, #tpu.memory_space<vmem>>, vector<1x128xf32>
    %4 = vector.broadcast %3 : vector<1x128xf32> to vector<32x128xf32>
    %5 = arith.addf %2, %4 : vector<32x128xf32>
    %6 = arith.truncf %5 : vector<32x128xf32> to vector<32x128xbf16>
    %c0_5 = arith.constant 0 : index
    %c0_6 = arith.constant 0 : index
    %7 = vector.load %arg5[%c0_5, %c0_6] : memref<32x128xbf16, #tpu.memory_space<vmem>>, vector<32x128xbf16>
    tpu.vector_store %arg5[%c0_5, %c0_6], %6 {strides = array<i32>} : memref<32x128xbf16, #tpu.memory_space<vmem>>, vector<32x128xbf16>,
    return
  }
  func.func @transform_0(%arg0: i32, %arg1: i32) -> (i32, i32) {
    %c0_i32 = arith.constant 0 : i32
    %c0_i32_0 = arith.constant 0 : i32
    return %arg0, %c0_i32 : i32, i32
  }
  func.func @transform_1(%arg0: i32, %arg1: i32) -> (i32, i32) {
    %c0_i32 = arith.constant 0 : i32
    %c0_i32_0 = arith.constant 0 : i32
    return %c0_i32, %arg1 : i32, i32
  }
  func.func @transform_2(%arg0: i32, %arg1: i32) -> (i32, i32) {
    %c0_i32 = arith.constant 0 : i32
    %c0_i32_0 = arith.constant 0 : i32
    return %c0_i32, %arg1 : i32, i32
  }
  func.func @transform_3(%arg0: i32, %arg1: i32) -> (i32, i32) {
    %c0_i32 = arith.constant 0 : i32
    return %arg0, %arg1 : i32, i32
  }
}

module attributes {stable_mosaic.version = 11 : i64} {
  func.func @kernel(%arg0: i32, %arg1: i32, %arg2: memref<32x1152xbf16, #tpu.memory_space<vmem>>, %arg3: memref<1152x128xbf16, #tpu.memory_space<vmem>>, %arg4: memref<1x128xf32, #tpu.memory_space<vmem>>, %arg5: memref<32x128xbf16, #tpu.memory_space<vmem>>, %arg6: memref<32x128xbf16, #tpu.memory_space<vmem>>) attributes {dimension_semantics = [#tpu.dimension_semantics<parallel>, #tpu.dimension_semantics<parallel>], iteration_bounds = array<i64: 1, 1>, scalar_prefetch = 0 : i64, scratch_operands = 0 : i64, tpu.core_type = #tpu.core_type<tc>, window_params = [{transform_indices = @transform_0, window_bounds = array<i64: 32, 1152>}, {transform_indices = @transform_1, window_bounds = array<i64: 1152, 128>}, {transform_indices = @transform_2, window_bounds = array<i64: 1, 128>}, {transform_indices = @transform_3, window_bounds = array<i64: 32, 128>}, {transform_indices = @transform_4, window_bounds = array<i64: 32, 128>}]} {
    %c0 = arith.constant 0 : index
    %c0_0 = arith.constant 0 : index
    %0 = vector.load %arg2[%c0, %c0_0] : memref<32x1152xbf16, #tpu.memory_space<vmem>>, vector<32x1152xbf16>
    %c0_1 = arith.constant 0 : index
    %c0_2 = arith.constant 0 : index
    %1 = vector.load %arg3[%c0_1, %c0_2] : memref<1152x128xbf16, #tpu.memory_space<vmem>>, vector<1152x128xbf16>
    %cst = arith.constant dense<0.000000e+00> : vector<32x128xf32>
    %2 = tpu.matmul %0, %1, %cst {dimension_numbers = #tpu.dot_dimension_numbers<[1], [0], [0], [1], [0, 0, 1, 1], [], []>} : vector<32x1152xbf16>, vector<1152x128xbf16>, vector<32x128xf32> -> vector<32x128xf32>
    %c0_3 = arith.constant 0 : index
    %c0_4 = arith.constant 0 : index
    %3 = vector.load %arg4[%c0_3, %c0_4] : memref<1x128xf32, #tpu.memory_space<vmem>>, vector<1x128xf32>
    %4 = vector.broadcast %3 : vector<1x128xf32> to vector<32x128xf32>
    %5 = arith.addf %2, %4 : vector<32x128xf32>
    %c0_5 = arith.constant 0 : index
    %c0_6 = arith.constant 0 : index
    %6 = vector.load %arg5[%c0_5, %c0_6] : memref<32x128xbf16, #tpu.memory_space<vmem>>, vector<32x128xbf16>
    %7 = arith.extf %6 : vector<32x128xbf16> to vector<32x128xf32>
    %8 = arith.addf %5, %7 : vector<32x128xf32>
    %cst_7 = arith.constant 0.000000e+00 : f32
    %9 = vector.broadcast %cst_7 : f32 to vector<32x128xf32>
    %10 = arith.maximumf %8, %9 : vector<32x128xf32>
    %11 = arith.truncf %10 : vector<32x128xf32> to vector<32x128xbf16>
    %c0_8 = arith.constant 0 : index
    %c0_9 = arith.constant 0 : index
    %12 = vector.load %arg6[%c0_8, %c0_9] : memref<32x128xbf16, #tpu.memory_space<vmem>>, vector<32x128xbf16>
    tpu.vector_store %arg6[%c0_8, %c0_9], %11 {strides = array<i32>} : memref<32x128xbf16, #tpu.memory_space<vmem>>, vector<32x128xbf16>,
    return
  }
  func.func @transform_0(%arg0: i32, %arg1: i32) -> (i32, i32) {
    %c0_i32 = arith.constant 0 : i32
    %c0_i32_0 = arith.constant 0 : i32
    return %arg0, %c0_i32 : i32, i32
  }
  func.func @transform_1(%arg0: i32, %arg1: i32) -> (i32, i32) {
    %c0_i32 = arith.constant 0 : i32
    %c0_i32_0 = arith.constant 0 : i32
    return %c0_i32, %arg1 : i32, i32
  }
  func.func @transform_2(%arg0: i32, %arg1: i32) -> (i32, i32) {
    %c0_i32 = arith.constant 0 : i32
    %c0_i32_0 = arith.constant 0 : i32
    return %c0_i32, %arg1 : i32, i32
  }
  func.func @transform_3(%arg0: i32, %arg1: i32) -> (i32, i32) {
    %c0_i32 = arith.constant 0 : i32
    return %arg0, %arg1 : i32, i32
  }
  func.func @transform_4(%arg0: i32, %arg1: i32) -> (i32, i32) {
    %c0_i32 = arith.constant 0 : i32
    return %arg0, %arg1 : i32, i32
  }
}

module attributes {stable_mosaic.version = 11 : i64} {
  func.func @kernel(%arg0: i32, %arg1: i32, %arg2: memref<16x1152xbf16, #tpu.memory_space<vmem>>, %arg3: memref<1152x128xbf16, #tpu.memory_space<vmem>>, %arg4: memref<1x128xf32, #tpu.memory_space<vmem>>, %arg5: memref<16x128xbf16, #tpu.memory_space<vmem>>) attributes {dimension_semantics = [#tpu.dimension_semantics<parallel>, #tpu.dimension_semantics<parallel>], iteration_bounds = array<i64: 1, 2>, scalar_prefetch = 0 : i64, scratch_operands = 0 : i64, tpu.core_type = #tpu.core_type<tc>, window_params = [{transform_indices = @transform_0, window_bounds = array<i64: 16, 1152>}, {transform_indices = @transform_1, window_bounds = array<i64: 1152, 128>}, {transform_indices = @transform_2, window_bounds = array<i64: 1, 128>}, {transform_indices = @transform_3, window_bounds = array<i64: 16, 128>}]} {
    %c0 = arith.constant 0 : index
    %c0_0 = arith.constant 0 : index
    %0 = vector.load %arg2[%c0, %c0_0] : memref<16x1152xbf16, #tpu.memory_space<vmem>>, vector<16x1152xbf16>
    %c0_1 = arith.constant 0 : index
    %c0_2 = arith.constant 0 : index
    %1 = vector.load %arg3[%c0_1, %c0_2] : memref<1152x128xbf16, #tpu.memory_space<vmem>>, vector<1152x128xbf16>
    %cst = arith.constant dense<0.000000e+00> : vector<16x128xf32>
    %2 = tpu.matmul %0, %1, %cst {dimension_numbers = #tpu.dot_dimension_numbers<[1], [0], [0], [1], [0, 0, 1, 1], [], []>} : vector<16x1152xbf16>, vector<1152x128xbf16>, vector<16x128xf32> -> vector<16x128xf32>
    %c0_3 = arith.constant 0 : index
    %c0_4 = arith.constant 0 : index
    %3 = vector.load %arg4[%c0_3, %c0_4] : memref<1x128xf32, #tpu.memory_space<vmem>>, vector<1x128xf32>
    %4 = vector.broadcast %3 : vector<1x128xf32> to vector<16x128xf32>
    %5 = arith.addf %2, %4 : vector<16x128xf32>
    %cst_5 = arith.constant 0.000000e+00 : f32
    %6 = vector.broadcast %cst_5 : f32 to vector<16x128xf32>
    %7 = arith.maximumf %5, %6 : vector<16x128xf32>
    %8 = arith.truncf %7 : vector<16x128xf32> to vector<16x128xbf16>
    %c0_6 = arith.constant 0 : index
    %c0_7 = arith.constant 0 : index
    %9 = vector.load %arg5[%c0_6, %c0_7] : memref<16x128xbf16, #tpu.memory_space<vmem>>, vector<16x128xbf16>
    tpu.vector_store %arg5[%c0_6, %c0_7], %8 {strides = array<i32>} : memref<16x128xbf16, #tpu.memory_space<vmem>>, vector<16x128xbf16>,
    return
  }
  func.func @transform_0(%arg0: i32, %arg1: i32) -> (i32, i32) {
    %c0_i32 = arith.constant 0 : i32
    %c0_i32_0 = arith.constant 0 : i32
    return %arg0, %c0_i32 : i32, i32
  }
  func.func @transform_1(%arg0: i32, %arg1: i32) -> (i32, i32) {
    %c0_i32 = arith.constant 0 : i32
    %c0_i32_0 = arith.constant 0 : i32
    return %c0_i32, %arg1 : i32, i32
  }
  func.func @transform_2(%arg0: i32, %arg1: i32) -> (i32, i32) {
    %c0_i32 = arith.constant 0 : i32
    %c0_i32_0 = arith.constant 0 : i32
    return %c0_i32, %arg1 : i32, i32
  }
  func.func @transform_3(%arg0: i32, %arg1: i32) -> (i32, i32) {
    %c0_i32 = arith.constant 0 : i32
    return %arg0, %arg1 : i32, i32
  }
}

module attributes {stable_mosaic.version = 11 : i64} {
  func.func @kernel(%arg0: i32, %arg1: i32, %arg2: memref<16x128xbf16, #tpu.memory_space<vmem>>, %arg3: memref<128x128xbf16, #tpu.memory_space<vmem>>, %arg4: memref<1x128xf32, #tpu.memory_space<vmem>>, %arg5: memref<16x128xbf16, #tpu.memory_space<vmem>>) attributes {dimension_semantics = [#tpu.dimension_semantics<parallel>, #tpu.dimension_semantics<parallel>], iteration_bounds = array<i64: 1, 2>, scalar_prefetch = 0 : i64, scratch_operands = 0 : i64, tpu.core_type = #tpu.core_type<tc>, window_params = [{transform_indices = @transform_0, window_bounds = array<i64: 16, 128>}, {transform_indices = @transform_1, window_bounds = array<i64: 128, 128>}, {transform_indices = @transform_2, window_bounds = array<i64: 1, 128>}, {transform_indices = @transform_3, window_bounds = array<i64: 16, 128>}]} {
    %c0 = arith.constant 0 : index
    %c0_0 = arith.constant 0 : index
    %0 = vector.load %arg2[%c0, %c0_0] : memref<16x128xbf16, #tpu.memory_space<vmem>>, vector<16x128xbf16>
    %c0_1 = arith.constant 0 : index
    %c0_2 = arith.constant 0 : index
    %1 = vector.load %arg3[%c0_1, %c0_2] : memref<128x128xbf16, #tpu.memory_space<vmem>>, vector<128x128xbf16>
    %cst = arith.constant dense<0.000000e+00> : vector<16x128xf32>
    %2 = tpu.matmul %0, %1, %cst {dimension_numbers = #tpu.dot_dimension_numbers<[1], [0], [0], [1], [0, 0, 1, 1], [], []>} : vector<16x128xbf16>, vector<128x128xbf16>, vector<16x128xf32> -> vector<16x128xf32>
    %c0_3 = arith.constant 0 : index
    %c0_4 = arith.constant 0 : index
    %3 = vector.load %arg4[%c0_3, %c0_4] : memref<1x128xf32, #tpu.memory_space<vmem>>, vector<1x128xf32>
    %4 = vector.broadcast %3 : vector<1x128xf32> to vector<16x128xf32>
    %5 = arith.addf %2, %4 : vector<16x128xf32>
    %6 = arith.truncf %5 : vector<16x128xf32> to vector<16x128xbf16>
    %c0_5 = arith.constant 0 : index
    %c0_6 = arith.constant 0 : index
    %7 = vector.load %arg5[%c0_5, %c0_6] : memref<16x128xbf16, #tpu.memory_space<vmem>>, vector<16x128xbf16>
    tpu.vector_store %arg5[%c0_5, %c0_6], %6 {strides = array<i32>} : memref<16x128xbf16, #tpu.memory_space<vmem>>, vector<16x128xbf16>,
    return
  }
  func.func @transform_0(%arg0: i32, %arg1: i32) -> (i32, i32) {
    %c0_i32 = arith.constant 0 : i32
    %c0_i32_0 = arith.constant 0 : i32
    return %arg0, %c0_i32 : i32, i32
  }
  func.func @transform_1(%arg0: i32, %arg1: i32) -> (i32, i32) {
    %c0_i32 = arith.constant 0 : i32
    %c0_i32_0 = arith.constant 0 : i32
    return %c0_i32, %arg1 : i32, i32
  }
  func.func @transform_2(%arg0: i32, %arg1: i32) -> (i32, i32) {
    %c0_i32 = arith.constant 0 : i32
    %c0_i32_0 = arith.constant 0 : i32
    return %c0_i32, %arg1 : i32, i32
  }
  func.func @transform_3(%arg0: i32, %arg1: i32) -> (i32, i32) {
    %c0_i32 = arith.constant 0 : i32
    return %arg0, %arg1 : i32, i32
  }
}

module attributes {stable_mosaic.version = 11 : i64} {
  func.func @kernel(%arg0: i32, %arg1: i32, %arg2: i32, %arg3: memref<16x768xbf16, #tpu.memory_space<vmem>>, %arg4: memref<768x128xbf16, #tpu.memory_space<vmem>>, %arg5: memref<1x128xf32, #tpu.memory_space<vmem>>, %arg6: memref<16x128xbf16, #tpu.memory_space<vmem>>, %arg7: memref<16x128xbf16, #tpu.memory_space<vmem>>, %arg8: memref<16x128xf32, #tpu.memory_space<vmem>>) attributes {dimension_semantics = [#tpu.dimension_semantics<parallel>, #tpu.dimension_semantics<parallel>, #tpu.dimension_semantics<arbitrary>], iteration_bounds = array<i64: 1, 2, 3>, scalar_prefetch = 0 : i64, scratch_operands = 1 : i64, tpu.core_type = #tpu.core_type<tc>, window_params = [{transform_indices = @transform_0, window_bounds = array<i64: 16, 768>}, {transform_indices = @transform_1, window_bounds = array<i64: 768, 128>}, {transform_indices = @transform_2, window_bounds = array<i64: 1, 128>}, {transform_indices = @transform_3, window_bounds = array<i64: 16, 128>}, {transform_indices = @transform_4, window_bounds = array<i64: 16, 128>}]} {
    %c0_i32 = arith.constant 0 : i32
    %0 = arith.cmpi eq, %arg2, %c0_i32 : i32
    %1 = arith.extui %0 : i1 to i32
    %c0_i32_0 = arith.constant 0 : i32
    %2 = arith.cmpi ne, %1, %c0_i32_0 : i32
    scf.if %2 {
      %cst_9 = arith.constant 0.000000e+00 : f32
      %12 = vector.broadcast %cst_9 : f32 to vector<16x128xf32>
      %c0_10 = arith.constant 0 : index
      %c0_11 = arith.constant 0 : index
      %13 = vector.load %arg8[%c0_10, %c0_11] : memref<16x128xf32, #tpu.memory_space<vmem>>, vector<16x128xf32>
      tpu.vector_store %arg8[%c0_10, %c0_11], %12 {strides = array<i32>} : memref<16x128xf32, #tpu.memory_space<vmem>>, vector<16x128xf32>,
    } else {
    }
    %c0 = arith.constant 0 : index
    %c0_1 = arith.constant 0 : index
    %3 = vector.load %arg8[%c0, %c0_1] : memref<16x128xf32, #tpu.memory_space<vmem>>, vector<16x128xf32>
    %c0_2 = arith.constant 0 : index
    %c0_3 = arith.constant 0 : index
    %4 = vector.load %arg3[%c0_2, %c0_3] : memref<16x768xbf16, #tpu.memory_space<vmem>>, vector<16x768xbf16>
    %c0_4 = arith.constant 0 : index
    %c0_5 = arith.constant 0 : index
    %5 = vector.load %arg4[%c0_4, %c0_5] : memref<768x128xbf16, #tpu.memory_space<vmem>>, vector<768x128xbf16>
    %cst = arith.constant dense<0.000000e+00> : vector<16x128xf32>
    %6 = tpu.matmul %4, %5, %cst {dimension_numbers = #tpu.dot_dimension_numbers<[1], [0], [0], [1], [0, 0, 1, 1], [], []>} : vector<16x768xbf16>, vector<768x128xbf16>, vector<16x128xf32> -> vector<16x128xf32>
    %7 = arith.addf %3, %6 : vector<16x128xf32>
    %c0_6 = arith.constant 0 : index
    %c0_7 = arith.constant 0 : index
    %8 = vector.load %arg8[%c0_6, %c0_7] : memref<16x128xf32, #tpu.memory_space<vmem>>, vector<16x128xf32>
    tpu.vector_store %arg8[%c0_6, %c0_7], %7 {strides = array<i32>} : memref<16x128xf32, #tpu.memory_space<vmem>>, vector<16x128xf32>,
    %c2_i32 = arith.constant 2 : i32
    %9 = arith.cmpi eq, %arg2, %c2_i32 : i32
    %10 = arith.extui %9 : i1 to i32
    %c0_i32_8 = arith.constant 0 : i32
    %11 = arith.cmpi ne, %10, %c0_i32_8 : i32
    scf.if %11 {
      %c0_9 = arith.constant 0 : index
      %c0_10 = arith.constant 0 : index
      %12 = vector.load %arg8[%c0_9, %c0_10] : memref<16x128xf32, #tpu.memory_space<vmem>>, vector<16x128xf32>
      %c0_11 = arith.constant 0 : index
      %c0_12 = arith.constant 0 : index
      %13 = vector.load %arg5[%c0_11, %c0_12] : memref<1x128xf32, #tpu.memory_space<vmem>>, vector<1x128xf32>
      %14 = vector.broadcast %13 : vector<1x128xf32> to vector<16x128xf32>
      %15 = arith.addf %12, %14 : vector<16x128xf32>
      %c0_13 = arith.constant 0 : index
      %c0_14 = arith.constant 0 : index
      %16 = vector.load %arg6[%c0_13, %c0_14] : memref<16x128xbf16, #tpu.memory_space<vmem>>, vector<16x128xbf16>
      %17 = arith.extf %16 : vector<16x128xbf16> to vector<16x128xf32>
      %18 = arith.addf %15, %17 : vector<16x128xf32>
      %cst_15 = arith.constant 0.000000e+00 : f32
      %19 = vector.broadcast %cst_15 : f32 to vector<16x128xf32>
      %20 = arith.maximumf %18, %19 : vector<16x128xf32>
      %21 = arith.truncf %20 : vector<16x128xf32> to vector<16x128xbf16>
      %c0_16 = arith.constant 0 : index
      %c0_17 = arith.constant 0 : index
      %22 = vector.load %arg7[%c0_16, %c0_17] : memref<16x128xbf16, #tpu.memory_space<vmem>>, vector<16x128xbf16>
      tpu.vector_store %arg7[%c0_16, %c0_17], %21 {strides = array<i32>} : memref<16x128xbf16, #tpu.memory_space<vmem>>, vector<16x128xbf16>,
    } else {
    }
    return
  }
  func.func @transform_0(%arg0: i32, %arg1: i32, %arg2: i32) -> (i32, i32) {
    %c0_i32 = arith.constant 0 : i32
    return %arg0, %arg2 : i32, i32
  }
  func.func @transform_1(%arg0: i32, %arg1: i32, %arg2: i32) -> (i32, i32) {
    %c0_i32 = arith.constant 0 : i32
    return %arg2, %arg1 : i32, i32
  }
  func.func @transform_2(%arg0: i32, %arg1: i32, %arg2: i32) -> (i32, i32) {
    %c0_i32 = arith.constant 0 : i32
    %c0_i32_0 = arith.constant 0 : i32
    return %c0_i32, %arg1 : i32, i32
  }
  func.func @transform_3(%arg0: i32, %arg1: i32, %arg2: i32) -> (i32, i32) {
    %c0_i32 = arith.constant 0 : i32
    return %arg0, %arg1 : i32, i32
  }
  func.func @transform_4(%arg0: i32, %arg1: i32, %arg2: i32) -> (i32, i32) {
    %c0_i32 = arith.constant 0 : i32
    return %arg0, %arg1 : i32, i32
  }
}

module attributes {stable_mosaic.version = 11 : i64} {
  func.func @kernel(%arg0: i32, %arg1: i32, %arg2: i32, %arg3: memref<16x768xbf16, #tpu.memory_space<vmem>>, %arg4: memref<768x128xbf16, #tpu.memory_space<vmem>>, %arg5: memref<1x128xf32, #tpu.memory_space<vmem>>, %arg6: memref<16x128xbf16, #tpu.memory_space<vmem>>, %arg7: memref<16x128xf32, #tpu.memory_space<vmem>>) attributes {dimension_semantics = [#tpu.dimension_semantics<parallel>, #tpu.dimension_semantics<parallel>, #tpu.dimension_semantics<arbitrary>], iteration_bounds = array<i64: 1, 2, 3>, scalar_prefetch = 0 : i64, scratch_operands = 1 : i64, tpu.core_type = #tpu.core_type<tc>, window_params = [{transform_indices = @transform_0, window_bounds = array<i64: 16, 768>}, {transform_indices = @transform_1, window_bounds = array<i64: 768, 128>}, {transform_indices = @transform_2, window_bounds = array<i64: 1, 128>}, {transform_indices = @transform_3, window_bounds = array<i64: 16, 128>}]} {
    %c0_i32 = arith.constant 0 : i32
    %0 = arith.cmpi eq, %arg2, %c0_i32 : i32
    %1 = arith.extui %0 : i1 to i32
    %c0_i32_0 = arith.constant 0 : i32
    %2 = arith.cmpi ne, %1, %c0_i32_0 : i32
    scf.if %2 {
      %cst_9 = arith.constant 0.000000e+00 : f32
      %12 = vector.broadcast %cst_9 : f32 to vector<16x128xf32>
      %c0_10 = arith.constant 0 : index
      %c0_11 = arith.constant 0 : index
      %13 = vector.load %arg7[%c0_10, %c0_11] : memref<16x128xf32, #tpu.memory_space<vmem>>, vector<16x128xf32>
      tpu.vector_store %arg7[%c0_10, %c0_11], %12 {strides = array<i32>} : memref<16x128xf32, #tpu.memory_space<vmem>>, vector<16x128xf32>,
    } else {
    }
    %c0 = arith.constant 0 : index
    %c0_1 = arith.constant 0 : index
    %3 = vector.load %arg7[%c0, %c0_1] : memref<16x128xf32, #tpu.memory_space<vmem>>, vector<16x128xf32>
    %c0_2 = arith.constant 0 : index
    %c0_3 = arith.constant 0 : index
    %4 = vector.load %arg3[%c0_2, %c0_3] : memref<16x768xbf16, #tpu.memory_space<vmem>>, vector<16x768xbf16>
    %c0_4 = arith.constant 0 : index
    %c0_5 = arith.constant 0 : index
    %5 = vector.load %arg4[%c0_4, %c0_5] : memref<768x128xbf16, #tpu.memory_space<vmem>>, vector<768x128xbf16>
    %cst = arith.constant dense<0.000000e+00> : vector<16x128xf32>
    %6 = tpu.matmul %4, %5, %cst {dimension_numbers = #tpu.dot_dimension_numbers<[1], [0], [0], [1], [0, 0, 1, 1], [], []>} : vector<16x768xbf16>, vector<768x128xbf16>, vector<16x128xf32> -> vector<16x128xf32>
    %7 = arith.addf %3, %6 : vector<16x128xf32>
    %c0_6 = arith.constant 0 : index
    %c0_7 = arith.constant 0 : index
    %8 = vector.load %arg7[%c0_6, %c0_7] : memref<16x128xf32, #tpu.memory_space<vmem>>, vector<16x128xf32>
    tpu.vector_store %arg7[%c0_6, %c0_7], %7 {strides = array<i32>} : memref<16x128xf32, #tpu.memory_space<vmem>>, vector<16x128xf32>,
    %c2_i32 = arith.constant 2 : i32
    %9 = arith.cmpi eq, %arg2, %c2_i32 : i32
    %10 = arith.extui %9 : i1 to i32
    %c0_i32_8 = arith.constant 0 : i32
    %11 = arith.cmpi ne, %10, %c0_i32_8 : i32
    scf.if %11 {
      %c0_9 = arith.constant 0 : index
      %c0_10 = arith.constant 0 : index
      %12 = vector.load %arg7[%c0_9, %c0_10] : memref<16x128xf32, #tpu.memory_space<vmem>>, vector<16x128xf32>
      %c0_11 = arith.constant 0 : index
      %c0_12 = arith.constant 0 : index
      %13 = vector.load %arg5[%c0_11, %c0_12] : memref<1x128xf32, #tpu.memory_space<vmem>>, vector<1x128xf32>
      %14 = vector.broadcast %13 : vector<1x128xf32> to vector<16x128xf32>
      %15 = arith.addf %12, %14 : vector<16x128xf32>
      %cst_13 = arith.constant 0.000000e+00 : f32
      %16 = vector.broadcast %cst_13 : f32 to vector<16x128xf32>
      %17 = arith.maximumf %15, %16 : vector<16x128xf32>
      %18 = arith.truncf %17 : vector<16x128xf32> to vector<16x128xbf16>
      %c0_14 = arith.constant 0 : index
      %c0_15 = arith.constant 0 : index
      %19 = vector.load %arg6[%c0_14, %c0_15] : memref<16x128xbf16, #tpu.memory_space<vmem>>, vector<16x128xbf16>
      tpu.vector_store %arg6[%c0_14, %c0_15], %18 {strides = array<i32>} : memref<16x128xbf16, #tpu.memory_space<vmem>>, vector<16x128xbf16>,
    } else {
    }
    return
  }
  func.func @transform_0(%arg0: i32, %arg1: i32, %arg2: i32) -> (i32, i32) {
    %c0_i32 = arith.constant 0 : i32
    return %arg0, %arg2 : i32, i32
  }
  func.func @transform_1(%arg0: i32, %arg1: i32, %arg2: i32) -> (i32, i32) {
    %c0_i32 = arith.constant 0 : i32
    return %arg2, %arg1 : i32, i32
  }
  func.func @transform_2(%arg0: i32, %arg1: i32, %arg2: i32) -> (i32, i32) {
    %c0_i32 = arith.constant 0 : i32
    %c0_i32_0 = arith.constant 0 : i32
    return %c0_i32, %arg1 : i32, i32
  }
  func.func @transform_3(%arg0: i32, %arg1: i32, %arg2: i32) -> (i32, i32) {
    %c0_i32 = arith.constant 0 : i32
    return %arg0, %arg1 : i32, i32
  }
}

module attributes {stable_mosaic.version = 11 : i64} {
  func.func @kernel(%arg0: i32, %arg1: i32, %arg2: i32, %arg3: memref<16x768xbf16, #tpu.memory_space<vmem>>, %arg4: memref<768x256xbf16, #tpu.memory_space<vmem>>, %arg5: memref<1x256xf32, #tpu.memory_space<vmem>>, %arg6: memref<16x256xbf16, #tpu.memory_space<vmem>>, %arg7: memref<16x256xf32, #tpu.memory_space<vmem>>) attributes {dimension_semantics = [#tpu.dimension_semantics<parallel>, #tpu.dimension_semantics<parallel>, #tpu.dimension_semantics<arbitrary>], iteration_bounds = array<i64: 1, 2, 3>, scalar_prefetch = 0 : i64, scratch_operands = 1 : i64, tpu.core_type = #tpu.core_type<tc>, window_params = [{transform_indices = @transform_0, window_bounds = array<i64: 16, 768>}, {transform_indices = @transform_1, window_bounds = array<i64: 768, 256>}, {transform_indices = @transform_2, window_bounds = array<i64: 1, 256>}, {transform_indices = @transform_3, window_bounds = array<i64: 16, 256>}]} {
    %c0_i32 = arith.constant 0 : i32
    %0 = arith.cmpi eq, %arg2, %c0_i32 : i32
    %1 = arith.extui %0 : i1 to i32
    %c0_i32_0 = arith.constant 0 : i32
    %2 = arith.cmpi ne, %1, %c0_i32_0 : i32
    scf.if %2 {
      %cst_9 = arith.constant 0.000000e+00 : f32
      %12 = vector.broadcast %cst_9 : f32 to vector<16x256xf32>
      %c0_10 = arith.constant 0 : index
      %c0_11 = arith.constant 0 : index
      %13 = vector.load %arg7[%c0_10, %c0_11] : memref<16x256xf32, #tpu.memory_space<vmem>>, vector<16x256xf32>
      tpu.vector_store %arg7[%c0_10, %c0_11], %12 {strides = array<i32>} : memref<16x256xf32, #tpu.memory_space<vmem>>, vector<16x256xf32>,
    } else {
    }
    %c0 = arith.constant 0 : index
    %c0_1 = arith.constant 0 : index
    %3 = vector.load %arg7[%c0, %c0_1] : memref<16x256xf32, #tpu.memory_space<vmem>>, vector<16x256xf32>
    %c0_2 = arith.constant 0 : index
    %c0_3 = arith.constant 0 : index
    %4 = vector.load %arg3[%c0_2, %c0_3] : memref<16x768xbf16, #tpu.memory_space<vmem>>, vector<16x768xbf16>
    %c0_4 = arith.constant 0 : index
    %c0_5 = arith.constant 0 : index
    %5 = vector.load %arg4[%c0_4, %c0_5] : memref<768x256xbf16, #tpu.memory_space<vmem>>, vector<768x256xbf16>
    %cst = arith.constant dense<0.000000e+00> : vector<16x256xf32>
    %6 = tpu.matmul %4, %5, %cst {dimension_numbers = #tpu.dot_dimension_numbers<[1], [0], [0], [1], [0, 0, 1, 1], [], []>} : vector<16x768xbf16>, vector<768x256xbf16>, vector<16x256xf32> -> vector<16x256xf32>
    %7 = arith.addf %3, %6 : vector<16x256xf32>
    %c0_6 = arith.constant 0 : index
    %c0_7 = arith.constant 0 : index
    %8 = vector.load %arg7[%c0_6, %c0_7] : memref<16x256xf32, #tpu.memory_space<vmem>>, vector<16x256xf32>
    tpu.vector_store %arg7[%c0_6, %c0_7], %7 {strides = array<i32>} : memref<16x256xf32, #tpu.memory_space<vmem>>, vector<16x256xf32>,
    %c2_i32 = arith.constant 2 : i32
    %9 = arith.cmpi eq, %arg2, %c2_i32 : i32
    %10 = arith.extui %9 : i1 to i32
    %c0_i32_8 = arith.constant 0 : i32
    %11 = arith.cmpi ne, %10, %c0_i32_8 : i32
    scf.if %11 {
      %c0_9 = arith.constant 0 : index
      %c0_10 = arith.constant 0 : index
      %12 = vector.load %arg7[%c0_9, %c0_10] : memref<16x256xf32, #tpu.memory_space<vmem>>, vector<16x256xf32>
      %c0_11 = arith.constant 0 : index
      %c0_12 = arith.constant 0 : index
      %13 = vector.load %arg5[%c0_11, %c0_12] : memref<1x256xf32, #tpu.memory_space<vmem>>, vector<1x256xf32>
      %14 = vector.broadcast %13 : vector<1x256xf32> to vector<16x256xf32>
      %15 = arith.addf %12, %14 : vector<16x256xf32>
      %cst_13 = arith.constant 0.000000e+00 : f32
      %16 = vector.broadcast %cst_13 : f32 to vector<16x256xf32>
      %17 = arith.maximumf %15, %16 : vector<16x256xf32>
      %18 = arith.truncf %17 : vector<16x256xf32> to vector<16x256xbf16>
      %c0_14 = arith.constant 0 : index
      %c0_15 = arith.constant 0 : index
      %19 = vector.load %arg6[%c0_14, %c0_15] : memref<16x256xbf16, #tpu.memory_space<vmem>>, vector<16x256xbf16>
      tpu.vector_store %arg6[%c0_14, %c0_15], %18 {strides = array<i32>} : memref<16x256xbf16, #tpu.memory_space<vmem>>, vector<16x256xbf16>,
    } else {
    }
    return
  }
  func.func @transform_0(%arg0: i32, %arg1: i32, %arg2: i32) -> (i32, i32) {
    %c0_i32 = arith.constant 0 : i32
    return %arg0, %arg2 : i32, i32
  }
  func.func @transform_1(%arg0: i32, %arg1: i32, %arg2: i32) -> (i32, i32) {
    %c0_i32 = arith.constant 0 : i32
    return %arg2, %arg1 : i32, i32
  }
  func.func @transform_2(%arg0: i32, %arg1: i32, %arg2: i32) -> (i32, i32) {
    %c0_i32 = arith.constant 0 : i32
    %c0_i32_0 = arith.constant 0 : i32
    return %c0_i32, %arg1 : i32, i32
  }
  func.func @transform_3(%arg0: i32, %arg1: i32, %arg2: i32) -> (i32, i32) {
    %c0_i32 = arith.constant 0 : i32
    return %arg0, %arg1 : i32, i32
  }
}

module attributes {stable_mosaic.version = 11 : i64} {
  func.func @kernel(%arg0: i32, %arg1: i32, %arg2: memref<16x256xbf16, #tpu.memory_space<vmem>>, %arg3: memref<256x256xbf16, #tpu.memory_space<vmem>>, %arg4: memref<1x256xf32, #tpu.memory_space<vmem>>, %arg5: memref<16x256xbf16, #tpu.memory_space<vmem>>) attributes {dimension_semantics = [#tpu.dimension_semantics<parallel>, #tpu.dimension_semantics<parallel>], iteration_bounds = array<i64: 1, 2>, scalar_prefetch = 0 : i64, scratch_operands = 0 : i64, tpu.core_type = #tpu.core_type<tc>, window_params = [{transform_indices = @transform_0, window_bounds = array<i64: 16, 256>}, {transform_indices = @transform_1, window_bounds = array<i64: 256, 256>}, {transform_indices = @transform_2, window_bounds = array<i64: 1, 256>}, {transform_indices = @transform_3, window_bounds = array<i64: 16, 256>}]} {
    %c0 = arith.constant 0 : index
    %c0_0 = arith.constant 0 : index
    %0 = vector.load %arg2[%c0, %c0_0] : memref<16x256xbf16, #tpu.memory_space<vmem>>, vector<16x256xbf16>
    %c0_1 = arith.constant 0 : index
    %c0_2 = arith.constant 0 : index
    %1 = vector.load %arg3[%c0_1, %c0_2] : memref<256x256xbf16, #tpu.memory_space<vmem>>, vector<256x256xbf16>
    %cst = arith.constant dense<0.000000e+00> : vector<16x256xf32>
    %2 = tpu.matmul %0, %1, %cst {dimension_numbers = #tpu.dot_dimension_numbers<[1], [0], [0], [1], [0, 0, 1, 1], [], []>} : vector<16x256xbf16>, vector<256x256xbf16>, vector<16x256xf32> -> vector<16x256xf32>
    %c0_3 = arith.constant 0 : index
    %c0_4 = arith.constant 0 : index
    %3 = vector.load %arg4[%c0_3, %c0_4] : memref<1x256xf32, #tpu.memory_space<vmem>>, vector<1x256xf32>
    %4 = vector.broadcast %3 : vector<1x256xf32> to vector<16x256xf32>
    %5 = arith.addf %2, %4 : vector<16x256xf32>
    %6 = arith.truncf %5 : vector<16x256xf32> to vector<16x256xbf16>
    %c0_5 = arith.constant 0 : index
    %c0_6 = arith.constant 0 : index
    %7 = vector.load %arg5[%c0_5, %c0_6] : memref<16x256xbf16, #tpu.memory_space<vmem>>, vector<16x256xbf16>
    tpu.vector_store %arg5[%c0_5, %c0_6], %6 {strides = array<i32>} : memref<16x256xbf16, #tpu.memory_space<vmem>>, vector<16x256xbf16>,
    return
  }
  func.func @transform_0(%arg0: i32, %arg1: i32) -> (i32, i32) {
    %c0_i32 = arith.constant 0 : i32
    %c0_i32_0 = arith.constant 0 : i32
    return %arg0, %c0_i32 : i32, i32
  }
  func.func @transform_1(%arg0: i32, %arg1: i32) -> (i32, i32) {
    %c0_i32 = arith.constant 0 : i32
    %c0_i32_0 = arith.constant 0 : i32
    return %c0_i32, %arg1 : i32, i32
  }
  func.func @transform_2(%arg0: i32, %arg1: i32) -> (i32, i32) {
    %c0_i32 = arith.constant 0 : i32
    %c0_i32_0 = arith.constant 0 : i32
    return %c0_i32, %arg1 : i32, i32
  }
  func.func @transform_3(%arg0: i32, %arg1: i32) -> (i32, i32) {
    %c0_i32 = arith.constant 0 : i32
    return %arg0, %arg1 : i32, i32
  }
}

module attributes {stable_mosaic.version = 11 : i64} {
  func.func @kernel(%arg0: i32, %arg1: i32, %arg2: i32, %arg3: memref<16x768xbf16, #tpu.memory_space<vmem>>, %arg4: memref<768x256xbf16, #tpu.memory_space<vmem>>, %arg5: memref<1x256xf32, #tpu.memory_space<vmem>>, %arg6: memref<16x256xbf16, #tpu.memory_space<vmem>>, %arg7: memref<16x256xbf16, #tpu.memory_space<vmem>>, %arg8: memref<16x256xf32, #tpu.memory_space<vmem>>) attributes {dimension_semantics = [#tpu.dimension_semantics<parallel>, #tpu.dimension_semantics<parallel>, #tpu.dimension_semantics<arbitrary>], iteration_bounds = array<i64: 1, 2, 6>, scalar_prefetch = 0 : i64, scratch_operands = 1 : i64, tpu.core_type = #tpu.core_type<tc>, window_params = [{transform_indices = @transform_0, window_bounds = array<i64: 16, 768>}, {transform_indices = @transform_1, window_bounds = array<i64: 768, 256>}, {transform_indices = @transform_2, window_bounds = array<i64: 1, 256>}, {transform_indices = @transform_3, window_bounds = array<i64: 16, 256>}, {transform_indices = @transform_4, window_bounds = array<i64: 16, 256>}]} {
    %c0_i32 = arith.constant 0 : i32
    %0 = arith.cmpi eq, %arg2, %c0_i32 : i32
    %1 = arith.extui %0 : i1 to i32
    %c0_i32_0 = arith.constant 0 : i32
    %2 = arith.cmpi ne, %1, %c0_i32_0 : i32
    scf.if %2 {
      %cst_9 = arith.constant 0.000000e+00 : f32
      %12 = vector.broadcast %cst_9 : f32 to vector<16x256xf32>
      %c0_10 = arith.constant 0 : index
      %c0_11 = arith.constant 0 : index
      %13 = vector.load %arg8[%c0_10, %c0_11] : memref<16x256xf32, #tpu.memory_space<vmem>>, vector<16x256xf32>
      tpu.vector_store %arg8[%c0_10, %c0_11], %12 {strides = array<i32>} : memref<16x256xf32, #tpu.memory_space<vmem>>, vector<16x256xf32>,
    } else {
    }
    %c0 = arith.constant 0 : index
    %c0_1 = arith.constant 0 : index
    %3 = vector.load %arg8[%c0, %c0_1] : memref<16x256xf32, #tpu.memory_space<vmem>>, vector<16x256xf32>
    %c0_2 = arith.constant 0 : index
    %c0_3 = arith.constant 0 : index
    %4 = vector.load %arg3[%c0_2, %c0_3] : memref<16x768xbf16, #tpu.memory_space<vmem>>, vector<16x768xbf16>
    %c0_4 = arith.constant 0 : index
    %c0_5 = arith.constant 0 : index
    %5 = vector.load %arg4[%c0_4, %c0_5] : memref<768x256xbf16, #tpu.memory_space<vmem>>, vector<768x256xbf16>
    %cst = arith.constant dense<0.000000e+00> : vector<16x256xf32>
    %6 = tpu.matmul %4, %5, %cst {dimension_numbers = #tpu.dot_dimension_numbers<[1], [0], [0], [1], [0, 0, 1, 1], [], []>} : vector<16x768xbf16>, vector<768x256xbf16>, vector<16x256xf32> -> vector<16x256xf32>
    %7 = arith.addf %3, %6 : vector<16x256xf32>
    %c0_6 = arith.constant 0 : index
    %c0_7 = arith.constant 0 : index
    %8 = vector.load %arg8[%c0_6, %c0_7] : memref<16x256xf32, #tpu.memory_space<vmem>>, vector<16x256xf32>
    tpu.vector_store %arg8[%c0_6, %c0_7], %7 {strides = array<i32>} : memref<16x256xf32, #tpu.memory_space<vmem>>, vector<16x256xf32>,
    %c5_i32 = arith.constant 5 : i32
    %9 = arith.cmpi eq, %arg2, %c5_i32 : i32
    %10 = arith.extui %9 : i1 to i32
    %c0_i32_8 = arith.constant 0 : i32
    %11 = arith.cmpi ne, %10, %c0_i32_8 : i32
    scf.if %11 {
      %c0_9 = arith.constant 0 : index
      %c0_10 = arith.constant 0 : index
      %12 = vector.load %arg8[%c0_9, %c0_10] : memref<16x256xf32, #tpu.memory_space<vmem>>, vector<16x256xf32>
      %c0_11 = arith.constant 0 : index
      %c0_12 = arith.constant 0 : index
      %13 = vector.load %arg5[%c0_11, %c0_12] : memref<1x256xf32, #tpu.memory_space<vmem>>, vector<1x256xf32>
      %14 = vector.broadcast %13 : vector<1x256xf32> to vector<16x256xf32>
      %15 = arith.addf %12, %14 : vector<16x256xf32>
      %c0_13 = arith.constant 0 : index
      %c0_14 = arith.constant 0 : index
      %16 = vector.load %arg6[%c0_13, %c0_14] : memref<16x256xbf16, #tpu.memory_space<vmem>>, vector<16x256xbf16>
      %17 = arith.extf %16 : vector<16x256xbf16> to vector<16x256xf32>
      %18 = arith.addf %15, %17 : vector<16x256xf32>
      %cst_15 = arith.constant 0.000000e+00 : f32
      %19 = vector.broadcast %cst_15 : f32 to vector<16x256xf32>
      %20 = arith.maximumf %18, %19 : vector<16x256xf32>
      %21 = arith.truncf %20 : vector<16x256xf32> to vector<16x256xbf16>
      %c0_16 = arith.constant 0 : index
      %c0_17 = arith.constant 0 : index
      %22 = vector.load %arg7[%c0_16, %c0_17] : memref<16x256xbf16, #tpu.memory_space<vmem>>, vector<16x256xbf16>
      tpu.vector_store %arg7[%c0_16, %c0_17], %21 {strides = array<i32>} : memref<16x256xbf16, #tpu.memory_space<vmem>>, vector<16x256xbf16>,
    } else {
    }
    return
  }
  func.func @transform_0(%arg0: i32, %arg1: i32, %arg2: i32) -> (i32, i32) {
    %c0_i32 = arith.constant 0 : i32
    return %arg0, %arg2 : i32, i32
  }
  func.func @transform_1(%arg0: i32, %arg1: i32, %arg2: i32) -> (i32, i32) {
    %c0_i32 = arith.constant 0 : i32
    return %arg2, %arg1 : i32, i32
  }
  func.func @transform_2(%arg0: i32, %arg1: i32, %arg2: i32) -> (i32, i32) {
    %c0_i32 = arith.constant 0 : i32
    %c0_i32_0 = arith.constant 0 : i32
    return %c0_i32, %arg1 : i32, i32
  }
  func.func @transform_3(%arg0: i32, %arg1: i32, %arg2: i32) -> (i32, i32) {
    %c0_i32 = arith.constant 0 : i32
    return %arg0, %arg1 : i32, i32
  }
  func.func @transform_4(%arg0: i32, %arg1: i32, %arg2: i32) -> (i32, i32) {
    %c0_i32 = arith.constant 0 : i32
    return %arg0, %arg1 : i32, i32
  }
}

module attributes {stable_mosaic.version = 11 : i64} {
  func.func @kernel(%arg0: i32, %arg1: i32, %arg2: i32, %arg3: memref<16x768xbf16, #tpu.memory_space<vmem>>, %arg4: memref<768x256xbf16, #tpu.memory_space<vmem>>, %arg5: memref<1x256xf32, #tpu.memory_space<vmem>>, %arg6: memref<16x256xbf16, #tpu.memory_space<vmem>>, %arg7: memref<16x256xf32, #tpu.memory_space<vmem>>) attributes {dimension_semantics = [#tpu.dimension_semantics<parallel>, #tpu.dimension_semantics<parallel>, #tpu.dimension_semantics<arbitrary>], iteration_bounds = array<i64: 1, 2, 6>, scalar_prefetch = 0 : i64, scratch_operands = 1 : i64, tpu.core_type = #tpu.core_type<tc>, window_params = [{transform_indices = @transform_0, window_bounds = array<i64: 16, 768>}, {transform_indices = @transform_1, window_bounds = array<i64: 768, 256>}, {transform_indices = @transform_2, window_bounds = array<i64: 1, 256>}, {transform_indices = @transform_3, window_bounds = array<i64: 16, 256>}]} {
    %c0_i32 = arith.constant 0 : i32
    %0 = arith.cmpi eq, %arg2, %c0_i32 : i32
    %1 = arith.extui %0 : i1 to i32
    %c0_i32_0 = arith.constant 0 : i32
    %2 = arith.cmpi ne, %1, %c0_i32_0 : i32
    scf.if %2 {
      %cst_9 = arith.constant 0.000000e+00 : f32
      %12 = vector.broadcast %cst_9 : f32 to vector<16x256xf32>
      %c0_10 = arith.constant 0 : index
      %c0_11 = arith.constant 0 : index
      %13 = vector.load %arg7[%c0_10, %c0_11] : memref<16x256xf32, #tpu.memory_space<vmem>>, vector<16x256xf32>
      tpu.vector_store %arg7[%c0_10, %c0_11], %12 {strides = array<i32>} : memref<16x256xf32, #tpu.memory_space<vmem>>, vector<16x256xf32>,
    } else {
    }
    %c0 = arith.constant 0 : index
    %c0_1 = arith.constant 0 : index
    %3 = vector.load %arg7[%c0, %c0_1] : memref<16x256xf32, #tpu.memory_space<vmem>>, vector<16x256xf32>
    %c0_2 = arith.constant 0 : index
    %c0_3 = arith.constant 0 : index
    %4 = vector.load %arg3[%c0_2, %c0_3] : memref<16x768xbf16, #tpu.memory_space<vmem>>, vector<16x768xbf16>
    %c0_4 = arith.constant 0 : index
    %c0_5 = arith.constant 0 : index
    %5 = vector.load %arg4[%c0_4, %c0_5] : memref<768x256xbf16, #tpu.memory_space<vmem>>, vector<768x256xbf16>
    %cst = arith.constant dense<0.000000e+00> : vector<16x256xf32>
    %6 = tpu.matmul %4, %5, %cst {dimension_numbers = #tpu.dot_dimension_numbers<[1], [0], [0], [1], [0, 0, 1, 1], [], []>} : vector<16x768xbf16>, vector<768x256xbf16>, vector<16x256xf32> -> vector<16x256xf32>
    %7 = arith.addf %3, %6 : vector<16x256xf32>
    %c0_6 = arith.constant 0 : index
    %c0_7 = arith.constant 0 : index
    %8 = vector.load %arg7[%c0_6, %c0_7] : memref<16x256xf32, #tpu.memory_space<vmem>>, vector<16x256xf32>
    tpu.vector_store %arg7[%c0_6, %c0_7], %7 {strides = array<i32>} : memref<16x256xf32, #tpu.memory_space<vmem>>, vector<16x256xf32>,
    %c5_i32 = arith.constant 5 : i32
    %9 = arith.cmpi eq, %arg2, %c5_i32 : i32
    %10 = arith.extui %9 : i1 to i32
    %c0_i32_8 = arith.constant 0 : i32
    %11 = arith.cmpi ne, %10, %c0_i32_8 : i32
    scf.if %11 {
      %c0_9 = arith.constant 0 : index
      %c0_10 = arith.constant 0 : index
      %12 = vector.load %arg7[%c0_9, %c0_10] : memref<16x256xf32, #tpu.memory_space<vmem>>, vector<16x256xf32>
      %c0_11 = arith.constant 0 : index
      %c0_12 = arith.constant 0 : index
      %13 = vector.load %arg5[%c0_11, %c0_12] : memref<1x256xf32, #tpu.memory_space<vmem>>, vector<1x256xf32>
      %14 = vector.broadcast %13 : vector<1x256xf32> to vector<16x256xf32>
      %15 = arith.addf %12, %14 : vector<16x256xf32>
      %cst_13 = arith.constant 0.000000e+00 : f32
      %16 = vector.broadcast %cst_13 : f32 to vector<16x256xf32>
      %17 = arith.maximumf %15, %16 : vector<16x256xf32>
      %18 = arith.truncf %17 : vector<16x256xf32> to vector<16x256xbf16>
      %c0_14 = arith.constant 0 : index
      %c0_15 = arith.constant 0 : index
      %19 = vector.load %arg6[%c0_14, %c0_15] : memref<16x256xbf16, #tpu.memory_space<vmem>>, vector<16x256xbf16>
      tpu.vector_store %arg6[%c0_14, %c0_15], %18 {strides = array<i32>} : memref<16x256xbf16, #tpu.memory_space<vmem>>, vector<16x256xbf16>,
    } else {
    }
    return
  }
  func.func @transform_0(%arg0: i32, %arg1: i32, %arg2: i32) -> (i32, i32) {
    %c0_i32 = arith.constant 0 : i32
    return %arg0, %arg2 : i32, i32
  }
  func.func @transform_1(%arg0: i32, %arg1: i32, %arg2: i32) -> (i32, i32) {
    %c0_i32 = arith.constant 0 : i32
    return %arg2, %arg1 : i32, i32
  }
  func.func @transform_2(%arg0: i32, %arg1: i32, %arg2: i32) -> (i32, i32) {
    %c0_i32 = arith.constant 0 : i32
    %c0_i32_0 = arith.constant 0 : i32
    return %c0_i32, %arg1 : i32, i32
  }
  func.func @transform_3(%arg0: i32, %arg1: i32, %arg2: i32) -> (i32, i32) {
    %c0_i32 = arith.constant 0 : i32
    return %arg0, %arg1 : i32, i32
  }
}

module attributes {stable_mosaic.version = 11 : i64} {
  func.func @kernel(%arg0: i32, %arg1: i32, %arg2: memref<16x512xbf16, #tpu.memory_space<vmem>>, %arg3: memref<512x128xbf16, #tpu.memory_space<vmem>>, %arg4: memref<1x128xf32, #tpu.memory_space<vmem>>, %arg5: memref<16x128xf32, #tpu.memory_space<vmem>>) attributes {dimension_semantics = [#tpu.dimension_semantics<parallel>, #tpu.dimension_semantics<parallel>], iteration_bounds = array<i64: 1, 1>, scalar_prefetch = 0 : i64, scratch_operands = 0 : i64, tpu.core_type = #tpu.core_type<tc>, window_params = [{transform_indices = @transform_0, window_bounds = array<i64: 16, 512>}, {transform_indices = @transform_1, window_bounds = array<i64: 512, 128>}, {transform_indices = @transform_2, window_bounds = array<i64: 1, 128>}, {transform_indices = @transform_3, window_bounds = array<i64: 16, 128>}]} {
    %c0 = arith.constant 0 : index
    %c0_0 = arith.constant 0 : index
    %0 = vector.load %arg2[%c0, %c0_0] : memref<16x512xbf16, #tpu.memory_space<vmem>>, vector<16x512xbf16>
    %c0_1 = arith.constant 0 : index
    %c0_2 = arith.constant 0 : index
    %1 = vector.load %arg3[%c0_1, %c0_2] : memref<512x128xbf16, #tpu.memory_space<vmem>>, vector<512x128xbf16>
    %cst = arith.constant dense<0.000000e+00> : vector<16x128xf32>
    %2 = tpu.matmul %0, %1, %cst {dimension_numbers = #tpu.dot_dimension_numbers<[1], [0], [0], [1], [0, 0, 1, 1], [], []>} : vector<16x512xbf16>, vector<512x128xbf16>, vector<16x128xf32> -> vector<16x128xf32>
    %c0_3 = arith.constant 0 : index
    %c0_4 = arith.constant 0 : index
    %3 = vector.load %arg4[%c0_3, %c0_4] : memref<1x128xf32, #tpu.memory_space<vmem>>, vector<1x128xf32>
    %4 = vector.broadcast %3 : vector<1x128xf32> to vector<16x128xf32>
    %5 = arith.addf %2, %4 : vector<16x128xf32>
    %c0_5 = arith.constant 0 : index
    %c0_6 = arith.constant 0 : index
    %6 = vector.load %arg5[%c0_5, %c0_6] : memref<16x128xf32, #tpu.memory_space<vmem>>, vector<16x128xf32>
    tpu.vector_store %arg5[%c0_5, %c0_6], %5 {strides = array<i32>} : memref<16x128xf32, #tpu.memory_space<vmem>>, vector<16x128xf32>,
    return
  }
  func.func @transform_0(%arg0: i32, %arg1: i32) -> (i32, i32) {
    %c0_i32 = arith.constant 0 : i32
    %c0_i32_0 = arith.constant 0 : i32
    return %arg0, %c0_i32 : i32, i32
  }
  func.func @transform_1(%arg0: i32, %arg1: i32) -> (i32, i32) {
    %c0_i32 = arith.constant 0 : i32
    %c0_i32_0 = arith.constant 0 : i32
    return %c0_i32, %arg1 : i32, i32
  }
  func.func @transform_2(%arg0: i32, %arg1: i32) -> (i32, i32) {
    %c0_i32 = arith.constant 0 : i32
    %c0_i32_0 = arith.constant 0 : i32
    return %c0_i32, %arg1 : i32, i32
  }
  func.func @transform_3(%arg0: i32, %arg1: i32) -> (i32, i32) {
    %c0_i32 = arith.constant 0 : i32
    return %arg0, %arg1 : i32, i32
  }
}

</mosaic_0001>

<bundles_post_ra>
// kernel: resnet18_forward.21
= control target key start
LH: loop header
LB: loop body
LE: loop exit
PB: predicated region body
PF: predicated region fallthrough
CT: control target
= control target key end

     0   :  { %v1566_v0 = vmov 0   ;;  %vm1143_vm0 = vcmask 519168   ;;  %s2184_s1 = inlined_call_operand.vmem [shape: bf16[256,64], index: 1, kind: input, shape index: {}]   ;;  %s2185_s0 = inlined_call_operand.vmem [shape: bf16[512,256], index: 0, kind: input, shape index: {}]   ;;  %s2186_s2 = inlined_call_operand.vmem [shape: f32[1,64], index: 2, kind: input, shape index: {}]   ;;  %s2187_s3 = inlined_call_operand.vmem [shape: bf16[512,64], index: 3, kind: output, shape index: {}]  }
   0x1   :  { %534 = vmatprep.subr.bf16.mxu0 %v1566_v0  ;;  %1421 = vmatprep.subr.bf16.mxu1 %v1566_v0  ;;  %v1454_v1 = vld [vmem:[%s2184_s1] sm:$0xff]   ;;  %v1455_v2 = vld [vmem:[%s2184_s1 + $0x8] sm:$0xff]   ;;  %v1456_v3 = vld [vmem:[%s2184_s1 + $0x10] sm:$0xff]  }
   0x2   :  { %535 = vmatpush1.bf16.msra.mxu0 %v1454_v1  ;;  %1437 = vmatpush1.bf16.msra.mxu1 %v1454_v1  ;;  %v1457_v4 = vld [vmem:[%s2184_s1 + $0x18] sm:$0xff]   ;;  %v1458_v5 = vld [vmem:[%s2184_s1 + $0x20] sm:$0xff]   ;;  %v1459_v7 = vld [vmem:[%s2184_s1 + $0x28] sm:$0xff]  }
   0x3   :  { %536 = vmatprep.subr.bf16.mxu0 %v1566_v0  ;;  %1422 = vmatprep.subr.bf16.mxu1 %v1566_v0  ;;  %v1472_v6 = vld [vmem:[%s2185_s0 + $0x4] ss:$8 sps:$4 sm:$0xff]   ;;  %v1460_v9 = vld [vmem:[%s2184_s1 + $0x30] sm:$0xff]   ;;  %v1461_v10 = vld [vmem:[%s2184_s1 + $0x38] sm:$0xff]  }
   0x4   :  { %v1475_v8 = vld [vmem:[%s2185_s0 + $0x104] ss:$8 sps:$4 sm:$0xff]   ;;  %566 = vmatprep.mubr.bf16.mxu0 %v1472_v6  ;;  %v1464_v13 = vld [vmem:[%s2184_s1 + $0x50] sm:$0xff]   ;;  %v1465_v14 = vld [vmem:[%s2184_s1 + $0x58] sm:$0xff]  }
   0x5   :  { %694 = vmatprep.mubr.bf16.mxu1 %v1475_v8  ;;  %v1462_v11 = vld [vmem:[%s2184_s1 + $0x40] sm:$0xff]   ;;  %v1463_v12 = vld [vmem:[%s2184_s1 + $0x48] sm:$0xff]   ;;  %v1468_v17 = vld [vmem:[%s2184_s1 + $0x70] sm:$0xff]  }
   0x6   :  { %537 = vmatpush1.bf16.msra.mxu0 %v1455_v2  ;;  %1438 = vmatpush1.bf16.msra.mxu1 %v1455_v2  ;;  %v1466_v15 = vld [vmem:[%s2184_s1 + $0x60] sm:$0xff]   ;;  %v1467_v16 = vld [vmem:[%s2184_s1 + $0x68] sm:$0xff]   ;;  %v1469_v18 = vld [vmem:[%s2184_s1 + $0x78] sm:$0xff]  }
   0x7   :  { %538 = vmatprep.subr.bf16.mxu0 %v1566_v0  ;;  %1423 = vmatprep.subr.bf16.mxu1 %v1566_v0  ;;  %v1470_v19 = vld [vmem:[%s2185_s0] ss:$8 sps:$4 sm:$0xff]   ;;  %v1476_v21 = vld [vmem:[%s2185_s0 + $0x14] ss:$8 sps:$4 sm:$0xff]   ;;  %v1480_v23 = vld [vmem:[%s2185_s0 + $0x10] ss:$8 sps:$4 sm:$0xff]  }
   0x8   :  { %v1473_v20 = vld [vmem:[%s2185_s0 + $0x100] ss:$8 sps:$4 sm:$0xff]   ;;  %v1478_v22 = vld [vmem:[%s2185_s0 + $0x114] ss:$8 sps:$4 sm:$0xff]   ;;  %v1481_v24 = vld [vmem:[%s2185_s0 + $0x110] ss:$8 sps:$4 sm:$0xff]  }
   0x9   :  { %v1482_v25 = vld [vmem:[%s2185_s0 + $0x24] ss:$8 sps:$4 sm:$0xff]   ;;  %v1486_v27 = vld [vmem:[%s2185_s0 + $0x20] ss:$8 sps:$4 sm:$0xff]   ;;  %v1488_v29 = vld [vmem:[%s2185_s0 + $0x34] ss:$8 sps:$4 sm:$0xff]  }
   0xa   :  { %539 = vmatpush1.bf16.msra.mxu0 %v1456_v3  ;;  %1439 = vmatpush1.bf16.msra.mxu1 %v1456_v3  ;;  %v1484_v26 = vld [vmem:[%s2185_s0 + $0x124] ss:$8 sps:$4 sm:$0xff]   ;;  %v1487_v28 = vld [vmem:[%s2185_s0 + $0x120] ss:$8 sps:$4 sm:$0xff]   ;;  %v1490_v30 = vld [vmem:[%s2185_s0 + $0x134] ss:$8 sps:$4 sm:$0xff]  }
   0xb   :  { %540 = vmatprep.subr.bf16.mxu0 %v1566_v0  ;;  %1424 = vmatprep.subr.bf16.mxu1 %v1566_v0  ;;  %v1492_v31 = vld [vmem:[%s2185_s0 + $0x30] ss:$8 sps:$4 sm:$0xff]   ;;  %v1494_v33 = vld [vmem:[%s2185_s0 + $0x44] ss:$8 sps:$4 sm:$0xff]   ;;  %v1498_v35 = vld [vmem:[%s2185_s0 + $0x40] ss:$8 sps:$4 sm:$0xff]  }
   0xc   :  { %v1493_v32 = vld [vmem:[%s2185_s0 + $0x130] ss:$8 sps:$4 sm:$0xff]   ;;  %v1496_v34 = vld [vmem:[%s2185_s0 + $0x144] ss:$8 sps:$4 sm:$0xff]   ;;  %v1499_v36 = vld [vmem:[%s2185_s0 + $0x140] ss:$8 sps:$4 sm:$0xff]  }
   0xd   :  { %v1500_v37 = vld [vmem:[%s2185_s0 + $0x54] ss:$8 sps:$4 sm:$0xff]   ;;  %v1504_v39 = vld [vmem:[%s2185_s0 + $0x50] ss:$8 sps:$4 sm:$0xff]   ;;  %v1506_v41 = vld [vmem:[%s2185_s0 + $0x64] ss:$8 sps:$4 sm:$0xff]  }
   0xe   :  { %541 = vmatpush1.bf16.msra.mxu0 %v1457_v4  ;;  %1440 = vmatpush1.bf16.msra.mxu1 %v1457_v4  ;;  %v1502_v38 = vld [vmem:[%s2185_s0 + $0x154] ss:$8 sps:$4 sm:$0xff]   ;;  %v1505_v40 = vld [vmem:[%s2185_s0 + $0x150] ss:$8 sps:$4 sm:$0xff]   ;;  %v1508_v42 = vld [vmem:[%s2185_s0 + $0x164] ss:$8 sps:$4 sm:$0xff]  }
   0xf   :  { %542 = vmatprep.subr.bf16.mxu0 %v1566_v0  ;;  %1425 = vmatprep.subr.bf16.mxu1 %v1566_v0  ;;  %v1510_v43 = vld [vmem:[%s2185_s0 + $0x60] ss:$8 sps:$4 sm:$0xff]   ;;  %v1512_v45 = vld [vmem:[%s2185_s0 + $0x74] ss:$8 sps:$4 sm:$0xff]   ;;  %v1516_v47 = vld [vmem:[%s2185_s0 + $0x70] ss:$8 sps:$4 sm:$0xff]  }
  0x10   :  { %v1511_v44 = vld [vmem:[%s2185_s0 + $0x160] ss:$8 sps:$4 sm:$0xff]   ;;  %v1514_v46 = vld [vmem:[%s2185_s0 + $0x174] ss:$8 sps:$4 sm:$0xff]   ;;  %v1517_v48 = vld [vmem:[%s2185_s0 + $0x170] ss:$8 sps:$4 sm:$0xff]  }
  0x11   :  { %v1518_v49 = vld [vmem:[%s2185_s0 + $0x84] ss:$8 sps:$4 sm:$0xff]   ;;  %v1522_v51 = vld [vmem:[%s2185_s0 + $0x80] ss:$8 sps:$4 sm:$0xff]   ;;  %v1524_v53 = vld [vmem:[%s2185_s0 + $0x94] ss:$8 sps:$4 sm:$0xff]  }
  0x12   :  { %543 = vmatpush1.bf16.msra.mxu0 %v1458_v5  ;;  %1441 = vmatpush1.bf16.msra.mxu1 %v1458_v5  ;;  %v1520_v50 = vld [vmem:[%s2185_s0 + $0x184] ss:$8 sps:$4 sm:$0xff]   ;;  %v1523_v52 = vld [vmem:[%s2185_s0 + $0x180] ss:$8 sps:$4 sm:$0xff]   ;;  %v1526_v54 = vld [vmem:[%s2185_s0 + $0x194] ss:$8 sps:$4 sm:$0xff]  }
  0x13   :  { %544 = vmatprep.subr.bf16.mxu0 %v1566_v0  ;;  %1426 = vmatprep.subr.bf16.mxu1 %v1566_v0  ;;  %v1528_v55 = vld [vmem:[%s2185_s0 + $0x90] ss:$8 sps:$4 sm:$0xff]   ;;  %v1530_v57 = vld [vmem:[%s2185_s0 + $0xa4] ss:$8 sps:$4 sm:$0xff]   ;;  %v1534_v59 = vld [vmem:[%s2185_s0 + $0xa0] ss:$8 sps:$4 sm:$0xff]  }
  0x14   :  { %v1529_v56 = vld [vmem:[%s2185_s0 + $0x190] ss:$8 sps:$4 sm:$0xff]   ;;  %v1532_v58 = vld [vmem:[%s2185_s0 + $0x1a4] ss:$8 sps:$4 sm:$0xff]   ;;  %v1535_v60 = vld [vmem:[%s2185_s0 + $0x1a0] ss:$8 sps:$4 sm:$0xff]  }
  0x15   :  { %v1536_v61 = vld [vmem:[%s2185_s0 + $0xb4] ss:$8 sps:$4 sm:$0xff]   ;;  %v1540_v63 = vld [vmem:[%s2185_s0 + $0xb0] ss:$8 sps:$4 sm:$0xff]   ;;  %v1542_v1 = vld [vmem:[%s2185_s0 + $0xc4] ss:$8 sps:$4 sm:$0xff]  }
  0x16   :  { %545 = vmatpush1.bf16.msra.mxu0 %v1459_v7  ;;  %1442 = vmatpush1.bf16.msra.mxu1 %v1459_v7  ;;  %v1538_v62 = vld [vmem:[%s2185_s0 + $0x1b4] ss:$8 sps:$4 sm:$0xff]   ;;  %v1544_v2 = vld [vmem:[%s2185_s0 + $0x1c4] ss:$8 sps:$4 sm:$0xff]   ;;  %v1546_v3 = vld [vmem:[%s2185_s0 + $0xc0] ss:$8 sps:$4 sm:$0xff]  }
  0x17   :  { %546 = vmatprep.subr.bf16.mxu0 %v1566_v0  ;;  %1427 = vmatprep.subr.bf16.mxu1 %v1566_v0  ;;  %v1547_v4 = vld [vmem:[%s2185_s0 + $0x1c0] ss:$8 sps:$4 sm:$0xff]   ;;  %v1548_v5 = vld [vmem:[%s2185_s0 + $0xd4] ss:$8 sps:$4 sm:$0xff]   ;;  %v1552_v7 = vld [vmem:[%s2185_s0 + $0xd0] ss:$8 sps:$4 sm:$0xff]  }
  0x18   :  { %v1550_v6 = vld [vmem:[%s2185_s0 + $0x1d4] ss:$8 sps:$4 sm:$0xff]   ;;  %v1553_v8 = vld [vmem:[%s2185_s0 + $0x1d0] ss:$8 sps:$4 sm:$0xff]  }
  0x1a   :  { %547 = vmatpush1.bf16.msra.mxu0 %v1460_v9  ;;  %1443 = vmatpush1.bf16.msra.mxu1 %v1460_v9  ;;  %v1554_v9 = vld [vmem:[%s2185_s0 + $0xe4] ss:$8 sps:$4 sm:$0xff]  }
  0x1b   :  { %548 = vmatprep.subr.bf16.mxu0 %v1566_v0  ;;  %1428 = vmatprep.subr.bf16.mxu1 %v1566_v0 }
  0x1e   :  { %549 = vmatpush1.bf16.msra.mxu0 %v1461_v10  ;;  %1444 = vmatpush1.bf16.msra.mxu1 %v1461_v10  ;;  %v1556_v10 = vld [vmem:[%s2185_s0 + $0x1e4] ss:$8 sps:$4 sm:$0xff]  }
  0x1f   :  { %550 = vmatprep.subr.bf16.mxu0 %v1566_v0  ;;  %1429 = vmatprep.subr.bf16.mxu1 %v1566_v0 }
  0x22   :  { %551 = vmatpush1.bf16.msra.mxu0 %v1462_v11  ;;  %1445 = vmatpush1.bf16.msra.mxu1 %v1462_v11  ;;  %v1558_v11 = vld [vmem:[%s2185_s0 + $0xe0] ss:$8 sps:$4 sm:$0xff]  }
  0x23   :  { %552 = vmatprep.subr.bf16.mxu0 %v1566_v0  ;;  %1430 = vmatprep.subr.bf16.mxu1 %v1566_v0 }
  0x26   :  { %553 = vmatpush1.bf16.msra.mxu0 %v1463_v12  ;;  %1446 = vmatpush1.bf16.msra.mxu1 %v1463_v12  ;;  %v1559_v12 = vld [vmem:[%s2185_s0 + $0x1e0] ss:$8 sps:$4 sm:$0xff]  }
  0x27   :  { %554 = vmatprep.subr.bf16.mxu0 %v1566_v0  ;;  %1431 = vmatprep.subr.bf16.mxu1 %v1566_v0 }
  0x2a   :  { %555 = vmatpush1.bf16.msra.mxu0 %v1464_v13  ;;  %1447 = vmatpush1.bf16.msra.mxu1 %v1464_v13  ;;  %v1560_v13 = vld [vmem:[%s2185_s0 + $0xf4] ss:$8 sps:$4 sm:$0xff]  }
  0x2b   :  { %556 = vmatprep.subr.bf16.mxu0 %v1566_v0  ;;  %1432 = vmatprep.subr.bf16.mxu1 %v1566_v0 }
  0x2e   :  { %557 = vmatpush1.bf16.msra.mxu0 %v1465_v14  ;;  %1448 = vmatpush1.bf16.msra.mxu1 %v1465_v14  ;;  %v1562_v14 = vld [vmem:[%s2185_s0 + $0x1f4] ss:$8 sps:$4 sm:$0xff]  }
  0x2f   :  { %558 = vmatprep.subr.bf16.mxu0 %v1566_v0  ;;  %1433 = vmatprep.subr.bf16.mxu1 %v1566_v0 }
  0x32   :  { %559 = vmatpush1.bf16.msra.mxu0 %v1466_v15  ;;  %1449 = vmatpush1.bf16.msra.mxu1 %v1466_v15  ;;  %v1564_v15 = vld [vmem:[%s2185_s0 + $0xf0] ss:$8 sps:$4 sm:$0xff]  }
  0x33   :  { %560 = vmatprep.subr.bf16.mxu0 %v1566_v0  ;;  %1434 = vmatprep.subr.bf16.mxu1 %v1566_v0 }
  0x36   :  { %561 = vmatpush1.bf16.msra.mxu0 %v1467_v16  ;;  %1450 = vmatpush1.bf16.msra.mxu1 %v1467_v16  ;;  %v1565_v16 = vld [vmem:[%s2185_s0 + $0x1f0] ss:$8 sps:$4 sm:$0xff]  }
  0x37   :  { %562 = vmatprep.subr.bf16.mxu0 %v1566_v0  ;;  %1435 = vmatprep.subr.bf16.mxu1 %v1566_v0 }
  0x3a   :  { %563 = vmatpush1.bf16.msra.mxu0 %v1468_v17  ;;  %1451 = vmatpush1.bf16.msra.mxu1 %v1468_v17  ;;  %v1862_v17 = vld [vmem:[%s2186_s2] ss:$0 sm:$0xff] }
  0x3b   :  { %564 = vmatprep.subr.bf16.mxu0 %v1566_v0  ;;  %1436 = vmatprep.subr.bf16.mxu1 %v1566_v0  ;;  %v1541_v0 = vld [vmem:[%s2185_s0 + $0x1b0] ss:$8 sps:$4 sm:$0xff]  }
  0x3e   :  { %565 = vmatpush1.bf16.msra.mxu0 %v1469_v18  ;;  %1452 = vmatpush1.bf16.msra.mxu1 %v1469_v18 }
  0x41   :  { %567 = vmatmul.mubr.bf16.vlgmr.msra.gmra.mrb[0].mxu0 %v1470_v19  ;;  %695 = vmatmul.mubr.bf16.vlgmr.msra.gmra.mrb[0].mxu1 %v1473_v20 }
  0x42   :  { %574 = vmatprep.mubr.bf16.mxu0 %v1476_v21  ;;  %702 = vmatprep.mubr.bf16.mxu1 %v1478_v22 }
  0x49   :  { %575 = vmatmul.mubr.bf16.gmra.mrb[4].mxu0 %v1480_v23  ;;  %703 = vmatmul.mubr.bf16.gmra.mrb[4].mxu1 %v1481_v24 }
  0x4a   :  { %582 = vmatprep.mubr.bf16.mxu0 %v1482_v25  ;;  %710 = vmatprep.mubr.bf16.mxu1 %v1484_v26 }
  0x51   :  { %583 = vmatmul.mubr.bf16.gmra.mrb[8].mxu0 %v1486_v27  ;;  %711 = vmatmul.mubr.bf16.gmra.mrb[8].mxu1 %v1487_v28 }
  0x52   :  { %590 = vmatprep.mubr.bf16.mxu0 %v1488_v29  ;;  %718 = vmatprep.mubr.bf16.mxu1 %v1490_v30 }
  0x59   :  { %591 = vmatmul.mubr.bf16.gmra.mrb[12].mxu0 %v1492_v31  ;;  %719 = vmatmul.mubr.bf16.gmra.mrb[12].mxu1 %v1493_v32 }
  0x5a   :  { %598 = vmatprep.mubr.bf16.mxu0 %v1494_v33  ;;  %726 = vmatprep.mubr.bf16.mxu1 %v1496_v34 }
  0x61   :  { %599 = vmatmul.mubr.bf16.gmra.mrb[16].mxu0 %v1498_v35  ;;  %727 = vmatmul.mubr.bf16.gmra.mrb[16].mxu1 %v1499_v36 }
  0x62   :  { %606 = vmatprep.mubr.bf16.mxu0 %v1500_v37  ;;  %734 = vmatprep.mubr.bf16.mxu1 %v1502_v38 }
  0x69   :  { %607 = vmatmul.mubr.bf16.gmra.mrb[20].mxu0 %v1504_v39  ;;  %735 = vmatmul.mubr.bf16.gmra.mrb[20].mxu1 %v1505_v40 }
  0x6a   :  { %614 = vmatprep.mubr.bf16.mxu0 %v1506_v41  ;;  %742 = vmatprep.mubr.bf16.mxu1 %v1508_v42 }
  0x71   :  { %615 = vmatmul.mubr.bf16.gmra.mrb[24].mxu0 %v1510_v43  ;;  %743 = vmatmul.mubr.bf16.gmra.mrb[24].mxu1 %v1511_v44 }
  0x72   :  { %622 = vmatprep.mubr.bf16.mxu0 %v1512_v45  ;;  %750 = vmatprep.mubr.bf16.mxu1 %v1514_v46 }
  0x79   :  { %623 = vmatmul.mubr.bf16.gmra.mrb[28].mxu0 %v1516_v47  ;;  %751 = vmatmul.mubr.bf16.gmra.mrb[28].mxu1 %v1517_v48 }
  0x7a   :  { %630 = vmatprep.mubr.bf16.mxu0 %v1518_v49  ;;  %758 = vmatprep.mubr.bf16.mxu1 %v1520_v50 }
  0x81   :  { %631 = vmatmul.mubr.bf16.gmra.mrb[32].mxu0 %v1522_v51  ;;  %759 = vmatmul.mubr.bf16.gmra.mrb[32].mxu1 %v1523_v52 }
  0x82   :  { %638 = vmatprep.mubr.bf16.mxu0 %v1524_v53  ;;  %766 = vmatprep.mubr.bf16.mxu1 %v1526_v54 }
  0x89   :  { %639 = vmatmul.mubr.bf16.gmra.mrb[36].mxu0 %v1528_v55  ;;  %767 = vmatmul.mubr.bf16.gmra.mrb[36].mxu1 %v1529_v56 }
  0x8a   :  { %646 = vmatprep.mubr.bf16.mxu0 %v1530_v57  ;;  %774 = vmatprep.mubr.bf16.mxu1 %v1532_v58 }
  0x91   :  { %647 = vmatmul.mubr.bf16.gmra.mrb[40].mxu0 %v1534_v59  ;;  %775 = vmatmul.mubr.bf16.gmra.mrb[40].mxu1 %v1535_v60 }
  0x92   :  { %654 = vmatprep.mubr.bf16.mxu0 %v1536_v61  ;;  %782 = vmatprep.mubr.bf16.mxu1 %v1538_v62 }
  0x99   :  { %655 = vmatmul.mubr.bf16.gmra.mrb[44].mxu0 %v1540_v63  ;;  %783 = vmatmul.mubr.bf16.gmra.mrb[44].mxu1 %v1541_v0 }
  0x9a   :  { %662 = vmatprep.mubr.bf16.mxu0 %v1542_v1  ;;  %790 = vmatprep.mubr.bf16.mxu1 %v1544_v2 }
  0xa1   :  { %663 = vmatmul.mubr.bf16.gmra.mrb[48].mxu0 %v1546_v3  ;;  %791 = vmatmul.mubr.bf16.gmra.mrb[48].mxu1 %v1547_v4 }
  0xa2   :  { %670 = vmatprep.mubr.bf16.mxu0 %v1548_v5  ;;  %798 = vmatprep.mubr.bf16.mxu1 %v1550_v6 }
  0xa9   :  { %671 = vmatmul.mubr.bf16.gmra.mrb[52].mxu0 %v1552_v7  ;;  %799 = vmatmul.mubr.bf16.gmra.mrb[52].mxu1 %v1553_v8 }
  0xaa   :  { %678 = vmatprep.mubr.bf16.mxu0 %v1554_v9  ;;  %806 = vmatprep.mubr.bf16.mxu1 %v1556_v10 }
  0xb1   :  { %679 = vmatmul.mubr.bf16.gmra.mrb[56].mxu0 %v1558_v11  ;;  %807 = vmatmul.mubr.bf16.gmra.mrb[56].mxu1 %v1559_v12 }
  0xb2   :  { %686 = vmatprep.mubr.bf16.mxu0 %v1560_v13  ;;  %814 = vmatprep.mubr.bf16.mxu1 %v1562_v14 }
  0xb9   :  { %687 = vmatmul.mubr.bf16.gmra.mrb[60].mxu0 %v1564_v15  ;;  %815 = vmatmul.mubr.bf16.gmra.mrb[60].mxu1 %v1565_v16 }
 0x114   :  { %v568_v18 = vpop.f32.mrb[0].mxu0  ;;  %v696_v19 = vpop.f32.mrb[0].mxu1 }
 0x115   :  { %v569_v20 = vadd.f32 %v1862_v17, %v568_v18  ;;  %v697_v21 = vadd.f32 %v1862_v17, %v696_v19  ;;  %v570_v22 = vpop.f32.mrb[1].mxu0  ;;  %v698_v23 = vpop.f32.mrb[1].mxu1 }
 0x116   :  { %v571_v24 = vpop.f32.mrb[2].mxu0  ;;  %v699_v25 = vpop.f32.mrb[2].mxu1 }
 0x117   :  { %v823_v26 = vmax.f32 %v569_v20, 0.0  ;;  %v855_v27 = vmax.f32 %v697_v21, 0.0  ;;  %v572_v28 = vadd.f32 %v1862_v17, %v571_v24  ;;  %v700_v29 = vadd.f32 %v1862_v17, %v699_v25  ;;  %v573_v30 = vpop.f32.mrb[3].mxu0  ;;  %v701_v31 = vpop.f32.mrb[3].mxu1 }
 0x119   :  { %v1357_v32 = vpack.c.bf16 %v823_v26, %v823_v26  ;;  %v1389_v33 = vpack.c.bf16 %v855_v27, %v855_v27  ;;  %v824_v34 = vmax.f32 %v572_v28, 0.0  ;;  %v856_v35 = vmax.f32 %v700_v29, 0.0 }
 0x11b   :  { %1144 = vst.msk [vmem:[%s2187_s3] sm:$0xf] %vm1143_vm0, %v1357_v32  ;;  %1176 = vst.msk [vmem:[%s2187_s3 + $0x80] sm:$0xf] %vm1143_vm0, %v1389_v33  ;;  %v1358_v36 = vpack.c.bf16 %v824_v34, %v824_v34  ;;  %v1390_v37 = vpack.c.bf16 %v856_v35, %v856_v35 }
 0x11c   :  { %v576_v38 = vpop.f32.mrb[4].mxu0  ;;  %v704_v39 = vpop.f32.mrb[4].mxu1 }
 0x11d   :  { %1145 = vst.msk [vmem:[%s2187_s3 + $0x4] sm:$0xf] %vm1143_vm0, %v1358_v36  ;;  %1177 = vst.msk [vmem:[%s2187_s3 + $0x84] sm:$0xf] %vm1143_vm0, %v1390_v37  ;;  %v577_v40 = vadd.f32 %v1862_v17, %v576_v38  ;;  %v705_v41 = vadd.f32 %v1862_v17, %v704_v39  ;;  %v578_v42 = vpop.f32.mrb[5].mxu0  ;;  %v706_v43 = vpop.f32.mrb[5].mxu1 }
 0x11e   :  { %v579_v44 = vpop.f32.mrb[6].mxu0  ;;  %v707_v45 = vpop.f32.mrb[6].mxu1 }
 0x11f   :  { %v825_v46 = vmax.f32 %v577_v40, 0.0  ;;  %v857_v47 = vmax.f32 %v705_v41, 0.0  ;;  %v580_v48 = vadd.f32 %v1862_v17, %v579_v44  ;;  %v708_v49 = vadd.f32 %v1862_v17, %v707_v45  ;;  %v581_v50 = vpop.f32.mrb[7].mxu0  ;;  %v709_v51 = vpop.f32.mrb[7].mxu1 }
 0x121   :  { %v1359_v52 = vpack.c.bf16 %v825_v46, %v825_v46  ;;  %v1391_v53 = vpack.c.bf16 %v857_v47, %v857_v47  ;;  %v826_v54 = vmax.f32 %v580_v48, 0.0  ;;  %v858_v55 = vmax.f32 %v708_v49, 0.0 }
 0x123   :  { %1146 = vst.msk [vmem:[%s2187_s3 + $0x8] sm:$0xf] %vm1143_vm0, %v1359_v52  ;;  %1178 = vst.msk [vmem:[%s2187_s3 + $0x88] sm:$0xf] %vm1143_vm0, %v1391_v53  ;;  %v1360_v56 = vpack.c.bf16 %v826_v54, %v826_v54  ;;  %v1392_v57 = vpack.c.bf16 %v858_v55, %v858_v55 }
 0x124   :  { %v584_v58 = vpop.f32.mrb[8].mxu0  ;;  %v712_v59 = vpop.f32.mrb[8].mxu1 }
 0x125   :  { %1147 = vst.msk [vmem:[%s2187_s3 + $0xc] sm:$0xf] %vm1143_vm0, %v1360_v56  ;;  %1179 = vst.msk [vmem:[%s2187_s3 + $0x8c] sm:$0xf] %vm1143_vm0, %v1392_v57  ;;  %v585_v60 = vadd.f32 %v1862_v17, %v584_v58  ;;  %v713_v61 = vadd.f32 %v1862_v17, %v712_v59  ;;  %v586_v62 = vpop.f32.mrb[9].mxu0  ;;  %v714_v63 = vpop.f32.mrb[9].mxu1 }
 0x126   :  { %v587_v0 = vpop.f32.mrb[10].mxu0  ;;  %v715_v1 = vpop.f32.mrb[10].mxu1 }
 0x127   :  { %v827_v2 = vmax.f32 %v585_v60, 0.0  ;;  %v859_v3 = vmax.f32 %v713_v61, 0.0  ;;  %v588_v4 = vadd.f32 %v1862_v17, %v587_v0  ;;  %v716_v5 = vadd.f32 %v1862_v17, %v715_v1  ;;  %v589_v6 = vpop.f32.mrb[11].mxu0  ;;  %v717_v7 = vpop.f32.mrb[11].mxu1 }
 0x129   :  { %v1361_v8 = vpack.c.bf16 %v827_v2, %v827_v2  ;;  %v1393_v9 = vpack.c.bf16 %v859_v3, %v859_v3  ;;  %v828_v10 = vmax.f32 %v588_v4, 0.0  ;;  %v860_v11 = vmax.f32 %v716_v5, 0.0 }
 0x12b   :  { %1148 = vst.msk [vmem:[%s2187_s3 + $0x10] sm:$0xf] %vm1143_vm0, %v1361_v8  ;;  %1180 = vst.msk [vmem:[%s2187_s3 + $0x90] sm:$0xf] %vm1143_vm0, %v1393_v9  ;;  %v1362_v12 = vpack.c.bf16 %v828_v10, %v828_v10  ;;  %v1394_v13 = vpack.c.bf16 %v860_v11, %v860_v11 }
 0x12c   :  { %v592_v14 = vpop.f32.mrb[12].mxu0  ;;  %v720_v15 = vpop.f32.mrb[12].mxu1 }
 0x12d   :  { %1149 = vst.msk [vmem:[%s2187_s3 + $0x14] sm:$0xf] %vm1143_vm0, %v1362_v12  ;;  %1181 = vst.msk [vmem:[%s2187_s3 + $0x94] sm:$0xf] %vm1143_vm0, %v1394_v13  ;;  %v593_v16 = vadd.f32 %v1862_v17, %v592_v14  ;;  %v721_v18 = vadd.f32 %v1862_v17, %v720_v15  ;;  %v594_v19 = vpop.f32.mrb[13].mxu0  ;;  %v722_v20 = vpop.f32.mrb[13].mxu1 }
 0x12e   :  { %v595_v21 = vpop.f32.mrb[14].mxu0  ;;  %v723_v22 = vpop.f32.mrb[14].mxu1 }
 0x12f   :  { %v829_v23 = vmax.f32 %v593_v16, 0.0  ;;  %v861_v24 = vmax.f32 %v721_v18, 0.0  ;;  %v596_v25 = vadd.f32 %v1862_v17, %v595_v21  ;;  %v724_v26 = vadd.f32 %v1862_v17, %v723_v22  ;;  %v597_v27 = vpop.f32.mrb[15].mxu0  ;;  %v725_v28 = vpop.f32.mrb[15].mxu1 }
 0x131   :  { %v1363_v29 = vpack.c.bf16 %v829_v23, %v829_v23  ;;  %v1395_v30 = vpack.c.bf16 %v861_v24, %v861_v24  ;;  %v830_v31 = vmax.f32 %v596_v25, 0.0  ;;  %v862_v32 = vmax.f32 %v724_v26, 0.0 }
 0x133   :  { %1150 = vst.msk [vmem:[%s2187_s3 + $0x18] sm:$0xf] %vm1143_vm0, %v1363_v29  ;;  %1182 = vst.msk [vmem:[%s2187_s3 + $0x98] sm:$0xf] %vm1143_vm0, %v1395_v30  ;;  %v1364_v33 = vpack.c.bf16 %v830_v31, %v830_v31  ;;  %v1396_v34 = vpack.c.bf16 %v862_v32, %v862_v32 }
 0x134   :  { %v600_v35 = vpop.f32.mrb[16].mxu0  ;;  %v728_v36 = vpop.f32.mrb[16].mxu1 }
 0x135   :  { %1151 = vst.msk [vmem:[%s2187_s3 + $0x1c] sm:$0xf] %vm1143_vm0, %v1364_v33  ;;  %1183 = vst.msk [vmem:[%s2187_s3 + $0x9c] sm:$0xf] %vm1143_vm0, %v1396_v34  ;;  %v601_v37 = vadd.f32 %v1862_v17, %v600_v35  ;;  %v729_v38 = vadd.f32 %v1862_v17, %v728_v36  ;;  %v602_v39 = vpop.f32.mrb[17].mxu0  ;;  %v730_v40 = vpop.f32.mrb[17].mxu1 }
 0x136   :  { %v603_v41 = vpop.f32.mrb[18].mxu0  ;;  %v731_v42 = vpop.f32.mrb[18].mxu1 }
 0x137   :  { %v831_v43 = vmax.f32 %v601_v37, 0.0  ;;  %v863_v44 = vmax.f32 %v729_v38, 0.0  ;;  %v604_v45 = vadd.f32 %v1862_v17, %v603_v41  ;;  %v732_v46 = vadd.f32 %v1862_v17, %v731_v42  ;;  %v605_v47 = vpop.f32.mrb[19].mxu0  ;;  %v733_v48 = vpop.f32.mrb[19].mxu1 }
 0x139   :  { %v1365_v49 = vpack.c.bf16 %v831_v43, %v831_v43  ;;  %v1397_v50 = vpack.c.bf16 %v863_v44, %v863_v44  ;;  %v832_v51 = vmax.f32 %v604_v45, 0.0  ;;  %v864_v52 = vmax.f32 %v732_v46, 0.0 }
 0x13b   :  { %1152 = vst.msk [vmem:[%s2187_s3 + $0x20] sm:$0xf] %vm1143_vm0, %v1365_v49  ;;  %1184 = vst.msk [vmem:[%s2187_s3 + $0xa0] sm:$0xf] %vm1143_vm0, %v1397_v50  ;;  %v1366_v53 = vpack.c.bf16 %v832_v51, %v832_v51  ;;  %v1398_v54 = vpack.c.bf16 %v864_v52, %v864_v52 }
 0x13c   :  { %v608_v55 = vpop.f32.mrb[20].mxu0  ;;  %v736_v56 = vpop.f32.mrb[20].mxu1 }
 0x13d   :  { %1153 = vst.msk [vmem:[%s2187_s3 + $0x24] sm:$0xf] %vm1143_vm0, %v1366_v53  ;;  %1185 = vst.msk [vmem:[%s2187_s3 + $0xa4] sm:$0xf] %vm1143_vm0, %v1398_v54  ;;  %v609_v57 = vadd.f32 %v1862_v17, %v608_v55  ;;  %v737_v58 = vadd.f32 %v1862_v17, %v736_v56  ;;  %v610_v59 = vpop.f32.mrb[21].mxu0  ;;  %v738_v60 = vpop.f32.mrb[21].mxu1 }
 0x13e   :  { %v611_v61 = vpop.f32.mrb[22].mxu0  ;;  %v739_v62 = vpop.f32.mrb[22].mxu1 }
 0x13f   :  { %v833_v63 = vmax.f32 %v609_v57, 0.0  ;;  %v865_v0 = vmax.f32 %v737_v58, 0.0  ;;  %v612_v1 = vadd.f32 %v1862_v17, %v611_v61  ;;  %v740_v2 = vadd.f32 %v1862_v17, %v739_v62  ;;  %v613_v3 = vpop.f32.mrb[23].mxu0  ;;  %v741_v4 = vpop.f32.mrb[23].mxu1 }
 0x141   :  { %v1367_v5 = vpack.c.bf16 %v833_v63, %v833_v63  ;;  %v1399_v6 = vpack.c.bf16 %v865_v0, %v865_v0  ;;  %v834_v7 = vmax.f32 %v612_v1, 0.0  ;;  %v866_v8 = vmax.f32 %v740_v2, 0.0 }
 0x143   :  { %1154 = vst.msk [vmem:[%s2187_s3 + $0x28] sm:$0xf] %vm1143_vm0, %v1367_v5  ;;  %1186 = vst.msk [vmem:[%s2187_s3 + $0xa8] sm:$0xf] %vm1143_vm0, %v1399_v6  ;;  %v1368_v9 = vpack.c.bf16 %v834_v7, %v834_v7  ;;  %v1400_v10 = vpack.c.bf16 %v866_v8, %v866_v8 }
 0x144   :  { %v616_v11 = vpop.f32.mrb[24].mxu0  ;;  %v744_v12 = vpop.f32.mrb[24].mxu1 }
 0x145   :  { %1155 = vst.msk [vmem:[%s2187_s3 + $0x2c] sm:$0xf] %vm1143_vm0, %v1368_v9  ;;  %1187 = vst.msk [vmem:[%s2187_s3 + $0xac] sm:$0xf] %vm1143_vm0, %v1400_v10  ;;  %v617_v13 = vadd.f32 %v1862_v17, %v616_v11  ;;  %v745_v14 = vadd.f32 %v1862_v17, %v744_v12  ;;  %v618_v15 = vpop.f32.mrb[25].mxu0  ;;  %v746_v16 = vpop.f32.mrb[25].mxu1 }
 0x146   :  { %v619_v18 = vpop.f32.mrb[26].mxu0  ;;  %v747_v19 = vpop.f32.mrb[26].mxu1 }
 0x147   :  { %v835_v20 = vmax.f32 %v617_v13, 0.0  ;;  %v867_v21 = vmax.f32 %v745_v14, 0.0  ;;  %v620_v22 = vadd.f32 %v1862_v17, %v619_v18  ;;  %v748_v23 = vadd.f32 %v1862_v17, %v747_v19  ;;  %v621_v24 = vpop.f32.mrb[27].mxu0  ;;  %v749_v25 = vpop.f32.mrb[27].mxu1 }
 0x149   :  { %v1369_v26 = vpack.c.bf16 %v835_v20, %v835_v20  ;;  %v1401_v27 = vpack.c.bf16 %v867_v21, %v867_v21  ;;  %v836_v28 = vmax.f32 %v620_v22, 0.0  ;;  %v868_v29 = vmax.f32 %v748_v23, 0.0 }
 0x14b   :  { %1156 = vst.msk [vmem:[%s2187_s3 + $0x30] sm:$0xf] %vm1143_vm0, %v1369_v26  ;;  %1188 = vst.msk [vmem:[%s2187_s3 + $0xb0] sm:$0xf] %vm1143_vm0, %v1401_v27  ;;  %v1370_v30 = vpack.c.bf16 %v836_v28, %v836_v28  ;;  %v1402_v31 = vpack.c.bf16 %v868_v29, %v868_v29 }
 0x14c   :  { %v624_v32 = vpop.f32.mrb[28].mxu0  ;;  %v752_v33 = vpop.f32.mrb[28].mxu1 }
 0x14d   :  { %1157 = vst.msk [vmem:[%s2187_s3 + $0x34] sm:$0xf] %vm1143_vm0, %v1370_v30  ;;  %1189 = vst.msk [vmem:[%s2187_s3 + $0xb4] sm:$0xf] %vm1143_vm0, %v1402_v31  ;;  %v625_v34 = vadd.f32 %v1862_v17, %v624_v32  ;;  %v753_v35 = vadd.f32 %v1862_v17, %v752_v33  ;;  %v626_v36 = vpop.f32.mrb[29].mxu0  ;;  %v754_v37 = vpop.f32.mrb[29].mxu1 }
 0x14e   :  { %v627_v38 = vpop.f32.mrb[30].mxu0  ;;  %v755_v39 = vpop.f32.mrb[30].mxu1 }
 0x14f   :  { %v837_v40 = vmax.f32 %v625_v34, 0.0  ;;  %v869_v41 = vmax.f32 %v753_v35, 0.0  ;;  %v628_v42 = vadd.f32 %v1862_v17, %v627_v38  ;;  %v756_v43 = vadd.f32 %v1862_v17, %v755_v39  ;;  %v629_v44 = vpop.f32.mrb[31].mxu0  ;;  %v757_v45 = vpop.f32.mrb[31].mxu1 }
 0x151   :  { %v1371_v46 = vpack.c.bf16 %v837_v40, %v837_v40  ;;  %v1403_v47 = vpack.c.bf16 %v869_v41, %v869_v41  ;;  %v838_v48 = vmax.f32 %v628_v42, 0.0  ;;  %v870_v49 = vmax.f32 %v756_v43, 0.0 }
 0x153   :  { %1158 = vst.msk [vmem:[%s2187_s3 + $0x38] sm:$0xf] %vm1143_vm0, %v1371_v46  ;;  %1190 = vst.msk [vmem:[%s2187_s3 + $0xb8] sm:$0xf] %vm1143_vm0, %v1403_v47  ;;  %v1372_v50 = vpack.c.bf16 %v838_v48, %v838_v48  ;;  %v1404_v51 = vpack.c.bf16 %v870_v49, %v870_v49 }
 0x154   :  { %v632_v52 = vpop.f32.mrb[32].mxu0  ;;  %v760_v53 = vpop.f32.mrb[32].mxu1 }
 0x155   :  { %1159 = vst.msk [vmem:[%s2187_s3 + $0x3c] sm:$0xf] %vm1143_vm0, %v1372_v50  ;;  %1191 = vst.msk [vmem:[%s2187_s3 + $0xbc] sm:$0xf] %vm1143_vm0, %v1404_v51  ;;  %v633_v54 = vadd.f32 %v1862_v17, %v632_v52  ;;  %v761_v55 = vadd.f32 %v1862_v17, %v760_v53  ;;  %v634_v56 = vpop.f32.mrb[33].mxu0  ;;  %v762_v57 = vpop.f32.mrb[33].mxu1 }
 0x156   :  { %v635_v58 = vpop.f32.mrb[34].mxu0  ;;  %v763_v59 = vpop.f32.mrb[34].mxu1 }
 0x157   :  { %v839_v60 = vmax.f32 %v633_v54, 0.0  ;;  %v871_v61 = vmax.f32 %v761_v55, 0.0  ;;  %v636_v62 = vadd.f32 %v1862_v17, %v635_v58  ;;  %v764_v63 = vadd.f32 %v1862_v17, %v763_v59  ;;  %v637_v0 = vpop.f32.mrb[35].mxu0  ;;  %v765_v1 = vpop.f32.mrb[35].mxu1 }
 0x159   :  { %v1373_v2 = vpack.c.bf16 %v839_v60, %v839_v60  ;;  %v1405_v3 = vpack.c.bf16 %v871_v61, %v871_v61  ;;  %v840_v4 = vmax.f32 %v636_v62, 0.0  ;;  %v872_v5 = vmax.f32 %v764_v63, 0.0 }
 0x15b   :  { %1160 = vst.msk [vmem:[%s2187_s3 + $0x40] sm:$0xf] %vm1143_vm0, %v1373_v2  ;;  %1192 = vst.msk [vmem:[%s2187_s3 + $0xc0] sm:$0xf] %vm1143_vm0, %v1405_v3  ;;  %v1374_v6 = vpack.c.bf16 %v840_v4, %v840_v4  ;;  %v1406_v7 = vpack.c.bf16 %v872_v5, %v872_v5 }
 0x15c   :  { %v640_v8 = vpop.f32.mrb[36].mxu0  ;;  %v768_v9 = vpop.f32.mrb[36].mxu1 }
 0x15d   :  { %1161 = vst.msk [vmem:[%s2187_s3 + $0x44] sm:$0xf] %vm1143_vm0, %v1374_v6  ;;  %1193 = vst.msk [vmem:[%s2187_s3 + $0xc4] sm:$0xf] %vm1143_vm0, %v1406_v7  ;;  %v641_v10 = vadd.f32 %v1862_v17, %v640_v8  ;;  %v769_v11 = vadd.f32 %v1862_v17, %v768_v9  ;;  %v642_v12 = vpop.f32.mrb[37].mxu0  ;;  %v770_v13 = vpop.f32.mrb[37].mxu1 }
 0x15e   :  { %v643_v14 = vpop.f32.mrb[38].mxu0  ;;  %v771_v15 = vpop.f32.mrb[38].mxu1 }
 0x15f   :  { %v841_v16 = vmax.f32 %v641_v10, 0.0  ;;  %v873_v18 = vmax.f32 %v769_v11, 0.0  ;;  %v644_v19 = vadd.f32 %v1862_v17, %v643_v14  ;;  %v772_v20 = vadd.f32 %v1862_v17, %v771_v15  ;;  %v645_v21 = vpop.f32.mrb[39].mxu0  ;;  %v773_v22 = vpop.f32.mrb[39].mxu1 }
 0x161   :  { %v1375_v23 = vpack.c.bf16 %v841_v16, %v841_v16  ;;  %v1407_v24 = vpack.c.bf16 %v873_v18, %v873_v18  ;;  %v842_v25 = vmax.f32 %v644_v19, 0.0  ;;  %v874_v26 = vmax.f32 %v772_v20, 0.0 }
 0x163   :  { %1162 = vst.msk [vmem:[%s2187_s3 + $0x48] sm:$0xf] %vm1143_vm0, %v1375_v23  ;;  %1194 = vst.msk [vmem:[%s2187_s3 + $0xc8] sm:$0xf] %vm1143_vm0, %v1407_v24  ;;  %v1376_v27 = vpack.c.bf16 %v842_v25, %v842_v25  ;;  %v1408_v28 = vpack.c.bf16 %v874_v26, %v874_v26 }
 0x164   :  { %v648_v29 = vpop.f32.mrb[40].mxu0  ;;  %v776_v30 = vpop.f32.mrb[40].mxu1 }
 0x165   :  { %1163 = vst.msk [vmem:[%s2187_s3 + $0x4c] sm:$0xf] %vm1143_vm0, %v1376_v27  ;;  %1195 = vst.msk [vmem:[%s2187_s3 + $0xcc] sm:$0xf] %vm1143_vm0, %v1408_v28  ;;  %v649_v31 = vadd.f32 %v1862_v17, %v648_v29  ;;  %v777_v32 = vadd.f32 %v1862_v17, %v776_v30  ;;  %v650_v33 = vpop.f32.mrb[41].mxu0  ;;  %v778_v34 = vpop.f32.mrb[41].mxu1 }
 0x166   :  { %v651_v35 = vpop.f32.mrb[42].mxu0  ;;  %v779_v36 = vpop.f32.mrb[42].mxu1 }
 0x167   :  { %v843_v37 = vmax.f32 %v649_v31, 0.0  ;;  %v875_v38 = vmax.f32 %v777_v32, 0.0  ;;  %v652_v39 = vadd.f32 %v1862_v17, %v651_v35  ;;  %v780_v40 = vadd.f32 %v1862_v17, %v779_v36  ;;  %v653_v41 = vpop.f32.mrb[43].mxu0  ;;  %v781_v42 = vpop.f32.mrb[43].mxu1 }
 0x169   :  { %v1377_v43 = vpack.c.bf16 %v843_v37, %v843_v37  ;;  %v1409_v44 = vpack.c.bf16 %v875_v38, %v875_v38  ;;  %v844_v45 = vmax.f32 %v652_v39, 0.0  ;;  %v876_v46 = vmax.f32 %v780_v40, 0.0 }
 0x16b   :  { %1164 = vst.msk [vmem:[%s2187_s3 + $0x50] sm:$0xf] %vm1143_vm0, %v1377_v43  ;;  %1196 = vst.msk [vmem:[%s2187_s3 + $0xd0] sm:$0xf] %vm1143_vm0, %v1409_v44  ;;  %v1378_v47 = vpack.c.bf16 %v844_v45, %v844_v45  ;;  %v1410_v48 = vpack.c.bf16 %v876_v46, %v876_v46 }
 0x16c   :  { %v656_v49 = vpop.f32.mrb[44].mxu0  ;;  %v784_v50 = vpop.f32.mrb[44].mxu1 }
 0x16d   :  { %1165 = vst.msk [vmem:[%s2187_s3 + $0x54] sm:$0xf] %vm1143_vm0, %v1378_v47  ;;  %1197 = vst.msk [vmem:[%s2187_s3 + $0xd4] sm:$0xf] %vm1143_vm0, %v1410_v48  ;;  %v657_v51 = vadd.f32 %v1862_v17, %v656_v49  ;;  %v785_v52 = vadd.f32 %v1862_v17, %v784_v50  ;;  %v658_v53 = vpop.f32.mrb[45].mxu0  ;;  %v786_v54 = vpop.f32.mrb[45].mxu1 }
 0x16e   :  { %v659_v55 = vpop.f32.mrb[46].mxu0  ;;  %v787_v56 = vpop.f32.mrb[46].mxu1 }
 0x16f   :  { %v845_v57 = vmax.f32 %v657_v51, 0.0  ;;  %v877_v58 = vmax.f32 %v785_v52, 0.0  ;;  %v660_v59 = vadd.f32 %v1862_v17, %v659_v55  ;;  %v788_v60 = vadd.f32 %v1862_v17, %v787_v56  ;;  %v661_v61 = vpop.f32.mrb[47].mxu0  ;;  %v789_v62 = vpop.f32.mrb[47].mxu1 }
 0x171   :  { %v1379_v63 = vpack.c.bf16 %v845_v57, %v845_v57  ;;  %v1411_v0 = vpack.c.bf16 %v877_v58, %v877_v58  ;;  %v846_v1 = vmax.f32 %v660_v59, 0.0  ;;  %v878_v2 = vmax.f32 %v788_v60, 0.0 }
 0x173   :  { %1166 = vst.msk [vmem:[%s2187_s3 + $0x58] sm:$0xf] %vm1143_vm0, %v1379_v63  ;;  %1198 = vst.msk [vmem:[%s2187_s3 + $0xd8] sm:$0xf] %vm1143_vm0, %v1411_v0  ;;  %v1380_v3 = vpack.c.bf16 %v846_v1, %v846_v1  ;;  %v1412_v4 = vpack.c.bf16 %v878_v2, %v878_v2 }
 0x174   :  { %v664_v5 = vpop.f32.mrb[48].mxu0  ;;  %v792_v6 = vpop.f32.mrb[48].mxu1 }
 0x175   :  { %1167 = vst.msk [vmem:[%s2187_s3 + $0x5c] sm:$0xf] %vm1143_vm0, %v1380_v3  ;;  %1199 = vst.msk [vmem:[%s2187_s3 + $0xdc] sm:$0xf] %vm1143_vm0, %v1412_v4  ;;  %v665_v7 = vadd.f32 %v1862_v17, %v664_v5  ;;  %v793_v8 = vadd.f32 %v1862_v17, %v792_v6  ;;  %v666_v9 = vpop.f32.mrb[49].mxu0  ;;  %v794_v10 = vpop.f32.mrb[49].mxu1 }
 0x176   :  { %v667_v11 = vpop.f32.mrb[50].mxu0  ;;  %v795_v12 = vpop.f32.mrb[50].mxu1 }
 0x177   :  { %v847_v13 = vmax.f32 %v665_v7, 0.0  ;;  %v879_v14 = vmax.f32 %v793_v8, 0.0  ;;  %v668_v15 = vadd.f32 %v1862_v17, %v667_v11  ;;  %v796_v16 = vadd.f32 %v1862_v17, %v795_v12  ;;  %v669_v18 = vpop.f32.mrb[51].mxu0  ;;  %v797_v19 = vpop.f32.mrb[51].mxu1 }
 0x179   :  { %v1381_v20 = vpack.c.bf16 %v847_v13, %v847_v13  ;;  %v1413_v21 = vpack.c.bf16 %v879_v14, %v879_v14  ;;  %v848_v22 = vmax.f32 %v668_v15, 0.0  ;;  %v880_v23 = vmax.f32 %v796_v16, 0.0 }
 0x17b   :  { %1168 = vst.msk [vmem:[%s2187_s3 + $0x60] sm:$0xf] %vm1143_vm0, %v1381_v20  ;;  %1200 = vst.msk [vmem:[%s2187_s3 + $0xe0] sm:$0xf] %vm1143_vm0, %v1413_v21  ;;  %v1382_v24 = vpack.c.bf16 %v848_v22, %v848_v22  ;;  %v1414_v25 = vpack.c.bf16 %v880_v23, %v880_v23 }
 0x17c   :  { %v672_v26 = vpop.f32.mrb[52].mxu0  ;;  %v800_v27 = vpop.f32.mrb[52].mxu1 }
 0x17d   :  { %1169 = vst.msk [vmem:[%s2187_s3 + $0x64] sm:$0xf] %vm1143_vm0, %v1382_v24  ;;  %1201 = vst.msk [vmem:[%s2187_s3 + $0xe4] sm:$0xf] %vm1143_vm0, %v1414_v25  ;;  %v673_v28 = vadd.f32 %v1862_v17, %v672_v26  ;;  %v801_v29 = vadd.f32 %v1862_v17, %v800_v27  ;;  %v674_v30 = vpop.f32.mrb[53].mxu0  ;;  %v802_v31 = vpop.f32.mrb[53].mxu1 }
 0x17e   :  { %v675_v32 = vpop.f32.mrb[54].mxu0  ;;  %v803_v33 = vpop.f32.mrb[54].mxu1 }
 0x17f   :  { %v849_v34 = vmax.f32 %v673_v28, 0.0  ;;  %v881_v35 = vmax.f32 %v801_v29, 0.0  ;;  %v676_v36 = vadd.f32 %v1862_v17, %v675_v32  ;;  %v804_v37 = vadd.f32 %v1862_v17, %v803_v33  ;;  %v677_v38 = vpop.f32.mrb[55].mxu0  ;;  %v805_v39 = vpop.f32.mrb[55].mxu1 }
 0x181   :  { %v1383_v40 = vpack.c.bf16 %v849_v34, %v849_v34  ;;  %v1415_v41 = vpack.c.bf16 %v881_v35, %v881_v35  ;;  %v850_v42 = vmax.f32 %v676_v36, 0.0  ;;  %v882_v43 = vmax.f32 %v804_v37, 0.0 }
 0x183   :  { %1170 = vst.msk [vmem:[%s2187_s3 + $0x68] sm:$0xf] %vm1143_vm0, %v1383_v40  ;;  %1202 = vst.msk [vmem:[%s2187_s3 + $0xe8] sm:$0xf] %vm1143_vm0, %v1415_v41  ;;  %v1384_v44 = vpack.c.bf16 %v850_v42, %v850_v42  ;;  %v1416_v45 = vpack.c.bf16 %v882_v43, %v882_v43 }
 0x184   :  { %v680_v46 = vpop.f32.mrb[56].mxu0  ;;  %v808_v47 = vpop.f32.mrb[56].mxu1 }
 0x185   :  { %1171 = vst.msk [vmem:[%s2187_s3 + $0x6c] sm:$0xf] %vm1143_vm0, %v1384_v44  ;;  %1203 = vst.msk [vmem:[%s2187_s3 + $0xec] sm:$0xf] %vm1143_vm0, %v1416_v45  ;;  %v681_v48 = vadd.f32 %v1862_v17, %v680_v46  ;;  %v809_v49 = vadd.f32 %v1862_v17, %v808_v47  ;;  %v682_v50 = vpop.f32.mrb[57].mxu0  ;;  %v810_v51 = vpop.f32.mrb[57].mxu1 }
 0x186   :  { %v683_v52 = vpop.f32.mrb[58].mxu0  ;;  %v811_v53 = vpop.f32.mrb[58].mxu1 }
 0x187   :  { %v851_v54 = vmax.f32 %v681_v48, 0.0  ;;  %v883_v55 = vmax.f32 %v809_v49, 0.0  ;;  %v684_v56 = vadd.f32 %v1862_v17, %v683_v52  ;;  %v812_v57 = vadd.f32 %v1862_v17, %v811_v53  ;;  %v685_v58 = vpop.f32.mrb[59].mxu0  ;;  %v813_v59 = vpop.f32.mrb[59].mxu1 }
 0x189   :  { %v1385_v60 = vpack.c.bf16 %v851_v54, %v851_v54  ;;  %v1417_v61 = vpack.c.bf16 %v883_v55, %v883_v55  ;;  %v852_v62 = vmax.f32 %v684_v56, 0.0  ;;  %v884_v63 = vmax.f32 %v812_v57, 0.0 }
 0x18b   :  { %1172 = vst.msk [vmem:[%s2187_s3 + $0x70] sm:$0xf] %vm1143_vm0, %v1385_v60  ;;  %1204 = vst.msk [vmem:[%s2187_s3 + $0xf0] sm:$0xf] %vm1143_vm0, %v1417_v61  ;;  %v1386_v0 = vpack.c.bf16 %v852_v62, %v852_v62  ;;  %v1418_v1 = vpack.c.bf16 %v884_v63, %v884_v63 }
 0x18c   :  { %v688_v2 = vpop.f32.mrb[60].mxu0  ;;  %v816_v3 = vpop.f32.mrb[60].mxu1 }
 0x18d   :  { %1173 = vst.msk [vmem:[%s2187_s3 + $0x74] sm:$0xf] %vm1143_vm0, %v1386_v0  ;;  %1205 = vst.msk [vmem:[%s2187_s3 + $0xf4] sm:$0xf] %vm1143_vm0, %v1418_v1  ;;  %v689_v4 = vadd.f32 %v1862_v17, %v688_v2  ;;  %v817_v5 = vadd.f32 %v1862_v17, %v816_v3  ;;  %v690_v6 = vpop.f32.mrb[61].mxu0  ;;  %v818_v7 = vpop.f32.mrb[61].mxu1 }
 0x18e   :  { %v691_v8 = vpop.f32.mrb[62].mxu0  ;;  %v819_v9 = vpop.f32.mrb[62].mxu1 }
 0x18f   :  { %v853_v10 = vmax.f32 %v689_v4, 0.0  ;;  %v885_v11 = vmax.f32 %v817_v5, 0.0  ;;  %v692_v12 = vadd.f32 %v1862_v17, %v691_v8  ;;  %v820_v13 = vadd.f32 %v1862_v17, %v819_v9  ;;  %v693_v14 = vpop.f32.mrb[63].mxu0  ;;  %v821_v15 = vpop.f32.mrb[63].mxu1 }
 0x191   :  { %v1387_v16 = vpack.c.bf16 %v853_v10, %v853_v10  ;;  %v1419_v18 = vpack.c.bf16 %v885_v11, %v885_v11  ;;  %v854_v19 = vmax.f32 %v692_v12, 0.0  ;;  %v886_v20 = vmax.f32 %v820_v13, 0.0 }
 0x193   :  { %1174 = vst.msk [vmem:[%s2187_s3 + $0x78] sm:$0xf] %vm1143_vm0, %v1387_v16  ;;  %1206 = vst.msk [vmem:[%s2187_s3 + $0xf8] sm:$0xf] %vm1143_vm0, %v1419_v18  ;;  %v1388_v21 = vpack.c.bf16 %v854_v19, %v854_v19  ;;  %v1420_v22 = vpack.c.bf16 %v886_v20, %v886_v20 }
 0x195   :  { %1175 = vst.msk [vmem:[%s2187_s3 + $0x7c] sm:$0xf] %vm1143_vm0, %v1388_v21  ;;  %1207 = vst.msk [vmem:[%s2187_s3 + $0xfc] sm:$0xf] %vm1143_vm0, %v1420_v22 }

// kernel: resnet18_forward.22
= control target key start
LH: loop header
LB: loop body
LE: loop exit
PB: predicated region body
PF: predicated region fallthrough
CT: control target
= control target key end

     0   :  { %vm969_vm0 = vcmask 519168   ;;  %s1769_s1 = inlined_call_operand.vmem [shape: bf16[640,64], index: 1, kind: input, shape index: {}]   ;;  %s1770_s0 = inlined_call_operand.vmem [shape: bf16[128,640], index: 0, kind: input, shape index: {}]   ;;  %s1771_s2 = inlined_call_operand.vmem [shape: f32[1,64], index: 2, kind: input, shape index: {}]   ;;  %s1772_s3 = inlined_call_operand.vmem [shape: bf16[128,64], index: 3, kind: output, shape index: {}]  }
   0x1   :  { %v1295_v0 = vld [vmem:[%s1769_s1 + $0x40] sm:$0xff]   ;;  %v1299_v4 = vld [vmem:[%s1769_s1 + $0x48] sm:$0xff]   ;;  %v1303_v8 = vld [vmem:[%s1769_s1 + $0x50] sm:$0xff]  }
   0x2   :  { %v1296_v1 = vld [vmem:[%s1769_s1 + $0xc0] sm:$0xff]   ;;  %1103 = vmatprep.subr.bf16.mxu0 %v1295_v0  ;;  %v1300_v5 = vld [vmem:[%s1769_s1 + $0xc8] sm:$0xff]   ;;  %v1304_v9 = vld [vmem:[%s1769_s1 + $0xd0] sm:$0xff]  }
   0x3   :  { %v1297_v2 = vld [vmem:[%s1769_s1] sm:$0xff]   ;;  %1167 = vmatprep.subr.bf16.mxu1 %v1296_v1  ;;  %v1301_v6 = vld [vmem:[%s1769_s1 + $0x8] sm:$0xff]   ;;  %v1305_v10 = vld [vmem:[%s1769_s1 + $0x10] sm:$0xff]  }
   0x4   :  { %v1298_v3 = vld [vmem:[%s1769_s1 + $0x80] sm:$0xff]   ;;  %1104 = vmatpush3.bf16.msra.mxu0 %v1297_v2  ;;  %v1302_v7 = vld [vmem:[%s1769_s1 + $0x88] sm:$0xff]   ;;  %v1306_v11 = vld [vmem:[%s1769_s1 + $0x90] sm:$0xff]  }
   0x5   :  { %1168 = vmatpush3.bf16.msra.mxu1 %v1298_v3  ;;  %1105 = vmatprep.subr.bf16.mxu0 %v1299_v4  ;;  %v1307_v12 = vld [vmem:[%s1769_s1 + $0x58] sm:$0xff]   ;;  %v1311_v16 = vld [vmem:[%s1769_s1 + $0x60] sm:$0xff]   ;;  %v1315_v20 = vld [vmem:[%s1769_s1 + $0x68] sm:$0xff]  }
   0x6   :  { %1169 = vmatprep.subr.bf16.mxu1 %v1300_v5  ;;  %v1308_v13 = vld [vmem:[%s1769_s1 + $0xd8] sm:$0xff]   ;;  %v1312_v17 = vld [vmem:[%s1769_s1 + $0xe0] sm:$0xff]   ;;  %v1316_v21 = vld [vmem:[%s1769_s1 + $0xe8] sm:$0xff]  }
   0x7   :  { %v1309_v14 = vld [vmem:[%s1769_s1 + $0x18] sm:$0xff]   ;;  %v1313_v18 = vld [vmem:[%s1769_s1 + $0x20] sm:$0xff]   ;;  %v1317_v22 = vld [vmem:[%s1769_s1 + $0x28] sm:$0xff]  }
   0x8   :  { %1106 = vmatpush3.bf16.msra.mxu0 %v1301_v6  ;;  %v1310_v15 = vld [vmem:[%s1769_s1 + $0x98] sm:$0xff]   ;;  %v1314_v19 = vld [vmem:[%s1769_s1 + $0xa0] sm:$0xff]   ;;  %v1318_v23 = vld [vmem:[%s1769_s1 + $0xa8] sm:$0xff]  }
   0x9   :  { %1170 = vmatpush3.bf16.msra.mxu1 %v1302_v7  ;;  %1107 = vmatprep.subr.bf16.mxu0 %v1303_v8  ;;  %v1319_v24 = vld [vmem:[%s1769_s1 + $0x70] sm:$0xff]   ;;  %v1323_v28 = vld [vmem:[%s1769_s1 + $0x78] sm:$0xff]   ;;  %v1332_v35 = vld [vmem:[%s1770_s0 + $0xc] ss:$20 sps:$4 sm:$0xff]  }
   0xa   :  { %1171 = vmatprep.subr.bf16.mxu1 %v1304_v9  ;;  %v1320_v25 = vld [vmem:[%s1769_s1 + $0xf0] sm:$0xff]   ;;  %v1324_v29 = vld [vmem:[%s1769_s1 + $0xf8] sm:$0xff]   ;;  %v1333_v36 = vld [vmem:[%s1769_s1 + $0x100] sm:$0xff]   ;;  %727 = vmatprep.mubr.bf16.mxu1 %v1332_v35 }
   0xb   :  { %v1321_v26 = vld [vmem:[%s1769_s1 + $0x30] sm:$0xff]   ;;  %v1325_v30 = vld [vmem:[%s1769_s1 + $0x38] sm:$0xff]   ;;  %v1334_v37 = vld [vmem:[%s1770_s0 + $0x2c] ss:$20 sps:$4 sm:$0xff]  }
   0xc   :  { %1108 = vmatpush3.bf16.msra.mxu0 %v1305_v10  ;;  %v1322_v27 = vld [vmem:[%s1769_s1 + $0xb0] sm:$0xff]   ;;  %v1326_v31 = vld [vmem:[%s1769_s1 + $0xb8] sm:$0xff]   ;;  %v1340_v39 = vld [vmem:[%s1769_s1 + $0x108] sm:$0xff]  }
   0xd   :  { %1172 = vmatpush3.bf16.msra.mxu1 %v1306_v11  ;;  %1109 = vmatprep.subr.bf16.mxu0 %v1307_v12  ;;  %v1327_v32 = vld [vmem:[%s1770_s0] ss:$20 sps:$4 sm:$0xff]   ;;  %v1329_v33 = vld [vmem:[%s1770_s0 + $0x4] ss:$20 sps:$4 sm:$0xff]   ;;  %v1330_v34 = vld [vmem:[%s1770_s0 + $0x8] ss:$20 sps:$4 sm:$0xff]  }
   0xe   :  { %1173 = vmatprep.subr.bf16.mxu1 %v1308_v13  ;;  %630 = vmatprep.mubr.bf16.mxu0 %v1329_v33  ;;  %v1336_v38 = vld [vmem:[%s1770_s0 + $0x34] ss:$20 sps:$4 sm:$0xff]   ;;  %v1339_v41 = vld [vmem:[%s1770_s0 + $0x30] ss:$20 sps:$4 sm:$0xff]   ;;  %v1354_v45 = vld [vmem:[%s1769_s1 + $0x118] sm:$0xff]  }
   0xf   :  { %v1338_v40 = vld [vmem:[%s1770_s0 + $0x28] ss:$20 sps:$4 sm:$0xff]   ;;  %v1347_v44 = vld [vmem:[%s1769_s1 + $0x110] sm:$0xff]   ;;  %v1346_v47 = vld [vmem:[%s1770_s0 + $0x58] ss:$20 sps:$4 sm:$0xff]  }
  0x10   :  { %1110 = vmatpush3.bf16.msra.mxu0 %v1309_v14  ;;  %v1341_v42 = vld [vmem:[%s1770_s0 + $0x54] ss:$20 sps:$4 sm:$0xff]   ;;  %v1343_v43 = vld [vmem:[%s1770_s0 + $0x5c] ss:$20 sps:$4 sm:$0xff]   ;;  %v1350_v49 = vld [vmem:[%s1770_s0 + $0x84] ss:$20 sps:$4 sm:$0xff]  }
  0x11   :  { %1174 = vmatpush3.bf16.msra.mxu1 %v1310_v15  ;;  %1111 = vmatprep.subr.bf16.mxu0 %v1311_v16  ;;  %v1345_v46 = vld [vmem:[%s1770_s0 + $0x50] ss:$20 sps:$4 sm:$0xff]   ;;  %v1368_v51 = vld [vmem:[%s1769_s1 + $0x128] sm:$0xff]   ;;  %v1353_v53 = vld [vmem:[%s1770_s0 + $0x80] ss:$20 sps:$4 sm:$0xff]  }
  0x12   :  { %1175 = vmatprep.subr.bf16.mxu1 %v1312_v17  ;;  %v1348_v48 = vld [vmem:[%s1770_s0 + $0x7c] ss:$20 sps:$4 sm:$0xff]   ;;  %v1361_v50 = vld [vmem:[%s1769_s1 + $0x120] sm:$0xff]   ;;  %v1352_v52 = vld [vmem:[%s1770_s0 + $0x78] ss:$20 sps:$4 sm:$0xff]  }
  0x13   :  { %v1355_v54 = vld [vmem:[%s1770_s0 + $0xa4] ss:$20 sps:$4 sm:$0xff]   ;;  %v1375_v55 = vld [vmem:[%s1769_s1 + $0x130] sm:$0xff]   ;;  %v1357_v56 = vld [vmem:[%s1770_s0 + $0xac] ss:$20 sps:$4 sm:$0xff]  }
  0x14   :  { %1112 = vmatpush3.bf16.msra.mxu0 %v1313_v18  ;;  %v1382_v57 = vld [vmem:[%s1769_s1 + $0x138] sm:$0xff]   ;;  %v1359_v58 = vld [vmem:[%s1770_s0 + $0xa0] ss:$20 sps:$4 sm:$0xff]   ;;  %v1367_v63 = vld [vmem:[%s1770_s0 + $0xd0] ss:$20 sps:$4 sm:$0xff]  }
  0x15   :  { %1176 = vmatpush3.bf16.msra.mxu1 %v1314_v19  ;;  %1113 = vmatprep.subr.bf16.mxu0 %v1315_v20  ;;  %v1360_v59 = vld [vmem:[%s1770_s0 + $0xa8] ss:$20 sps:$4 sm:$0xff]   ;;  %v1362_v60 = vld [vmem:[%s1770_s0 + $0xcc] ss:$20 sps:$4 sm:$0xff]   ;;  %v1373_v2 = vld [vmem:[%s1770_s0 + $0xf0] ss:$20 sps:$4 sm:$0xff]  }
  0x16   :  { %1177 = vmatprep.subr.bf16.mxu1 %v1316_v21  ;;  %v1364_v61 = vld [vmem:[%s1770_s0 + $0xd4] ss:$20 sps:$4 sm:$0xff]   ;;  %v1371_v1 = vld [vmem:[%s1770_s0 + $0xfc] ss:$20 sps:$4 sm:$0xff]   ;;  %v1374_v3 = vld [vmem:[%s1770_s0 + $0xf8] ss:$20 sps:$4 sm:$0xff]  }
  0x17   :  { %v1366_v62 = vld [vmem:[%s1770_s0 + $0xc8] ss:$20 sps:$4 sm:$0xff]   ;;  %v1378_v5 = vld [vmem:[%s1770_s0 + $0x124] ss:$20 sps:$4 sm:$0xff]   ;;  %v1381_v7 = vld [vmem:[%s1770_s0 + $0x120] ss:$20 sps:$4 sm:$0xff]  }
  0x18   :  { %1114 = vmatpush3.bf16.msra.mxu0 %v1317_v22  ;;  %v1369_v0 = vld [vmem:[%s1770_s0 + $0xf4] ss:$20 sps:$4 sm:$0xff]   ;;  %v1376_v4 = vld [vmem:[%s1770_s0 + $0x11c] ss:$20 sps:$4 sm:$0xff]   ;;  %v1380_v6 = vld [vmem:[%s1770_s0 + $0x118] ss:$20 sps:$4 sm:$0xff]  }
  0x19   :  { %1178 = vmatpush3.bf16.msra.mxu1 %v1318_v23  ;;  %1115 = vmatprep.subr.bf16.mxu0 %v1319_v24  ;;  %v1383_v8 = vld [vmem:[%s1770_s0 + $0x10] ss:$20 sps:$4 sm:$0xff]   ;;  %v1385_v10 = vld [vmem:[%s1770_s0 + $0x38] ss:$20 sps:$4 sm:$0xff]   ;;  %v1387_v12 = vld [vmem:[%s1770_s0 + $0x60] ss:$20 sps:$4 sm:$0xff]  }
  0x1a   :  { %1179 = vmatprep.subr.bf16.mxu1 %v1320_v25  ;;  %v1384_v9 = vld [vmem:[%s1770_s0 + $0xb0] ss:$20 sps:$4 sm:$0xff]   ;;  %v1386_v11 = vld [vmem:[%s1770_s0 + $0xd8] ss:$20 sps:$4 sm:$0xff]   ;;  %v1388_v13 = vld [vmem:[%s1770_s0 + $0x100] ss:$20 sps:$4 sm:$0xff]  }
  0x1b   :  { %v1389_v14 = vld [vmem:[%s1770_s0 + $0x88] ss:$20 sps:$4 sm:$0xff]   ;;  %v1654_v18 = vld [vmem:[%s1771_s2] ss:$0 sm:$0xff] }
  0x1c   :  { %1116 = vmatpush3.bf16.msra.mxu0 %v1321_v26  ;;  %v1390_v15 = vld [vmem:[%s1770_s0 + $0x128] ss:$20 sps:$4 sm:$0xff]  }
  0x1d   :  { %1180 = vmatpush3.bf16.msra.mxu1 %v1322_v27  ;;  %1117 = vmatprep.subr.bf16.mxu0 %v1323_v28 }
  0x1e   :  { %1181 = vmatprep.subr.bf16.mxu1 %v1324_v29 }
  0x20   :  { %1118 = vmatpush3.bf16.msra.mxu0 %v1325_v30 }
  0x21   :  { %1182 = vmatpush3.bf16.msra.mxu1 %v1326_v31  ;;  %1247 = vmatprep.subr.bf16.mxu0 %v1333_v36 }
  0x22   :  { %1279 = vmatprep.subr.bf16.mxu1 %v1333_v36 }
  0x23   :  { %631 = vmatmul.mubr.bf16.vlgmr.msra.gmra.mrb[0].mxu0 %v1327_v32 }
  0x24   :  { %728 = vmatmul.mubr.bf16.vlgmr.msra.gmra.mrb[0].mxu1 %v1330_v34  ;;  %1248 = vmatpush3.bf16.msra.mxu0 %v1333_v36 }
  0x25   :  { %1287 = vmatpush3.bf16.msra.mxu1 %v1333_v36  ;;  %638 = vmatprep.mubr.bf16.mxu0 %v1334_v37 }
  0x26   :  { %735 = vmatprep.mubr.bf16.mxu1 %v1336_v38  ;;  %1249 = vmatprep.subr.bf16.mxu0 %v1340_v39 }
  0x27   :  { %1280 = vmatprep.subr.bf16.mxu1 %v1340_v39 }
  0x28   :  { %1250 = vmatpush3.bf16.msra.mxu0 %v1340_v39 }
  0x29   :  { %1288 = vmatpush3.bf16.msra.mxu1 %v1340_v39  ;;  %1251 = vmatprep.subr.bf16.mxu0 %v1347_v44 }
  0x2a   :  { %1281 = vmatprep.subr.bf16.mxu1 %v1347_v44 }
  0x2b   :  { %639 = vmatmul.mubr.bf16.gmra.mrb[4].mxu0 %v1338_v40 }
  0x2c   :  { %736 = vmatmul.mubr.bf16.gmra.mrb[4].mxu1 %v1339_v41  ;;  %646 = vmatprep.mubr.bf16.mxu0 %v1341_v42 }
  0x2d   :  { %743 = vmatprep.mubr.bf16.mxu1 %v1343_v43  ;;  %1252 = vmatpush3.bf16.msra.mxu0 %v1347_v44 }
  0x2e   :  { %1289 = vmatpush3.bf16.msra.mxu1 %v1347_v44  ;;  %1253 = vmatprep.subr.bf16.mxu0 %v1354_v45 }
  0x2f   :  { %1282 = vmatprep.subr.bf16.mxu1 %v1354_v45 }
  0x31   :  { %1254 = vmatpush3.bf16.msra.mxu0 %v1354_v45 }
  0x32   :  { %1290 = vmatpush3.bf16.msra.mxu1 %v1354_v45  ;;  %1255 = vmatprep.subr.bf16.mxu0 %v1361_v50 }
  0x33   :  { %647 = vmatmul.mubr.bf16.gmra.mrb[8].mxu0 %v1345_v46  ;;  %1283 = vmatprep.subr.bf16.mxu1 %v1361_v50 }
  0x34   :  { %744 = vmatmul.mubr.bf16.gmra.mrb[8].mxu1 %v1346_v47  ;;  %654 = vmatprep.mubr.bf16.mxu0 %v1348_v48 }
  0x35   :  { %751 = vmatprep.mubr.bf16.mxu1 %v1350_v49  ;;  %1256 = vmatpush3.bf16.msra.mxu0 %v1361_v50 }
  0x36   :  { %1291 = vmatpush3.bf16.msra.mxu1 %v1361_v50  ;;  %1257 = vmatprep.subr.bf16.mxu0 %v1368_v51 }
  0x37   :  { %1284 = vmatprep.subr.bf16.mxu1 %v1368_v51 }
  0x39   :  { %1258 = vmatpush3.bf16.msra.mxu0 %v1368_v51 }
  0x3a   :  { %1292 = vmatpush3.bf16.msra.mxu1 %v1368_v51  ;;  %1259 = vmatprep.subr.bf16.mxu0 %v1375_v55 }
  0x3b   :  { %655 = vmatmul.mubr.bf16.gmra.mrb[12].mxu0 %v1352_v52  ;;  %1285 = vmatprep.subr.bf16.mxu1 %v1375_v55 }
  0x3c   :  { %752 = vmatmul.mubr.bf16.gmra.mrb[12].mxu1 %v1353_v53  ;;  %662 = vmatprep.mubr.bf16.mxu0 %v1355_v54 }
  0x3d   :  { %759 = vmatprep.mubr.bf16.mxu1 %v1357_v56  ;;  %1260 = vmatpush3.bf16.msra.mxu0 %v1375_v55 }
  0x3e   :  { %1293 = vmatpush3.bf16.msra.mxu1 %v1375_v55  ;;  %1261 = vmatprep.subr.bf16.mxu0 %v1382_v57 }
  0x3f   :  { %1286 = vmatprep.subr.bf16.mxu1 %v1382_v57 }
  0x41   :  { %1262 = vmatpush3.bf16.msra.mxu0 %v1382_v57 }
  0x42   :  { %1294 = vmatpush3.bf16.msra.mxu1 %v1382_v57 }
  0x43   :  { %663 = vmatmul.mubr.bf16.gmra.mrb[16].mxu0 %v1359_v58 }
  0x44   :  { %760 = vmatmul.mubr.bf16.gmra.mrb[16].mxu1 %v1360_v59  ;;  %670 = vmatprep.mubr.bf16.mxu0 %v1362_v60 }
  0x45   :  { %767 = vmatprep.mubr.bf16.mxu1 %v1364_v61 }
  0x4b   :  { %671 = vmatmul.mubr.bf16.gmra.mrb[20].mxu0 %v1366_v62 }
  0x4c   :  { %768 = vmatmul.mubr.bf16.gmra.mrb[20].mxu1 %v1367_v63  ;;  %678 = vmatprep.mubr.bf16.mxu0 %v1369_v0 }
  0x4d   :  { %775 = vmatprep.mubr.bf16.mxu1 %v1371_v1 }
  0x53   :  { %679 = vmatmul.mubr.bf16.gmra.mrb[24].mxu0 %v1373_v2 }
  0x54   :  { %776 = vmatmul.mubr.bf16.gmra.mrb[24].mxu1 %v1374_v3  ;;  %686 = vmatprep.mubr.bf16.mxu0 %v1376_v4 }
  0x55   :  { %783 = vmatprep.mubr.bf16.mxu1 %v1378_v5 }
  0x5b   :  { %687 = vmatmul.mubr.bf16.gmra.mrb[28].mxu0 %v1380_v6 }
  0x5c   :  { %784 = vmatmul.mubr.bf16.gmra.mrb[28].mxu1 %v1381_v7  ;;  %1263 = vmatprep.mubr.bf16.mxu0 %v1383_v8 }
  0x5d   :  { %1271 = vmatprep.mubr.bf16.mxu1 %v1384_v9 }
  0x63   :  { %1264 = vmatmul.mubr.bf16.vlgmr.msra.gmra.mrb[32].mxu0 %v1385_v10 }
  0x64   :  { %1272 = vmatmul.mubr.bf16.vlgmr.msra.gmra.mrb[32].mxu1 %v1386_v11  ;;  %1267 = vmatprep.mubr.bf16.mxu0 %v1387_v12 }
  0x65   :  { %1275 = vmatprep.mubr.bf16.mxu1 %v1388_v13 }
  0x6b   :  { %1268 = vmatmul.mubr.bf16.gmra.mrb[36].mxu0 %v1389_v14 }
  0x6c   :  { %1276 = vmatmul.mubr.bf16.gmra.mrb[36].mxu1 %v1390_v15 }
  0xf6   :  { %v1119_v16 = vpop.f32.mrb[0].mxu0 }
  0xf7   :  { %v1183_v17 = vpop.f32.mrb[0].mxu1  ;;  %v1120_v19 = vpop.f32.mrb[1].mxu0 }
  0xf8   :  { %v1121_v20 = vadd.f32 %v1120_v19, %v1119_v16  ;;  %v1184_v21 = vpop.f32.mrb[1].mxu1  ;;  %v1122_v22 = vpop.f32.mrb[2].mxu0 }
  0xf9   :  { %v1185_v23 = vadd.f32 %v1184_v21, %v1183_v17  ;;  %v1186_v24 = vpop.f32.mrb[2].mxu1  ;;  %v1123_v25 = vpop.f32.mrb[3].mxu0 }
  0xfa   :  { %v633_v26 = vadd.f32 %v1121_v20, %v1654_v18  ;;  %v1124_v27 = vadd.f32 %v1123_v25, %v1122_v22  ;;  %v1187_v28 = vpop.f32.mrb[3].mxu1 }
  0xfb   :  { %v1188_v29 = vadd.f32 %v1187_v28, %v1186_v24 }
  0xfc   :  { %v636_v30 = vadd.f32 %v1124_v27, %v1654_v18  ;;  %v1658_v31 = vadd.f32 %v1185_v23, %v633_v26 }
  0xfe   :  { %v1125_v32 = vpop.f32.mrb[4].mxu0  ;;  %v1660_v33 = vadd.f32 %v1188_v29, %v636_v30 }
  0xff   :  { %v1189_v34 = vpop.f32.mrb[4].mxu1  ;;  %v1126_v35 = vpop.f32.mrb[5].mxu0 }
 0x100   :  { %v1127_v36 = vadd.f32 %v1126_v35, %v1125_v32  ;;  %v1190_v37 = vpop.f32.mrb[5].mxu1  ;;  %v1128_v38 = vpop.f32.mrb[6].mxu0 }
 0x101   :  { %v1191_v39 = vadd.f32 %v1190_v37, %v1189_v34  ;;  %v1192_v40 = vpop.f32.mrb[6].mxu1  ;;  %v1129_v41 = vpop.f32.mrb[7].mxu0 }
 0x102   :  { %v641_v42 = vadd.f32 %v1127_v36, %v1654_v18  ;;  %v1130_v43 = vadd.f32 %v1129_v41, %v1128_v38  ;;  %v1193_v44 = vpop.f32.mrb[7].mxu1 }
 0x103   :  { %v1194_v45 = vadd.f32 %v1193_v44, %v1192_v40 }
 0x104   :  { %v644_v46 = vadd.f32 %v1130_v43, %v1654_v18  ;;  %v1664_v47 = vadd.f32 %v1191_v39, %v641_v42 }
 0x106   :  { %v1131_v48 = vpop.f32.mrb[8].mxu0  ;;  %v1666_v49 = vadd.f32 %v1194_v45, %v644_v46 }
 0x107   :  { %v1195_v50 = vpop.f32.mrb[8].mxu1  ;;  %v1132_v51 = vpop.f32.mrb[9].mxu0 }
 0x108   :  { %v1133_v52 = vadd.f32 %v1132_v51, %v1131_v48  ;;  %v1196_v53 = vpop.f32.mrb[9].mxu1  ;;  %v1134_v54 = vpop.f32.mrb[10].mxu0 }
 0x109   :  { %v1197_v55 = vadd.f32 %v1196_v53, %v1195_v50  ;;  %v1198_v56 = vpop.f32.mrb[10].mxu1  ;;  %v1135_v57 = vpop.f32.mrb[11].mxu0 }
 0x10a   :  { %v649_v58 = vadd.f32 %v1133_v52, %v1654_v18  ;;  %v1136_v59 = vadd.f32 %v1135_v57, %v1134_v54  ;;  %v1199_v60 = vpop.f32.mrb[11].mxu1 }
 0x10b   :  { %v1200_v61 = vadd.f32 %v1199_v60, %v1198_v56 }
 0x10c   :  { %v652_v62 = vadd.f32 %v1136_v59, %v1654_v18  ;;  %v1670_v63 = vadd.f32 %v1197_v55, %v649_v58 }
 0x10e   :  { %v1137_v0 = vpop.f32.mrb[12].mxu0  ;;  %v1672_v1 = vadd.f32 %v1200_v61, %v652_v62 }
 0x10f   :  { %v1201_v2 = vpop.f32.mrb[12].mxu1  ;;  %v1138_v3 = vpop.f32.mrb[13].mxu0 }
 0x110   :  { %v1139_v4 = vadd.f32 %v1138_v3, %v1137_v0  ;;  %v1202_v5 = vpop.f32.mrb[13].mxu1  ;;  %v1140_v6 = vpop.f32.mrb[14].mxu0 }
 0x111   :  { %v1203_v7 = vadd.f32 %v1202_v5, %v1201_v2  ;;  %v1204_v8 = vpop.f32.mrb[14].mxu1  ;;  %v1141_v9 = vpop.f32.mrb[15].mxu0 }
 0x112   :  { %v657_v10 = vadd.f32 %v1139_v4, %v1654_v18  ;;  %v1142_v11 = vadd.f32 %v1141_v9, %v1140_v6  ;;  %v1205_v12 = vpop.f32.mrb[15].mxu1 }
 0x113   :  { %v1206_v13 = vadd.f32 %v1205_v12, %v1204_v8 }
 0x114   :  { %v660_v14 = vadd.f32 %v1142_v11, %v1654_v18  ;;  %v1676_v15 = vadd.f32 %v1203_v7, %v657_v10 }
 0x116   :  { %v1143_v16 = vpop.f32.mrb[16].mxu0  ;;  %v1678_v17 = vadd.f32 %v1206_v13, %v660_v14 }
 0x117   :  { %v1207_v19 = vpop.f32.mrb[16].mxu1  ;;  %v1144_v20 = vpop.f32.mrb[17].mxu0 }
 0x118   :  { %v1145_v21 = vadd.f32 %v1144_v20, %v1143_v16  ;;  %v1208_v22 = vpop.f32.mrb[17].mxu1  ;;  %v1146_v23 = vpop.f32.mrb[18].mxu0 }
 0x119   :  { %v1209_v24 = vadd.f32 %v1208_v22, %v1207_v19  ;;  %v1210_v25 = vpop.f32.mrb[18].mxu1  ;;  %v1147_v26 = vpop.f32.mrb[19].mxu0 }
 0x11a   :  { %v665_v27 = vadd.f32 %v1145_v21, %v1654_v18  ;;  %v1148_v28 = vadd.f32 %v1147_v26, %v1146_v23  ;;  %v1211_v29 = vpop.f32.mrb[19].mxu1 }
 0x11b   :  { %v1212_v30 = vadd.f32 %v1211_v29, %v1210_v25 }
 0x11c   :  { %v668_v32 = vadd.f32 %v1148_v28, %v1654_v18  ;;  %v762_v34 = vadd.f32 %v1209_v24, %v665_v27 }
 0x11e   :  { %v1149_v35 = vpop.f32.mrb[20].mxu0  ;;  %v1682_v36 = vadd.f32 %v1212_v30, %v668_v32 }
 0x11f   :  { %v1213_v37 = vpop.f32.mrb[20].mxu1  ;;  %v1150_v38 = vpop.f32.mrb[21].mxu0 }
 0x120   :  { %v1151_v39 = vadd.f32 %v1150_v38, %v1149_v35  ;;  %v1214_v40 = vpop.f32.mrb[21].mxu1  ;;  %v1152_v41 = vpop.f32.mrb[22].mxu0 }
 0x121   :  { %v1215_v42 = vadd.f32 %v1214_v40, %v1213_v37  ;;  %v1216_v43 = vpop.f32.mrb[22].mxu1  ;;  %v1153_v44 = vpop.f32.mrb[23].mxu0 }
 0x122   :  { %v673_v45 = vadd.f32 %v1151_v39, %v1654_v18  ;;  %v1154_v46 = vadd.f32 %v1153_v44, %v1152_v41  ;;  %v1217_v48 = vpop.f32.mrb[23].mxu1 }
 0x123   :  { %v1218_v50 = vadd.f32 %v1217_v48, %v1216_v43 }
 0x124   :  { %v676_v51 = vadd.f32 %v1154_v46, %v1654_v18  ;;  %v770_v52 = vadd.f32 %v1215_v42, %v673_v45 }
 0x126   :  { %v1155_v53 = vpop.f32.mrb[24].mxu0  ;;  %v773_v54 = vadd.f32 %v1218_v50, %v676_v51 }
 0x127   :  { %v1219_v55 = vpop.f32.mrb[24].mxu1  ;;  %v1156_v56 = vpop.f32.mrb[25].mxu0 }
 0x128   :  { %v1157_v57 = vadd.f32 %v1156_v56, %v1155_v53  ;;  %v1220_v58 = vpop.f32.mrb[25].mxu1  ;;  %v1158_v59 = vpop.f32.mrb[26].mxu0 }
 0x129   :  { %v1221_v60 = vadd.f32 %v1220_v58, %v1219_v55  ;;  %v1222_v61 = vpop.f32.mrb[26].mxu1  ;;  %v1159_v62 = vpop.f32.mrb[27].mxu0 }
 0x12a   :  { %v681_v0 = vadd.f32 %v1157_v57, %v1654_v18  ;;  %v1160_v2 = vadd.f32 %v1159_v62, %v1158_v59  ;;  %v1223_v3 = vpop.f32.mrb[27].mxu1 }
 0x12b   :  { %v1224_v4 = vadd.f32 %v1223_v3, %v1222_v61 }
 0x12c   :  { %v684_v5 = vadd.f32 %v1160_v2, %v1654_v18  ;;  %v1688_v6 = vadd.f32 %v1221_v60, %v681_v0 }
 0x12e   :  { %v1161_v7 = vpop.f32.mrb[28].mxu0  ;;  %v1690_v8 = vadd.f32 %v1224_v4, %v684_v5 }
 0x12f   :  { %v1225_v9 = vpop.f32.mrb[28].mxu1  ;;  %v1162_v10 = vpop.f32.mrb[29].mxu0 }
 0x130   :  { %v1163_v11 = vadd.f32 %v1162_v10, %v1161_v7  ;;  %v1226_v12 = vpop.f32.mrb[29].mxu1  ;;  %v1164_v13 = vpop.f32.mrb[30].mxu0 }
 0x131   :  { %v1227_v14 = vadd.f32 %v1226_v12, %v1225_v9  ;;  %v1228_v16 = vpop.f32.mrb[30].mxu1  ;;  %v1165_v19 = vpop.f32.mrb[31].mxu0 }
 0x132   :  { %v689_v20 = vadd.f32 %v1163_v11, %v1654_v18  ;;  %v1166_v21 = vadd.f32 %v1165_v19, %v1164_v13  ;;  %v1229_v22 = vpop.f32.mrb[31].mxu1 }
 0x133   :  { %v1230_v23 = vadd.f32 %v1229_v22, %v1228_v16 }
 0x134   :  { %v692_v24 = vadd.f32 %v1166_v21, %v1654_v18  ;;  %v786_v25 = vadd.f32 %v1227_v14, %v689_v20 }
 0x136   :  { %v1265_v26 = vpop.f32.mrb[32].mxu0  ;;  %v789_v27 = vadd.f32 %v1230_v23, %v692_v24 }
 0x137   :  { %v835_v28 = vadd.f32 %v1265_v26, %v1664_v47  ;;  %v1273_v29 = vpop.f32.mrb[32].mxu1  ;;  %v826_v30 = vpop.f32.mrb[33].mxu0 }
 0x138   :  { %v867_v32 = vadd.f32 %v1273_v29, %v770_v52  ;;  %v827_v35 = vadd.f32 %v826_v30, %v1658_v31  ;;  %v858_v37 = vpop.f32.mrb[33].mxu1  ;;  %v1266_v38 = vpop.f32.mrb[34].mxu0 }
 0x139   :  { %v891_v39 = vmax.f32 %v835_v28, 0.0  ;;  %v859_v40 = vadd.f32 %v858_v37, %v762_v34  ;;  %v838_v41 = vadd.f32 %v1266_v38, %v1666_v49  ;;  %v1274_v42 = vpop.f32.mrb[34].mxu1  ;;  %v829_v43 = vpop.f32.mrb[35].mxu0 }
 0x13a   :  { %v899_v18 = vmax.f32 %v867_v32, 0.0  ;;  %v889_v44 = vmax.f32 %v827_v35, 0.0  ;;  %v870_v45 = vadd.f32 %v1274_v42, %v773_v54  ;;  %v830_v46 = vadd.f32 %v829_v43, %v1660_v33  ;;  %v861_v47 = vpop.f32.mrb[35].mxu1 }
 0x13b   :  { %v1089_v48 = vpack.c.bf16 %v891_v39, %v891_v39  ;;  %v897_v50 = vmax.f32 %v859_v40, 0.0  ;;  %v892_v51 = vmax.f32 %v838_v41, 0.0  ;;  %v862_v31 = vadd.f32 %v861_v47, %v1682_v36 }
 0x13c   :  { %v1097_v52 = vpack.c.bf16 %v899_v18, %v899_v18  ;;  %v1087_v53 = vpack.c.bf16 %v889_v44, %v889_v44  ;;  %v900_v55 = vmax.f32 %v870_v45, 0.0  ;;  %v890_v56 = vmax.f32 %v830_v46, 0.0 }
 0x13d   :  { %972 = vst.msk [vmem:[%s1772_s3 + $0x8] sm:$0xf] %vm969_vm0, %v1089_v48  ;;  %v1095_v49 = vpack.c.bf16 %v897_v50, %v897_v50  ;;  %v1090_v34 = vpack.c.bf16 %v892_v51, %v892_v51  ;;  %v898_v54 = vmax.f32 %v862_v31, 0.0 }
 0x13e   :  { %980 = vst.msk [vmem:[%s1772_s3 + $0x28] sm:$0xf] %vm969_vm0, %v1097_v52  ;;  %970 = vst.msk [vmem:[%s1772_s3] sm:$0xf] %vm969_vm0, %v1087_v53  ;;  %v1098_v33 = vpack.c.bf16 %v900_v55, %v900_v55  ;;  %v1088_v36 = vpack.c.bf16 %v890_v56, %v890_v56  ;;  %v1269_v57 = vpop.f32.mrb[36].mxu0 }
 0x13f   :  { %978 = vst.msk [vmem:[%s1772_s3 + $0x20] sm:$0xf] %vm969_vm0, %v1095_v49  ;;  %973 = vst.msk [vmem:[%s1772_s3 + $0xc] sm:$0xf] %vm969_vm0, %v1090_v34  ;;  %v1096_v58 = vpack.c.bf16 %v898_v54, %v898_v54  ;;  %v851_v59 = vadd.f32 %v1269_v57, %v1676_v15  ;;  %v1277_v60 = vpop.f32.mrb[36].mxu1  ;;  %v842_v61 = vpop.f32.mrb[37].mxu0 }
 0x140   :  { %981 = vst.msk [vmem:[%s1772_s3 + $0x2c] sm:$0xf] %vm969_vm0, %v1098_v33  ;;  %971 = vst.msk [vmem:[%s1772_s3 + $0x4] sm:$0xf] %vm969_vm0, %v1088_v36  ;;  %v883_v62 = vadd.f32 %v1277_v60, %v786_v25  ;;  %v843_v0 = vadd.f32 %v842_v61, %v1670_v63  ;;  %v874_v2 = vpop.f32.mrb[37].mxu1  ;;  %v1270_v3 = vpop.f32.mrb[38].mxu0 }
 0x141   :  { %979 = vst.msk [vmem:[%s1772_s3 + $0x24] sm:$0xf] %vm969_vm0, %v1096_v58  ;;  %v895_v15 = vmax.f32 %v851_v59, 0.0  ;;  %v875_v4 = vadd.f32 %v874_v2, %v1688_v6  ;;  %v854_v5 = vadd.f32 %v1270_v3, %v1678_v17  ;;  %v1278_v7 = vpop.f32.mrb[38].mxu1  ;;  %v845_v9 = vpop.f32.mrb[39].mxu0 }
 0x142   :  { %v903_v10 = vmax.f32 %v883_v62, 0.0  ;;  %v893_v11 = vmax.f32 %v843_v0, 0.0  ;;  %v886_v12 = vadd.f32 %v1278_v7, %v789_v27  ;;  %v846_v13 = vadd.f32 %v845_v9, %v1672_v1  ;;  %v877_v63 = vpop.f32.mrb[39].mxu1 }
 0x143   :  { %v1093_v14 = vpack.c.bf16 %v895_v15, %v895_v15  ;;  %v901_v16 = vmax.f32 %v875_v4, 0.0  ;;  %v896_v19 = vmax.f32 %v854_v5, 0.0  ;;  %v878_v20 = vadd.f32 %v877_v63, %v1690_v8 }
 0x144   :  { %v1101_v21 = vpack.c.bf16 %v903_v10, %v903_v10  ;;  %v1091_v22 = vpack.c.bf16 %v893_v11, %v893_v11  ;;  %v904_v23 = vmax.f32 %v886_v12, 0.0  ;;  %v894_v24 = vmax.f32 %v846_v13, 0.0 }
 0x145   :  { %976 = vst.msk [vmem:[%s1772_s3 + $0x18] sm:$0xf] %vm969_vm0, %v1093_v14  ;;  %v1099_v17 = vpack.c.bf16 %v901_v16, %v901_v16  ;;  %v1094_v6 = vpack.c.bf16 %v896_v19, %v896_v19  ;;  %v902_v25 = vmax.f32 %v878_v20, 0.0 }
 0x146   :  { %984 = vst.msk [vmem:[%s1772_s3 + $0x38] sm:$0xf] %vm969_vm0, %v1101_v21  ;;  %974 = vst.msk [vmem:[%s1772_s3 + $0x10] sm:$0xf] %vm969_vm0, %v1091_v22  ;;  %v1102_v1 = vpack.c.bf16 %v904_v23, %v904_v23  ;;  %v1092_v8 = vpack.c.bf16 %v894_v24, %v894_v24 }
 0x147   :  { %982 = vst.msk [vmem:[%s1772_s3 + $0x30] sm:$0xf] %vm969_vm0, %v1099_v17  ;;  %977 = vst.msk [vmem:[%s1772_s3 + $0x1c] sm:$0xf] %vm969_vm0, %v1094_v6  ;;  %v1100_v26 = vpack.c.bf16 %v902_v25, %v902_v25 }
 0x148   :  { %985 = vst.msk [vmem:[%s1772_s3 + $0x3c] sm:$0xf] %vm969_vm0, %v1102_v1  ;;  %975 = vst.msk [vmem:[%s1772_s3 + $0x14] sm:$0xf] %vm969_vm0, %v1092_v8 }
 0x149   :  { %983 = vst.msk [vmem:[%s1772_s3 + $0x34] sm:$0xf] %vm969_vm0, %v1100_v26 }

// kernel: resnet18_forward.23
= control target key start
LH: loop header
LB: loop body
LE: loop exit
PB: predicated region body
PF: predicated region fallthrough
CT: control target
= control target key end

     0   :  { %vm1020_vm0 = vcmask 519168   ;;  %s1930_s1 = inlined_call_operand.vmem [shape: bf16[640,64], index: 1, kind: input, shape index: {}]   ;;  %s1931_s0 = inlined_call_operand.vmem [shape: bf16[128,640], index: 0, kind: input, shape index: {}]   ;;  %s1932_s2 = inlined_call_operand.vmem [shape: f32[1,64], index: 2, kind: input, shape index: {}]   ;;  %s1933_s3 = inlined_call_operand.vmem [shape: bf16[128,64], index: 3, kind: input, shape index: {}]   ;;  %s1934_s4 = inlined_call_operand.vmem [shape: bf16[128,64], index: 4, kind: output, shape index: {}]  }
   0x1   :  { %v1385_v0 = vld [vmem:[%s1930_s1 + $0x40] sm:$0xff]   ;;  %v1389_v4 = vld [vmem:[%s1930_s1 + $0x48] sm:$0xff]   ;;  %v1393_v8 = vld [vmem:[%s1930_s1 + $0x50] sm:$0xff]  }
   0x2   :  { %v1386_v1 = vld [vmem:[%s1930_s1 + $0xc0] sm:$0xff]   ;;  %1193 = vmatprep.subr.bf16.mxu0 %v1385_v0  ;;  %v1390_v5 = vld [vmem:[%s1930_s1 + $0xc8] sm:$0xff]   ;;  %v1394_v9 = vld [vmem:[%s1930_s1 + $0xd0] sm:$0xff]  }
   0x3   :  { %v1387_v2 = vld [vmem:[%s1930_s1] sm:$0xff]   ;;  %1257 = vmatprep.subr.bf16.mxu1 %v1386_v1  ;;  %v1391_v6 = vld [vmem:[%s1930_s1 + $0x8] sm:$0xff]   ;;  %v1395_v10 = vld [vmem:[%s1930_s1 + $0x10] sm:$0xff]  }
   0x4   :  { %v1388_v3 = vld [vmem:[%s1930_s1 + $0x80] sm:$0xff]   ;;  %1194 = vmatpush3.bf16.msra.mxu0 %v1387_v2  ;;  %v1392_v7 = vld [vmem:[%s1930_s1 + $0x88] sm:$0xff]   ;;  %v1396_v11 = vld [vmem:[%s1930_s1 + $0x90] sm:$0xff]  }
   0x5   :  { %1258 = vmatpush3.bf16.msra.mxu1 %v1388_v3  ;;  %1195 = vmatprep.subr.bf16.mxu0 %v1389_v4  ;;  %v1397_v12 = vld [vmem:[%s1930_s1 + $0x58] sm:$0xff]   ;;  %v1401_v16 = vld [vmem:[%s1930_s1 + $0x60] sm:$0xff]   ;;  %v1405_v20 = vld [vmem:[%s1930_s1 + $0x68] sm:$0xff]  }
   0x6   :  { %1259 = vmatprep.subr.bf16.mxu1 %v1390_v5  ;;  %v1398_v13 = vld [vmem:[%s1930_s1 + $0xd8] sm:$0xff]   ;;  %v1402_v17 = vld [vmem:[%s1930_s1 + $0xe0] sm:$0xff]   ;;  %v1406_v21 = vld [vmem:[%s1930_s1 + $0xe8] sm:$0xff]  }
   0x7   :  { %v1399_v14 = vld [vmem:[%s1930_s1 + $0x18] sm:$0xff]   ;;  %v1403_v18 = vld [vmem:[%s1930_s1 + $0x20] sm:$0xff]   ;;  %v1407_v22 = vld [vmem:[%s1930_s1 + $0x28] sm:$0xff]  }
   0x8   :  { %1196 = vmatpush3.bf16.msra.mxu0 %v1391_v6  ;;  %v1400_v15 = vld [vmem:[%s1930_s1 + $0x98] sm:$0xff]   ;;  %v1404_v19 = vld [vmem:[%s1930_s1 + $0xa0] sm:$0xff]   ;;  %v1408_v23 = vld [vmem:[%s1930_s1 + $0xa8] sm:$0xff]  }
   0x9   :  { %1260 = vmatpush3.bf16.msra.mxu1 %v1392_v7  ;;  %1197 = vmatprep.subr.bf16.mxu0 %v1393_v8  ;;  %v1409_v24 = vld [vmem:[%s1930_s1 + $0x70] sm:$0xff]   ;;  %v1413_v28 = vld [vmem:[%s1930_s1 + $0x78] sm:$0xff]   ;;  %v1422_v35 = vld [vmem:[%s1931_s0 + $0xc] ss:$20 sps:$4 sm:$0xff]  }
   0xa   :  { %1261 = vmatprep.subr.bf16.mxu1 %v1394_v9  ;;  %v1410_v25 = vld [vmem:[%s1930_s1 + $0xf0] sm:$0xff]   ;;  %v1414_v29 = vld [vmem:[%s1930_s1 + $0xf8] sm:$0xff]   ;;  %v1423_v36 = vld [vmem:[%s1930_s1 + $0x100] sm:$0xff]   ;;  %730 = vmatprep.mubr.bf16.mxu1 %v1422_v35 }
   0xb   :  { %v1411_v26 = vld [vmem:[%s1930_s1 + $0x30] sm:$0xff]   ;;  %v1415_v30 = vld [vmem:[%s1930_s1 + $0x38] sm:$0xff]   ;;  %v1424_v37 = vld [vmem:[%s1931_s0 + $0x2c] ss:$20 sps:$4 sm:$0xff]  }
   0xc   :  { %1198 = vmatpush3.bf16.msra.mxu0 %v1395_v10  ;;  %v1412_v27 = vld [vmem:[%s1930_s1 + $0xb0] sm:$0xff]   ;;  %v1416_v31 = vld [vmem:[%s1930_s1 + $0xb8] sm:$0xff]   ;;  %v1430_v39 = vld [vmem:[%s1930_s1 + $0x108] sm:$0xff]  }
   0xd   :  { %1262 = vmatpush3.bf16.msra.mxu1 %v1396_v11  ;;  %1199 = vmatprep.subr.bf16.mxu0 %v1397_v12  ;;  %v1417_v32 = vld [vmem:[%s1931_s0] ss:$20 sps:$4 sm:$0xff]   ;;  %v1419_v33 = vld [vmem:[%s1931_s0 + $0x4] ss:$20 sps:$4 sm:$0xff]   ;;  %v1420_v34 = vld [vmem:[%s1931_s0 + $0x8] ss:$20 sps:$4 sm:$0xff]  }
   0xe   :  { %1263 = vmatprep.subr.bf16.mxu1 %v1398_v13  ;;  %633 = vmatprep.mubr.bf16.mxu0 %v1419_v33  ;;  %v1426_v38 = vld [vmem:[%s1931_s0 + $0x34] ss:$20 sps:$4 sm:$0xff]   ;;  %v1429_v41 = vld [vmem:[%s1931_s0 + $0x30] ss:$20 sps:$4 sm:$0xff]   ;;  %v1444_v45 = vld [vmem:[%s1930_s1 + $0x118] sm:$0xff]  }
   0xf   :  { %v1428_v40 = vld [vmem:[%s1931_s0 + $0x28] ss:$20 sps:$4 sm:$0xff]   ;;  %v1437_v44 = vld [vmem:[%s1930_s1 + $0x110] sm:$0xff]   ;;  %v1436_v47 = vld [vmem:[%s1931_s0 + $0x58] ss:$20 sps:$4 sm:$0xff]  }
  0x10   :  { %1200 = vmatpush3.bf16.msra.mxu0 %v1399_v14  ;;  %v1431_v42 = vld [vmem:[%s1931_s0 + $0x54] ss:$20 sps:$4 sm:$0xff]   ;;  %v1433_v43 = vld [vmem:[%s1931_s0 + $0x5c] ss:$20 sps:$4 sm:$0xff]   ;;  %v1440_v49 = vld [vmem:[%s1931_s0 + $0x84] ss:$20 sps:$4 sm:$0xff]  }
  0x11   :  { %1264 = vmatpush3.bf16.msra.mxu1 %v1400_v15  ;;  %1201 = vmatprep.subr.bf16.mxu0 %v1401_v16  ;;  %v1435_v46 = vld [vmem:[%s1931_s0 + $0x50] ss:$20 sps:$4 sm:$0xff]   ;;  %v1458_v51 = vld [vmem:[%s1930_s1 + $0x128] sm:$0xff]   ;;  %v1443_v53 = vld [vmem:[%s1931_s0 + $0x80] ss:$20 sps:$4 sm:$0xff]  }
  0x12   :  { %1265 = vmatprep.subr.bf16.mxu1 %v1402_v17  ;;  %v1438_v48 = vld [vmem:[%s1931_s0 + $0x7c] ss:$20 sps:$4 sm:$0xff]   ;;  %v1451_v50 = vld [vmem:[%s1930_s1 + $0x120] sm:$0xff]   ;;  %v1442_v52 = vld [vmem:[%s1931_s0 + $0x78] ss:$20 sps:$4 sm:$0xff]  }
  0x13   :  { %v1445_v54 = vld [vmem:[%s1931_s0 + $0xa4] ss:$20 sps:$4 sm:$0xff]   ;;  %v1465_v55 = vld [vmem:[%s1930_s1 + $0x130] sm:$0xff]   ;;  %v1447_v56 = vld [vmem:[%s1931_s0 + $0xac] ss:$20 sps:$4 sm:$0xff]  }
  0x14   :  { %1202 = vmatpush3.bf16.msra.mxu0 %v1403_v18  ;;  %v1472_v57 = vld [vmem:[%s1930_s1 + $0x138] sm:$0xff]   ;;  %v1449_v58 = vld [vmem:[%s1931_s0 + $0xa0] ss:$20 sps:$4 sm:$0xff]   ;;  %v1457_v63 = vld [vmem:[%s1931_s0 + $0xd0] ss:$20 sps:$4 sm:$0xff]  }
  0x15   :  { %1266 = vmatpush3.bf16.msra.mxu1 %v1404_v19  ;;  %1203 = vmatprep.subr.bf16.mxu0 %v1405_v20  ;;  %v1450_v59 = vld [vmem:[%s1931_s0 + $0xa8] ss:$20 sps:$4 sm:$0xff]   ;;  %v1452_v60 = vld [vmem:[%s1931_s0 + $0xcc] ss:$20 sps:$4 sm:$0xff]   ;;  %v1463_v2 = vld [vmem:[%s1931_s0 + $0xf0] ss:$20 sps:$4 sm:$0xff]  }
  0x16   :  { %1267 = vmatprep.subr.bf16.mxu1 %v1406_v21  ;;  %v1454_v61 = vld [vmem:[%s1931_s0 + $0xd4] ss:$20 sps:$4 sm:$0xff]   ;;  %v1461_v1 = vld [vmem:[%s1931_s0 + $0xfc] ss:$20 sps:$4 sm:$0xff]   ;;  %v1464_v3 = vld [vmem:[%s1931_s0 + $0xf8] ss:$20 sps:$4 sm:$0xff]  }
  0x17   :  { %v1456_v62 = vld [vmem:[%s1931_s0 + $0xc8] ss:$20 sps:$4 sm:$0xff]   ;;  %v1468_v5 = vld [vmem:[%s1931_s0 + $0x124] ss:$20 sps:$4 sm:$0xff]   ;;  %v1471_v7 = vld [vmem:[%s1931_s0 + $0x120] ss:$20 sps:$4 sm:$0xff]  }
  0x18   :  { %1204 = vmatpush3.bf16.msra.mxu0 %v1407_v22  ;;  %v1459_v0 = vld [vmem:[%s1931_s0 + $0xf4] ss:$20 sps:$4 sm:$0xff]   ;;  %v1466_v4 = vld [vmem:[%s1931_s0 + $0x11c] ss:$20 sps:$4 sm:$0xff]   ;;  %v1470_v6 = vld [vmem:[%s1931_s0 + $0x118] ss:$20 sps:$4 sm:$0xff]  }
  0x19   :  { %1268 = vmatpush3.bf16.msra.mxu1 %v1408_v23  ;;  %1205 = vmatprep.subr.bf16.mxu0 %v1409_v24  ;;  %v1473_v8 = vld [vmem:[%s1931_s0 + $0x10] ss:$20 sps:$4 sm:$0xff]   ;;  %v1475_v10 = vld [vmem:[%s1931_s0 + $0x38] ss:$20 sps:$4 sm:$0xff]   ;;  %v1477_v12 = vld [vmem:[%s1931_s0 + $0x60] ss:$20 sps:$4 sm:$0xff]  }
  0x1a   :  { %1269 = vmatprep.subr.bf16.mxu1 %v1410_v25  ;;  %v1474_v9 = vld [vmem:[%s1931_s0 + $0xb0] ss:$20 sps:$4 sm:$0xff]   ;;  %v1476_v11 = vld [vmem:[%s1931_s0 + $0xd8] ss:$20 sps:$4 sm:$0xff]   ;;  %v1478_v13 = vld [vmem:[%s1931_s0 + $0x100] ss:$20 sps:$4 sm:$0xff]  }
  0x1b   :  { %v1479_v14 = vld [vmem:[%s1931_s0 + $0x88] ss:$20 sps:$4 sm:$0xff]   ;;  %v1749_v18 = vld [vmem:[%s1932_s2] ss:$0 sm:$0xff] }
  0x1c   :  { %1206 = vmatpush3.bf16.msra.mxu0 %v1411_v26  ;;  %v1480_v15 = vld [vmem:[%s1931_s0 + $0x128] ss:$20 sps:$4 sm:$0xff]  }
  0x1d   :  { %1270 = vmatpush3.bf16.msra.mxu1 %v1412_v27  ;;  %1207 = vmatprep.subr.bf16.mxu0 %v1413_v28 }
  0x1e   :  { %1271 = vmatprep.subr.bf16.mxu1 %v1414_v29 }
  0x20   :  { %1208 = vmatpush3.bf16.msra.mxu0 %v1415_v30 }
  0x21   :  { %1272 = vmatpush3.bf16.msra.mxu1 %v1416_v31  ;;  %1337 = vmatprep.subr.bf16.mxu0 %v1423_v36 }
  0x22   :  { %1369 = vmatprep.subr.bf16.mxu1 %v1423_v36 }
  0x23   :  { %634 = vmatmul.mubr.bf16.vlgmr.msra.gmra.mrb[0].mxu0 %v1417_v32 }
  0x24   :  { %731 = vmatmul.mubr.bf16.vlgmr.msra.gmra.mrb[0].mxu1 %v1420_v34  ;;  %1338 = vmatpush3.bf16.msra.mxu0 %v1423_v36 }
  0x25   :  { %1377 = vmatpush3.bf16.msra.mxu1 %v1423_v36  ;;  %641 = vmatprep.mubr.bf16.mxu0 %v1424_v37 }
  0x26   :  { %738 = vmatprep.mubr.bf16.mxu1 %v1426_v38  ;;  %1339 = vmatprep.subr.bf16.mxu0 %v1430_v39 }
  0x27   :  { %1370 = vmatprep.subr.bf16.mxu1 %v1430_v39 }
  0x28   :  { %1340 = vmatpush3.bf16.msra.mxu0 %v1430_v39 }
  0x29   :  { %1378 = vmatpush3.bf16.msra.mxu1 %v1430_v39  ;;  %1341 = vmatprep.subr.bf16.mxu0 %v1437_v44 }
  0x2a   :  { %1371 = vmatprep.subr.bf16.mxu1 %v1437_v44 }
  0x2b   :  { %642 = vmatmul.mubr.bf16.gmra.mrb[4].mxu0 %v1428_v40 }
  0x2c   :  { %739 = vmatmul.mubr.bf16.gmra.mrb[4].mxu1 %v1429_v41  ;;  %649 = vmatprep.mubr.bf16.mxu0 %v1431_v42 }
  0x2d   :  { %746 = vmatprep.mubr.bf16.mxu1 %v1433_v43  ;;  %1342 = vmatpush3.bf16.msra.mxu0 %v1437_v44 }
  0x2e   :  { %1379 = vmatpush3.bf16.msra.mxu1 %v1437_v44  ;;  %1343 = vmatprep.subr.bf16.mxu0 %v1444_v45 }
  0x2f   :  { %1372 = vmatprep.subr.bf16.mxu1 %v1444_v45 }
  0x31   :  { %1344 = vmatpush3.bf16.msra.mxu0 %v1444_v45 }
  0x32   :  { %1380 = vmatpush3.bf16.msra.mxu1 %v1444_v45  ;;  %1345 = vmatprep.subr.bf16.mxu0 %v1451_v50 }
  0x33   :  { %650 = vmatmul.mubr.bf16.gmra.mrb[8].mxu0 %v1435_v46  ;;  %1373 = vmatprep.subr.bf16.mxu1 %v1451_v50 }
  0x34   :  { %747 = vmatmul.mubr.bf16.gmra.mrb[8].mxu1 %v1436_v47  ;;  %657 = vmatprep.mubr.bf16.mxu0 %v1438_v48 }
  0x35   :  { %754 = vmatprep.mubr.bf16.mxu1 %v1440_v49  ;;  %1346 = vmatpush3.bf16.msra.mxu0 %v1451_v50 }
  0x36   :  { %1381 = vmatpush3.bf16.msra.mxu1 %v1451_v50  ;;  %1347 = vmatprep.subr.bf16.mxu0 %v1458_v51 }
  0x37   :  { %1374 = vmatprep.subr.bf16.mxu1 %v1458_v51 }
  0x39   :  { %1348 = vmatpush3.bf16.msra.mxu0 %v1458_v51 }
  0x3a   :  { %1382 = vmatpush3.bf16.msra.mxu1 %v1458_v51  ;;  %1349 = vmatprep.subr.bf16.mxu0 %v1465_v55 }
  0x3b   :  { %658 = vmatmul.mubr.bf16.gmra.mrb[12].mxu0 %v1442_v52  ;;  %1375 = vmatprep.subr.bf16.mxu1 %v1465_v55 }
  0x3c   :  { %755 = vmatmul.mubr.bf16.gmra.mrb[12].mxu1 %v1443_v53  ;;  %665 = vmatprep.mubr.bf16.mxu0 %v1445_v54 }
  0x3d   :  { %762 = vmatprep.mubr.bf16.mxu1 %v1447_v56  ;;  %1350 = vmatpush3.bf16.msra.mxu0 %v1465_v55 }
  0x3e   :  { %1383 = vmatpush3.bf16.msra.mxu1 %v1465_v55  ;;  %1351 = vmatprep.subr.bf16.mxu0 %v1472_v57 }
  0x3f   :  { %1376 = vmatprep.subr.bf16.mxu1 %v1472_v57 }
  0x41   :  { %1352 = vmatpush3.bf16.msra.mxu0 %v1472_v57 }
  0x42   :  { %1384 = vmatpush3.bf16.msra.mxu1 %v1472_v57 }
  0x43   :  { %666 = vmatmul.mubr.bf16.gmra.mrb[16].mxu0 %v1449_v58 }
  0x44   :  { %763 = vmatmul.mubr.bf16.gmra.mrb[16].mxu1 %v1450_v59  ;;  %673 = vmatprep.mubr.bf16.mxu0 %v1452_v60 }
  0x45   :  { %770 = vmatprep.mubr.bf16.mxu1 %v1454_v61 }
  0x4b   :  { %674 = vmatmul.mubr.bf16.gmra.mrb[20].mxu0 %v1456_v62 }
  0x4c   :  { %771 = vmatmul.mubr.bf16.gmra.mrb[20].mxu1 %v1457_v63  ;;  %681 = vmatprep.mubr.bf16.mxu0 %v1459_v0 }
  0x4d   :  { %778 = vmatprep.mubr.bf16.mxu1 %v1461_v1 }
  0x53   :  { %682 = vmatmul.mubr.bf16.gmra.mrb[24].mxu0 %v1463_v2 }
  0x54   :  { %779 = vmatmul.mubr.bf16.gmra.mrb[24].mxu1 %v1464_v3  ;;  %689 = vmatprep.mubr.bf16.mxu0 %v1466_v4 }
  0x55   :  { %786 = vmatprep.mubr.bf16.mxu1 %v1468_v5 }
  0x5b   :  { %690 = vmatmul.mubr.bf16.gmra.mrb[28].mxu0 %v1470_v6 }
  0x5c   :  { %787 = vmatmul.mubr.bf16.gmra.mrb[28].mxu1 %v1471_v7  ;;  %1353 = vmatprep.mubr.bf16.mxu0 %v1473_v8 }
  0x5d   :  { %1361 = vmatprep.mubr.bf16.mxu1 %v1474_v9 }
  0x63   :  { %1354 = vmatmul.mubr.bf16.vlgmr.msra.gmra.mrb[32].mxu0 %v1475_v10 }
  0x64   :  { %1362 = vmatmul.mubr.bf16.vlgmr.msra.gmra.mrb[32].mxu1 %v1476_v11  ;;  %1357 = vmatprep.mubr.bf16.mxu0 %v1477_v12 }
  0x65   :  { %1365 = vmatprep.mubr.bf16.mxu1 %v1478_v13 }
  0x6b   :  { %1358 = vmatmul.mubr.bf16.gmra.mrb[36].mxu0 %v1479_v14 }
  0x6c   :  { %1366 = vmatmul.mubr.bf16.gmra.mrb[36].mxu1 %v1480_v15 }
  0xf6   :  { %v1209_v16 = vpop.f32.mrb[0].mxu0 }
  0xf7   :  { %v1273_v17 = vpop.f32.mrb[0].mxu1  ;;  %v1210_v19 = vpop.f32.mrb[1].mxu0 }
  0xf8   :  { %v1211_v20 = vadd.f32 %v1210_v19, %v1209_v16  ;;  %v1274_v21 = vpop.f32.mrb[1].mxu1  ;;  %v1212_v22 = vpop.f32.mrb[2].mxu0 }
  0xf9   :  { %v1275_v23 = vadd.f32 %v1274_v21, %v1273_v17  ;;  %v1276_v24 = vpop.f32.mrb[2].mxu1  ;;  %v1213_v25 = vpop.f32.mrb[3].mxu0 }
  0xfa   :  { %v636_v26 = vadd.f32 %v1211_v20, %v1749_v18  ;;  %v1214_v27 = vadd.f32 %v1213_v25, %v1212_v22  ;;  %v1277_v28 = vpop.f32.mrb[3].mxu1 }
  0xfb   :  { %v1278_v29 = vadd.f32 %v1277_v28, %v1276_v24 }
  0xfc   :  { %v639_v30 = vadd.f32 %v1214_v27, %v1749_v18  ;;  %v1753_v31 = vadd.f32 %v1275_v23, %v636_v26 }
  0xfe   :  { %v1215_v32 = vpop.f32.mrb[4].mxu0  ;;  %v1755_v33 = vadd.f32 %v1278_v29, %v639_v30 }
  0xff   :  { %v1279_v34 = vpop.f32.mrb[4].mxu1  ;;  %v1216_v35 = vpop.f32.mrb[5].mxu0 }
 0x100   :  { %v1217_v36 = vadd.f32 %v1216_v35, %v1215_v32  ;;  %v1280_v37 = vpop.f32.mrb[5].mxu1  ;;  %v1218_v38 = vpop.f32.mrb[6].mxu0 }
 0x101   :  { %v1281_v39 = vadd.f32 %v1280_v37, %v1279_v34  ;;  %v1282_v40 = vpop.f32.mrb[6].mxu1  ;;  %v1219_v41 = vpop.f32.mrb[7].mxu0 }
 0x102   :  { %v644_v42 = vadd.f32 %v1217_v36, %v1749_v18  ;;  %v1220_v43 = vadd.f32 %v1219_v41, %v1218_v38  ;;  %v1283_v44 = vpop.f32.mrb[7].mxu1 }
 0x103   :  { %v1284_v45 = vadd.f32 %v1283_v44, %v1282_v40 }
 0x104   :  { %v647_v46 = vadd.f32 %v1220_v43, %v1749_v18  ;;  %v1759_v47 = vadd.f32 %v1281_v39, %v644_v42 }
 0x106   :  { %v1221_v48 = vpop.f32.mrb[8].mxu0  ;;  %v1761_v49 = vadd.f32 %v1284_v45, %v647_v46 }
 0x107   :  { %v1285_v50 = vpop.f32.mrb[8].mxu1  ;;  %v1222_v51 = vpop.f32.mrb[9].mxu0 }
 0x108   :  { %v1223_v52 = vadd.f32 %v1222_v51, %v1221_v48  ;;  %v1286_v53 = vpop.f32.mrb[9].mxu1  ;;  %v1224_v54 = vpop.f32.mrb[10].mxu0 }
 0x109   :  { %v1287_v55 = vadd.f32 %v1286_v53, %v1285_v50  ;;  %v1288_v56 = vpop.f32.mrb[10].mxu1  ;;  %v1225_v57 = vpop.f32.mrb[11].mxu0 }
 0x10a   :  { %v652_v58 = vadd.f32 %v1223_v52, %v1749_v18  ;;  %v1226_v59 = vadd.f32 %v1225_v57, %v1224_v54  ;;  %v1289_v60 = vpop.f32.mrb[11].mxu1 }
 0x10b   :  { %v1290_v61 = vadd.f32 %v1289_v60, %v1288_v56 }
 0x10c   :  { %v655_v62 = vadd.f32 %v1226_v59, %v1749_v18  ;;  %v1765_v63 = vadd.f32 %v1287_v55, %v652_v58 }
 0x10e   :  { %v1227_v0 = vpop.f32.mrb[12].mxu0  ;;  %v1767_v1 = vadd.f32 %v1290_v61, %v655_v62 }
 0x10f   :  { %v1291_v2 = vpop.f32.mrb[12].mxu1  ;;  %v1228_v3 = vpop.f32.mrb[13].mxu0 }
 0x110   :  { %v1229_v4 = vadd.f32 %v1228_v3, %v1227_v0  ;;  %v1292_v5 = vpop.f32.mrb[13].mxu1  ;;  %v1230_v6 = vpop.f32.mrb[14].mxu0 }
 0x111   :  { %v1293_v7 = vadd.f32 %v1292_v5, %v1291_v2  ;;  %v1294_v8 = vpop.f32.mrb[14].mxu1  ;;  %v1231_v9 = vpop.f32.mrb[15].mxu0 }
 0x112   :  { %v660_v10 = vadd.f32 %v1229_v4, %v1749_v18  ;;  %v1232_v11 = vadd.f32 %v1231_v9, %v1230_v6  ;;  %v1295_v12 = vpop.f32.mrb[15].mxu1 }
 0x113   :  { %v1296_v13 = vadd.f32 %v1295_v12, %v1294_v8 }
 0x114   :  { %v663_v14 = vadd.f32 %v1232_v11, %v1749_v18  ;;  %v1771_v15 = vadd.f32 %v1293_v7, %v660_v10 }
 0x116   :  { %v1233_v16 = vpop.f32.mrb[16].mxu0  ;;  %v1773_v17 = vadd.f32 %v1296_v13, %v663_v14  ;;  %v1186_v14 = vld [vmem:[%s1933_s3 + $0x8] sm:$0xff]  }
 0x117   :  { %v1297_v19 = vpop.f32.mrb[16].mxu1  ;;  %v1234_v20 = vpop.f32.mrb[17].mxu0 }
 0x118   :  { %v1235_v21 = vadd.f32 %v1234_v20, %v1233_v16  ;;  %v1298_v22 = vpop.f32.mrb[17].mxu1  ;;  %v1236_v23 = vpop.f32.mrb[18].mxu0  ;;  %v1190_v16 = vld [vmem:[%s1933_s3 + $0x28] sm:$0xff]  }
 0x119   :  { %v1299_v24 = vadd.f32 %v1298_v22, %v1297_v19  ;;  %v1300_v25 = vpop.f32.mrb[18].mxu1  ;;  %v1237_v26 = vpop.f32.mrb[19].mxu0  ;;  %v1155_v22 = vld [vmem:[%s1933_s3] sm:$0xff]  }
 0x11a   :  { %v668_v27 = vadd.f32 %v1235_v21, %v1749_v18  ;;  %v1238_v28 = vadd.f32 %v1237_v26, %v1236_v23  ;;  %v1301_v29 = vpop.f32.mrb[19].mxu1  ;;  %v1189_v23 = vld [vmem:[%s1933_s3 + $0x20] sm:$0xff]  }
 0x11b   :  { %v1302_v30 = vadd.f32 %v1301_v29, %v1300_v25  ;;  %v1176_v29 = vunpack.c.l.bf16 %v1190_v16 }
 0x11c   :  { %v671_v32 = vadd.f32 %v1238_v28, %v1749_v18  ;;  %v1777_v34 = vadd.f32 %v1299_v24, %v668_v27  ;;  %v1160_v28 = vunpack.c.l.bf16 %v1186_v14 }
 0x11e   :  { %v1239_v35 = vpop.f32.mrb[20].mxu0  ;;  %v1779_v36 = vadd.f32 %v1302_v30, %v671_v32  ;;  %v1807_v30 = vld [vmem:[%s1933_s3 + $0x18] sm:$0xff]  }
 0x11f   :  { %v1303_v37 = vpop.f32.mrb[20].mxu1  ;;  %v1240_v38 = vpop.f32.mrb[21].mxu0  ;;  %v1812_v32 = vld [vmem:[%s1933_s3 + $0x38] sm:$0xff]  }
 0x120   :  { %v1241_v39 = vadd.f32 %v1240_v38, %v1239_v35  ;;  %v1304_v40 = vpop.f32.mrb[21].mxu1  ;;  %v1242_v41 = vpop.f32.mrb[22].mxu0  ;;  %v1172_v38 = vunpack.c.l.bf16 %v1189_v23 }
 0x121   :  { %v1305_v42 = vadd.f32 %v1304_v40, %v1303_v37  ;;  %v1306_v43 = vpop.f32.mrb[22].mxu1  ;;  %v1243_v44 = vpop.f32.mrb[23].mxu0  ;;  %v1156_v37 = vunpack.c.l.bf16 %v1155_v22  ;;  %v1820_v40 = vld [vmem:[%s1933_s3 + $0x10] sm:$0xff]  }
 0x122   :  { %v676_v45 = vadd.f32 %v1241_v39, %v1749_v18  ;;  %v1244_v46 = vadd.f32 %v1243_v44, %v1242_v41  ;;  %v1307_v48 = vpop.f32.mrb[23].mxu1  ;;  %v1825_v41 = vld [vmem:[%s1933_s3 + $0x30] sm:$0xff]   ;;  %v1157_v44 = vunpack.c.h.bf16 %v1155_v22 }
 0x123   :  { %v1308_v50 = vadd.f32 %v1307_v48, %v1306_v43  ;;  %v1177_v43 = vunpack.c.h.bf16 %v1190_v16  ;;  %v1184_v48 = vunpack.c.l.bf16 %v1812_v32 }
 0x124   :  { %v679_v51 = vadd.f32 %v1244_v46, %v1749_v18  ;;  %v773_v52 = vadd.f32 %v1305_v42, %v676_v45  ;;  %v1161_v42 = vunpack.c.h.bf16 %v1186_v14  ;;  %v1173_v45 = vunpack.c.h.bf16 %v1189_v23 }
 0x126   :  { %v1245_v53 = vpop.f32.mrb[24].mxu0  ;;  %v1783_v54 = vadd.f32 %v1308_v50, %v679_v51 }
 0x127   :  { %v1309_v55 = vpop.f32.mrb[24].mxu1  ;;  %v1246_v56 = vpop.f32.mrb[25].mxu0 }
 0x128   :  { %v1247_v57 = vadd.f32 %v1246_v56, %v1245_v53  ;;  %v1310_v58 = vpop.f32.mrb[25].mxu1  ;;  %v1248_v59 = vpop.f32.mrb[26].mxu0  ;;  %v1164_v56 = vunpack.c.l.bf16 %v1820_v40 }
 0x129   :  { %v1311_v60 = vadd.f32 %v1310_v58, %v1309_v55  ;;  %v1312_v61 = vpop.f32.mrb[26].mxu1  ;;  %v1249_v62 = vpop.f32.mrb[27].mxu0  ;;  %v1169_v58 = vunpack.c.h.bf16 %v1807_v30 }
 0x12a   :  { %v684_v0 = vadd.f32 %v1247_v57, %v1749_v18  ;;  %v1250_v2 = vadd.f32 %v1249_v62, %v1248_v59  ;;  %v1313_v3 = vpop.f32.mrb[27].mxu1  ;;  %v1180_v57 = vunpack.c.l.bf16 %v1825_v41 }
 0x12b   :  { %v1314_v4 = vadd.f32 %v1313_v3, %v1312_v61 }
 0x12c   :  { %v687_v5 = vadd.f32 %v1250_v2, %v1749_v18  ;;  %v1787_v6 = vadd.f32 %v1311_v60, %v684_v0  ;;  %v1185_v0 = vunpack.c.h.bf16 %v1812_v32  ;;  %v1165_v2 = vunpack.c.h.bf16 %v1820_v40 }
 0x12e   :  { %v1251_v7 = vpop.f32.mrb[28].mxu0  ;;  %v1789_v8 = vadd.f32 %v1314_v4, %v687_v5 }
 0x12f   :  { %v1315_v9 = vpop.f32.mrb[28].mxu1  ;;  %v1252_v10 = vpop.f32.mrb[29].mxu0 }
 0x130   :  { %v1253_v11 = vadd.f32 %v1252_v10, %v1251_v7  ;;  %v1316_v12 = vpop.f32.mrb[29].mxu1  ;;  %v1254_v13 = vpop.f32.mrb[30].mxu0 }
 0x131   :  { %v1317_v19 = vadd.f32 %v1316_v12, %v1315_v9  ;;  %v1318_v20 = vpop.f32.mrb[30].mxu1  ;;  %v1255_v21 = vpop.f32.mrb[31].mxu0  ;;  %v1181_v9 = vunpack.c.h.bf16 %v1825_v41 }
 0x132   :  { %v692_v24 = vadd.f32 %v1253_v11, %v1749_v18  ;;  %v1256_v25 = vadd.f32 %v1255_v21, %v1254_v13  ;;  %v1319_v26 = vpop.f32.mrb[31].mxu1 }
 0x133   :  { %v1320_v27 = vadd.f32 %v1319_v26, %v1318_v20 }
 0x134   :  { %v695_v35 = vadd.f32 %v1256_v25, %v1749_v18  ;;  %v1815_v39 = vadd.f32 %v1317_v19, %v692_v24  ;;  %v1168_v18 = vunpack.c.l.bf16 %v1807_v30 }
 0x136   :  { %v1355_v46 = vpop.f32.mrb[32].mxu0  ;;  %v1829_v50 = vadd.f32 %v1320_v27, %v695_v35 }
 0x137   :  { %v838_v51 = vadd.f32 %v1355_v46, %v1759_v47  ;;  %v1363_v53 = vpop.f32.mrb[32].mxu1  ;;  %v829_v55 = vpop.f32.mrb[33].mxu0 }
 0x138   :  { %v870_v59 = vadd.f32 %v1363_v53, %v773_v52  ;;  %v830_v60 = vadd.f32 %v829_v55, %v1753_v31  ;;  %v861_v61 = vpop.f32.mrb[33].mxu1  ;;  %v1356_v62 = vpop.f32.mrb[34].mxu0 }
 0x139   :  { %v926_v3 = vadd.f32 %v1160_v28, %v838_v51  ;;  %v862_v47 = vadd.f32 %v861_v61, %v1777_v34  ;;  %v841_v4 = vadd.f32 %v1356_v62, %v1761_v49  ;;  %v1364_v5 = vpop.f32.mrb[34].mxu1  ;;  %v832_v7 = vpop.f32.mrb[35].mxu0 }
 0x13a   :  { %v934_v10 = vadd.f32 %v1176_v29, %v870_v59  ;;  %v924_v11 = vadd.f32 %v1156_v37, %v830_v60  ;;  %v873_v52 = vadd.f32 %v1364_v5, %v1783_v54  ;;  %v833_v31 = vadd.f32 %v832_v7, %v1755_v33  ;;  %v864_v12 = vpop.f32.mrb[35].mxu1 }
 0x13b   :  { %v942_v13 = vmax.f32 %v926_v3, 0.0  ;;  %v932_v14 = vadd.f32 %v1172_v38, %v862_v47  ;;  %v927_v16 = vadd.f32 %v1161_v42, %v841_v4  ;;  %v865_v19 = vadd.f32 %v864_v12, %v1779_v36 }
 0x13c   :  { %v950_v20 = vmax.f32 %v934_v10, 0.0  ;;  %v940_v34 = vmax.f32 %v924_v11, 0.0  ;;  %v935_v21 = vadd.f32 %v1177_v43, %v873_v52  ;;  %v925_v49 = vadd.f32 %v1157_v44, %v833_v31 }
 0x13d   :  { %v1140_v22 = vpack.c.bf16 %v942_v13, %v942_v13  ;;  %v948_v23 = vmax.f32 %v932_v14, 0.0  ;;  %v943_v24 = vmax.f32 %v927_v16, 0.0  ;;  %v933_v25 = vadd.f32 %v1173_v45, %v865_v19 }
 0x13e   :  { %v1148_v26 = vpack.c.bf16 %v950_v20, %v950_v20  ;;  %v1138_v27 = vpack.c.bf16 %v940_v34, %v940_v34  ;;  %v951_v28 = vmax.f32 %v935_v21, 0.0  ;;  %v941_v54 = vmax.f32 %v925_v49, 0.0  ;;  %v1359_v29 = vpop.f32.mrb[36].mxu0 }
 0x13f   :  { %1023 = vst.msk [vmem:[%s1934_s4 + $0x8] sm:$0xf] %vm1020_vm0, %v1140_v22  ;;  %v1146_v33 = vpack.c.bf16 %v948_v23, %v948_v23  ;;  %v1141_v36 = vpack.c.bf16 %v943_v24, %v943_v24  ;;  %v949_v35 = vmax.f32 %v933_v25, 0.0  ;;  %v854_v37 = vadd.f32 %v1359_v29, %v1771_v15  ;;  %v1367_v38 = vpop.f32.mrb[36].mxu1  ;;  %v845_v42 = vpop.f32.mrb[37].mxu0 }
 0x140   :  { %1031 = vst.msk [vmem:[%s1934_s4 + $0x28] sm:$0xf] %vm1020_vm0, %v1148_v26  ;;  %1021 = vst.msk [vmem:[%s1934_s4] sm:$0xf] %vm1020_vm0, %v1138_v27  ;;  %v1149_v43 = vpack.c.bf16 %v951_v28, %v951_v28  ;;  %v1139_v44 = vpack.c.bf16 %v941_v54, %v941_v54  ;;  %v886_v45 = vadd.f32 %v1367_v38, %v1815_v39  ;;  %v877_v51 = vpop.f32.mrb[37].mxu1  ;;  %v1360_v15 = vpop.f32.mrb[38].mxu0 }
 0x141   :  { %v846_v46 = vadd.f32 %v845_v42, %v1765_v63  ;;  %1029 = vst.msk [vmem:[%s1934_s4 + $0x20] sm:$0xf] %vm1020_vm0, %v1146_v33  ;;  %1024 = vst.msk [vmem:[%s1934_s4 + $0xc] sm:$0xf] %vm1020_vm0, %v1141_v36  ;;  %v1147_v53 = vpack.c.bf16 %v949_v35, %v949_v35  ;;  %v930_v55 = vadd.f32 %v1168_v18, %v854_v37  ;;  %v1368_v60 = vpop.f32.mrb[38].mxu1  ;;  %v848_v63 = vpop.f32.mrb[39].mxu0 }
 0x142   :  { %v878_v59 = vadd.f32 %v877_v51, %v1787_v6  ;;  %v857_v39 = vadd.f32 %v1360_v15, %v1773_v17  ;;  %1032 = vst.msk [vmem:[%s1934_s4 + $0x2c] sm:$0xf] %vm1020_vm0, %v1149_v43  ;;  %1022 = vst.msk [vmem:[%s1934_s4 + $0x4] sm:$0xf] %vm1020_vm0, %v1139_v44  ;;  %v938_v61 = vadd.f32 %v1184_v48, %v886_v45  ;;  %v880_v62 = vpop.f32.mrb[39].mxu1 }
 0x143   :  { %v928_v6 = vadd.f32 %v1164_v56, %v846_v46  ;;  %v889_v17 = vadd.f32 %v1368_v60, %v1829_v50  ;;  %v849_v18 = vadd.f32 %v848_v63, %v1767_v1  ;;  %1030 = vst.msk [vmem:[%s1934_s4 + $0x24] sm:$0xf] %vm1020_vm0, %v1147_v53  ;;  %v946_v3 = vmax.f32 %v930_v55, 0.0 }
 0x144   :  { %v936_v47 = vadd.f32 %v1180_v57, %v878_v59  ;;  %v931_v48 = vadd.f32 %v1169_v58, %v857_v39  ;;  %v881_v4 = vadd.f32 %v880_v62, %v1789_v8  ;;  %v954_v56 = vmax.f32 %v938_v61, 0.0 }
 0x145   :  { %v944_v5 = vmax.f32 %v928_v6, 0.0  ;;  %v939_v1 = vadd.f32 %v1185_v0, %v889_v17  ;;  %v929_v50 = vadd.f32 %v1165_v2, %v849_v18  ;;  %v1144_v7 = vpack.c.bf16 %v946_v3, %v946_v3 }
 0x146   :  { %v952_v10 = vmax.f32 %v936_v47, 0.0  ;;  %v947_v11 = vmax.f32 %v931_v48, 0.0  ;;  %v937_v52 = vadd.f32 %v1181_v9, %v881_v4  ;;  %v1152_v57 = vpack.c.bf16 %v954_v56, %v954_v56 }
 0x147   :  { %v1142_v31 = vpack.c.bf16 %v944_v5, %v944_v5  ;;  %v955_v30 = vmax.f32 %v939_v1, 0.0  ;;  %v945_v58 = vmax.f32 %v929_v50, 0.0  ;;  %1027 = vst.msk [vmem:[%s1934_s4 + $0x18] sm:$0xf] %vm1020_vm0, %v1144_v7 }
 0x148   :  { %v1150_v8 = vpack.c.bf16 %v952_v10, %v952_v10  ;;  %v1145_v32 = vpack.c.bf16 %v947_v11, %v947_v11  ;;  %v953_v0 = vmax.f32 %v937_v52, 0.0  ;;  %1035 = vst.msk [vmem:[%s1934_s4 + $0x38] sm:$0xf] %vm1020_vm0, %v1152_v57 }
 0x149   :  { %1025 = vst.msk [vmem:[%s1934_s4 + $0x10] sm:$0xf] %vm1020_vm0, %v1142_v31  ;;  %v1153_v40 = vpack.c.bf16 %v955_v30, %v955_v30  ;;  %v1143_v41 = vpack.c.bf16 %v945_v58, %v945_v58 }
 0x14a   :  { %1033 = vst.msk [vmem:[%s1934_s4 + $0x30] sm:$0xf] %vm1020_vm0, %v1150_v8  ;;  %1028 = vst.msk [vmem:[%s1934_s4 + $0x1c] sm:$0xf] %vm1020_vm0, %v1145_v32  ;;  %v1151_v2 = vpack.c.bf16 %v953_v0, %v953_v0 }
 0x14b   :  { %1036 = vst.msk [vmem:[%s1934_s4 + $0x3c] sm:$0xf] %vm1020_vm0, %v1153_v40  ;;  %1026 = vst.msk [vmem:[%s1934_s4 + $0x14] sm:$0xf] %vm1020_vm0, %v1143_v41 }
 0x14c   :  { %1034 = vst.msk [vmem:[%s1934_s4 + $0x34] sm:$0xf] %vm1020_vm0, %v1151_v2 }

// kernel: resnet18_forward.27
= control target key start
LH: loop header
LB: loop body
LE: loop exit
PB: predicated region body
PF: predicated region fallthrough
CT: control target
= control target key end

     0   :  { %s970_s1 = inlined_call_operand.vmem [shape: bf16[640,128], index: 1, kind: input, shape index: {}]   ;;  %s971_s0 = inlined_call_operand.vmem [shape: bf16[32,640], index: 0, kind: input, shape index: {}]   ;;  %s972_s2 = inlined_call_operand.vmem [shape: f32[1,128], index: 2, kind: input, shape index: {}]   ;;  %s973_s3 = inlined_call_operand.vmem [shape: bf16[32,128], index: 3, kind: output, shape index: {}]  }
   0x1   :  { %v737_v0 = vld [vmem:[%s970_s1 + $0x40] sm:$0xff]   ;;  %v741_v4 = vld [vmem:[%s970_s1 + $0x48] sm:$0xff]   ;;  %v745_v8 = vld [vmem:[%s970_s1 + $0x50] sm:$0xff]  }
   0x2   :  { %v738_v1 = vld [vmem:[%s970_s1] sm:$0xff]   ;;  %651 = vmatprep.subr.bf16.mxu0 %v737_v0  ;;  %v742_v5 = vld [vmem:[%s970_s1 + $0x8] sm:$0xff]   ;;  %v746_v9 = vld [vmem:[%s970_s1 + $0x10] sm:$0xff]  }
   0x3   :  { %v739_v2 = vld [vmem:[%s970_s1 + $0xc0] sm:$0xff]   ;;  %652 = vmatpush3.bf16.msra.mxu0 %v738_v1  ;;  %v743_v6 = vld [vmem:[%s970_s1 + $0xc8] sm:$0xff]   ;;  %v747_v10 = vld [vmem:[%s970_s1 + $0xd0] sm:$0xff]  }
   0x4   :  { %v740_v3 = vld [vmem:[%s970_s1 + $0x80] sm:$0xff]   ;;  %679 = vmatprep.subr.bf16.mxu1 %v739_v2  ;;  %653 = vmatprep.subr.bf16.mxu0 %v741_v4  ;;  %v744_v7 = vld [vmem:[%s970_s1 + $0x88] sm:$0xff]   ;;  %v748_v11 = vld [vmem:[%s970_s1 + $0x90] sm:$0xff]  }
   0x5   :  { %680 = vmatpush3.bf16.msra.mxu1 %v740_v3  ;;  %v749_v12 = vld [vmem:[%s970_s1 + $0x58] sm:$0xff]   ;;  %v753_v16 = vld [vmem:[%s970_s1 + $0x60] sm:$0xff]   ;;  %v757_v20 = vld [vmem:[%s970_s1 + $0x68] sm:$0xff]  }
   0x6   :  { %681 = vmatprep.subr.bf16.mxu1 %v743_v6  ;;  %v750_v13 = vld [vmem:[%s970_s1 + $0x18] sm:$0xff]   ;;  %v754_v17 = vld [vmem:[%s970_s1 + $0x20] sm:$0xff]   ;;  %v758_v21 = vld [vmem:[%s970_s1 + $0x28] sm:$0xff]  }
   0x7   :  { %654 = vmatpush3.bf16.msra.mxu0 %v742_v5  ;;  %v751_v14 = vld [vmem:[%s970_s1 + $0xd8] sm:$0xff]   ;;  %v755_v18 = vld [vmem:[%s970_s1 + $0xe0] sm:$0xff]   ;;  %v759_v22 = vld [vmem:[%s970_s1 + $0xe8] sm:$0xff]  }
   0x8   :  { %655 = vmatprep.subr.bf16.mxu0 %v745_v8  ;;  %v752_v15 = vld [vmem:[%s970_s1 + $0x98] sm:$0xff]   ;;  %v756_v19 = vld [vmem:[%s970_s1 + $0xa0] sm:$0xff]   ;;  %v760_v23 = vld [vmem:[%s970_s1 + $0xa8] sm:$0xff]  }
   0x9   :  { %682 = vmatpush3.bf16.msra.mxu1 %v744_v7  ;;  %v761_v24 = vld [vmem:[%s970_s1 + $0x70] sm:$0xff]   ;;  %v765_v28 = vld [vmem:[%s970_s1 + $0x78] sm:$0xff]   ;;  %v772_v34 = vld [vmem:[%s970_s1 + $0x100] sm:$0xff]  }
   0xa   :  { %683 = vmatprep.subr.bf16.mxu1 %v747_v10  ;;  %v762_v25 = vld [vmem:[%s970_s1 + $0x30] sm:$0xff]   ;;  %v766_v29 = vld [vmem:[%s970_s1 + $0x38] sm:$0xff]   ;;  %v775_v36 = vld [vmem:[%s971_s0 + $0xc] ss:$20 sps:$4 sm:$0xff]  }
   0xb   :  { %656 = vmatpush3.bf16.msra.mxu0 %v746_v9  ;;  %v763_v26 = vld [vmem:[%s970_s1 + $0xf0] sm:$0xff]   ;;  %v767_v30 = vld [vmem:[%s970_s1 + $0xf8] sm:$0xff]   ;;  %v776_v37 = vld [vmem:[%s970_s1 + $0x108] sm:$0xff]   ;;  %487 = vmatprep.mubr.bf16.mxu1 %v775_v36 }
   0xc   :  { %657 = vmatprep.subr.bf16.mxu0 %v749_v12  ;;  %v764_v27 = vld [vmem:[%s970_s1 + $0xb0] sm:$0xff]   ;;  %v770_v32 = vld [vmem:[%s971_s0 + $0x4] ss:$20 sps:$4 sm:$0xff]   ;;  %v773_v35 = vld [vmem:[%s971_s0 + $0x8] ss:$20 sps:$4 sm:$0xff]  }
   0xd   :  { %684 = vmatpush3.bf16.msra.mxu1 %v748_v11  ;;  %v768_v31 = vld [vmem:[%s971_s0] ss:$20 sps:$4 sm:$0xff]   ;;  %v771_v33 = vld [vmem:[%s970_s1 + $0xb8] sm:$0xff]   ;;  %438 = vmatprep.mubr.bf16.mxu0 %v770_v32  ;;  %v786_v43 = vld [vmem:[%s971_s0 + $0x30] ss:$20 sps:$4 sm:$0xff]  }
   0xe   :  { %685 = vmatprep.subr.bf16.mxu1 %v751_v14  ;;  %v777_v38 = vld [vmem:[%s970_s1 + $0x110] sm:$0xff]   ;;  %v780_v39 = vld [vmem:[%s971_s0 + $0x2c] ss:$20 sps:$4 sm:$0xff]   ;;  %v778_v40 = vld [vmem:[%s970_s1 + $0x118] sm:$0xff]  }
   0xf   :  { %658 = vmatpush3.bf16.msra.mxu0 %v750_v13  ;;  %v783_v41 = vld [vmem:[%s971_s0 + $0x28] ss:$20 sps:$4 sm:$0xff]   ;;  %v779_v44 = vld [vmem:[%s970_s1 + $0x120] sm:$0xff]   ;;  %v787_v47 = vld [vmem:[%s970_s1 + $0x130] sm:$0xff]  }
  0x10   :  { %659 = vmatprep.subr.bf16.mxu0 %v753_v16  ;;  %v784_v42 = vld [vmem:[%s971_s0 + $0x34] ss:$20 sps:$4 sm:$0xff]   ;;  %v789_v45 = vld [vmem:[%s971_s0 + $0x10] ss:$20 sps:$4 sm:$0xff]   ;;  %v788_v48 = vld [vmem:[%s970_s1 + $0x138] sm:$0xff]  }
  0x11   :  { %686 = vmatpush3.bf16.msra.mxu1 %v752_v15  ;;  %v782_v46 = vld [vmem:[%s970_s1 + $0x128] sm:$0xff]   ;;  %v581_v51 = vld [vmem:[%s972_s2] ss:$0 sm:$0xff] }
  0x12   :  { %687 = vmatprep.subr.bf16.mxu1 %v755_v18  ;;  %v790_v49 = vld [vmem:[%s971_s0 + $0x38] ss:$20 sps:$4 sm:$0xff]  }
  0x13   :  { %660 = vmatpush3.bf16.msra.mxu0 %v754_v17 }
  0x14   :  { %661 = vmatprep.subr.bf16.mxu0 %v757_v20 }
  0x15   :  { %688 = vmatpush3.bf16.msra.mxu1 %v756_v19 }
  0x16   :  { %689 = vmatprep.subr.bf16.mxu1 %v759_v22 }
  0x17   :  { %662 = vmatpush3.bf16.msra.mxu0 %v758_v21 }
  0x18   :  { %663 = vmatprep.subr.bf16.mxu0 %v761_v24 }
  0x19   :  { %690 = vmatpush3.bf16.msra.mxu1 %v760_v23 }
  0x1a   :  { %691 = vmatprep.subr.bf16.mxu1 %v763_v26 }
  0x1b   :  { %664 = vmatpush3.bf16.msra.mxu0 %v762_v25 }
  0x1c   :  { %665 = vmatprep.subr.bf16.mxu0 %v765_v28 }
  0x1d   :  { %692 = vmatpush3.bf16.msra.mxu1 %v764_v27 }
  0x1e   :  { %693 = vmatprep.subr.bf16.mxu1 %v767_v30 }
  0x1f   :  { %666 = vmatpush3.bf16.msra.mxu0 %v766_v29 }
  0x20   :  { %717 = vmatprep.subr.bf16.mxu0 %v772_v34 }
  0x21   :  { %694 = vmatpush3.bf16.msra.mxu1 %v771_v33 }
  0x22   :  { %439 = vmatmul.mubr.bf16.vlgmr.msra.gmra.mrb[0].mxu0 %v768_v31 }
  0x23   :  { %718 = vmatpush3.bf16.msra.mxu0 %v772_v34  ;;  %446 = vmatprep.mubr.bf16.mxu0 %v780_v39 }
  0x24   :  { %488 = vmatmul.mubr.bf16.vlgmr.msra.gmra.mrb[0].mxu1 %v773_v35  ;;  %719 = vmatprep.subr.bf16.mxu0 %v776_v37 }
  0x25   :  { %495 = vmatprep.mubr.bf16.mxu1 %v784_v42 }
  0x27   :  { %720 = vmatpush3.bf16.msra.mxu0 %v776_v37 }
  0x28   :  { %721 = vmatprep.subr.bf16.mxu0 %v777_v38 }
  0x2a   :  { %447 = vmatmul.mubr.bf16.gmra.mrb[4].mxu0 %v783_v41 }
  0x2b   :  { %722 = vmatpush3.bf16.msra.mxu0 %v777_v38  ;;  %733 = vmatprep.mubr.bf16.mxu0 %v789_v45 }
  0x2c   :  { %723 = vmatprep.subr.bf16.mxu0 %v778_v40  ;;  %496 = vmatmul.mubr.bf16.gmra.mrb[4].mxu1 %v786_v43 }
  0x2f   :  { %724 = vmatpush3.bf16.msra.mxu0 %v778_v40 }
  0x30   :  { %725 = vmatprep.subr.bf16.mxu0 %v779_v44 }
  0x33   :  { %726 = vmatpush3.bf16.msra.mxu0 %v779_v44 }
  0x34   :  { %727 = vmatprep.subr.bf16.mxu0 %v782_v46 }
  0x37   :  { %728 = vmatpush3.bf16.msra.mxu0 %v782_v46 }
  0x38   :  { %729 = vmatprep.subr.bf16.mxu0 %v787_v47 }
  0x3b   :  { %730 = vmatpush3.bf16.msra.mxu0 %v787_v47 }
  0x3c   :  { %731 = vmatprep.subr.bf16.mxu0 %v788_v48 }
  0x3f   :  { %732 = vmatpush3.bf16.msra.mxu0 %v788_v48 }
  0x42   :  { %734 = vmatmul.mubr.bf16.vlgmr.msra.gmra.mrb[8].mxu0 %v790_v49 }
  0xf5   :  { %v667_v50 = vpop.f32.mrb[0].mxu0 }
  0xf6   :  { %v668_v52 = vpop.f32.mrb[1].mxu0 }
  0xf7   :  { %v669_v53 = vadd.f32 %v668_v52, %v667_v50  ;;  %v670_v54 = vpop.f32.mrb[2].mxu0  ;;  %v695_v55 = vpop.f32.mrb[0].mxu1 }
  0xf8   :  { %v671_v56 = vpop.f32.mrb[3].mxu0  ;;  %v696_v59 = vpop.f32.mrb[1].mxu1 }
  0xf9   :  { %v441_v57 = vadd.f32 %v669_v53, %v581_v51  ;;  %v672_v58 = vadd.f32 %v671_v56, %v670_v54  ;;  %v697_v60 = vadd.f32 %v696_v59, %v695_v55  ;;  %v698_v61 = vpop.f32.mrb[2].mxu1 }
  0xfa   :  { %v699_v63 = vpop.f32.mrb[3].mxu1 }
  0xfb   :  { %v444_v62 = vadd.f32 %v672_v58, %v581_v51  ;;  %v700_v0 = vadd.f32 %v699_v63, %v698_v61  ;;  %v490_v1 = vadd.f32 %v697_v60, %v441_v57 }
  0xfd   :  { %v673_v2 = vpop.f32.mrb[4].mxu0  ;;  %v493_v4 = vadd.f32 %v700_v0, %v444_v62 }
  0xfe   :  { %v674_v3 = vpop.f32.mrb[5].mxu0 }
  0xff   :  { %v675_v5 = vadd.f32 %v674_v3, %v673_v2  ;;  %v676_v6 = vpop.f32.mrb[6].mxu0  ;;  %v701_v7 = vpop.f32.mrb[4].mxu1 }
 0x100   :  { %v677_v8 = vpop.f32.mrb[7].mxu0  ;;  %v702_v11 = vpop.f32.mrb[5].mxu1 }
 0x101   :  { %v449_v9 = vadd.f32 %v675_v5, %v581_v51  ;;  %v678_v10 = vadd.f32 %v677_v8, %v676_v6  ;;  %v703_v12 = vadd.f32 %v702_v11, %v701_v7  ;;  %v704_v13 = vpop.f32.mrb[6].mxu1 }
 0x102   :  { %v705_v15 = vpop.f32.mrb[7].mxu1 }
 0x103   :  { %v452_v14 = vadd.f32 %v678_v10, %v581_v51  ;;  %v706_v16 = vadd.f32 %v705_v15, %v704_v13  ;;  %v498_v17 = vadd.f32 %v703_v12, %v449_v9 }
 0x105   :  { %v501_v18 = vadd.f32 %v706_v16, %v452_v14 }
 0x115   :  { %v735_v19 = vpop.f32.mrb[8].mxu0 }
 0x116   :  { %v547_v20 = vadd.f32 %v735_v19, %v498_v17  ;;  %v538_v21 = vpop.f32.mrb[9].mxu0 }
 0x117   :  { %v539_v22 = vadd.f32 %v538_v21, %v490_v1  ;;  %v736_v23 = vpop.f32.mrb[10].mxu0 }
 0x118   :  { %v550_v24 = vadd.f32 %v736_v23, %v501_v18  ;;  %v541_v25 = vpop.f32.mrb[11].mxu0  ;;  %v555_v27 = vmax.f32 %v547_v20, 0.0 }
 0x119   :  { %v542_v26 = vadd.f32 %v541_v25, %v493_v4  ;;  %v553_v29 = vmax.f32 %v539_v22, 0.0 }
 0x11a   :  { %v556_v28 = vmax.f32 %v550_v24, 0.0 }
 0x11b   :  { %v554_v30 = vmax.f32 %v542_v26, 0.0 }
 0x11c   :  { %v648_v31 = vpack.c.bf16 %v556_v28, %v555_v27 }
 0x11d   :  { %v643_v32 = vpack.c.bf16 %v554_v30, %v553_v29 }
 0x11e   :  { %650 = vst [vmem:[%s973_s3 + $0x8] sm:$0xff] %v648_v31  }
 0x11f   :  { %644 = vst [vmem:[%s973_s3] sm:$0xff] %v643_v32  }

// kernel: resnet18_forward.26
= control target key start
LH: loop header
LB: loop body
LE: loop exit
PB: predicated region body
PF: predicated region fallthrough
CT: control target
= control target key end

     0   :  { %s304_s1 = inlined_call_operand.vmem [shape: bf16[128,128], index: 1, kind: input, shape index: {}]   ;;  %s305_s0 = inlined_call_operand.vmem [shape: bf16[32,128], index: 0, kind: input, shape index: {}]   ;;  %s306_s2 = inlined_call_operand.vmem [shape: f32[1,128], index: 2, kind: input, shape index: {}]   ;;  %s307_s3 = inlined_call_operand.vmem [shape: bf16[32,128], index: 3, kind: output, shape index: {}]  }
   0x1   :  { %v235_v0 = vld [vmem:[%s304_s1] sm:$0xff]   ;;  %v236_v1 = vld [vmem:[%s304_s1 + $0x8] sm:$0xff]   ;;  %v237_v2 = vld [vmem:[%s304_s1 + $0x10] sm:$0xff]  }
   0x2   :  { %215 = vmatprep.subr.bf16.mxu0 %v235_v0  ;;  %v238_v3 = vld [vmem:[%s304_s1 + $0x18] sm:$0xff]   ;;  %v243_v4 = vld [vmem:[%s305_s0] sm:$0xff]   ;;  %v240_v6 = vld [vmem:[%s304_s1 + $0x28] sm:$0xff]  }
   0x3   :  { %216 = vmatpush3.bf16.msra.mxu0 %v235_v0  ;;  %231 = vmatprep.mubr.bf16.mxu0 %v243_v4  ;;  %v239_v5 = vld [vmem:[%s304_s1 + $0x20] sm:$0xff]   ;;  %v241_v7 = vld [vmem:[%s304_s1 + $0x30] sm:$0xff]   ;;  %v242_v8 = vld [vmem:[%s304_s1 + $0x38] sm:$0xff]  }
   0x4   :  { %217 = vmatprep.subr.bf16.mxu0 %v236_v1  ;;  %v244_v9 = vld [vmem:[%s305_s0 + $0x8] sm:$0xff]   ;;  %v175_v11 = vld [vmem:[%s306_s2] ss:$0 sm:$0xff] }
   0x7   :  { %218 = vmatpush3.bf16.msra.mxu0 %v236_v1 }
   0x8   :  { %219 = vmatprep.subr.bf16.mxu0 %v237_v2 }
   0xb   :  { %220 = vmatpush3.bf16.msra.mxu0 %v237_v2 }
   0xc   :  { %221 = vmatprep.subr.bf16.mxu0 %v238_v3 }
   0xf   :  { %222 = vmatpush3.bf16.msra.mxu0 %v238_v3 }
  0x10   :  { %223 = vmatprep.subr.bf16.mxu0 %v239_v5 }
  0x13   :  { %224 = vmatpush3.bf16.msra.mxu0 %v239_v5 }
  0x14   :  { %225 = vmatprep.subr.bf16.mxu0 %v240_v6 }
  0x17   :  { %226 = vmatpush3.bf16.msra.mxu0 %v240_v6 }
  0x18   :  { %227 = vmatprep.subr.bf16.mxu0 %v241_v7 }
  0x1b   :  { %228 = vmatpush3.bf16.msra.mxu0 %v241_v7 }
  0x1c   :  { %229 = vmatprep.subr.bf16.mxu0 %v242_v8 }
  0x1f   :  { %230 = vmatpush3.bf16.msra.mxu0 %v242_v8 }
  0x22   :  { %232 = vmatmul.mubr.bf16.vlgmr.msra.gmra.mrb[0].mxu0 %v244_v9 }
  0xf5   :  { %v233_v10 = vpop.f32.mrb[0].mxu0 }
  0xf6   :  { %v136_v12 = vpop.f32.mrb[1].mxu0  ;;  %v145_v14 = vadd.f32 %v233_v10, %v175_v11 }
  0xf7   :  { %v234_v13 = vpop.f32.mrb[2].mxu0  ;;  %v137_v17 = vadd.f32 %v175_v11, %v136_v12 }
  0xf8   :  { %v148_v15 = vadd.f32 %v234_v13, %v175_v11  ;;  %v139_v16 = vpop.f32.mrb[3].mxu0 }
  0xf9   :  { %v140_v18 = vadd.f32 %v175_v11, %v139_v16 }
  0xfa   :  { %v202_v19 = vpack.c.bf16 %v148_v15, %v145_v14 }
  0xfb   :  { %v197_v20 = vpack.c.bf16 %v140_v18, %v137_v17 }
  0xfc   :  { %204 = vst [vmem:[%s307_s3 + $0x8] sm:$0xff] %v202_v19  }
  0xfd   :  { %198 = vst [vmem:[%s307_s3] sm:$0xff] %v197_v20  }

// kernel: resnet18_forward.29
= control target key start
LH: loop header
LB: loop body
LE: loop exit
PB: predicated region body
PF: predicated region fallthrough
CT: control target
= control target key end

     0   :  { %s1632_s1 = inlined_call_operand.vmem [shape: bf16[1152,128], index: 1, kind: input, shape index: {}]   ;;  %s1633_s0 = inlined_call_operand.vmem [shape: bf16[32,1152], index: 0, kind: input, shape index: {}]   ;;  %s1634_s2 = inlined_call_operand.vmem [shape: f32[1,128], index: 2, kind: input, shape index: {}]   ;;  %s1635_s3 = inlined_call_operand.vmem [shape: bf16[32,128], index: 3, kind: output, shape index: {}]  }
   0x1   :  { %v1235_v0 = vld [vmem:[%s1632_s1 + $0x40] sm:$0xff]   ;;  %v1239_v4 = vld [vmem:[%s1632_s1 + $0x48] sm:$0xff]   ;;  %v1243_v8 = vld [vmem:[%s1632_s1 + $0x50] sm:$0xff]  }
   0x2   :  { %v1236_v1 = vld [vmem:[%s1632_s1] sm:$0xff]   ;;  %1093 = vmatprep.subr.bf16.mxu0 %v1235_v0  ;;  %v1240_v5 = vld [vmem:[%s1632_s1 + $0x8] sm:$0xff]   ;;  %v1244_v9 = vld [vmem:[%s1632_s1 + $0x10] sm:$0xff]  }
   0x3   :  { %v1237_v2 = vld [vmem:[%s1632_s1 + $0xc0] sm:$0xff]   ;;  %1094 = vmatpush3.bf16.msra.mxu0 %v1236_v1  ;;  %v1241_v6 = vld [vmem:[%s1632_s1 + $0xc8] sm:$0xff]   ;;  %v1245_v10 = vld [vmem:[%s1632_s1 + $0xd0] sm:$0xff]  }
   0x4   :  { %v1238_v3 = vld [vmem:[%s1632_s1 + $0x80] sm:$0xff]   ;;  %1121 = vmatprep.subr.bf16.mxu1 %v1237_v2  ;;  %1095 = vmatprep.subr.bf16.mxu0 %v1239_v4  ;;  %v1242_v7 = vld [vmem:[%s1632_s1 + $0x88] sm:$0xff]   ;;  %v1246_v11 = vld [vmem:[%s1632_s1 + $0x90] sm:$0xff]  }
   0x5   :  { %1122 = vmatpush3.bf16.msra.mxu1 %v1238_v3  ;;  %v1247_v12 = vld [vmem:[%s1632_s1 + $0x58] sm:$0xff]   ;;  %v1251_v16 = vld [vmem:[%s1632_s1 + $0x60] sm:$0xff]   ;;  %v1255_v20 = vld [vmem:[%s1632_s1 + $0x68] sm:$0xff]  }
   0x6   :  { %1123 = vmatprep.subr.bf16.mxu1 %v1241_v6  ;;  %v1248_v13 = vld [vmem:[%s1632_s1 + $0x18] sm:$0xff]   ;;  %v1252_v17 = vld [vmem:[%s1632_s1 + $0x20] sm:$0xff]   ;;  %v1256_v21 = vld [vmem:[%s1632_s1 + $0x28] sm:$0xff]  }
   0x7   :  { %1096 = vmatpush3.bf16.msra.mxu0 %v1240_v5  ;;  %v1249_v14 = vld [vmem:[%s1632_s1 + $0xd8] sm:$0xff]   ;;  %v1253_v18 = vld [vmem:[%s1632_s1 + $0xe0] sm:$0xff]   ;;  %v1257_v22 = vld [vmem:[%s1632_s1 + $0xe8] sm:$0xff]  }
   0x8   :  { %1097 = vmatprep.subr.bf16.mxu0 %v1243_v8  ;;  %v1250_v15 = vld [vmem:[%s1632_s1 + $0x98] sm:$0xff]   ;;  %v1254_v19 = vld [vmem:[%s1632_s1 + $0xa0] sm:$0xff]   ;;  %v1258_v23 = vld [vmem:[%s1632_s1 + $0xa8] sm:$0xff]  }
   0x9   :  { %1124 = vmatpush3.bf16.msra.mxu1 %v1242_v7  ;;  %v1259_v24 = vld [vmem:[%s1632_s1 + $0x70] sm:$0xff]   ;;  %v1263_v28 = vld [vmem:[%s1632_s1 + $0x78] sm:$0xff]   ;;  %v1266_v31 = vld [vmem:[%s1633_s0] ss:$36 sps:$4 sm:$0xff]  }
   0xa   :  { %1125 = vmatprep.subr.bf16.mxu1 %v1245_v10  ;;  %v1260_v25 = vld [vmem:[%s1632_s1 + $0x30] sm:$0xff]   ;;  %v1264_v29 = vld [vmem:[%s1632_s1 + $0x38] sm:$0xff]   ;;  %v1268_v32 = vld [vmem:[%s1633_s0 + $0x4] ss:$36 sps:$4 sm:$0xff]  }
   0xb   :  { %1098 = vmatpush3.bf16.msra.mxu0 %v1244_v9  ;;  %v1261_v26 = vld [vmem:[%s1632_s1 + $0xf0] sm:$0xff]   ;;  %v1265_v30 = vld [vmem:[%s1632_s1 + $0xf8] sm:$0xff]   ;;  %742 = vmatprep.mubr.bf16.mxu0 %v1268_v32  ;;  %v1270_v34 = vld [vmem:[%s1632_s1 + $0x140] sm:$0xff]  }
   0xc   :  { %1099 = vmatprep.subr.bf16.mxu0 %v1247_v12  ;;  %v1262_v27 = vld [vmem:[%s1632_s1 + $0xb0] sm:$0xff]   ;;  %v1269_v33 = vld [vmem:[%s1632_s1 + $0xb8] sm:$0xff]   ;;  %v1271_v35 = vld [vmem:[%s1633_s0 + $0x8] ss:$36 sps:$4 sm:$0xff]  }
   0xd   :  { %1126 = vmatpush3.bf16.msra.mxu1 %v1246_v11  ;;  %v1273_v36 = vld [vmem:[%s1633_s0 + $0xc] ss:$36 sps:$4 sm:$0xff]   ;;  %v1274_v37 = vld [vmem:[%s1632_s1 + $0x100] sm:$0xff]   ;;  %v1285_v48 = vld [vmem:[%s1632_s1 + $0x158] sm:$0xff]  }
   0xe   :  { %1127 = vmatprep.subr.bf16.mxu1 %v1249_v14  ;;  %791 = vmatprep.mubr.bf16.mxu1 %v1273_v36  ;;  %v1275_v38 = vld [vmem:[%s1632_s1 + $0x1c0] sm:$0xff]   ;;  %v1277_v40 = vld [vmem:[%s1632_s1 + $0x148] sm:$0xff]   ;;  %v1281_v44 = vld [vmem:[%s1632_s1 + $0x150] sm:$0xff]  }
   0xf   :  { %1100 = vmatpush3.bf16.msra.mxu0 %v1248_v13  ;;  %v1276_v39 = vld [vmem:[%s1632_s1 + $0x180] sm:$0xff]   ;;  %v1278_v41 = vld [vmem:[%s1632_s1 + $0x108] sm:$0xff]   ;;  %v1282_v45 = vld [vmem:[%s1632_s1 + $0x110] sm:$0xff]  }
  0x10   :  { %1101 = vmatprep.subr.bf16.mxu0 %v1251_v16  ;;  %v1279_v42 = vld [vmem:[%s1632_s1 + $0x1c8] sm:$0xff]   ;;  %v1283_v46 = vld [vmem:[%s1632_s1 + $0x1d0] sm:$0xff]   ;;  %v1286_v49 = vld [vmem:[%s1632_s1 + $0x118] sm:$0xff]  }
  0x11   :  { %1128 = vmatpush3.bf16.msra.mxu1 %v1250_v15  ;;  %v1280_v43 = vld [vmem:[%s1632_s1 + $0x188] sm:$0xff]   ;;  %v1284_v47 = vld [vmem:[%s1632_s1 + $0x190] sm:$0xff]   ;;  %v1287_v50 = vld [vmem:[%s1632_s1 + $0x1d8] sm:$0xff]  }
  0x12   :  { %1129 = vmatprep.subr.bf16.mxu1 %v1253_v18  ;;  %v1288_v51 = vld [vmem:[%s1632_s1 + $0x198] sm:$0xff]   ;;  %v1289_v52 = vld [vmem:[%s1632_s1 + $0x160] sm:$0xff]   ;;  %v1293_v56 = vld [vmem:[%s1632_s1 + $0x168] sm:$0xff]  }
  0x13   :  { %1102 = vmatpush3.bf16.msra.mxu0 %v1252_v17  ;;  %v1290_v53 = vld [vmem:[%s1632_s1 + $0x120] sm:$0xff]   ;;  %v1294_v57 = vld [vmem:[%s1633_s0 + $0x4c] ss:$36 sps:$4 sm:$0xff]   ;;  %v1299_v61 = vld [vmem:[%s1633_s0 + $0x54] ss:$36 sps:$4 sm:$0xff]  }
  0x14   :  { %1103 = vmatprep.subr.bf16.mxu0 %v1255_v20  ;;  %v1291_v54 = vld [vmem:[%s1632_s1 + $0x1e0] sm:$0xff]   ;;  %v1296_v58 = vld [vmem:[%s1632_s1 + $0x128] sm:$0xff]   ;;  %v1302_v63 = vld [vmem:[%s1633_s0 + $0x50] ss:$36 sps:$4 sm:$0xff]  }
  0x15   :  { %1130 = vmatpush3.bf16.msra.mxu1 %v1254_v19  ;;  %v1292_v55 = vld [vmem:[%s1632_s1 + $0x1a0] sm:$0xff]   ;;  %v1297_v59 = vld [vmem:[%s1633_s0 + $0x48] ss:$36 sps:$4 sm:$0xff]   ;;  %v1303_v0 = vld [vmem:[%s1632_s1 + $0x170] sm:$0xff]  }
  0x16   :  { %1131 = vmatprep.subr.bf16.mxu1 %v1257_v22  ;;  %v1298_v60 = vld [vmem:[%s1632_s1 + $0x1e8] sm:$0xff]   ;;  %v1304_v1 = vld [vmem:[%s1632_s1 + $0x130] sm:$0xff]   ;;  %v1307_v4 = vld [vmem:[%s1632_s1 + $0x178] sm:$0xff]  }
  0x17   :  { %1104 = vmatpush3.bf16.msra.mxu0 %v1256_v21  ;;  %v1301_v62 = vld [vmem:[%s1632_s1 + $0x1a8] sm:$0xff]   ;;  %v1305_v2 = vld [vmem:[%s1632_s1 + $0x1f0] sm:$0xff]   ;;  %v1308_v5 = vld [vmem:[%s1632_s1 + $0x138] sm:$0xff]  }
  0x18   :  { %1105 = vmatprep.subr.bf16.mxu0 %v1259_v24  ;;  %v1306_v3 = vld [vmem:[%s1632_s1 + $0x1b0] sm:$0xff]   ;;  %v1309_v6 = vld [vmem:[%s1632_s1 + $0x1f8] sm:$0xff]   ;;  %v1314_v10 = vld [vmem:[%s1632_s1 + $0x200] sm:$0xff]  }
  0x19   :  { %1132 = vmatpush3.bf16.msra.mxu1 %v1258_v23  ;;  %v1310_v7 = vld [vmem:[%s1633_s0 + $0x10] ss:$36 sps:$4 sm:$0xff]   ;;  %v1313_v9 = vld [vmem:[%s1632_s1 + $0x1b8] sm:$0xff]   ;;  %v1318_v13 = vld [vmem:[%s1632_s1 + $0x208] sm:$0xff]  }
  0x1a   :  { %1133 = vmatprep.subr.bf16.mxu1 %v1261_v26  ;;  %v1312_v8 = vld [vmem:[%s1633_s0 + $0x14] ss:$36 sps:$4 sm:$0xff]   ;;  %v1317_v12 = vld [vmem:[%s1633_s0 + $0x1c] ss:$36 sps:$4 sm:$0xff]   ;;  %v1323_v17 = vld [vmem:[%s1633_s0 + $0x64] ss:$36 sps:$4 sm:$0xff]  }
  0x1b   :  { %1106 = vmatpush3.bf16.msra.mxu0 %v1260_v25  ;;  %v1315_v11 = vld [vmem:[%s1633_s0 + $0x18] ss:$36 sps:$4 sm:$0xff]   ;;  %v1322_v16 = vld [vmem:[%s1632_s1 + $0x210] sm:$0xff]   ;;  %v1325_v18 = vld [vmem:[%s1633_s0 + $0x60] ss:$36 sps:$4 sm:$0xff]  }
  0x1c   :  { %1107 = vmatprep.subr.bf16.mxu0 %v1263_v28  ;;  %v1319_v14 = vld [vmem:[%s1633_s0 + $0x5c] ss:$36 sps:$4 sm:$0xff]   ;;  %v1328_v22 = vld [vmem:[%s1632_s1 + $0x228] sm:$0xff]   ;;  %v1329_v23 = vld [vmem:[%s1632_s1 + $0x230] sm:$0xff]  }
  0x1d   :  { %1134 = vmatpush3.bf16.msra.mxu1 %v1262_v27  ;;  %v1321_v15 = vld [vmem:[%s1633_s0 + $0x58] ss:$36 sps:$4 sm:$0xff]   ;;  %v1327_v20 = vld [vmem:[%s1632_s1 + $0x220] sm:$0xff]   ;;  %v1332_v25 = vld [vmem:[%s1633_s0 + $0x68] ss:$36 sps:$4 sm:$0xff]  }
  0x1e   :  { %1135 = vmatprep.subr.bf16.mxu1 %v1265_v30  ;;  %v1326_v19 = vld [vmem:[%s1632_s1 + $0x218] sm:$0xff]   ;;  %v1331_v21 = vld [vmem:[%s1633_s0 + $0x20] ss:$36 sps:$4 sm:$0xff]  }
  0x1f   :  { %1108 = vmatpush3.bf16.msra.mxu0 %v1264_v29  ;;  %v1330_v24 = vld [vmem:[%s1632_s1 + $0x238] sm:$0xff]   ;;  %v983_v27 = vld [vmem:[%s1634_s2] ss:$0 sm:$0xff] }
  0x20   :  { %1149 = vmatprep.subr.bf16.mxu0 %v1270_v34 }
  0x21   :  { %1136 = vmatpush3.bf16.msra.mxu1 %v1269_v33 }
  0x22   :  { %743 = vmatmul.mubr.bf16.vlgmr.msra.gmra.mrb[0].mxu0 %v1266_v31  ;;  %1177 = vmatprep.subr.bf16.mxu1 %v1275_v38 }
  0x23   :  { %1150 = vmatpush3.bf16.msra.mxu0 %v1274_v37  ;;  %750 = vmatprep.mubr.bf16.mxu0 %v1294_v57 }
  0x24   :  { %792 = vmatmul.mubr.bf16.vlgmr.msra.gmra.mrb[0].mxu1 %v1271_v35  ;;  %1151 = vmatprep.subr.bf16.mxu0 %v1277_v40 }
  0x25   :  { %1178 = vmatpush3.bf16.msra.mxu1 %v1276_v39  ;;  %799 = vmatprep.mubr.bf16.mxu1 %v1299_v61 }
  0x26   :  { %1179 = vmatprep.subr.bf16.mxu1 %v1279_v42 }
  0x27   :  { %1152 = vmatpush3.bf16.msra.mxu0 %v1278_v41 }
  0x28   :  { %1153 = vmatprep.subr.bf16.mxu0 %v1281_v44 }
  0x29   :  { %1180 = vmatpush3.bf16.msra.mxu1 %v1280_v43 }
  0x2a   :  { %1181 = vmatprep.subr.bf16.mxu1 %v1283_v46  ;;  %751 = vmatmul.mubr.bf16.gmra.mrb[4].mxu0 %v1297_v59 }
  0x2b   :  { %1154 = vmatpush3.bf16.msra.mxu0 %v1282_v45  ;;  %840 = vmatprep.mubr.bf16.mxu0 %v1312_v8 }
  0x2c   :  { %1155 = vmatprep.subr.bf16.mxu0 %v1285_v48  ;;  %800 = vmatmul.mubr.bf16.gmra.mrb[4].mxu1 %v1302_v63 }
  0x2d   :  { %1182 = vmatpush3.bf16.msra.mxu1 %v1284_v47  ;;  %889 = vmatprep.mubr.bf16.mxu1 %v1317_v12 }
  0x2e   :  { %1183 = vmatprep.subr.bf16.mxu1 %v1287_v50 }
  0x2f   :  { %1156 = vmatpush3.bf16.msra.mxu0 %v1286_v49 }
  0x30   :  { %1157 = vmatprep.subr.bf16.mxu0 %v1289_v52 }
  0x31   :  { %1184 = vmatpush3.bf16.msra.mxu1 %v1288_v51 }
  0x32   :  { %1185 = vmatprep.subr.bf16.mxu1 %v1291_v54 }
  0x33   :  { %1158 = vmatpush3.bf16.msra.mxu0 %v1290_v53 }
  0x34   :  { %1159 = vmatprep.subr.bf16.mxu0 %v1293_v56 }
  0x35   :  { %1186 = vmatpush3.bf16.msra.mxu1 %v1292_v55 }
  0x36   :  { %1187 = vmatprep.subr.bf16.mxu1 %v1298_v60 }
  0x37   :  { %1160 = vmatpush3.bf16.msra.mxu0 %v1296_v58 }
  0x38   :  { %1161 = vmatprep.subr.bf16.mxu0 %v1303_v0 }
  0x39   :  { %1188 = vmatpush3.bf16.msra.mxu1 %v1301_v62 }
  0x3a   :  { %1189 = vmatprep.subr.bf16.mxu1 %v1305_v2 }
  0x3b   :  { %1162 = vmatpush3.bf16.msra.mxu0 %v1304_v1 }
  0x3c   :  { %1163 = vmatprep.subr.bf16.mxu0 %v1307_v4 }
  0x3d   :  { %1190 = vmatpush3.bf16.msra.mxu1 %v1306_v3 }
  0x3e   :  { %1191 = vmatprep.subr.bf16.mxu1 %v1309_v6 }
  0x3f   :  { %1164 = vmatpush3.bf16.msra.mxu0 %v1308_v5 }
  0x40   :  { %1215 = vmatprep.subr.bf16.mxu0 %v1314_v10 }
  0x41   :  { %1192 = vmatpush3.bf16.msra.mxu1 %v1313_v9 }
  0x42   :  { %841 = vmatmul.mubr.bf16.vlgmr.msra.gmra.mrb[8].mxu0 %v1310_v7 }
  0x43   :  { %1216 = vmatpush3.bf16.msra.mxu0 %v1314_v10  ;;  %848 = vmatprep.mubr.bf16.mxu0 %v1319_v14 }
  0x44   :  { %890 = vmatmul.mubr.bf16.vlgmr.msra.gmra.mrb[8].mxu1 %v1315_v11  ;;  %1217 = vmatprep.subr.bf16.mxu0 %v1318_v13 }
  0x45   :  { %897 = vmatprep.mubr.bf16.mxu1 %v1323_v17 }
  0x47   :  { %1218 = vmatpush3.bf16.msra.mxu0 %v1318_v13 }
  0x48   :  { %1219 = vmatprep.subr.bf16.mxu0 %v1322_v16 }
  0x4a   :  { %849 = vmatmul.mubr.bf16.gmra.mrb[12].mxu0 %v1321_v15 }
  0x4b   :  { %1220 = vmatpush3.bf16.msra.mxu0 %v1322_v16  ;;  %1231 = vmatprep.mubr.bf16.mxu0 %v1331_v21 }
  0x4c   :  { %898 = vmatmul.mubr.bf16.gmra.mrb[12].mxu1 %v1325_v18  ;;  %1221 = vmatprep.subr.bf16.mxu0 %v1326_v19 }
  0x4f   :  { %1222 = vmatpush3.bf16.msra.mxu0 %v1326_v19 }
  0x50   :  { %1223 = vmatprep.subr.bf16.mxu0 %v1327_v20 }
  0x53   :  { %1224 = vmatpush3.bf16.msra.mxu0 %v1327_v20 }
  0x54   :  { %1225 = vmatprep.subr.bf16.mxu0 %v1328_v22 }
  0x57   :  { %1226 = vmatpush3.bf16.msra.mxu0 %v1328_v22 }
  0x58   :  { %1227 = vmatprep.subr.bf16.mxu0 %v1329_v23 }
  0x5b   :  { %1228 = vmatpush3.bf16.msra.mxu0 %v1329_v23 }
  0x5c   :  { %1229 = vmatprep.subr.bf16.mxu0 %v1330_v24 }
  0x5f   :  { %1230 = vmatpush3.bf16.msra.mxu0 %v1330_v24 }
  0x62   :  { %1232 = vmatmul.mubr.bf16.vlgmr.msra.gmra.mrb[16].mxu0 %v1332_v25 }
  0xf5   :  { %v1109_v26 = vpop.f32.mrb[0].mxu0 }
  0xf6   :  { %v1110_v28 = vpop.f32.mrb[1].mxu0 }
  0xf7   :  { %v1111_v29 = vadd.f32 %v1110_v28, %v1109_v26  ;;  %v1112_v30 = vpop.f32.mrb[2].mxu0  ;;  %v1137_v31 = vpop.f32.mrb[0].mxu1 }
  0xf8   :  { %v1113_v32 = vpop.f32.mrb[3].mxu0  ;;  %v1138_v35 = vpop.f32.mrb[1].mxu1 }
  0xf9   :  { %v745_v33 = vadd.f32 %v1111_v29, %v983_v27  ;;  %v1114_v34 = vadd.f32 %v1113_v32, %v1112_v30  ;;  %v1139_v36 = vadd.f32 %v1138_v35, %v1137_v31  ;;  %v1140_v37 = vpop.f32.mrb[2].mxu1 }
  0xfa   :  { %v1141_v39 = vpop.f32.mrb[3].mxu1 }
  0xfb   :  { %v748_v38 = vadd.f32 %v1114_v34, %v983_v27  ;;  %v794_v40 = vadd.f32 %v1139_v36, %v745_v33  ;;  %v1142_v41 = vadd.f32 %v1141_v39, %v1140_v37 }
  0xfd   :  { %v797_v42 = vadd.f32 %v1142_v41, %v748_v38  ;;  %v1115_v43 = vpop.f32.mrb[4].mxu0 }
  0xfe   :  { %v1116_v44 = vpop.f32.mrb[5].mxu0 }
  0xff   :  { %v1117_v45 = vadd.f32 %v1116_v44, %v1115_v43  ;;  %v1118_v46 = vpop.f32.mrb[6].mxu0  ;;  %v1143_v47 = vpop.f32.mrb[4].mxu1 }
 0x100   :  { %v1119_v48 = vpop.f32.mrb[7].mxu0  ;;  %v1144_v51 = vpop.f32.mrb[5].mxu1 }
 0x101   :  { %v753_v49 = vadd.f32 %v1117_v45, %v983_v27  ;;  %v1120_v50 = vadd.f32 %v1119_v48, %v1118_v46  ;;  %v1145_v52 = vadd.f32 %v1144_v51, %v1143_v47  ;;  %v1146_v53 = vpop.f32.mrb[6].mxu1 }
 0x102   :  { %v1147_v55 = vpop.f32.mrb[7].mxu1 }
 0x103   :  { %v756_v54 = vadd.f32 %v1120_v50, %v983_v27  ;;  %v802_v56 = vadd.f32 %v1145_v52, %v753_v49  ;;  %v1148_v57 = vadd.f32 %v1147_v55, %v1146_v53 }
 0x105   :  { %v805_v58 = vadd.f32 %v1148_v57, %v756_v54 }
 0x115   :  { %v1165_v59 = vpop.f32.mrb[8].mxu0 }
 0x116   :  { %v1166_v60 = vpop.f32.mrb[9].mxu0 }
 0x117   :  { %v1167_v61 = vadd.f32 %v1166_v60, %v1165_v59  ;;  %v1168_v62 = vpop.f32.mrb[10].mxu0  ;;  %v1193_v63 = vpop.f32.mrb[8].mxu1 }
 0x118   :  { %v1169_v0 = vpop.f32.mrb[11].mxu0  ;;  %v1194_v3 = vpop.f32.mrb[9].mxu1 }
 0x119   :  { %v843_v1 = vadd.f32 %v1167_v61, %v794_v40  ;;  %v1170_v2 = vadd.f32 %v1169_v0, %v1168_v62  ;;  %v1195_v4 = vadd.f32 %v1194_v3, %v1193_v63  ;;  %v1196_v5 = vpop.f32.mrb[10].mxu1 }
 0x11a   :  { %v1197_v7 = vpop.f32.mrb[11].mxu1 }
 0x11b   :  { %v846_v6 = vadd.f32 %v1170_v2, %v797_v42  ;;  %v1198_v8 = vadd.f32 %v1197_v7, %v1196_v5  ;;  %v892_v9 = vadd.f32 %v1195_v4, %v843_v1 }
 0x11d   :  { %v1171_v10 = vpop.f32.mrb[12].mxu0  ;;  %v895_v12 = vadd.f32 %v1198_v8, %v846_v6 }
 0x11e   :  { %v1172_v11 = vpop.f32.mrb[13].mxu0 }
 0x11f   :  { %v1173_v13 = vadd.f32 %v1172_v11, %v1171_v10  ;;  %v1174_v14 = vpop.f32.mrb[14].mxu0  ;;  %v1199_v15 = vpop.f32.mrb[12].mxu1 }
 0x120   :  { %v1175_v16 = vpop.f32.mrb[15].mxu0  ;;  %v1200_v19 = vpop.f32.mrb[13].mxu1 }
 0x121   :  { %v851_v17 = vadd.f32 %v1173_v13, %v802_v56  ;;  %v1176_v18 = vadd.f32 %v1175_v16, %v1174_v14  ;;  %v1201_v20 = vadd.f32 %v1200_v19, %v1199_v15  ;;  %v1202_v21 = vpop.f32.mrb[14].mxu1 }
 0x122   :  { %v1203_v23 = vpop.f32.mrb[15].mxu1 }
 0x123   :  { %v854_v22 = vadd.f32 %v1176_v18, %v805_v58  ;;  %v1204_v24 = vadd.f32 %v1203_v23, %v1202_v21  ;;  %v900_v25 = vadd.f32 %v1201_v20, %v851_v17 }
 0x125   :  { %v903_v26 = vadd.f32 %v1204_v24, %v854_v22 }
 0x135   :  { %v1233_v27 = vpop.f32.mrb[16].mxu0 }
 0x136   :  { %v949_v28 = vadd.f32 %v1233_v27, %v900_v25  ;;  %v940_v29 = vpop.f32.mrb[17].mxu0 }
 0x137   :  { %v941_v30 = vadd.f32 %v940_v29, %v892_v9  ;;  %v1234_v31 = vpop.f32.mrb[18].mxu0 }
 0x138   :  { %v952_v32 = vadd.f32 %v1234_v31, %v903_v26  ;;  %v943_v33 = vpop.f32.mrb[19].mxu0  ;;  %v957_v35 = vmax.f32 %v949_v28, 0.0 }
 0x139   :  { %v944_v34 = vadd.f32 %v943_v33, %v895_v12  ;;  %v955_v37 = vmax.f32 %v941_v30, 0.0 }
 0x13a   :  { %v958_v36 = vmax.f32 %v952_v32, 0.0 }
 0x13b   :  { %v956_v38 = vmax.f32 %v944_v34, 0.0 }
 0x13c   :  { %v1090_v39 = vpack.c.bf16 %v958_v36, %v957_v35 }
 0x13d   :  { %v1085_v40 = vpack.c.bf16 %v956_v38, %v955_v37 }
 0x13e   :  { %1092 = vst [vmem:[%s1635_s3 + $0x8] sm:$0xff] %v1090_v39  }
 0x13f   :  { %1086 = vst [vmem:[%s1635_s3] sm:$0xff] %v1085_v40  }

// kernel: resnet18_forward.28
= control target key start
LH: loop header
LB: loop body
LE: loop exit
PB: predicated region body
PF: predicated region fallthrough
CT: control target
= control target key end

     0   :  { %s1667_s1 = inlined_call_operand.vmem [shape: bf16[1152,128], index: 1, kind: input, shape index: {}]   ;;  %s1668_s0 = inlined_call_operand.vmem [shape: bf16[32,1152], index: 0, kind: input, shape index: {}]   ;;  %s1669_s2 = inlined_call_operand.vmem [shape: f32[1,128], index: 2, kind: input, shape index: {}]   ;;  %s1670_s3 = inlined_call_operand.vmem [shape: bf16[32,128], index: 3, kind: input, shape index: {}]   ;;  %s1671_s4 = inlined_call_operand.vmem [shape: bf16[32,128], index: 4, kind: output, shape index: {}]  }
   0x1   :  { %v1259_v0 = vld [vmem:[%s1667_s1 + $0x40] sm:$0xff]   ;;  %v1263_v4 = vld [vmem:[%s1667_s1 + $0x48] sm:$0xff]   ;;  %v1267_v8 = vld [vmem:[%s1667_s1 + $0x50] sm:$0xff]  }
   0x2   :  { %v1260_v1 = vld [vmem:[%s1667_s1] sm:$0xff]   ;;  %1117 = vmatprep.subr.bf16.mxu0 %v1259_v0  ;;  %v1264_v5 = vld [vmem:[%s1667_s1 + $0x8] sm:$0xff]   ;;  %v1268_v9 = vld [vmem:[%s1667_s1 + $0x10] sm:$0xff]  }
   0x3   :  { %v1261_v2 = vld [vmem:[%s1667_s1 + $0xc0] sm:$0xff]   ;;  %1118 = vmatpush3.bf16.msra.mxu0 %v1260_v1  ;;  %v1265_v6 = vld [vmem:[%s1667_s1 + $0xc8] sm:$0xff]   ;;  %v1269_v10 = vld [vmem:[%s1667_s1 + $0xd0] sm:$0xff]  }
   0x4   :  { %v1262_v3 = vld [vmem:[%s1667_s1 + $0x80] sm:$0xff]   ;;  %1145 = vmatprep.subr.bf16.mxu1 %v1261_v2  ;;  %1119 = vmatprep.subr.bf16.mxu0 %v1263_v4  ;;  %v1266_v7 = vld [vmem:[%s1667_s1 + $0x88] sm:$0xff]   ;;  %v1270_v11 = vld [vmem:[%s1667_s1 + $0x90] sm:$0xff]  }
   0x5   :  { %1146 = vmatpush3.bf16.msra.mxu1 %v1262_v3  ;;  %v1271_v12 = vld [vmem:[%s1667_s1 + $0x58] sm:$0xff]   ;;  %v1275_v16 = vld [vmem:[%s1667_s1 + $0x60] sm:$0xff]   ;;  %v1279_v20 = vld [vmem:[%s1667_s1 + $0x68] sm:$0xff]  }
   0x6   :  { %1147 = vmatprep.subr.bf16.mxu1 %v1265_v6  ;;  %v1272_v13 = vld [vmem:[%s1667_s1 + $0x18] sm:$0xff]   ;;  %v1276_v17 = vld [vmem:[%s1667_s1 + $0x20] sm:$0xff]   ;;  %v1280_v21 = vld [vmem:[%s1667_s1 + $0x28] sm:$0xff]  }
   0x7   :  { %1120 = vmatpush3.bf16.msra.mxu0 %v1264_v5  ;;  %v1273_v14 = vld [vmem:[%s1667_s1 + $0xd8] sm:$0xff]   ;;  %v1277_v18 = vld [vmem:[%s1667_s1 + $0xe0] sm:$0xff]   ;;  %v1281_v22 = vld [vmem:[%s1667_s1 + $0xe8] sm:$0xff]  }
   0x8   :  { %1121 = vmatprep.subr.bf16.mxu0 %v1267_v8  ;;  %v1274_v15 = vld [vmem:[%s1667_s1 + $0x98] sm:$0xff]   ;;  %v1278_v19 = vld [vmem:[%s1667_s1 + $0xa0] sm:$0xff]   ;;  %v1282_v23 = vld [vmem:[%s1667_s1 + $0xa8] sm:$0xff]  }
   0x9   :  { %1148 = vmatpush3.bf16.msra.mxu1 %v1266_v7  ;;  %v1283_v24 = vld [vmem:[%s1667_s1 + $0x70] sm:$0xff]   ;;  %v1287_v28 = vld [vmem:[%s1667_s1 + $0x78] sm:$0xff]   ;;  %v1290_v31 = vld [vmem:[%s1668_s0] ss:$36 sps:$4 sm:$0xff]  }
   0xa   :  { %1149 = vmatprep.subr.bf16.mxu1 %v1269_v10  ;;  %v1284_v25 = vld [vmem:[%s1667_s1 + $0x30] sm:$0xff]   ;;  %v1288_v29 = vld [vmem:[%s1667_s1 + $0x38] sm:$0xff]   ;;  %v1292_v32 = vld [vmem:[%s1668_s0 + $0x4] ss:$36 sps:$4 sm:$0xff]  }
   0xb   :  { %1122 = vmatpush3.bf16.msra.mxu0 %v1268_v9  ;;  %v1285_v26 = vld [vmem:[%s1667_s1 + $0xf0] sm:$0xff]   ;;  %v1289_v30 = vld [vmem:[%s1667_s1 + $0xf8] sm:$0xff]   ;;  %745 = vmatprep.mubr.bf16.mxu0 %v1292_v32  ;;  %v1294_v34 = vld [vmem:[%s1667_s1 + $0x140] sm:$0xff]  }
   0xc   :  { %1123 = vmatprep.subr.bf16.mxu0 %v1271_v12  ;;  %v1286_v27 = vld [vmem:[%s1667_s1 + $0xb0] sm:$0xff]   ;;  %v1293_v33 = vld [vmem:[%s1667_s1 + $0xb8] sm:$0xff]   ;;  %v1295_v35 = vld [vmem:[%s1668_s0 + $0x8] ss:$36 sps:$4 sm:$0xff]  }
   0xd   :  { %1150 = vmatpush3.bf16.msra.mxu1 %v1270_v11  ;;  %v1297_v36 = vld [vmem:[%s1668_s0 + $0xc] ss:$36 sps:$4 sm:$0xff]   ;;  %v1298_v37 = vld [vmem:[%s1667_s1 + $0x100] sm:$0xff]   ;;  %v1309_v48 = vld [vmem:[%s1667_s1 + $0x158] sm:$0xff]  }
   0xe   :  { %1151 = vmatprep.subr.bf16.mxu1 %v1273_v14  ;;  %794 = vmatprep.mubr.bf16.mxu1 %v1297_v36  ;;  %v1299_v38 = vld [vmem:[%s1667_s1 + $0x1c0] sm:$0xff]   ;;  %v1301_v40 = vld [vmem:[%s1667_s1 + $0x148] sm:$0xff]   ;;  %v1305_v44 = vld [vmem:[%s1667_s1 + $0x150] sm:$0xff]  }
   0xf   :  { %1124 = vmatpush3.bf16.msra.mxu0 %v1272_v13  ;;  %v1300_v39 = vld [vmem:[%s1667_s1 + $0x180] sm:$0xff]   ;;  %v1302_v41 = vld [vmem:[%s1667_s1 + $0x108] sm:$0xff]   ;;  %v1306_v45 = vld [vmem:[%s1667_s1 + $0x110] sm:$0xff]  }
  0x10   :  { %1125 = vmatprep.subr.bf16.mxu0 %v1275_v16  ;;  %v1303_v42 = vld [vmem:[%s1667_s1 + $0x1c8] sm:$0xff]   ;;  %v1307_v46 = vld [vmem:[%s1667_s1 + $0x1d0] sm:$0xff]   ;;  %v1310_v49 = vld [vmem:[%s1667_s1 + $0x118] sm:$0xff]  }
  0x11   :  { %1152 = vmatpush3.bf16.msra.mxu1 %v1274_v15  ;;  %v1304_v43 = vld [vmem:[%s1667_s1 + $0x188] sm:$0xff]   ;;  %v1308_v47 = vld [vmem:[%s1667_s1 + $0x190] sm:$0xff]   ;;  %v1311_v50 = vld [vmem:[%s1667_s1 + $0x1d8] sm:$0xff]  }
  0x12   :  { %1153 = vmatprep.subr.bf16.mxu1 %v1277_v18  ;;  %v1312_v51 = vld [vmem:[%s1667_s1 + $0x198] sm:$0xff]   ;;  %v1313_v52 = vld [vmem:[%s1667_s1 + $0x160] sm:$0xff]   ;;  %v1317_v56 = vld [vmem:[%s1667_s1 + $0x168] sm:$0xff]  }
  0x13   :  { %1126 = vmatpush3.bf16.msra.mxu0 %v1276_v17  ;;  %v1314_v53 = vld [vmem:[%s1667_s1 + $0x120] sm:$0xff]   ;;  %v1318_v57 = vld [vmem:[%s1668_s0 + $0x4c] ss:$36 sps:$4 sm:$0xff]   ;;  %v1323_v61 = vld [vmem:[%s1668_s0 + $0x54] ss:$36 sps:$4 sm:$0xff]  }
  0x14   :  { %1127 = vmatprep.subr.bf16.mxu0 %v1279_v20  ;;  %v1315_v54 = vld [vmem:[%s1667_s1 + $0x1e0] sm:$0xff]   ;;  %v1320_v58 = vld [vmem:[%s1667_s1 + $0x128] sm:$0xff]   ;;  %v1326_v63 = vld [vmem:[%s1668_s0 + $0x50] ss:$36 sps:$4 sm:$0xff]  }
  0x15   :  { %1154 = vmatpush3.bf16.msra.mxu1 %v1278_v19  ;;  %v1316_v55 = vld [vmem:[%s1667_s1 + $0x1a0] sm:$0xff]   ;;  %v1321_v59 = vld [vmem:[%s1668_s0 + $0x48] ss:$36 sps:$4 sm:$0xff]   ;;  %v1327_v0 = vld [vmem:[%s1667_s1 + $0x170] sm:$0xff]  }
  0x16   :  { %1155 = vmatprep.subr.bf16.mxu1 %v1281_v22  ;;  %v1322_v60 = vld [vmem:[%s1667_s1 + $0x1e8] sm:$0xff]   ;;  %v1328_v1 = vld [vmem:[%s1667_s1 + $0x130] sm:$0xff]   ;;  %v1331_v4 = vld [vmem:[%s1667_s1 + $0x178] sm:$0xff]  }
  0x17   :  { %1128 = vmatpush3.bf16.msra.mxu0 %v1280_v21  ;;  %v1325_v62 = vld [vmem:[%s1667_s1 + $0x1a8] sm:$0xff]   ;;  %v1329_v2 = vld [vmem:[%s1667_s1 + $0x1f0] sm:$0xff]   ;;  %v1332_v5 = vld [vmem:[%s1667_s1 + $0x138] sm:$0xff]  }
  0x18   :  { %1129 = vmatprep.subr.bf16.mxu0 %v1283_v24  ;;  %v1330_v3 = vld [vmem:[%s1667_s1 + $0x1b0] sm:$0xff]   ;;  %v1333_v6 = vld [vmem:[%s1667_s1 + $0x1f8] sm:$0xff]   ;;  %v1338_v10 = vld [vmem:[%s1667_s1 + $0x200] sm:$0xff]  }
  0x19   :  { %1156 = vmatpush3.bf16.msra.mxu1 %v1282_v23  ;;  %v1334_v7 = vld [vmem:[%s1668_s0 + $0x10] ss:$36 sps:$4 sm:$0xff]   ;;  %v1337_v9 = vld [vmem:[%s1667_s1 + $0x1b8] sm:$0xff]   ;;  %v1342_v13 = vld [vmem:[%s1667_s1 + $0x208] sm:$0xff]  }
  0x1a   :  { %1157 = vmatprep.subr.bf16.mxu1 %v1285_v26  ;;  %v1336_v8 = vld [vmem:[%s1668_s0 + $0x14] ss:$36 sps:$4 sm:$0xff]   ;;  %v1341_v12 = vld [vmem:[%s1668_s0 + $0x1c] ss:$36 sps:$4 sm:$0xff]   ;;  %v1347_v17 = vld [vmem:[%s1668_s0 + $0x64] ss:$36 sps:$4 sm:$0xff]  }
  0x1b   :  { %1130 = vmatpush3.bf16.msra.mxu0 %v1284_v25  ;;  %v1339_v11 = vld [vmem:[%s1668_s0 + $0x18] ss:$36 sps:$4 sm:$0xff]   ;;  %v1346_v16 = vld [vmem:[%s1667_s1 + $0x210] sm:$0xff]   ;;  %v1349_v18 = vld [vmem:[%s1668_s0 + $0x60] ss:$36 sps:$4 sm:$0xff]  }
  0x1c   :  { %1131 = vmatprep.subr.bf16.mxu0 %v1287_v28  ;;  %v1343_v14 = vld [vmem:[%s1668_s0 + $0x5c] ss:$36 sps:$4 sm:$0xff]   ;;  %v1352_v22 = vld [vmem:[%s1667_s1 + $0x228] sm:$0xff]   ;;  %v1353_v23 = vld [vmem:[%s1667_s1 + $0x230] sm:$0xff]  }
  0x1d   :  { %1158 = vmatpush3.bf16.msra.mxu1 %v1286_v27  ;;  %v1345_v15 = vld [vmem:[%s1668_s0 + $0x58] ss:$36 sps:$4 sm:$0xff]   ;;  %v1351_v20 = vld [vmem:[%s1667_s1 + $0x220] sm:$0xff]   ;;  %v1356_v25 = vld [vmem:[%s1668_s0 + $0x68] ss:$36 sps:$4 sm:$0xff]  }
  0x1e   :  { %1159 = vmatprep.subr.bf16.mxu1 %v1289_v30  ;;  %v1350_v19 = vld [vmem:[%s1667_s1 + $0x218] sm:$0xff]   ;;  %v1355_v21 = vld [vmem:[%s1668_s0 + $0x20] ss:$36 sps:$4 sm:$0xff]  }
  0x1f   :  { %1132 = vmatpush3.bf16.msra.mxu0 %v1288_v29  ;;  %v1354_v24 = vld [vmem:[%s1667_s1 + $0x238] sm:$0xff]   ;;  %v998_v27 = vld [vmem:[%s1669_s2] ss:$0 sm:$0xff] }
  0x20   :  { %1173 = vmatprep.subr.bf16.mxu0 %v1294_v34 }
  0x21   :  { %1160 = vmatpush3.bf16.msra.mxu1 %v1293_v33 }
  0x22   :  { %746 = vmatmul.mubr.bf16.vlgmr.msra.gmra.mrb[0].mxu0 %v1290_v31  ;;  %1201 = vmatprep.subr.bf16.mxu1 %v1299_v38 }
  0x23   :  { %1174 = vmatpush3.bf16.msra.mxu0 %v1298_v37  ;;  %753 = vmatprep.mubr.bf16.mxu0 %v1318_v57 }
  0x24   :  { %795 = vmatmul.mubr.bf16.vlgmr.msra.gmra.mrb[0].mxu1 %v1295_v35  ;;  %1175 = vmatprep.subr.bf16.mxu0 %v1301_v40 }
  0x25   :  { %1202 = vmatpush3.bf16.msra.mxu1 %v1300_v39  ;;  %802 = vmatprep.mubr.bf16.mxu1 %v1323_v61 }
  0x26   :  { %1203 = vmatprep.subr.bf16.mxu1 %v1303_v42 }
  0x27   :  { %1176 = vmatpush3.bf16.msra.mxu0 %v1302_v41 }
  0x28   :  { %1177 = vmatprep.subr.bf16.mxu0 %v1305_v44 }
  0x29   :  { %1204 = vmatpush3.bf16.msra.mxu1 %v1304_v43 }
  0x2a   :  { %1205 = vmatprep.subr.bf16.mxu1 %v1307_v46  ;;  %754 = vmatmul.mubr.bf16.gmra.mrb[4].mxu0 %v1321_v59 }
  0x2b   :  { %1178 = vmatpush3.bf16.msra.mxu0 %v1306_v45  ;;  %843 = vmatprep.mubr.bf16.mxu0 %v1336_v8 }
  0x2c   :  { %1179 = vmatprep.subr.bf16.mxu0 %v1309_v48  ;;  %803 = vmatmul.mubr.bf16.gmra.mrb[4].mxu1 %v1326_v63 }
  0x2d   :  { %1206 = vmatpush3.bf16.msra.mxu1 %v1308_v47  ;;  %892 = vmatprep.mubr.bf16.mxu1 %v1341_v12 }
  0x2e   :  { %1207 = vmatprep.subr.bf16.mxu1 %v1311_v50 }
  0x2f   :  { %1180 = vmatpush3.bf16.msra.mxu0 %v1310_v49 }
  0x30   :  { %1181 = vmatprep.subr.bf16.mxu0 %v1313_v52 }
  0x31   :  { %1208 = vmatpush3.bf16.msra.mxu1 %v1312_v51 }
  0x32   :  { %1209 = vmatprep.subr.bf16.mxu1 %v1315_v54 }
  0x33   :  { %1182 = vmatpush3.bf16.msra.mxu0 %v1314_v53 }
  0x34   :  { %1183 = vmatprep.subr.bf16.mxu0 %v1317_v56 }
  0x35   :  { %1210 = vmatpush3.bf16.msra.mxu1 %v1316_v55 }
  0x36   :  { %1211 = vmatprep.subr.bf16.mxu1 %v1322_v60 }
  0x37   :  { %1184 = vmatpush3.bf16.msra.mxu0 %v1320_v58 }
  0x38   :  { %1185 = vmatprep.subr.bf16.mxu0 %v1327_v0 }
  0x39   :  { %1212 = vmatpush3.bf16.msra.mxu1 %v1325_v62 }
  0x3a   :  { %1213 = vmatprep.subr.bf16.mxu1 %v1329_v2 }
  0x3b   :  { %1186 = vmatpush3.bf16.msra.mxu0 %v1328_v1 }
  0x3c   :  { %1187 = vmatprep.subr.bf16.mxu0 %v1331_v4 }
  0x3d   :  { %1214 = vmatpush3.bf16.msra.mxu1 %v1330_v3 }
  0x3e   :  { %1215 = vmatprep.subr.bf16.mxu1 %v1333_v6 }
  0x3f   :  { %1188 = vmatpush3.bf16.msra.mxu0 %v1332_v5 }
  0x40   :  { %1239 = vmatprep.subr.bf16.mxu0 %v1338_v10 }
  0x41   :  { %1216 = vmatpush3.bf16.msra.mxu1 %v1337_v9 }
  0x42   :  { %844 = vmatmul.mubr.bf16.vlgmr.msra.gmra.mrb[8].mxu0 %v1334_v7 }
  0x43   :  { %1240 = vmatpush3.bf16.msra.mxu0 %v1338_v10  ;;  %851 = vmatprep.mubr.bf16.mxu0 %v1343_v14 }
  0x44   :  { %893 = vmatmul.mubr.bf16.vlgmr.msra.gmra.mrb[8].mxu1 %v1339_v11  ;;  %1241 = vmatprep.subr.bf16.mxu0 %v1342_v13 }
  0x45   :  { %900 = vmatprep.mubr.bf16.mxu1 %v1347_v17 }
  0x47   :  { %1242 = vmatpush3.bf16.msra.mxu0 %v1342_v13 }
  0x48   :  { %1243 = vmatprep.subr.bf16.mxu0 %v1346_v16 }
  0x4a   :  { %852 = vmatmul.mubr.bf16.gmra.mrb[12].mxu0 %v1345_v15 }
  0x4b   :  { %1244 = vmatpush3.bf16.msra.mxu0 %v1346_v16  ;;  %1255 = vmatprep.mubr.bf16.mxu0 %v1355_v21 }
  0x4c   :  { %901 = vmatmul.mubr.bf16.gmra.mrb[12].mxu1 %v1349_v18  ;;  %1245 = vmatprep.subr.bf16.mxu0 %v1350_v19 }
  0x4f   :  { %1246 = vmatpush3.bf16.msra.mxu0 %v1350_v19 }
  0x50   :  { %1247 = vmatprep.subr.bf16.mxu0 %v1351_v20 }
  0x53   :  { %1248 = vmatpush3.bf16.msra.mxu0 %v1351_v20 }
  0x54   :  { %1249 = vmatprep.subr.bf16.mxu0 %v1352_v22 }
  0x57   :  { %1250 = vmatpush3.bf16.msra.mxu0 %v1352_v22 }
  0x58   :  { %1251 = vmatprep.subr.bf16.mxu0 %v1353_v23 }
  0x5b   :  { %1252 = vmatpush3.bf16.msra.mxu0 %v1353_v23 }
  0x5c   :  { %1253 = vmatprep.subr.bf16.mxu0 %v1354_v24 }
  0x5f   :  { %1254 = vmatpush3.bf16.msra.mxu0 %v1354_v24 }
  0x62   :  { %1256 = vmatmul.mubr.bf16.vlgmr.msra.gmra.mrb[16].mxu0 %v1356_v25 }
  0xf5   :  { %v1133_v26 = vpop.f32.mrb[0].mxu0 }
  0xf6   :  { %v1134_v28 = vpop.f32.mrb[1].mxu0 }
  0xf7   :  { %v1135_v29 = vadd.f32 %v1134_v28, %v1133_v26  ;;  %v1136_v30 = vpop.f32.mrb[2].mxu0  ;;  %v1161_v31 = vpop.f32.mrb[0].mxu1  ;;  %v1098_v28 = vld [vmem:[%s1670_s3] sm:$0xff]  }
  0xf8   :  { %v1137_v32 = vpop.f32.mrb[3].mxu0  ;;  %v1162_v35 = vpop.f32.mrb[1].mxu1 }
  0xf9   :  { %v748_v33 = vadd.f32 %v1135_v29, %v998_v27  ;;  %v1138_v34 = vadd.f32 %v1137_v32, %v1136_v30  ;;  %v1163_v36 = vadd.f32 %v1162_v35, %v1161_v31  ;;  %v1164_v37 = vpop.f32.mrb[2].mxu1  ;;  %v1099_v31 = vunpack.c.l.bf16 %v1098_v28 }
  0xfa   :  { %v1165_v39 = vpop.f32.mrb[3].mxu1 }
  0xfb   :  { %v751_v38 = vadd.f32 %v1138_v34, %v998_v27  ;;  %v797_v40 = vadd.f32 %v1163_v36, %v748_v33  ;;  %v1166_v41 = vadd.f32 %v1165_v39, %v1164_v37  ;;  %v1100_v37 = vunpack.c.h.bf16 %v1098_v28 }
  0xfd   :  { %v800_v42 = vadd.f32 %v1166_v41, %v751_v38  ;;  %v1139_v43 = vpop.f32.mrb[4].mxu0 }
  0xfe   :  { %v1140_v44 = vpop.f32.mrb[5].mxu0 }
  0xff   :  { %v1141_v45 = vadd.f32 %v1140_v44, %v1139_v43  ;;  %v1142_v46 = vpop.f32.mrb[6].mxu0  ;;  %v1167_v47 = vpop.f32.mrb[4].mxu1 }
 0x100   :  { %v1143_v48 = vpop.f32.mrb[7].mxu0  ;;  %v1168_v51 = vpop.f32.mrb[5].mxu1 }
 0x101   :  { %v756_v49 = vadd.f32 %v1141_v45, %v998_v27  ;;  %v1144_v50 = vadd.f32 %v1143_v48, %v1142_v46  ;;  %v1169_v52 = vadd.f32 %v1168_v51, %v1167_v47  ;;  %v1170_v53 = vpop.f32.mrb[6].mxu1 }
 0x102   :  { %v1171_v55 = vpop.f32.mrb[7].mxu1 }
 0x103   :  { %v759_v54 = vadd.f32 %v1144_v50, %v998_v27  ;;  %v805_v56 = vadd.f32 %v1169_v52, %v756_v49  ;;  %v1172_v57 = vadd.f32 %v1171_v55, %v1170_v53  ;;  %v1115_v27 = vld [vmem:[%s1670_s3 + $0x8] sm:$0xff]  }
 0x104   :  { %v1103_v29 = vunpack.c.l.bf16 %v1115_v27  ;;  %v1104_v34 = vunpack.c.h.bf16 %v1115_v27 }
 0x105   :  { %v808_v58 = vadd.f32 %v1172_v57, %v759_v54 }
 0x115   :  { %v1189_v59 = vpop.f32.mrb[8].mxu0 }
 0x116   :  { %v1190_v60 = vpop.f32.mrb[9].mxu0 }
 0x117   :  { %v1191_v61 = vadd.f32 %v1190_v60, %v1189_v59  ;;  %v1192_v62 = vpop.f32.mrb[10].mxu0  ;;  %v1217_v63 = vpop.f32.mrb[8].mxu1 }
 0x118   :  { %v1193_v0 = vpop.f32.mrb[11].mxu0  ;;  %v1218_v3 = vpop.f32.mrb[9].mxu1 }
 0x119   :  { %v846_v1 = vadd.f32 %v1191_v61, %v797_v40  ;;  %v1194_v2 = vadd.f32 %v1193_v0, %v1192_v62  ;;  %v1219_v4 = vadd.f32 %v1218_v3, %v1217_v63  ;;  %v1220_v5 = vpop.f32.mrb[10].mxu1 }
 0x11a   :  { %v1221_v7 = vpop.f32.mrb[11].mxu1 }
 0x11b   :  { %v849_v6 = vadd.f32 %v1194_v2, %v800_v42  ;;  %v1222_v8 = vadd.f32 %v1221_v7, %v1220_v5  ;;  %v895_v9 = vadd.f32 %v1219_v4, %v846_v1 }
 0x11d   :  { %v1195_v10 = vpop.f32.mrb[12].mxu0  ;;  %v898_v12 = vadd.f32 %v1222_v8, %v849_v6 }
 0x11e   :  { %v1196_v11 = vpop.f32.mrb[13].mxu0 }
 0x11f   :  { %v1197_v13 = vadd.f32 %v1196_v11, %v1195_v10  ;;  %v1198_v14 = vpop.f32.mrb[14].mxu0  ;;  %v1223_v15 = vpop.f32.mrb[12].mxu1 }
 0x120   :  { %v1199_v16 = vpop.f32.mrb[15].mxu0  ;;  %v1224_v19 = vpop.f32.mrb[13].mxu1 }
 0x121   :  { %v854_v17 = vadd.f32 %v1197_v13, %v805_v56  ;;  %v1200_v18 = vadd.f32 %v1199_v16, %v1198_v14  ;;  %v1225_v20 = vadd.f32 %v1224_v19, %v1223_v15  ;;  %v1226_v21 = vpop.f32.mrb[14].mxu1 }
 0x122   :  { %v1227_v23 = vpop.f32.mrb[15].mxu1 }
 0x123   :  { %v857_v22 = vadd.f32 %v1200_v18, %v808_v58  ;;  %v1228_v24 = vadd.f32 %v1227_v23, %v1226_v21  ;;  %v903_v25 = vadd.f32 %v1225_v20, %v854_v17 }
 0x125   :  { %v906_v26 = vadd.f32 %v1228_v24, %v857_v22 }
 0x135   :  { %v1257_v30 = vpop.f32.mrb[16].mxu0 }
 0x136   :  { %v952_v32 = vadd.f32 %v1257_v30, %v903_v25  ;;  %v943_v33 = vpop.f32.mrb[17].mxu0 }
 0x137   :  { %v944_v35 = vadd.f32 %v943_v33, %v895_v9  ;;  %v1258_v36 = vpop.f32.mrb[18].mxu0 }
 0x138   :  { %v968_v38 = vadd.f32 %v1103_v29, %v952_v32  ;;  %v955_v39 = vadd.f32 %v1258_v36, %v906_v26  ;;  %v946_v40 = vpop.f32.mrb[19].mxu0 }
 0x139   :  { %v966_v41 = vadd.f32 %v1099_v31, %v944_v35  ;;  %v947_v42 = vadd.f32 %v946_v40, %v898_v12 }
 0x13a   :  { %v969_v43 = vadd.f32 %v1104_v34, %v955_v39  ;;  %v972_v45 = vmax.f32 %v968_v38, 0.0 }
 0x13b   :  { %v967_v44 = vadd.f32 %v1100_v37, %v947_v42  ;;  %v970_v47 = vmax.f32 %v966_v41, 0.0 }
 0x13c   :  { %v973_v46 = vmax.f32 %v969_v43, 0.0 }
 0x13d   :  { %v971_v48 = vmax.f32 %v967_v44, 0.0 }
 0x13e   :  { %v1113_v49 = vpack.c.bf16 %v973_v46, %v972_v45 }
 0x13f   :  { %v1108_v50 = vpack.c.bf16 %v971_v48, %v970_v47 }
 0x140   :  { %1116 = vst [vmem:[%s1671_s4 + $0x8] sm:$0xff] %v1113_v49  }
 0x141   :  { %1109 = vst [vmem:[%s1671_s4] sm:$0xff] %v1108_v50  }

// kernel: resnet18_forward.32
= control target key start
LH: loop header
LB: loop body
LE: loop exit
PB: predicated region body
PF: predicated region fallthrough
CT: control target
= control target key end

     0   :  { %s2246_s12 = smov 0   ;;  %s2248_s13 = smov 0   ;;  %s2720_s0 = inlined_call_operand.vmem [shape: bf16[16,1152], index: 0, kind: input, shape index: {}]   ;;  %s2721_s1 = inlined_call_operand.vmem [shape: bf16[1152,256], index: 1, kind: input, shape index: {}]   ;;  %s2722_s2 = inlined_call_operand.vmem [shape: f32[1,256], index: 2, kind: input, shape index: {}]   ;;  %s2723_s3 = inlined_call_operand.vmem [shape: bf16[16,256], index: 3, kind: output, shape index: {}]  }
   0x1   :  { %s2250_s14 = smov 0   ;;  %s2252_s15 = smov 0  }
   0x2   :  { %s2254_s16 = smov 0  }
   0x3 LB: > { %s22_s17 = sadd.s32 1, %s2218_s15  ;;  %s1835_s18 = sadd.s32 4294967295, %s2222_s16   ;;  %s2222_s16 = sphi %s2254_s16, %s13_s16   ;;  %s2218_s15 = sphi %s2252_s15, %s2728_s15   ;;  %s2214_s14 = sphi %s2250_s14, %s2727_s14   ;;  %s2210_s13 = sphi %s2248_s13, %s2726_s13   ;;  %s2206_s12 = sphi %s2246_s12, %s2725_s12  }
   0x4   : > { %p23_p0 = scmp.ge.s32.totalorder %s22_s17, 2  ;;  %p65_p1 = scmp.ne.s32.totalorder %s2210_s13, %s2206_s12 }
   0x5   : > { %p66_p2 = scmp.eq.s32.totalorder %s2222_s16, 0  ;;  %p123_p4 = scmp.eq.s32.totalorder %s1835_s18, 1 }
   0x6   : > { %s2730_s17 = smov (%p23_p0, %s22_s17), 0  ;;  %s58_s20 = sadd.s32 1, %s2210_s13 }
   0x7   : > { %p67_p3 = por %p66_p2, %p65_p1  ;;  %s55_s19 = ssub.s32 %s2218_s15, %s2730_s17 }
   0x8   : > { %p56_p5 = scmp.eq.s32.totalorder %s55_s19, 0  ;;  %p2281_p6 = por %p123_p4, %p65_p1 }
   0x9   : > { %p1839_p7 = scmp.ge.s32.totalorder %s2222_s16, 2 }
   0xa   : > { %s2286_s22 = scalar_select %p56_p5, %s2210_s13, %s58_s20  }
   0xb   : > { %155 = sbr.rel (%p1839_p7) target bundleno = 118 (0x76), region = 20 }
  0x12   : > { %158 = sbr.rel (!%p67_p3) target bundleno = 118 (0x76), region = 24  ;;  %s160_s23 = sand.u32 (%p67_p3), 1, %s2210_s13  }
  0x13   : > { %s1840_s24 = sshll.u32 (%p67_p3), %s2218_s15, 2  ;;  %s2055_s25 = smul.u32 (%p67_p3), 576, %s160_s23 }
  0x14   : > { %s2294_s28 = scalar_lea.vmem (%p67_p3), %s2721_s1, %s1840_s24 }
  0x15   : > { %v180_v0 = vld [vmem:[%s2294_s28] sm:$0xf] (%p67_p3)  ;;  %v182_v1 = vld [vmem:[%s2294_s28 + $0x8] sm:$0xf] (%p67_p3)  ;;  %v184_v2 = vld [vmem:[%s2294_s28 + $0x10] sm:$0xf] (%p67_p3) }
  0x16   : > { %v186_v3 = vld [vmem:[%s2294_s28 + $0x18] sm:$0xf] (%p67_p3)  ;;  %v188_v4 = vld [vmem:[%s2294_s28 + $0x20] sm:$0xf] (%p67_p3)  ;;  %s2301_s29 = scalar_lea.vmem (%p67_p3), [#allocation2], %s2055_s25 }
  0x17   : > { %181 = vst [vmem:[%s2301_s29] sm:$0xf] (%p67_p3), %v180_v0  ;;  %183 = vst [vmem:[%s2301_s29 + $0x4] sm:$0xf] (%p67_p3), %v182_v1  ;;  %v190_v5 = vld [vmem:[%s2294_s28 + $0x28] sm:$0xf] (%p67_p3) }
  0x18   : > { %185 = vst [vmem:[%s2301_s29 + $0x8] sm:$0xf] (%p67_p3), %v184_v2  ;;  %187 = vst [vmem:[%s2301_s29 + $0xc] sm:$0xf] (%p67_p3), %v186_v3  ;;  %v192_v6 = vld [vmem:[%s2294_s28 + $0x30] sm:$0xf] (%p67_p3) }
  0x19   : > { %189 = vst [vmem:[%s2301_s29 + $0x10] sm:$0xf] %v188_v4  ;;  %v194_v7 = vld [vmem:[%s2294_s28 + $0x38] sm:$0xf]  ;;  %191 = vst [vmem:[%s2301_s29 + $0x14] sm:$0xf] %v190_v5 }
  0x1a   : > { %193 = vst [vmem:[%s2301_s29 + $0x18] sm:$0xf] %v192_v6  ;;  %195 = vst [vmem:[%s2301_s29 + $0x1c] sm:$0xf] %v194_v7  ;;  %v196_v8 = vld [vmem:[%s2294_s28 + $0x40] sm:$0xf] }
  0x1b   : > { %v198_v9 = vld [vmem:[%s2294_s28 + $0x48] sm:$0xf]  ;;  %v200_v10 = vld [vmem:[%s2294_s28 + $0x50] sm:$0xf]  ;;  %197 = vst [vmem:[%s2301_s29 + $0x20] sm:$0xf] %v196_v8 }
  0x1c   : > { %199 = vst [vmem:[%s2301_s29 + $0x24] sm:$0xf] %v198_v9  ;;  %201 = vst [vmem:[%s2301_s29 + $0x28] sm:$0xf] %v200_v10  ;;  %v202_v11 = vld [vmem:[%s2294_s28 + $0x58] sm:$0xf] }
  0x1d   : > { %v204_v12 = vld [vmem:[%s2294_s28 + $0x60] sm:$0xf]  ;;  %v206_v13 = vld [vmem:[%s2294_s28 + $0x68] sm:$0xf]  ;;  %203 = vst [vmem:[%s2301_s29 + $0x2c] sm:$0xf] %v202_v11 }
  0x1e   : > { %205 = vst [vmem:[%s2301_s29 + $0x30] sm:$0xf] %v204_v12  ;;  %207 = vst [vmem:[%s2301_s29 + $0x34] sm:$0xf] %v206_v13  ;;  %v208_v14 = vld [vmem:[%s2294_s28 + $0x70] sm:$0xf] }
  0x1f   : > { %v210_v15 = vld [vmem:[%s2294_s28 + $0x78] sm:$0xf]  ;;  %v212_v16 = vld [vmem:[%s2294_s28 + $0x80] sm:$0xf]  ;;  %209 = vst [vmem:[%s2301_s29 + $0x38] sm:$0xf] %v208_v14 }
  0x20   : > { %211 = vst [vmem:[%s2301_s29 + $0x3c] sm:$0xf] %v210_v15  ;;  %213 = vst [vmem:[%s2301_s29 + $0x40] sm:$0xf] %v212_v16  ;;  %v214_v17 = vld [vmem:[%s2294_s28 + $0x88] sm:$0xf] }
  0x21   : > { %v216_v18 = vld [vmem:[%s2294_s28 + $0x90] sm:$0xf]  ;;  %v218_v19 = vld [vmem:[%s2294_s28 + $0x98] sm:$0xf]  ;;  %215 = vst [vmem:[%s2301_s29 + $0x44] sm:$0xf] %v214_v17 }
  0x22   : > { %217 = vst [vmem:[%s2301_s29 + $0x48] sm:$0xf] %v216_v18  ;;  %219 = vst [vmem:[%s2301_s29 + $0x4c] sm:$0xf] %v218_v19  ;;  %v220_v20 = vld [vmem:[%s2294_s28 + $0xa0] sm:$0xf] }
  0x23   : > { %v222_v21 = vld [vmem:[%s2294_s28 + $0xa8] sm:$0xf]  ;;  %v224_v22 = vld [vmem:[%s2294_s28 + $0xb0] sm:$0xf]  ;;  %221 = vst [vmem:[%s2301_s29 + $0x50] sm:$0xf] %v220_v20 }
  0x24   : > { %223 = vst [vmem:[%s2301_s29 + $0x54] sm:$0xf] %v222_v21  ;;  %225 = vst [vmem:[%s2301_s29 + $0x58] sm:$0xf] %v224_v22  ;;  %v226_v23 = vld [vmem:[%s2294_s28 + $0xb8] sm:$0xf] }
  0x25   : > { %v228_v24 = vld [vmem:[%s2294_s28 + $0xc0] sm:$0xf]  ;;  %v230_v25 = vld [vmem:[%s2294_s28 + $0xc8] sm:$0xf]  ;;  %227 = vst [vmem:[%s2301_s29 + $0x5c] sm:$0xf] %v226_v23 }
  0x26   : > { %229 = vst [vmem:[%s2301_s29 + $0x60] sm:$0xf] %v228_v24  ;;  %231 = vst [vmem:[%s2301_s29 + $0x64] sm:$0xf] %v230_v25  ;;  %v232_v26 = vld [vmem:[%s2294_s28 + $0xd0] sm:$0xf] }
  0x27   : > { %v234_v27 = vld [vmem:[%s2294_s28 + $0xd8] sm:$0xf]  ;;  %v236_v28 = vld [vmem:[%s2294_s28 + $0xe0] sm:$0xf]  ;;  %233 = vst [vmem:[%s2301_s29 + $0x68] sm:$0xf] %v232_v26 }
  0x28   : > { %235 = vst [vmem:[%s2301_s29 + $0x6c] sm:$0xf] %v234_v27  ;;  %237 = vst [vmem:[%s2301_s29 + $0x70] sm:$0xf] %v236_v28  ;;  %v238_v29 = vld [vmem:[%s2294_s28 + $0xe8] sm:$0xf] }
  0x29   : > { %v240_v30 = vld [vmem:[%s2294_s28 + $0xf0] sm:$0xf]  ;;  %v242_v31 = vld [vmem:[%s2294_s28 + $0xf8] sm:$0xf]  ;;  %239 = vst [vmem:[%s2301_s29 + $0x74] sm:$0xf] %v238_v29 }
  0x2a   : > { %241 = vst [vmem:[%s2301_s29 + $0x78] sm:$0xf] %v240_v30  ;;  %243 = vst [vmem:[%s2301_s29 + $0x7c] sm:$0xf] %v242_v31  ;;  %v244_v32 = vld [vmem:[%s2294_s28 + $0x100] sm:$0xf] }
  0x2b   : > { %v246_v33 = vld [vmem:[%s2294_s28 + $0x108] sm:$0xf]  ;;  %v248_v34 = vld [vmem:[%s2294_s28 + $0x110] sm:$0xf]  ;;  %245 = vst [vmem:[%s2301_s29 + $0x80] sm:$0xf] %v244_v32 }
  0x2c   : > { %247 = vst [vmem:[%s2301_s29 + $0x84] sm:$0xf] %v246_v33  ;;  %249 = vst [vmem:[%s2301_s29 + $0x88] sm:$0xf] %v248_v34  ;;  %v250_v35 = vld [vmem:[%s2294_s28 + $0x118] sm:$0xf] }
  0x2d   : > { %v252_v36 = vld [vmem:[%s2294_s28 + $0x120] sm:$0xf]  ;;  %v254_v37 = vld [vmem:[%s2294_s28 + $0x128] sm:$0xf]  ;;  %251 = vst [vmem:[%s2301_s29 + $0x8c] sm:$0xf] %v250_v35 }
  0x2e   : > { %253 = vst [vmem:[%s2301_s29 + $0x90] sm:$0xf] %v252_v36  ;;  %255 = vst [vmem:[%s2301_s29 + $0x94] sm:$0xf] %v254_v37  ;;  %v256_v38 = vld [vmem:[%s2294_s28 + $0x130] sm:$0xf] }
  0x2f   : > { %v258_v39 = vld [vmem:[%s2294_s28 + $0x138] sm:$0xf]  ;;  %v260_v40 = vld [vmem:[%s2294_s28 + $0x140] sm:$0xf]  ;;  %257 = vst [vmem:[%s2301_s29 + $0x98] sm:$0xf] %v256_v38 }
  0x30   : > { %259 = vst [vmem:[%s2301_s29 + $0x9c] sm:$0xf] %v258_v39  ;;  %261 = vst [vmem:[%s2301_s29 + $0xa0] sm:$0xf] %v260_v40  ;;  %v262_v41 = vld [vmem:[%s2294_s28 + $0x148] sm:$0xf] }
  0x31   : > { %v264_v42 = vld [vmem:[%s2294_s28 + $0x150] sm:$0xf]  ;;  %v266_v43 = vld [vmem:[%s2294_s28 + $0x158] sm:$0xf]  ;;  %263 = vst [vmem:[%s2301_s29 + $0xa4] sm:$0xf] %v262_v41 }
  0x32   : > { %265 = vst [vmem:[%s2301_s29 + $0xa8] sm:$0xf] %v264_v42  ;;  %267 = vst [vmem:[%s2301_s29 + $0xac] sm:$0xf] %v266_v43  ;;  %v268_v44 = vld [vmem:[%s2294_s28 + $0x160] sm:$0xf] }
  0x33   : > { %v270_v45 = vld [vmem:[%s2294_s28 + $0x168] sm:$0xf]  ;;  %v272_v46 = vld [vmem:[%s2294_s28 + $0x170] sm:$0xf]  ;;  %269 = vst [vmem:[%s2301_s29 + $0xb0] sm:$0xf] %v268_v44 }
  0x34   : > { %271 = vst [vmem:[%s2301_s29 + $0xb4] sm:$0xf] %v270_v45  ;;  %273 = vst [vmem:[%s2301_s29 + $0xb8] sm:$0xf] %v272_v46  ;;  %v274_v47 = vld [vmem:[%s2294_s28 + $0x178] sm:$0xf] }
  0x35   : > { %v276_v48 = vld [vmem:[%s2294_s28 + $0x180] sm:$0xf]  ;;  %v278_v49 = vld [vmem:[%s2294_s28 + $0x188] sm:$0xf]  ;;  %275 = vst [vmem:[%s2301_s29 + $0xbc] sm:$0xf] %v274_v47 }
  0x36   : > { %277 = vst [vmem:[%s2301_s29 + $0xc0] sm:$0xf] %v276_v48  ;;  %279 = vst [vmem:[%s2301_s29 + $0xc4] sm:$0xf] %v278_v49  ;;  %v280_v50 = vld [vmem:[%s2294_s28 + $0x190] sm:$0xf] }
  0x37   : > { %v282_v51 = vld [vmem:[%s2294_s28 + $0x198] sm:$0xf]  ;;  %v284_v52 = vld [vmem:[%s2294_s28 + $0x1a0] sm:$0xf]  ;;  %281 = vst [vmem:[%s2301_s29 + $0xc8] sm:$0xf] %v280_v50 }
  0x38   : > { %283 = vst [vmem:[%s2301_s29 + $0xcc] sm:$0xf] %v282_v51  ;;  %285 = vst [vmem:[%s2301_s29 + $0xd0] sm:$0xf] %v284_v52  ;;  %v286_v53 = vld [vmem:[%s2294_s28 + $0x1a8] sm:$0xf] }
  0x39   : > { %v288_v54 = vld [vmem:[%s2294_s28 + $0x1b0] sm:$0xf]  ;;  %v290_v55 = vld [vmem:[%s2294_s28 + $0x1b8] sm:$0xf]  ;;  %287 = vst [vmem:[%s2301_s29 + $0xd4] sm:$0xf] %v286_v53 }
  0x3a   : > { %289 = vst [vmem:[%s2301_s29 + $0xd8] sm:$0xf] %v288_v54  ;;  %291 = vst [vmem:[%s2301_s29 + $0xdc] sm:$0xf] %v290_v55  ;;  %v292_v56 = vld [vmem:[%s2294_s28 + $0x1c0] sm:$0xf] }
  0x3b   : > { %v294_v57 = vld [vmem:[%s2294_s28 + $0x1c8] sm:$0xf]  ;;  %v296_v58 = vld [vmem:[%s2294_s28 + $0x1d0] sm:$0xf]  ;;  %293 = vst [vmem:[%s2301_s29 + $0xe0] sm:$0xf] %v292_v56 }
  0x3c   : > { %295 = vst [vmem:[%s2301_s29 + $0xe4] sm:$0xf] %v294_v57  ;;  %297 = vst [vmem:[%s2301_s29 + $0xe8] sm:$0xf] %v296_v58  ;;  %v298_v59 = vld [vmem:[%s2294_s28 + $0x1d8] sm:$0xf] }
  0x3d   : > { %v300_v60 = vld [vmem:[%s2294_s28 + $0x1e0] sm:$0xf]  ;;  %v302_v61 = vld [vmem:[%s2294_s28 + $0x1e8] sm:$0xf]  ;;  %299 = vst [vmem:[%s2301_s29 + $0xec] sm:$0xf] %v298_v59 }
  0x3e   : > { %301 = vst [vmem:[%s2301_s29 + $0xf0] sm:$0xf] %v300_v60  ;;  %303 = vst [vmem:[%s2301_s29 + $0xf4] sm:$0xf] %v302_v61  ;;  %v304_v62 = vld [vmem:[%s2294_s28 + $0x1f0] sm:$0xf] }
  0x3f   : > { %v306_v63 = vld [vmem:[%s2294_s28 + $0x1f8] sm:$0xf]  ;;  %v308_v0 = vld [vmem:[%s2294_s28 + $0x200] sm:$0xf]  ;;  %305 = vst [vmem:[%s2301_s29 + $0xf8] sm:$0xf] %v304_v62 }
  0x40   : > { %307 = vst [vmem:[%s2301_s29 + $0xfc] sm:$0xf] %v306_v63  ;;  %309 = vst [vmem:[%s2301_s29 + $0x100] sm:$0xf] %v308_v0  ;;  %v310_v1 = vld [vmem:[%s2294_s28 + $0x208] sm:$0xf] }
  0x41   : > { %v312_v2 = vld [vmem:[%s2294_s28 + $0x210] sm:$0xf]  ;;  %v314_v3 = vld [vmem:[%s2294_s28 + $0x218] sm:$0xf]  ;;  %311 = vst [vmem:[%s2301_s29 + $0x104] sm:$0xf] %v310_v1 }
  0x42   : > { %313 = vst [vmem:[%s2301_s29 + $0x108] sm:$0xf] %v312_v2  ;;  %315 = vst [vmem:[%s2301_s29 + $0x10c] sm:$0xf] %v314_v3  ;;  %v316_v4 = vld [vmem:[%s2294_s28 + $0x220] sm:$0xf] }
  0x43   : > { %v318_v5 = vld [vmem:[%s2294_s28 + $0x228] sm:$0xf]  ;;  %v320_v6 = vld [vmem:[%s2294_s28 + $0x230] sm:$0xf]  ;;  %317 = vst [vmem:[%s2301_s29 + $0x110] sm:$0xf] %v316_v4 }
  0x44   : > { %319 = vst [vmem:[%s2301_s29 + $0x114] sm:$0xf] %v318_v5  ;;  %321 = vst [vmem:[%s2301_s29 + $0x118] sm:$0xf] %v320_v6  ;;  %v322_v7 = vld [vmem:[%s2294_s28 + $0x238] sm:$0xf] }
  0x45   : > { %v324_v8 = vld [vmem:[%s2294_s28 + $0x240] sm:$0xf]  ;;  %v326_v9 = vld [vmem:[%s2294_s28 + $0x248] sm:$0xf]  ;;  %323 = vst [vmem:[%s2301_s29 + $0x11c] sm:$0xf] %v322_v7 }
  0x46   : > { %325 = vst [vmem:[%s2301_s29 + $0x120] sm:$0xf] %v324_v8  ;;  %327 = vst [vmem:[%s2301_s29 + $0x124] sm:$0xf] %v326_v9  ;;  %v328_v10 = vld [vmem:[%s2294_s28 + $0x250] sm:$0xf] }
  0x47   : > { %v330_v11 = vld [vmem:[%s2294_s28 + $0x258] sm:$0xf]  ;;  %v332_v12 = vld [vmem:[%s2294_s28 + $0x260] sm:$0xf]  ;;  %329 = vst [vmem:[%s2301_s29 + $0x128] sm:$0xf] %v328_v10 }
  0x48   : > { %331 = vst [vmem:[%s2301_s29 + $0x12c] sm:$0xf] %v330_v11  ;;  %333 = vst [vmem:[%s2301_s29 + $0x130] sm:$0xf] %v332_v12  ;;  %v334_v13 = vld [vmem:[%s2294_s28 + $0x268] sm:$0xf] }
  0x49   : > { %v336_v14 = vld [vmem:[%s2294_s28 + $0x270] sm:$0xf]  ;;  %v338_v15 = vld [vmem:[%s2294_s28 + $0x278] sm:$0xf]  ;;  %335 = vst [vmem:[%s2301_s29 + $0x134] sm:$0xf] %v334_v13 }
  0x4a   : > { %337 = vst [vmem:[%s2301_s29 + $0x138] sm:$0xf] %v336_v14  ;;  %339 = vst [vmem:[%s2301_s29 + $0x13c] sm:$0xf] %v338_v15  ;;  %v340_v16 = vld [vmem:[%s2294_s28 + $0x280] sm:$0xf] }
  0x4b   : > { %v342_v17 = vld [vmem:[%s2294_s28 + $0x288] sm:$0xf]  ;;  %v344_v18 = vld [vmem:[%s2294_s28 + $0x290] sm:$0xf]  ;;  %341 = vst [vmem:[%s2301_s29 + $0x140] sm:$0xf] %v340_v16 }
  0x4c   : > { %343 = vst [vmem:[%s2301_s29 + $0x144] sm:$0xf] %v342_v17  ;;  %345 = vst [vmem:[%s2301_s29 + $0x148] sm:$0xf] %v344_v18  ;;  %v346_v19 = vld [vmem:[%s2294_s28 + $0x298] sm:$0xf] }
  0x4d   : > { %v348_v20 = vld [vmem:[%s2294_s28 + $0x2a0] sm:$0xf]  ;;  %v350_v21 = vld [vmem:[%s2294_s28 + $0x2a8] sm:$0xf]  ;;  %347 = vst [vmem:[%s2301_s29 + $0x14c] sm:$0xf] %v346_v19 }
  0x4e   : > { %349 = vst [vmem:[%s2301_s29 + $0x150] sm:$0xf] %v348_v20  ;;  %351 = vst [vmem:[%s2301_s29 + $0x154] sm:$0xf] %v350_v21  ;;  %v352_v22 = vld [vmem:[%s2294_s28 + $0x2b0] sm:$0xf] }
  0x4f   : > { %v354_v23 = vld [vmem:[%s2294_s28 + $0x2b8] sm:$0xf]  ;;  %v356_v24 = vld [vmem:[%s2294_s28 + $0x2c0] sm:$0xf]  ;;  %353 = vst [vmem:[%s2301_s29 + $0x158] sm:$0xf] %v352_v22 }
  0x50   : > { %355 = vst [vmem:[%s2301_s29 + $0x15c] sm:$0xf] %v354_v23  ;;  %357 = vst [vmem:[%s2301_s29 + $0x160] sm:$0xf] %v356_v24  ;;  %v358_v25 = vld [vmem:[%s2294_s28 + $0x2c8] sm:$0xf] }
  0x51   : > { %v360_v26 = vld [vmem:[%s2294_s28 + $0x2d0] sm:$0xf]  ;;  %v362_v27 = vld [vmem:[%s2294_s28 + $0x2d8] sm:$0xf]  ;;  %359 = vst [vmem:[%s2301_s29 + $0x164] sm:$0xf] %v358_v25 }
  0x52   : > { %361 = vst [vmem:[%s2301_s29 + $0x168] sm:$0xf] %v360_v26  ;;  %363 = vst [vmem:[%s2301_s29 + $0x16c] sm:$0xf] %v362_v27  ;;  %v364_v28 = vld [vmem:[%s2294_s28 + $0x2e0] sm:$0xf] }
  0x53   : > { %v366_v29 = vld [vmem:[%s2294_s28 + $0x2e8] sm:$0xf]  ;;  %v368_v30 = vld [vmem:[%s2294_s28 + $0x2f0] sm:$0xf]  ;;  %365 = vst [vmem:[%s2301_s29 + $0x170] sm:$0xf] %v364_v28 }
  0x54   : > { %367 = vst [vmem:[%s2301_s29 + $0x174] sm:$0xf] %v366_v29  ;;  %369 = vst [vmem:[%s2301_s29 + $0x178] sm:$0xf] %v368_v30  ;;  %v370_v31 = vld [vmem:[%s2294_s28 + $0x2f8] sm:$0xf] }
  0x55   : > { %v372_v32 = vld [vmem:[%s2294_s28 + $0x300] sm:$0xf]  ;;  %v374_v33 = vld [vmem:[%s2294_s28 + $0x308] sm:$0xf]  ;;  %371 = vst [vmem:[%s2301_s29 + $0x17c] sm:$0xf] %v370_v31 }
  0x56   : > { %373 = vst [vmem:[%s2301_s29 + $0x180] sm:$0xf] %v372_v32  ;;  %375 = vst [vmem:[%s2301_s29 + $0x184] sm:$0xf] %v374_v33  ;;  %v376_v34 = vld [vmem:[%s2294_s28 + $0x310] sm:$0xf] }
  0x57   : > { %v378_v35 = vld [vmem:[%s2294_s28 + $0x318] sm:$0xf]  ;;  %v380_v36 = vld [vmem:[%s2294_s28 + $0x320] sm:$0xf]  ;;  %377 = vst [vmem:[%s2301_s29 + $0x188] sm:$0xf] %v376_v34 }
  0x58   : > { %379 = vst [vmem:[%s2301_s29 + $0x18c] sm:$0xf] %v378_v35  ;;  %381 = vst [vmem:[%s2301_s29 + $0x190] sm:$0xf] %v380_v36  ;;  %v382_v37 = vld [vmem:[%s2294_s28 + $0x328] sm:$0xf] }
  0x59   : > { %v384_v38 = vld [vmem:[%s2294_s28 + $0x330] sm:$0xf]  ;;  %v386_v39 = vld [vmem:[%s2294_s28 + $0x338] sm:$0xf]  ;;  %383 = vst [vmem:[%s2301_s29 + $0x194] sm:$0xf] %v382_v37 }
  0x5a   : > { %385 = vst [vmem:[%s2301_s29 + $0x198] sm:$0xf] %v384_v38  ;;  %387 = vst [vmem:[%s2301_s29 + $0x19c] sm:$0xf] %v386_v39  ;;  %v388_v40 = vld [vmem:[%s2294_s28 + $0x340] sm:$0xf] }
  0x5b   : > { %v390_v41 = vld [vmem:[%s2294_s28 + $0x348] sm:$0xf]  ;;  %v392_v42 = vld [vmem:[%s2294_s28 + $0x350] sm:$0xf]  ;;  %389 = vst [vmem:[%s2301_s29 + $0x1a0] sm:$0xf] %v388_v40 }
  0x5c   : > { %391 = vst [vmem:[%s2301_s29 + $0x1a4] sm:$0xf] %v390_v41  ;;  %393 = vst [vmem:[%s2301_s29 + $0x1a8] sm:$0xf] %v392_v42  ;;  %v394_v43 = vld [vmem:[%s2294_s28 + $0x358] sm:$0xf] }
  0x5d   : > { %v396_v44 = vld [vmem:[%s2294_s28 + $0x360] sm:$0xf]  ;;  %v398_v45 = vld [vmem:[%s2294_s28 + $0x368] sm:$0xf]  ;;  %395 = vst [vmem:[%s2301_s29 + $0x1ac] sm:$0xf] %v394_v43 }
  0x5e   : > { %397 = vst [vmem:[%s2301_s29 + $0x1b0] sm:$0xf] %v396_v44  ;;  %399 = vst [vmem:[%s2301_s29 + $0x1b4] sm:$0xf] %v398_v45  ;;  %v400_v46 = vld [vmem:[%s2294_s28 + $0x370] sm:$0xf] }
  0x5f   : > { %v402_v47 = vld [vmem:[%s2294_s28 + $0x378] sm:$0xf]  ;;  %v404_v48 = vld [vmem:[%s2294_s28 + $0x380] sm:$0xf]  ;;  %401 = vst [vmem:[%s2301_s29 + $0x1b8] sm:$0xf] %v400_v46 }
  0x60   : > { %403 = vst [vmem:[%s2301_s29 + $0x1bc] sm:$0xf] %v402_v47  ;;  %405 = vst [vmem:[%s2301_s29 + $0x1c0] sm:$0xf] %v404_v48  ;;  %v406_v49 = vld [vmem:[%s2294_s28 + $0x388] sm:$0xf] }
  0x61   : > { %v408_v50 = vld [vmem:[%s2294_s28 + $0x390] sm:$0xf]  ;;  %v410_v51 = vld [vmem:[%s2294_s28 + $0x398] sm:$0xf]  ;;  %407 = vst [vmem:[%s2301_s29 + $0x1c4] sm:$0xf] %v406_v49 }
  0x62   : > { %409 = vst [vmem:[%s2301_s29 + $0x1c8] sm:$0xf] %v408_v50  ;;  %411 = vst [vmem:[%s2301_s29 + $0x1cc] sm:$0xf] %v410_v51  ;;  %v412_v52 = vld [vmem:[%s2294_s28 + $0x3a0] sm:$0xf] }
  0x63   : > { %v414_v53 = vld [vmem:[%s2294_s28 + $0x3a8] sm:$0xf]  ;;  %v416_v54 = vld [vmem:[%s2294_s28 + $0x3b0] sm:$0xf]  ;;  %413 = vst [vmem:[%s2301_s29 + $0x1d0] sm:$0xf] %v412_v52 }
  0x64   : > { %415 = vst [vmem:[%s2301_s29 + $0x1d4] sm:$0xf] %v414_v53  ;;  %417 = vst [vmem:[%s2301_s29 + $0x1d8] sm:$0xf] %v416_v54  ;;  %v418_v55 = vld [vmem:[%s2294_s28 + $0x3b8] sm:$0xf] }
  0x65   : > { %v420_v56 = vld [vmem:[%s2294_s28 + $0x3c0] sm:$0xf]  ;;  %v422_v57 = vld [vmem:[%s2294_s28 + $0x3c8] sm:$0xf]  ;;  %419 = vst [vmem:[%s2301_s29 + $0x1dc] sm:$0xf] %v418_v55 }
  0x66   : > { %421 = vst [vmem:[%s2301_s29 + $0x1e0] sm:$0xf] %v420_v56  ;;  %423 = vst [vmem:[%s2301_s29 + $0x1e4] sm:$0xf] %v422_v57  ;;  %v424_v58 = vld [vmem:[%s2294_s28 + $0x3d0] sm:$0xf] }
  0x67   : > { %v426_v59 = vld [vmem:[%s2294_s28 + $0x3d8] sm:$0xf]  ;;  %v428_v60 = vld [vmem:[%s2294_s28 + $0x3e0] sm:$0xf]  ;;  %425 = vst [vmem:[%s2301_s29 + $0x1e8] sm:$0xf] %v424_v58 }
  0x68   : > { %427 = vst [vmem:[%s2301_s29 + $0x1ec] sm:$0xf] %v426_v59  ;;  %429 = vst [vmem:[%s2301_s29 + $0x1f0] sm:$0xf] %v428_v60  ;;  %v430_v61 = vld [vmem:[%s2294_s28 + $0x3e8] sm:$0xf] }
  0x69   : > { %v432_v62 = vld [vmem:[%s2294_s28 + $0x3f0] sm:$0xf]  ;;  %v434_v63 = vld [vmem:[%s2294_s28 + $0x3f8] sm:$0xf]  ;;  %431 = vst [vmem:[%s2301_s29 + $0x1f4] sm:$0xf] %v430_v61 }
  0x6a   : > { %433 = vst [vmem:[%s2301_s29 + $0x1f8] sm:$0xf] %v432_v62  ;;  %435 = vst [vmem:[%s2301_s29 + $0x1fc] sm:$0xf] %v434_v63  ;;  %v436_v0 = vld [vmem:[%s2294_s28 + $0x400] sm:$0xf] }
  0x6b   : > { %v438_v1 = vld [vmem:[%s2294_s28 + $0x408] sm:$0xf]  ;;  %v440_v2 = vld [vmem:[%s2294_s28 + $0x410] sm:$0xf]  ;;  %437 = vst [vmem:[%s2301_s29 + $0x200] sm:$0xf] %v436_v0 }
  0x6c   : > { %439 = vst [vmem:[%s2301_s29 + $0x204] sm:$0xf] %v438_v1  ;;  %441 = vst [vmem:[%s2301_s29 + $0x208] sm:$0xf] %v440_v2  ;;  %v442_v3 = vld [vmem:[%s2294_s28 + $0x418] sm:$0xf] }
  0x6d   : > { %v444_v4 = vld [vmem:[%s2294_s28 + $0x420] sm:$0xf]  ;;  %v446_v5 = vld [vmem:[%s2294_s28 + $0x428] sm:$0xf]  ;;  %443 = vst [vmem:[%s2301_s29 + $0x20c] sm:$0xf] %v442_v3 }
  0x6e   : > { %445 = vst [vmem:[%s2301_s29 + $0x210] sm:$0xf] %v444_v4  ;;  %447 = vst [vmem:[%s2301_s29 + $0x214] sm:$0xf] %v446_v5  ;;  %v448_v6 = vld [vmem:[%s2294_s28 + $0x430] sm:$0xf] }
  0x6f   : > { %v450_v7 = vld [vmem:[%s2294_s28 + $0x438] sm:$0xf]  ;;  %v452_v8 = vld [vmem:[%s2294_s28 + $0x440] sm:$0xf]  ;;  %449 = vst [vmem:[%s2301_s29 + $0x218] sm:$0xf] %v448_v6 }
  0x70   : > { %451 = vst [vmem:[%s2301_s29 + $0x21c] sm:$0xf] %v450_v7  ;;  %453 = vst [vmem:[%s2301_s29 + $0x220] sm:$0xf] %v452_v8  ;;  %v454_v9 = vld [vmem:[%s2294_s28 + $0x448] sm:$0xf] }
  0x71   : > { %v456_v10 = vld [vmem:[%s2294_s28 + $0x450] sm:$0xf]  ;;  %v458_v11 = vld [vmem:[%s2294_s28 + $0x458] sm:$0xf]  ;;  %455 = vst [vmem:[%s2301_s29 + $0x224] sm:$0xf] %v454_v9 }
  0x72   : > { %457 = vst [vmem:[%s2301_s29 + $0x228] sm:$0xf] %v456_v10  ;;  %459 = vst [vmem:[%s2301_s29 + $0x22c] sm:$0xf] %v458_v11  ;;  %v460_v12 = vld [vmem:[%s2294_s28 + $0x460] sm:$0xf] }
  0x73   : > { %v462_v13 = vld [vmem:[%s2294_s28 + $0x468] sm:$0xf]  ;;  %v464_v14 = vld [vmem:[%s2294_s28 + $0x470] sm:$0xf]  ;;  %461 = vst [vmem:[%s2301_s29 + $0x230] sm:$0xf] %v460_v12 }
  0x74   : > { %463 = vst [vmem:[%s2301_s29 + $0x234] sm:$0xf] %v462_v13  ;;  %465 = vst [vmem:[%s2301_s29 + $0x238] sm:$0xf] %v464_v14  ;;  %v466_v15 = vld [vmem:[%s2294_s28 + $0x478] sm:$0xf] }
  0x75   : > { %467 = vst [vmem:[%s2301_s29 + $0x23c] sm:$0xf] %v466_v15 }
  0x76 PF: > { %p1841_p8 = scmp.ge.s32.totalorder %s2222_s16, 1  ;;  %p783_p9 = scmp.lt.s32.totalorder %s2222_s16, 3 }
  0x78   : > { %p784_p10 = pnand %p1841_p8, %p783_p9 }
  0x79   : > { %s790_s30 = sand.u32 (!%p784_p10), 1, %s2206_s12   ;;  %v2132_v16 = vld [vmem:[%s2720_s0 + $0x4] ss:$36 sps:$4 sm:$0xff] (!%p784_p10)   ;;  %v2137_v17 = vld [vmem:[%s2720_s0 + $0xc] ss:$36 sps:$4 sm:$0xff] (!%p784_p10)   ;;  %vm2225_vm0 = vmmov (!%p784_p10), 0  }
  0x7a   : > { %787 = sbr.rel (%p784_p10) target bundleno = 452 (0x1c4), region = 69  ;;  %1504 = vmatprep.mubr.bf16.mxu0 (!%p784_p10), %v2132_v16  ;;  %1545 = vmatprep.mubr.bf16.mxu1 (!%p784_p10), %v2137_v17  ;;  %v2130_v47 = vld [vmem:[%s2720_s0] ss:$36 sps:$4 sm:$0xff] (!%p784_p10)   ;;  %v2170_v49 = vld [vmem:[%s2720_s0 + $0x14] ss:$36 sps:$4 sm:$0xff] (!%p784_p10)   ;;  %p828_p11 = scmp.lt.s32.totalorder (!%p784_p10), %s2214_s14, 1 }
  0x7b   : > { %s2056_s4 = smul.u32 (!%p784_p10), 576, %s790_s30  ;;  %v2135_v51 = vld [vmem:[%s2720_s0 + $0x8] ss:$36 sps:$4 sm:$0xff] (!%p784_p10)  }
  0x7d   : > { %s2597_s9 = scalar_lea.vmem (!%p784_p10), [#allocation2], %s2056_s4 }
  0x7e   : > { %v2099_v18 = vld [vmem:[%s2597_s9 + $0x40] sm:$0xff] (!%p784_p10)   ;;  %v2103_v22 = vld [vmem:[%s2597_s9 + $0x48] sm:$0xff] (!%p784_p10)   ;;  %v2107_v26 = vld [vmem:[%s2597_s9 + $0x50] sm:$0xff] (!%p784_p10)  }
  0x7f   : > { %v2100_v19 = vld [vmem:[%s2597_s9] sm:$0xff] (!%p784_p10)   ;;  %1938 = vmatprep.subr.bf16.mxu0 (!%p784_p10), %v2099_v18  ;;  %v2104_v23 = vld [vmem:[%s2597_s9 + $0x8] sm:$0xff] (!%p784_p10)   ;;  %v2108_v27 = vld [vmem:[%s2597_s9 + $0x10] sm:$0xff] (!%p784_p10)  }
  0x80   : > { %v2101_v20 = vld [vmem:[%s2597_s9 + $0xc0] sm:$0xff] (!%p784_p10)   ;;  %1939 = vmatpush3.bf16.msra.mxu0 (!%p784_p10), %v2100_v19  ;;  %v2105_v24 = vld [vmem:[%s2597_s9 + $0xc8] sm:$0xff] (!%p784_p10)   ;;  %v2109_v28 = vld [vmem:[%s2597_s9 + $0xd0] sm:$0xff] (!%p784_p10)  }
  0x81   : > { %v2102_v21 = vld [vmem:[%s2597_s9 + $0x80] sm:$0xff]   ;;  %1960 = vmatprep.subr.bf16.mxu1 %v2101_v20  ;;  %1940 = vmatprep.subr.bf16.mxu0 %v2103_v22  ;;  %v2106_v25 = vld [vmem:[%s2597_s9 + $0x88] sm:$0xff]   ;;  %v2110_v29 = vld [vmem:[%s2597_s9 + $0x90] sm:$0xff]   ;;  %v2224_v22 = vmov 0.0   ;;  %s829_s6 = scalar_select %p828_p11, %s2214_s14, 1 }
  0x82   : > { %1961 = vmatpush3.bf16.msra.mxu1 %v2102_v21  ;;  %v2111_v30 = vld [vmem:[%s2597_s9 + $0x58] sm:$0xff]   ;;  %v2115_v34 = vld [vmem:[%s2597_s9 + $0x60] sm:$0xff]   ;;  %v2119_v38 = vld [vmem:[%s2597_s9 + $0x68] sm:$0xff]   ;;  %s1928_s18 = sshll.u32 (%p2281_p6), %s2214_s14, 2 }
  0x83   : > { %1962 = vmatprep.subr.bf16.mxu1 %v2105_v24  ;;  %v2112_v31 = vld [vmem:[%s2597_s9 + $0x18] sm:$0xff]   ;;  %v2116_v35 = vld [vmem:[%s2597_s9 + $0x20] sm:$0xff]   ;;  %v2120_v39 = vld [vmem:[%s2597_s9 + $0x28] sm:$0xff]   ;;  %s830_s10 = scalar_lea.vmem %s2722_s2, %s829_s6  ;;  %s1700_s23 = scalar_lea.vmem (%p2281_p6), %s2723_s3, %s1928_s18 }
  0x84   : > { %1941 = vmatpush3.bf16.msra.mxu0 %v2104_v23  ;;  %v2113_v32 = vld [vmem:[%s2597_s9 + $0xd8] sm:$0xff]   ;;  %v2117_v36 = vld [vmem:[%s2597_s9 + $0xe0] sm:$0xff]   ;;  %v2121_v40 = vld [vmem:[%s2597_s9 + $0xe8] sm:$0xff]  }
  0x85   : > { %1942 = vmatprep.subr.bf16.mxu0 %v2107_v26  ;;  %v2114_v33 = vld [vmem:[%s2597_s9 + $0x98] sm:$0xff]   ;;  %v2118_v37 = vld [vmem:[%s2597_s9 + $0xa0] sm:$0xff]   ;;  %v2122_v41 = vld [vmem:[%s2597_s9 + $0xa8] sm:$0xff]  }
  0x86   : > { %1963 = vmatpush3.bf16.msra.mxu1 %v2106_v25  ;;  %v2123_v42 = vld [vmem:[%s2597_s9 + $0x70] sm:$0xff]   ;;  %v2127_v46 = vld [vmem:[%s2597_s9 + $0x78] sm:$0xff]   ;;  %v2134_v53 = vld [vmem:[%s2597_s9 + $0x140] sm:$0xff]  }
  0x87   : > { %1964 = vmatprep.subr.bf16.mxu1 %v2109_v28  ;;  %v2124_v43 = vld [vmem:[%s2597_s9 + $0x30] sm:$0xff]   ;;  %v2128_v48 = vld [vmem:[%s2597_s9 + $0x38] sm:$0xff]   ;;  %v2138_v54 = vld [vmem:[%s2597_s9 + $0x100] sm:$0xff]  }
  0x88   : > { %1943 = vmatpush3.bf16.msra.mxu0 %v2108_v27  ;;  %v2125_v44 = vld [vmem:[%s2597_s9 + $0xf0] sm:$0xff]   ;;  %v2129_v50 = vld [vmem:[%s2597_s9 + $0xf8] sm:$0xff]   ;;  %v2139_v55 = vld [vmem:[%s2597_s9 + $0x1c0] sm:$0xff]  }
  0x89   : > { %1944 = vmatprep.subr.bf16.mxu0 %v2111_v30  ;;  %v2126_v45 = vld [vmem:[%s2597_s9 + $0xb0] sm:$0xff]   ;;  %v2133_v52 = vld [vmem:[%s2597_s9 + $0xb8] sm:$0xff]   ;;  %v2140_v56 = vld [vmem:[%s2597_s9 + $0x180] sm:$0xff]  }
  0x8a   : > { %1965 = vmatpush3.bf16.msra.mxu1 %v2110_v29  ;;  %v2141_v57 = vld [vmem:[%s2597_s9 + $0x148] sm:$0xff]   ;;  %v2145_v61 = vld [vmem:[%s2597_s9 + $0x150] sm:$0xff]   ;;  %v2149_v1 = vld [vmem:[%s2597_s9 + $0x158] sm:$0xff]  }
  0x8b   : > { %1966 = vmatprep.subr.bf16.mxu1 %v2113_v32  ;;  %v2142_v58 = vld [vmem:[%s2597_s9 + $0x108] sm:$0xff]   ;;  %v2146_v62 = vld [vmem:[%s2597_s9 + $0x110] sm:$0xff]   ;;  %v2150_v2 = vld [vmem:[%s2597_s9 + $0x118] sm:$0xff]  }
  0x8c   : > { %1945 = vmatpush3.bf16.msra.mxu0 %v2112_v31  ;;  %v2143_v59 = vld [vmem:[%s2597_s9 + $0x1c8] sm:$0xff]   ;;  %v2147_v63 = vld [vmem:[%s2597_s9 + $0x1d0] sm:$0xff]   ;;  %v2151_v3 = vld [vmem:[%s2597_s9 + $0x1d8] sm:$0xff]  }
  0x8d   : > { %1946 = vmatprep.subr.bf16.mxu0 %v2115_v34  ;;  %v2144_v60 = vld [vmem:[%s2597_s9 + $0x188] sm:$0xff]   ;;  %v2148_v0 = vld [vmem:[%s2597_s9 + $0x190] sm:$0xff]   ;;  %v2152_v4 = vld [vmem:[%s2597_s9 + $0x198] sm:$0xff]  }
  0x8e   : > { %1967 = vmatpush3.bf16.msra.mxu1 %v2114_v33  ;;  %v2153_v5 = vld [vmem:[%s2597_s9 + $0x160] sm:$0xff]   ;;  %v2157_v9 = vld [vmem:[%s2597_s9 + $0x168] sm:$0xff]   ;;  %v2161_v13 = vld [vmem:[%s2597_s9 + $0x170] sm:$0xff]  }
  0x8f   : > { %1968 = vmatprep.subr.bf16.mxu1 %v2117_v36  ;;  %v2154_v6 = vld [vmem:[%s2597_s9 + $0x120] sm:$0xff]   ;;  %v2158_v10 = vld [vmem:[%s2597_s9 + $0x128] sm:$0xff]   ;;  %v2162_v14 = vld [vmem:[%s2597_s9 + $0x130] sm:$0xff]  }
  0x90   : > { %1947 = vmatpush3.bf16.msra.mxu0 %v2116_v35  ;;  %v2155_v7 = vld [vmem:[%s2597_s9 + $0x1e0] sm:$0xff]   ;;  %v2159_v11 = vld [vmem:[%s2597_s9 + $0x1e8] sm:$0xff]   ;;  %v2163_v15 = vld [vmem:[%s2597_s9 + $0x1f0] sm:$0xff]  }
  0x91   : > { %1948 = vmatprep.subr.bf16.mxu0 %v2119_v38  ;;  %v2156_v8 = vld [vmem:[%s2597_s9 + $0x1a0] sm:$0xff]   ;;  %v2160_v12 = vld [vmem:[%s2597_s9 + $0x1a8] sm:$0xff]   ;;  %v2164_v16 = vld [vmem:[%s2597_s9 + $0x1b0] sm:$0xff]  }
  0x92   : > { %1969 = vmatpush3.bf16.msra.mxu1 %v2118_v37  ;;  %v2165_v17 = vld [vmem:[%s2597_s9 + $0x178] sm:$0xff]   ;;  %v2168_v18 = vld [vmem:[%s2720_s0 + $0x10] ss:$36 sps:$4 sm:$0xff]   ;;  %v2175_v25 = vld [vmem:[%s2597_s9 + $0x200] sm:$0xff]  }
  0x93   : > { %1970 = vmatprep.subr.bf16.mxu1 %v2121_v40  ;;  %v2166_v19 = vld [vmem:[%s2597_s9 + $0x138] sm:$0xff]   ;;  %v2176_v26 = vld [vmem:[%s2597_s9 + $0x208] sm:$0xff]   ;;  %v2177_v27 = vld [vmem:[%s2597_s9 + $0x210] sm:$0xff]  }
  0x94   : > { %1949 = vmatpush3.bf16.msra.mxu0 %v2120_v39  ;;  %v2167_v20 = vld [vmem:[%s2597_s9 + $0x1f8] sm:$0xff]   ;;  %v2179_v29 = vld [vmem:[%s2597_s9 + $0x220] sm:$0xff]   ;;  %v2180_v30 = vld [vmem:[%s2597_s9 + $0x228] sm:$0xff]  }
  0x95   : > { %1950 = vmatprep.subr.bf16.mxu0 %v2123_v42  ;;  %v2171_v21 = vld [vmem:[%s2597_s9 + $0x1b8] sm:$0xff]   ;;  %v2181_v31 = vld [vmem:[%s2597_s9 + $0x230] sm:$0xff]   ;;  %v2183_v33 = vld [vmem:[%s2720_s0 + $0x20] ss:$36 sps:$4 sm:$0xff]  }
  0x96   : > { %1971 = vmatpush3.bf16.msra.mxu1 %v2122_v41  ;;  %v2172_v23 = vld [vmem:[%s2720_s0 + $0x18] ss:$36 sps:$4 sm:$0xff]   ;;  %v1843_v35 = vld [vmem:[%s830_s10] ss:$0 sm:$0xff] }
  0x97   : > { %1972 = vmatprep.subr.bf16.mxu1 %v2125_v44  ;;  %v2174_v24 = vld [vmem:[%s2720_s0 + $0x1c] ss:$36 sps:$4 sm:$0xff]  }
  0x98   : > { %1951 = vmatpush3.bf16.msra.mxu0 %v2124_v43  ;;  %v2178_v28 = vld [vmem:[%s2597_s9 + $0x218] sm:$0xff]  }
  0x99   : > { %1952 = vmatprep.subr.bf16.mxu0 %v2127_v46  ;;  %v2182_v32 = vld [vmem:[%s2597_s9 + $0x238] sm:$0xff]   ;;  %s1842_s9 = sshll.u32 %s790_s30, 3 }
  0x9a   : > { %1973 = vmatpush3.bf16.msra.mxu1 %v2126_v45  ;;  %s820_s11 = scalar_lea.vmem [#allocation3], %s1842_s9 }
  0x9b   : > { %1974 = vmatprep.subr.bf16.mxu1 %v2129_v50 }
  0x9c   : > { %1953 = vmatpush3.bf16.msra.mxu0 %v2128_v48 }
  0x9d   : > { %1982 = vmatprep.subr.bf16.mxu0 %v2134_v53 }
  0x9e   : > { %1975 = vmatpush3.bf16.msra.mxu1 %v2133_v52 }
  0x9f   : > { %1505 = vmatmul.mubr.bf16.vlgmr.msra.gmra.mrb[0].mxu0 %v2130_v47  ;;  %2004 = vmatprep.subr.bf16.mxu1 %v2139_v55 }
  0xa0   : > { %1983 = vmatpush3.bf16.msra.mxu0 %v2138_v54  ;;  %1586 = vmatprep.mubr.bf16.mxu0 %v2170_v49 }
  0xa1   : > { %1546 = vmatmul.mubr.bf16.vlgmr.msra.gmra.mrb[0].mxu1 %v2135_v51  ;;  %1984 = vmatprep.subr.bf16.mxu0 %v2141_v57 }
  0xa2   : > { %2005 = vmatpush3.bf16.msra.mxu1 %v2140_v56  ;;  %1627 = vmatprep.mubr.bf16.mxu1 %v2174_v24 }
  0xa3   : > { %2006 = vmatprep.subr.bf16.mxu1 %v2143_v59 }
  0xa4   : > { %1985 = vmatpush3.bf16.msra.mxu0 %v2142_v58 }
  0xa5   : > { %1986 = vmatprep.subr.bf16.mxu0 %v2145_v61 }
  0xa6   : > { %2007 = vmatpush3.bf16.msra.mxu1 %v2144_v60 }
  0xa7   : > { %2008 = vmatprep.subr.bf16.mxu1 %v2147_v63 }
  0xa8   : > { %1987 = vmatpush3.bf16.msra.mxu0 %v2146_v62 }
  0xa9   : > { %1988 = vmatprep.subr.bf16.mxu0 %v2149_v1 }
  0xaa   : > { %2009 = vmatpush3.bf16.msra.mxu1 %v2148_v0 }
  0xab   : > { %2010 = vmatprep.subr.bf16.mxu1 %v2151_v3 }
  0xac   : > { %1989 = vmatpush3.bf16.msra.mxu0 %v2150_v2 }
  0xad   : > { %1990 = vmatprep.subr.bf16.mxu0 %v2153_v5 }
  0xae   : > { %2011 = vmatpush3.bf16.msra.mxu1 %v2152_v4 }
  0xaf   : > { %2012 = vmatprep.subr.bf16.mxu1 %v2155_v7 }
  0xb0   : > { %1991 = vmatpush3.bf16.msra.mxu0 %v2154_v6 }
  0xb1   : > { %1992 = vmatprep.subr.bf16.mxu0 %v2157_v9 }
  0xb2   : > { %2013 = vmatpush3.bf16.msra.mxu1 %v2156_v8 }
  0xb3   : > { %2014 = vmatprep.subr.bf16.mxu1 %v2159_v11 }
  0xb4   : > { %1993 = vmatpush3.bf16.msra.mxu0 %v2158_v10 }
  0xb5   : > { %1994 = vmatprep.subr.bf16.mxu0 %v2161_v13 }
  0xb6   : > { %2015 = vmatpush3.bf16.msra.mxu1 %v2160_v12 }
  0xb7   : > { %2016 = vmatprep.subr.bf16.mxu1 %v2163_v15 }
  0xb8   : > { %1995 = vmatpush3.bf16.msra.mxu0 %v2162_v14 }
  0xb9   : > { %1996 = vmatprep.subr.bf16.mxu0 %v2165_v17 }
  0xba   : > { %2017 = vmatpush3.bf16.msra.mxu1 %v2164_v16 }
  0xbb   : > { %2018 = vmatprep.subr.bf16.mxu1 %v2167_v20 }
  0xbc   : > { %1997 = vmatpush3.bf16.msra.mxu0 %v2166_v19 }
  0xbd   : > { %2035 = vmatprep.subr.bf16.mxu0 %v2224_v22 }
  0xbe   : > { %2019 = vmatpush3.bf16.msra.mxu1 %v2171_v21 }
  0xbf   : > { %1587 = vmatmul.mubr.bf16.vlgmr.msra.gmra.mrb[4].mxu0 %v2168_v18 }
  0xc0   : > { %2051 = vmatprep.mubr.msk.bf16.mxu0 %vm2225_vm0, %v2224_v22  ;;  %2036 = vmatpush3.bf16.msra.mxu0 %v2175_v25 }
  0xc1   : > { %1628 = vmatmul.mubr.bf16.vlgmr.msra.gmra.mrb[4].mxu1 %v2172_v23  ;;  %2037 = vmatprep.subr.bf16.mxu0 %v2224_v22 }
  0xc4   : > { %2038 = vmatpush3.bf16.msra.mxu0 %v2176_v26 }
  0xc5   : > { %2039 = vmatprep.subr.bf16.mxu0 %v2224_v22 }
  0xc8   : > { %2040 = vmatpush3.bf16.msra.mxu0 %v2177_v27 }
  0xc9   : > { %2041 = vmatprep.subr.bf16.mxu0 %v2224_v22 }
  0xcc   : > { %2042 = vmatpush3.bf16.msra.mxu0 %v2178_v28 }
  0xcd   : > { %2043 = vmatprep.subr.bf16.mxu0 %v2224_v22 }
  0xd0   : > { %2044 = vmatpush3.bf16.msra.mxu0 %v2179_v29 }
  0xd1   : > { %2045 = vmatprep.subr.bf16.mxu0 %v2224_v22 }
  0xd4   : > { %2046 = vmatpush3.bf16.msra.mxu0 %v2180_v30 }
  0xd5   : > { %2047 = vmatprep.subr.bf16.mxu0 %v2224_v22 }
  0xd8   : > { %2048 = vmatpush3.bf16.msra.mxu0 %v2181_v31 }
  0xd9   : > { %2049 = vmatprep.subr.bf16.mxu0 %v2224_v22 }
  0xdc   : > { %2050 = vmatpush3.bf16.msra.mxu0 %v2182_v32 }
  0xdf   : > { %2052 = vmatmul.mubr.bf16.vlgmr.msra.gmra.mrb[8].mxu0 %v2183_v33 }
 0x172   : > { %v1954_v34 = vpop.f32.mrb[0].mxu0 }
 0x173   : > { %v1955_v36 = vpop.f32.mrb[1].mxu0 }
 0x174   : > { %v1956_v37 = vadd.f32 %v1955_v36, %v1954_v34  ;;  %v1957_v38 = vpop.f32.mrb[2].mxu0  ;;  %v1976_v39 = vpop.f32.mrb[0].mxu1 }
 0x175   : > { %v1958_v40 = vpop.f32.mrb[3].mxu0  ;;  %v1977_v41 = vpop.f32.mrb[1].mxu1 }
 0x176   : > { %v1507_v42 = vadd.f32 %v1956_v37, %v1843_v35  ;;  %v1959_v43 = vadd.f32 %v1958_v40, %v1957_v38  ;;  %v1978_v44 = vadd.f32 %v1977_v41, %v1976_v39  ;;  %v1979_v45 = vpop.f32.mrb[2].mxu1 }
 0x177   : > { %v1980_v46 = vpop.f32.mrb[3].mxu1 }
 0x178   : > { %v1510_v47 = vadd.f32 %v1959_v43, %v1843_v35  ;;  %v1548_v48 = vadd.f32 %v1978_v44, %v1507_v42  ;;  %v1981_v49 = vadd.f32 %v1980_v46, %v1979_v45 }
 0x17a   : > { %v1551_v50 = vadd.f32 %v1981_v49, %v1510_v47 }
 0x192   : > { %v1998_v51 = vpop.f32.mrb[4].mxu0 }
 0x193   : > { %v1999_v52 = vpop.f32.mrb[5].mxu0 }
 0x194   : > { %v2000_v53 = vadd.f32 %v1999_v52, %v1998_v51  ;;  %v2001_v54 = vpop.f32.mrb[6].mxu0  ;;  %v2020_v55 = vpop.f32.mrb[4].mxu1 }
 0x195   : > { %v2002_v56 = vpop.f32.mrb[7].mxu0  ;;  %v2021_v57 = vpop.f32.mrb[5].mxu1 }
 0x196   : > { %v1589_v58 = vadd.f32 %v2000_v53, %v1548_v48  ;;  %v2003_v59 = vadd.f32 %v2002_v56, %v2001_v54  ;;  %v2022_v60 = vadd.f32 %v2021_v57, %v2020_v55  ;;  %v2023_v61 = vpop.f32.mrb[6].mxu1 }
 0x197   : > { %v2024_v62 = vpop.f32.mrb[7].mxu1 }
 0x198   : > { %v1592_v63 = vadd.f32 %v2003_v59, %v1551_v50  ;;  %v2025_v0 = vadd.f32 %v2024_v62, %v2023_v61  ;;  %v1630_v1 = vadd.f32 %v2022_v60, %v1589_v58 }
 0x19a   : > { %v1633_v2 = vadd.f32 %v2025_v0, %v1592_v63 }
 0x1b2   : > { %v1670_v3 = vpop.f32.mrb[8].mxu0 }
 0x1b3   : > { %v1671_v4 = vadd.f32 %v1670_v3, %v1630_v1  ;;  %v2053_v5 = vpop.f32.mrb[9].mxu0 }
 0x1b4   : > { %v1673_v6 = vpop.f32.mrb[10].mxu0 }
 0x1b5   : > { %v1674_v7 = vadd.f32 %v1673_v6, %v1633_v2  ;;  %v2054_v8 = vpop.f32.mrb[11].mxu0  ;;  %v1677_v9 = vmax.f32 %v1671_v4, 0.0  ;;  %1695 = sbr.rel (!%p2281_p6) target bundleno = 452 (0x1c4), region = 77 }
 0x1b7   : > { %v1678_v10 = vmax.f32 %v1674_v7, 0.0 }
 0x1b9   : > { %v1936_v11 = vpack.c.bf16 %v1678_v10, %v1677_v9 }
 0x1bb   : > { %1937 = vst [vmem:[%s820_s11] sm:$0xff] %v1936_v11  }
 0x1c2   : > { %v1716_v12 = vld [vmem:[%s820_s11] sm:$0xf]  ;;  %v1718_v13 = vld [vmem:[%s820_s11 + $0x4] sm:$0xf] }
 0x1c3   : > { %1717 = vst [vmem:[%s1700_s23] sm:$0xf] %v1716_v12  ;;  %1719 = vst [vmem:[%s1700_s23 + $0x8] sm:$0xf] %v1718_v13 }
 0x1c4 PF: > { %s13_s16 = sadd.s32 1, %s2222_s16   ;;  %s2725_s12 = smov %s2210_s13 }
 0x1c5   : > { %p10_p12 = scmp.ge.s32.totalorder %s13_s16, 4   ;;  %s2726_s13 = smov %s2286_s22 }
 0x1c6   : > { %s2727_s14 = smov %s2218_s15  ;;  %s2728_s15 = smov %s2730_s17 }
 0x1c7   :  { %12 = sbr.rel (!%p10_p12) target bundleno = 3 (0x3), region = 155 }

// kernel: resnet18_forward.31
= control target key start
LH: loop header
LB: loop body
LE: loop exit
PB: predicated region body
PF: predicated region fallthrough
CT: control target
= control target key end

     0   :  { %s769_s12 = smov 0   ;;  %s771_s13 = smov 0   ;;  %s871_s0 = inlined_call_operand.vmem [shape: bf16[16,128], index: 0, kind: input, shape index: {}]   ;;  %s872_s1 = inlined_call_operand.vmem [shape: bf16[128,256], index: 1, kind: input, shape index: {}]   ;;  %s873_s2 = inlined_call_operand.vmem [shape: f32[1,256], index: 2, kind: input, shape index: {}]   ;;  %s874_s3 = inlined_call_operand.vmem [shape: bf16[16,256], index: 3, kind: output, shape index: {}]  }
   0x1   :  { %s773_s14 = smov 0   ;;  %s775_s15 = smov 0  }
   0x2   :  { %s777_s16 = smov 0  }
   0x3 LB: > { %s22_s17 = sadd.s32 1, %s741_s15  ;;  %s594_s18 = sadd.s32 4294967295, %s745_s16   ;;  %s745_s16 = sphi %s777_s16, %s13_s16   ;;  %s741_s15 = sphi %s775_s15, %s879_s15   ;;  %s737_s14 = sphi %s773_s14, %s878_s14   ;;  %s733_s13 = sphi %s771_s13, %s877_s13   ;;  %s729_s12 = sphi %s769_s12, %s876_s12  }
   0x4   : > { %p23_p0 = scmp.ge.s32.totalorder %s22_s17, 2  ;;  %p65_p1 = scmp.ne.s32.totalorder %s733_s13, %s729_s12 }
   0x5   : > { %p66_p2 = scmp.eq.s32.totalorder %s745_s16, 0  ;;  %p123_p4 = scmp.eq.s32.totalorder %s594_s18, 1 }
   0x6   : > { %s881_s17 = smov (%p23_p0, %s22_s17), 0  ;;  %s58_s20 = sadd.s32 1, %s733_s13 }
   0x7   : > { %p67_p3 = por %p66_p2, %p65_p1  ;;  %s55_s19 = ssub.s32 %s741_s15, %s881_s17 }
   0x8   : > { %p56_p5 = scmp.eq.s32.totalorder %s55_s19, 0  ;;  %p804_p6 = por %p123_p4, %p65_p1 }
   0x9   : > { %p598_p7 = scmp.ge.s32.totalorder %s745_s16, 2 }
   0xa   : > { %s809_s22 = scalar_select %p56_p5, %s733_s13, %s58_s20  }
   0xb   : > { %154 = sbr.rel (%p598_p7) target bundleno = 32 (0x20), region = 20 }
  0x12   : > { %157 = sbr.rel (!%p67_p3) target bundleno = 32 (0x20), region = 24  ;;  %s159_s23 = sand.u32 (%p67_p3), 1, %s733_s13  }
  0x13   : > { %s600_s24 = sshll.u32 (%p67_p3), %s741_s15, 2  ;;  %s599_s25 = sshll.u32 (%p67_p3), %s159_s23, 6 }
  0x14   : > { %s817_s28 = scalar_lea.vmem (%p67_p3), %s872_s1, %s600_s24  ;;  %s161_s29 = scalar_lea.vmem (%p67_p3), [#allocation2], %s599_s25 }
  0x15   : > { %v179_v0 = vld [vmem:[%s817_s28] sm:$0xf] (%p67_p3)  ;;  %v181_v1 = vld [vmem:[%s817_s28 + $0x8] sm:$0xf] (%p67_p3)  ;;  %v183_v2 = vld [vmem:[%s817_s28 + $0x10] sm:$0xf] (%p67_p3) }
  0x16   : > { %180 = vst [vmem:[%s161_s29] sm:$0xf] (%p67_p3), %v179_v0  ;;  %182 = vst [vmem:[%s161_s29 + $0x4] sm:$0xf] (%p67_p3), %v181_v1  ;;  %v185_v3 = vld [vmem:[%s817_s28 + $0x18] sm:$0xf] (%p67_p3) }
  0x17   : > { %v187_v4 = vld [vmem:[%s817_s28 + $0x20] sm:$0xf] (%p67_p3)  ;;  %184 = vst [vmem:[%s161_s29 + $0x8] sm:$0xf] (%p67_p3), %v183_v2  ;;  %186 = vst [vmem:[%s161_s29 + $0xc] sm:$0xf] (%p67_p3), %v185_v3 }
  0x18   : > { %188 = vst [vmem:[%s161_s29 + $0x10] sm:$0xf] (%p67_p3), %v187_v4  ;;  %v189_v5 = vld [vmem:[%s817_s28 + $0x28] sm:$0xf] (%p67_p3)  ;;  %v191_v6 = vld [vmem:[%s817_s28 + $0x30] sm:$0xf] (%p67_p3) }
  0x19   : > { %v193_v7 = vld [vmem:[%s817_s28 + $0x38] sm:$0xf]  ;;  %190 = vst [vmem:[%s161_s29 + $0x14] sm:$0xf] %v189_v5  ;;  %192 = vst [vmem:[%s161_s29 + $0x18] sm:$0xf] %v191_v6 }
  0x1a   : > { %194 = vst [vmem:[%s161_s29 + $0x1c] sm:$0xf] %v193_v7  ;;  %v195_v8 = vld [vmem:[%s817_s28 + $0x40] sm:$0xf]  ;;  %v197_v9 = vld [vmem:[%s817_s28 + $0x48] sm:$0xf] }
  0x1b   : > { %v199_v10 = vld [vmem:[%s817_s28 + $0x50] sm:$0xf]  ;;  %196 = vst [vmem:[%s161_s29 + $0x20] sm:$0xf] %v195_v8  ;;  %198 = vst [vmem:[%s161_s29 + $0x24] sm:$0xf] %v197_v9 }
  0x1c   : > { %200 = vst [vmem:[%s161_s29 + $0x28] sm:$0xf] %v199_v10  ;;  %v201_v11 = vld [vmem:[%s817_s28 + $0x58] sm:$0xf]  ;;  %v203_v12 = vld [vmem:[%s817_s28 + $0x60] sm:$0xf] }
  0x1d   : > { %v205_v13 = vld [vmem:[%s817_s28 + $0x68] sm:$0xf]  ;;  %202 = vst [vmem:[%s161_s29 + $0x2c] sm:$0xf] %v201_v11  ;;  %204 = vst [vmem:[%s161_s29 + $0x30] sm:$0xf] %v203_v12 }
  0x1e   : > { %206 = vst [vmem:[%s161_s29 + $0x34] sm:$0xf] %v205_v13  ;;  %v207_v14 = vld [vmem:[%s817_s28 + $0x70] sm:$0xf]  ;;  %v209_v15 = vld [vmem:[%s817_s28 + $0x78] sm:$0xf] }
  0x1f   : > { %208 = vst [vmem:[%s161_s29 + $0x38] sm:$0xf] %v207_v14  ;;  %210 = vst [vmem:[%s161_s29 + $0x3c] sm:$0xf] %v209_v15 }
  0x20 PF: > { %p601_p8 = scmp.ge.s32.totalorder %s745_s16, 1  ;;  %p270_p9 = scmp.lt.s32.totalorder %s745_s16, 3 }
  0x22   : > { %p271_p10 = pnand %p601_p8, %p270_p9 }
  0x23   : > { %s277_s30 = sand.u32 (!%p271_p10), 1, %s729_s12   ;;  %v747_v16 = vmov (!%p271_p10), 0.0   ;;  %vm748_vm0 = vmmov (!%p271_p10), 0   ;;  %v706_v25 = vld [vmem:[%s871_s0] sm:$0xff] (!%p271_p10)   ;;  %p313_p11 = scmp.lt.s32.totalorder (!%p271_p10), %s737_s14, 1 }
  0x24   : > { %274 = sbr.rel (%p271_p10) target bundleno = 297 (0x129), region = 69  ;;  %636 = vmatprep.subr.bf16.mxu0 (!%p271_p10), %v747_v16  ;;  %s602_s4 = sshll.u32 (!%p271_p10), %s277_s30, 6  ;;  %652 = vmatprep.mubr.msk.bf16.mxu0 (!%p271_p10), %vm748_vm0, %v747_v16 }
  0x25   : > { %s279_s5 = scalar_lea.vmem (!%p271_p10), [#allocation2], %s602_s4  ;;  %s603_s18 = sshll.u32 (!%p271_p10), %s277_s30, 3 }
  0x26   : > { %v698_v17 = vld [vmem:[%s279_s5] sm:$0xff] (!%p271_p10)   ;;  %v699_v18 = vld [vmem:[%s279_s5 + $0x8] sm:$0xff] (!%p271_p10)   ;;  %v700_v19 = vld [vmem:[%s279_s5 + $0x10] sm:$0xff] (!%p271_p10)   ;;  %s306_s19 = scalar_lea.vmem (!%p271_p10), [#allocation3], %s603_s18 }
  0x27   : > { %637 = vmatpush3.bf16.msra.mxu0 (!%p271_p10), %v698_v17  ;;  %v701_v20 = vld [vmem:[%s279_s5 + $0x18] sm:$0xff] (!%p271_p10)   ;;  %v702_v21 = vld [vmem:[%s279_s5 + $0x20] sm:$0xff] (!%p271_p10)   ;;  %v703_v22 = vld [vmem:[%s279_s5 + $0x28] sm:$0xff] (!%p271_p10)  }
  0x28   : > { %638 = vmatprep.subr.bf16.mxu0 (!%p271_p10), %v747_v16  ;;  %v704_v23 = vld [vmem:[%s279_s5 + $0x30] sm:$0xff] (!%p271_p10)   ;;  %v705_v24 = vld [vmem:[%s279_s5 + $0x38] sm:$0xff] (!%p271_p10)  }
  0x2b   : > { %639 = vmatpush3.bf16.msra.mxu0 %v699_v18  ;;  %s314_s8 = scalar_select %p313_p11, %s737_s14, 1 }
  0x2c   : > { %640 = vmatprep.subr.bf16.mxu0 %v747_v16  ;;  %s617_s20 = sshll.u32 (%p804_p6), %s737_s14, 2 }
  0x2d   : > { %s315_s11 = scalar_lea.vmem %s873_s2, %s314_s8  ;;  %s459_s25 = scalar_lea.vmem (%p804_p6), %s874_s3, %s617_s20 }
  0x2e   : > { %v604_v26 = vld [vmem:[%s315_s11] ss:$0 sm:$0xff] }
  0x2f   : > { %641 = vmatpush3.bf16.msra.mxu0 %v700_v19 }
  0x30   : > { %642 = vmatprep.subr.bf16.mxu0 %v747_v16 }
  0x33   : > { %643 = vmatpush3.bf16.msra.mxu0 %v701_v20 }
  0x34   : > { %644 = vmatprep.subr.bf16.mxu0 %v747_v16 }
  0x37   : > { %645 = vmatpush3.bf16.msra.mxu0 %v702_v21 }
  0x38   : > { %646 = vmatprep.subr.bf16.mxu0 %v747_v16 }
  0x3b   : > { %647 = vmatpush3.bf16.msra.mxu0 %v703_v22 }
  0x3c   : > { %648 = vmatprep.subr.bf16.mxu0 %v747_v16 }
  0x3f   : > { %649 = vmatpush3.bf16.msra.mxu0 %v704_v23 }
  0x40   : > { %650 = vmatprep.subr.bf16.mxu0 %v747_v16 }
  0x43   : > { %651 = vmatpush3.bf16.msra.mxu0 %v705_v24 }
  0x46   : > { %653 = vmatmul.mubr.bf16.vlgmr.msra.gmra.mrb[0].mxu0 %v706_v25 }
 0x119   : > { %v431_v27 = vpop.f32.mrb[0].mxu0 }
 0x11a   : > { %v654_v28 = vpop.f32.mrb[1].mxu0  ;;  %v432_v30 = vadd.f32 %v604_v26, %v431_v27  ;;  %454 = sbr.rel (!%p804_p6) target bundleno = 297 (0x129), region = 77 }
 0x11b   : > { %v434_v29 = vpop.f32.mrb[2].mxu0 }
 0x11c   : > { %v435_v31 = vadd.f32 %v604_v26, %v434_v29  ;;  %v655_v32 = vpop.f32.mrb[3].mxu0 }
 0x11e   : > { %v625_v33 = vpack.c.bf16 %v435_v31, %v432_v30 }
 0x120   : > { %626 = vst [vmem:[%s306_s19] sm:$0xff] %v625_v33  }
 0x127   : > { %v475_v34 = vld [vmem:[%s306_s19] sm:$0xf]  ;;  %v477_v35 = vld [vmem:[%s306_s19 + $0x4] sm:$0xf] }
 0x128   : > { %476 = vst [vmem:[%s459_s25] sm:$0xf] %v475_v34  ;;  %478 = vst [vmem:[%s459_s25 + $0x8] sm:$0xf] %v477_v35 }
 0x129 PF: > { %s13_s16 = sadd.s32 1, %s745_s16   ;;  %s876_s12 = smov %s733_s13 }
 0x12a   : > { %p10_p12 = scmp.ge.s32.totalorder %s13_s16, 4   ;;  %s877_s13 = smov %s809_s22 }
 0x12b   : > { %s878_s14 = smov %s741_s15  ;;  %s879_s15 = smov %s881_s17 }
 0x12c   :  { %12 = sbr.rel (!%p10_p12) target bundleno = 3 (0x3), region = 155 }

// kernel: resnet18_forward.33
= control target key start
LH: loop header
LB: loop body
LE: loop exit
PB: predicated region body
PF: predicated region fallthrough
CT: control target
= control target key end

     0   :  { %s2425_s0 = inlined_call_operand.vmem [shape: bf16[16,2304], index: 0, kind: input, shape index: {}]   ;;  %s2426_s1 = inlined_call_operand.vmem [shape: bf16[2304,256], index: 1, kind: input, shape index: {}]   ;;  %s2427_s2 = inlined_call_operand.vmem [shape: f32[1,256], index: 2, kind: input, shape index: {}]   ;;  %s2428_s3 = inlined_call_operand.vmem [shape: bf16[16,256], index: 3, kind: input, shape index: {}]   ;;  %s2429_s4 = inlined_call_operand.vmem [shape: bf16[16,256], index: 4, kind: output, shape index: {}]  }
   0x1   :  { %2432 = sst [smem:[#allocation9_spill]] %s2425_s0 }
   0x2   :  { %s1970_s15 = smov 0   ;;  %s1972_s16 = smov 0  }
   0x3   :  { %s1974_s17 = smov 0   ;;  %s1976_s18 = smov 0  }
   0x4   :  { %s1978_s19 = smov 0   ;;  %s1980_s20 = smov 0  }
   0x5   :  { %s1982_s21 = smov 0   ;;  %s1984_s22 = smov 0  }
   0x6   :  { %s1986_s23 = smov 0   ;;  %s1988_s24 = smov 0  }
   0x7   :  { %s1990_s25 = smov 0  }
   0x8 LB: > { %s1552_s26 = sadd.s32 4294967295, %s1942_s25   ;;  %s26_s27 = sadd.s32 1, %s1934_s23  ;;  %s1942_s25 = sphi %s1990_s25, %s14_s25   ;;  %s1938_s24 = sphi %s1988_s24, %s2451_s24   ;;  %s1934_s23 = sphi %s1986_s23, %s2450_s23   ;;  %s1930_s22 = sphi %s1984_s22, %s2449_s22   ;;  %s1926_s21 = sphi %s1982_s21, %s2448_s21   ;;  %s1922_s20 = sphi %s1980_s20, %s2447_s20   ;;  %s1918_s19 = sphi %s1978_s19, %s2446_s19   ;;  %s1914_s18 = sphi %s1976_s18, %s2445_s18   ;;  %s1910_s17 = sphi %s1974_s17, %s2444_s17   ;;  %s1906_s16 = sphi %s1972_s16, %s2443_s16   ;;  %s1902_s15 = sphi %s1970_s15, %s2442_s15  }
   0x9   : > { %p27_p0 = scmp.ge.s32.totalorder %s26_s27, 3  ;;  %s29_s28 = sadd.s32 1, %s1938_s24 }
   0xa   : > { %s42_s29 = sadd.s32 1, %s1922_s20  ;;  %p49_p1 = scmp.ne.s32.totalorder %s1922_s20, %s1918_s19 }
   0xb   : > { %s2453_s27 = smov (%p27_p0, %s26_s27), 0  ;;  %s2455_s28 = smov (!%p27_p0, %s29_s28), %s1938_s24 }
   0xc   : > { %2433 = sst [smem:[#allocation7_spill]] %s2453_s27  ;;  %s38_s30 = ssub.s32 %s1934_s23, %s2453_s27 }
   0xd   : > { %p50_p2 = scmp.eq.s32.totalorder %s1942_s25, 0  ;;  %p31_p3 = scmp.ge.s32.totalorder %s2455_s28, 2 }
   0xe   : > { %p40_p4 = scmp.eq.s32.totalorder %s38_s30, 0  ;;  %s70_s6 = sadd.s32 1, %s1914_s18 }
   0xf   : > { %p2039_p5 = por %p50_p2, %p49_p1  ;;  %s2457_s28 = smov (%p31_p3, %s2455_s28), 0 }
  0x10   : > { %2435 = sst [smem:[#allocation8_spill]] %s2457_s28  ;;  %s66_s8 = ssub.s32 %s1938_s24, %s2457_s28 }
  0x11   : > { %s2047_s7 = scalar_select %p40_p4, %s1922_s20, %s42_s29  }
  0x12   : > { %p77_p6 = scmp.ne.s32.totalorder %s1914_s18, %s1910_s17  ;;  %s67_s9 = sor.u32 %s66_s8, %s38_s30 }
  0x13   : > { %p122_p7 = scmp.eq.s32.totalorder %s66_s8, 0  ;;  %p68_p8 = scmp.eq.s32.totalorder %s67_s9, 0 }
  0x14   : > { %p2055_p9 = por %p77_p6, %p50_p2  ;;  %s124_s11 = sadd.s32 1, %s1906_s16 }
  0x15   : > { %p131_p10 = scmp.ne.s32.totalorder %s1906_s16, %s1902_s15  ;;  %p163_p12 = scmp.eq.s32.totalorder %s1552_s26, 5 }
  0x16   : > { %s2063_s12 = scalar_select %p68_p8, %s1914_s18, %s70_s6  }
  0x17   : > { %s2066_s13 = scalar_select %p122_p7, %s1906_s16, %s124_s11  }
  0x18   : > { %p2070_p11 = por %p131_p10, %p50_p2  ;;  %p2074_p13 = por %p163_p12, %p131_p10 }
  0x19   : > { %p1555_p0 = scmp.ge.s32.totalorder %s1942_s25, 6 }
  0x1b   : > { %185 = sbr.rel (%p1555_p0) target bundleno = 124 (0x7c), region = 16 }
  0x22   : > { %188 = sbr.rel (!%p2039_p5) target bundleno = 46 (0x2e), region = 20  ;;  %s190_s30 = sand.u32 (%p2039_p5), 1, %s1922_s20  }
  0x23   : > { %s1627_s6 = smul.u32 (%p2039_p5), 24, %s1934_s23  ;;  %s2439_s0 = sld [smem:[#allocation9_spill]] (%p2039_p5) }
  0x24   : > { %s1706_s8 = smul.u32 (%p2039_p5), 48, %s190_s30 }
  0x26   : > { %s192_s26 = scalar_lea.vmem (%p2039_p5), [#allocation3], %s1706_s8 }
  0x29   : > { %s198_s28 = scalar_lea.vmem %s2439_s0, %s1627_s6 }
  0x2a   : > { %v211_v0 = vld [vmem:[%s198_s28] sm:$0xff]  ;;  %v213_v1 = vld [vmem:[%s198_s28 + $0x8] sm:$0xff]  ;;  %v215_v2 = vld [vmem:[%s198_s28 + $0x10] sm:$0xff] }
  0x2b   : > { %212 = vst [vmem:[%s192_s26] sm:$0xff] %v211_v0  ;;  %214 = vst [vmem:[%s192_s26 + $0x8] sm:$0xff] %v213_v1  ;;  %v217_v3 = vld [vmem:[%s198_s28 + $0x48] sm:$0xff]  ;;  %v219_v4 = vld [vmem:[%s198_s28 + $0x50] sm:$0xff] }
  0x2c   : > { %216 = vst [vmem:[%s192_s26 + $0x10] sm:$0xff] %v215_v2  ;;  %v221_v5 = vld [vmem:[%s198_s28 + $0x58] sm:$0xff]  ;;  %218 = vst [vmem:[%s192_s26 + $0x18] sm:$0xff] %v217_v3 }
  0x2d   : > { %220 = vst [vmem:[%s192_s26 + $0x20] sm:$0xff] %v219_v4  ;;  %222 = vst [vmem:[%s192_s26 + $0x28] sm:$0xff] %v221_v5 }
  0x2e PF: > { %228 = sbr.rel (!%p2055_p9) target bundleno = 117 (0x75), region = 43  ;;  %s230_s5 = sand.u32 (%p2055_p9), 1, %s1914_s18  }
  0x2f   : > { %s1628_s30 = smul.u32 (%p2055_p9), 192, %s1934_s23 }
  0x30   : > { %s1707_s6 = smul.u32 (%p2055_p9), 384, %s230_s5 }
  0x31   : > { %s235_s8 = sadd.s32 (%p2055_p9), %s1938_s24, %s1628_s30 }
  0x32   : > { %s1558_s9 = sshll.u32 (%p2055_p9), %s235_s8, 2  ;;  %s2099_s28 = scalar_lea.vmem (%p2055_p9), [#allocation4], %s1707_s6 }
  0x33   : > { %s2094_s27 = scalar_lea.vmem (%p2055_p9), %s2426_s1, %s1558_s9 }
  0x34   : > { %v253_v6 = vld [vmem:[%s2094_s27] sm:$0xf] (%p2055_p9)  ;;  %v255_v7 = vld [vmem:[%s2094_s27 + $0x8] sm:$0xf] (%p2055_p9)  ;;  %v257_v8 = vld [vmem:[%s2094_s27 + $0x10] sm:$0xf] (%p2055_p9) }
  0x35   : > { %254 = vst [vmem:[%s2099_s28] sm:$0xf] %v253_v6  ;;  %256 = vst [vmem:[%s2099_s28 + $0x4] sm:$0xf] %v255_v7  ;;  %v259_v9 = vld [vmem:[%s2094_s27 + $0x18] sm:$0xf] }
  0x36   : > { %258 = vst [vmem:[%s2099_s28 + $0x8] sm:$0xf] %v257_v8  ;;  %v261_v10 = vld [vmem:[%s2094_s27 + $0x20] sm:$0xf]  ;;  %v263_v11 = vld [vmem:[%s2094_s27 + $0x28] sm:$0xf] }
  0x37   : > { %260 = vst [vmem:[%s2099_s28 + $0xc] sm:$0xf] %v259_v9  ;;  %262 = vst [vmem:[%s2099_s28 + $0x10] sm:$0xf] %v261_v10  ;;  %v265_v12 = vld [vmem:[%s2094_s27 + $0x30] sm:$0xf] }
  0x38   : > { %264 = vst [vmem:[%s2099_s28 + $0x14] sm:$0xf] %v263_v11  ;;  %v267_v13 = vld [vmem:[%s2094_s27 + $0x38] sm:$0xf]  ;;  %v269_v14 = vld [vmem:[%s2094_s27 + $0x40] sm:$0xf] }
  0x39   : > { %266 = vst [vmem:[%s2099_s28 + $0x18] sm:$0xf] %v265_v12  ;;  %268 = vst [vmem:[%s2099_s28 + $0x1c] sm:$0xf] %v267_v13  ;;  %v271_v15 = vld [vmem:[%s2094_s27 + $0x48] sm:$0xf] }
  0x3a   : > { %270 = vst [vmem:[%s2099_s28 + $0x20] sm:$0xf] %v269_v14  ;;  %v273_v16 = vld [vmem:[%s2094_s27 + $0x50] sm:$0xf]  ;;  %v275_v17 = vld [vmem:[%s2094_s27 + $0x58] sm:$0xf] }
  0x3b   : > { %272 = vst [vmem:[%s2099_s28 + $0x24] sm:$0xf] %v271_v15  ;;  %274 = vst [vmem:[%s2099_s28 + $0x28] sm:$0xf] %v273_v16  ;;  %v277_v18 = vld [vmem:[%s2094_s27 + $0x60] sm:$0xf] }
  0x3c   : > { %276 = vst [vmem:[%s2099_s28 + $0x2c] sm:$0xf] %v275_v17  ;;  %v279_v19 = vld [vmem:[%s2094_s27 + $0x68] sm:$0xf]  ;;  %v281_v20 = vld [vmem:[%s2094_s27 + $0x70] sm:$0xf] }
  0x3d   : > { %278 = vst [vmem:[%s2099_s28 + $0x30] sm:$0xf] %v277_v18  ;;  %280 = vst [vmem:[%s2099_s28 + $0x34] sm:$0xf] %v279_v19  ;;  %v283_v21 = vld [vmem:[%s2094_s27 + $0x78] sm:$0xf] }
  0x3e   : > { %282 = vst [vmem:[%s2099_s28 + $0x38] sm:$0xf] %v281_v20  ;;  %v285_v22 = vld [vmem:[%s2094_s27 + $0x80] sm:$0xf]  ;;  %v287_v23 = vld [vmem:[%s2094_s27 + $0x88] sm:$0xf] }
  0x3f   : > { %284 = vst [vmem:[%s2099_s28 + $0x3c] sm:$0xf] %v283_v21  ;;  %286 = vst [vmem:[%s2099_s28 + $0x40] sm:$0xf] %v285_v22  ;;  %v289_v24 = vld [vmem:[%s2094_s27 + $0x90] sm:$0xf] }
  0x40   : > { %288 = vst [vmem:[%s2099_s28 + $0x44] sm:$0xf] %v287_v23  ;;  %v291_v25 = vld [vmem:[%s2094_s27 + $0x98] sm:$0xf]  ;;  %v293_v26 = vld [vmem:[%s2094_s27 + $0xa0] sm:$0xf] }
  0x41   : > { %290 = vst [vmem:[%s2099_s28 + $0x48] sm:$0xf] %v289_v24  ;;  %292 = vst [vmem:[%s2099_s28 + $0x4c] sm:$0xf] %v291_v25  ;;  %v295_v27 = vld [vmem:[%s2094_s27 + $0xa8] sm:$0xf] }
  0x42   : > { %294 = vst [vmem:[%s2099_s28 + $0x50] sm:$0xf] %v293_v26  ;;  %v297_v28 = vld [vmem:[%s2094_s27 + $0xb0] sm:$0xf]  ;;  %v299_v29 = vld [vmem:[%s2094_s27 + $0xb8] sm:$0xf] }
  0x43   : > { %296 = vst [vmem:[%s2099_s28 + $0x54] sm:$0xf] %v295_v27  ;;  %298 = vst [vmem:[%s2099_s28 + $0x58] sm:$0xf] %v297_v28  ;;  %v301_v30 = vld [vmem:[%s2094_s27 + $0xc0] sm:$0xf] }
  0x44   : > { %300 = vst [vmem:[%s2099_s28 + $0x5c] sm:$0xf] %v299_v29  ;;  %v303_v31 = vld [vmem:[%s2094_s27 + $0xc8] sm:$0xf]  ;;  %v305_v32 = vld [vmem:[%s2094_s27 + $0xd0] sm:$0xf] }
  0x45   : > { %302 = vst [vmem:[%s2099_s28 + $0x60] sm:$0xf] %v301_v30  ;;  %304 = vst [vmem:[%s2099_s28 + $0x64] sm:$0xf] %v303_v31  ;;  %v307_v33 = vld [vmem:[%s2094_s27 + $0xd8] sm:$0xf] }
  0x46   : > { %306 = vst [vmem:[%s2099_s28 + $0x68] sm:$0xf] %v305_v32  ;;  %v309_v34 = vld [vmem:[%s2094_s27 + $0xe0] sm:$0xf]  ;;  %v311_v35 = vld [vmem:[%s2094_s27 + $0xe8] sm:$0xf] }
  0x47   : > { %308 = vst [vmem:[%s2099_s28 + $0x6c] sm:$0xf] %v307_v33  ;;  %310 = vst [vmem:[%s2099_s28 + $0x70] sm:$0xf] %v309_v34  ;;  %v313_v36 = vld [vmem:[%s2094_s27 + $0xf0] sm:$0xf] }
  0x48   : > { %312 = vst [vmem:[%s2099_s28 + $0x74] sm:$0xf] %v311_v35  ;;  %v315_v37 = vld [vmem:[%s2094_s27 + $0xf8] sm:$0xf]  ;;  %v317_v38 = vld [vmem:[%s2094_s27 + $0x100] sm:$0xf] }
  0x49   : > { %314 = vst [vmem:[%s2099_s28 + $0x78] sm:$0xf] %v313_v36  ;;  %316 = vst [vmem:[%s2099_s28 + $0x7c] sm:$0xf] %v315_v37  ;;  %v319_v39 = vld [vmem:[%s2094_s27 + $0x108] sm:$0xf] }
  0x4a   : > { %318 = vst [vmem:[%s2099_s28 + $0x80] sm:$0xf] %v317_v38  ;;  %v321_v40 = vld [vmem:[%s2094_s27 + $0x110] sm:$0xf]  ;;  %v323_v41 = vld [vmem:[%s2094_s27 + $0x118] sm:$0xf] }
  0x4b   : > { %320 = vst [vmem:[%s2099_s28 + $0x84] sm:$0xf] %v319_v39  ;;  %322 = vst [vmem:[%s2099_s28 + $0x88] sm:$0xf] %v321_v40  ;;  %v325_v42 = vld [vmem:[%s2094_s27 + $0x120] sm:$0xf] }
  0x4c   : > { %324 = vst [vmem:[%s2099_s28 + $0x8c] sm:$0xf] %v323_v41  ;;  %v327_v43 = vld [vmem:[%s2094_s27 + $0x128] sm:$0xf]  ;;  %v329_v44 = vld [vmem:[%s2094_s27 + $0x130] sm:$0xf] }
  0x4d   : > { %326 = vst [vmem:[%s2099_s28 + $0x90] sm:$0xf] %v325_v42  ;;  %328 = vst [vmem:[%s2099_s28 + $0x94] sm:$0xf] %v327_v43  ;;  %v331_v45 = vld [vmem:[%s2094_s27 + $0x138] sm:$0xf] }
  0x4e   : > { %330 = vst [vmem:[%s2099_s28 + $0x98] sm:$0xf] %v329_v44  ;;  %v333_v46 = vld [vmem:[%s2094_s27 + $0x140] sm:$0xf]  ;;  %v335_v47 = vld [vmem:[%s2094_s27 + $0x148] sm:$0xf] }
  0x4f   : > { %332 = vst [vmem:[%s2099_s28 + $0x9c] sm:$0xf] %v331_v45  ;;  %334 = vst [vmem:[%s2099_s28 + $0xa0] sm:$0xf] %v333_v46  ;;  %v337_v48 = vld [vmem:[%s2094_s27 + $0x150] sm:$0xf] }
  0x50   : > { %336 = vst [vmem:[%s2099_s28 + $0xa4] sm:$0xf] %v335_v47  ;;  %v339_v49 = vld [vmem:[%s2094_s27 + $0x158] sm:$0xf]  ;;  %v341_v50 = vld [vmem:[%s2094_s27 + $0x160] sm:$0xf] }
  0x51   : > { %338 = vst [vmem:[%s2099_s28 + $0xa8] sm:$0xf] %v337_v48  ;;  %340 = vst [vmem:[%s2099_s28 + $0xac] sm:$0xf] %v339_v49  ;;  %v343_v51 = vld [vmem:[%s2094_s27 + $0x168] sm:$0xf] }
  0x52   : > { %342 = vst [vmem:[%s2099_s28 + $0xb0] sm:$0xf] %v341_v50  ;;  %v345_v52 = vld [vmem:[%s2094_s27 + $0x170] sm:$0xf]  ;;  %v347_v53 = vld [vmem:[%s2094_s27 + $0x178] sm:$0xf] }
  0x53   : > { %344 = vst [vmem:[%s2099_s28 + $0xb4] sm:$0xf] %v343_v51  ;;  %346 = vst [vmem:[%s2099_s28 + $0xb8] sm:$0xf] %v345_v52  ;;  %v349_v54 = vld [vmem:[%s2094_s27 + $0x180] sm:$0xf] }
  0x54   : > { %348 = vst [vmem:[%s2099_s28 + $0xbc] sm:$0xf] %v347_v53  ;;  %v351_v55 = vld [vmem:[%s2094_s27 + $0x188] sm:$0xf]  ;;  %v353_v56 = vld [vmem:[%s2094_s27 + $0x190] sm:$0xf] }
  0x55   : > { %350 = vst [vmem:[%s2099_s28 + $0xc0] sm:$0xf] %v349_v54  ;;  %352 = vst [vmem:[%s2099_s28 + $0xc4] sm:$0xf] %v351_v55  ;;  %v355_v57 = vld [vmem:[%s2094_s27 + $0x198] sm:$0xf] }
  0x56   : > { %354 = vst [vmem:[%s2099_s28 + $0xc8] sm:$0xf] %v353_v56  ;;  %v357_v58 = vld [vmem:[%s2094_s27 + $0x1a0] sm:$0xf]  ;;  %v359_v59 = vld [vmem:[%s2094_s27 + $0x1a8] sm:$0xf] }
  0x57   : > { %356 = vst [vmem:[%s2099_s28 + $0xcc] sm:$0xf] %v355_v57  ;;  %358 = vst [vmem:[%s2099_s28 + $0xd0] sm:$0xf] %v357_v58  ;;  %v361_v60 = vld [vmem:[%s2094_s27 + $0x1b0] sm:$0xf] }
  0x58   : > { %360 = vst [vmem:[%s2099_s28 + $0xd4] sm:$0xf] %v359_v59  ;;  %v363_v61 = vld [vmem:[%s2094_s27 + $0x1b8] sm:$0xf]  ;;  %v365_v62 = vld [vmem:[%s2094_s27 + $0x1c0] sm:$0xf] }
  0x59   : > { %362 = vst [vmem:[%s2099_s28 + $0xd8] sm:$0xf] %v361_v60  ;;  %364 = vst [vmem:[%s2099_s28 + $0xdc] sm:$0xf] %v363_v61  ;;  %v367_v63 = vld [vmem:[%s2094_s27 + $0x1c8] sm:$0xf] }
  0x5a   : > { %366 = vst [vmem:[%s2099_s28 + $0xe0] sm:$0xf] %v365_v62  ;;  %v369_v0 = vld [vmem:[%s2094_s27 + $0x1d0] sm:$0xf]  ;;  %v371_v1 = vld [vmem:[%s2094_s27 + $0x1d8] sm:$0xf] }
  0x5b   : > { %368 = vst [vmem:[%s2099_s28 + $0xe4] sm:$0xf] %v367_v63  ;;  %370 = vst [vmem:[%s2099_s28 + $0xe8] sm:$0xf] %v369_v0  ;;  %v373_v2 = vld [vmem:[%s2094_s27 + $0x1e0] sm:$0xf] }
  0x5c   : > { %372 = vst [vmem:[%s2099_s28 + $0xec] sm:$0xf] %v371_v1  ;;  %v375_v3 = vld [vmem:[%s2094_s27 + $0x1e8] sm:$0xf]  ;;  %v377_v4 = vld [vmem:[%s2094_s27 + $0x1f0] sm:$0xf] }
  0x5d   : > { %374 = vst [vmem:[%s2099_s28 + $0xf0] sm:$0xf] %v373_v2  ;;  %376 = vst [vmem:[%s2099_s28 + $0xf4] sm:$0xf] %v375_v3  ;;  %v379_v5 = vld [vmem:[%s2094_s27 + $0x1f8] sm:$0xf] }
  0x5e   : > { %378 = vst [vmem:[%s2099_s28 + $0xf8] sm:$0xf] %v377_v4  ;;  %v381_v6 = vld [vmem:[%s2094_s27 + $0x200] sm:$0xf]  ;;  %v383_v7 = vld [vmem:[%s2094_s27 + $0x208] sm:$0xf] }
  0x5f   : > { %380 = vst [vmem:[%s2099_s28 + $0xfc] sm:$0xf] %v379_v5  ;;  %382 = vst [vmem:[%s2099_s28 + $0x100] sm:$0xf] %v381_v6  ;;  %v385_v8 = vld [vmem:[%s2094_s27 + $0x210] sm:$0xf] }
  0x60   : > { %384 = vst [vmem:[%s2099_s28 + $0x104] sm:$0xf] %v383_v7  ;;  %v387_v9 = vld [vmem:[%s2094_s27 + $0x218] sm:$0xf]  ;;  %v389_v10 = vld [vmem:[%s2094_s27 + $0x220] sm:$0xf] }
  0x61   : > { %386 = vst [vmem:[%s2099_s28 + $0x108] sm:$0xf] %v385_v8  ;;  %388 = vst [vmem:[%s2099_s28 + $0x10c] sm:$0xf] %v387_v9  ;;  %v391_v11 = vld [vmem:[%s2094_s27 + $0x228] sm:$0xf] }
  0x62   : > { %390 = vst [vmem:[%s2099_s28 + $0x110] sm:$0xf] %v389_v10  ;;  %v393_v12 = vld [vmem:[%s2094_s27 + $0x230] sm:$0xf]  ;;  %v395_v13 = vld [vmem:[%s2094_s27 + $0x238] sm:$0xf] }
  0x63   : > { %392 = vst [vmem:[%s2099_s28 + $0x114] sm:$0xf] %v391_v11  ;;  %394 = vst [vmem:[%s2099_s28 + $0x118] sm:$0xf] %v393_v12  ;;  %v397_v14 = vld [vmem:[%s2094_s27 + $0x240] sm:$0xf] }
  0x64   : > { %396 = vst [vmem:[%s2099_s28 + $0x11c] sm:$0xf] %v395_v13  ;;  %v399_v15 = vld [vmem:[%s2094_s27 + $0x248] sm:$0xf]  ;;  %v401_v16 = vld [vmem:[%s2094_s27 + $0x250] sm:$0xf] }
  0x65   : > { %398 = vst [vmem:[%s2099_s28 + $0x120] sm:$0xf] %v397_v14  ;;  %400 = vst [vmem:[%s2099_s28 + $0x124] sm:$0xf] %v399_v15  ;;  %v403_v17 = vld [vmem:[%s2094_s27 + $0x258] sm:$0xf] }
  0x66   : > { %402 = vst [vmem:[%s2099_s28 + $0x128] sm:$0xf] %v401_v16  ;;  %v405_v18 = vld [vmem:[%s2094_s27 + $0x260] sm:$0xf]  ;;  %v407_v19 = vld [vmem:[%s2094_s27 + $0x268] sm:$0xf] }
  0x67   : > { %404 = vst [vmem:[%s2099_s28 + $0x12c] sm:$0xf] %v403_v17  ;;  %406 = vst [vmem:[%s2099_s28 + $0x130] sm:$0xf] %v405_v18  ;;  %v409_v20 = vld [vmem:[%s2094_s27 + $0x270] sm:$0xf] }
  0x68   : > { %408 = vst [vmem:[%s2099_s28 + $0x134] sm:$0xf] %v407_v19  ;;  %v411_v21 = vld [vmem:[%s2094_s27 + $0x278] sm:$0xf]  ;;  %v413_v22 = vld [vmem:[%s2094_s27 + $0x280] sm:$0xf] }
  0x69   : > { %410 = vst [vmem:[%s2099_s28 + $0x138] sm:$0xf] %v409_v20  ;;  %412 = vst [vmem:[%s2099_s28 + $0x13c] sm:$0xf] %v411_v21  ;;  %v415_v23 = vld [vmem:[%s2094_s27 + $0x288] sm:$0xf] }
  0x6a   : > { %414 = vst [vmem:[%s2099_s28 + $0x140] sm:$0xf] %v413_v22  ;;  %v417_v24 = vld [vmem:[%s2094_s27 + $0x290] sm:$0xf]  ;;  %v419_v25 = vld [vmem:[%s2094_s27 + $0x298] sm:$0xf] }
  0x6b   : > { %416 = vst [vmem:[%s2099_s28 + $0x144] sm:$0xf] %v415_v23  ;;  %418 = vst [vmem:[%s2099_s28 + $0x148] sm:$0xf] %v417_v24  ;;  %v421_v26 = vld [vmem:[%s2094_s27 + $0x2a0] sm:$0xf] }
  0x6c   : > { %420 = vst [vmem:[%s2099_s28 + $0x14c] sm:$0xf] %v419_v25  ;;  %v423_v27 = vld [vmem:[%s2094_s27 + $0x2a8] sm:$0xf]  ;;  %v425_v28 = vld [vmem:[%s2094_s27 + $0x2b0] sm:$0xf] }
  0x6d   : > { %422 = vst [vmem:[%s2099_s28 + $0x150] sm:$0xf] %v421_v26  ;;  %424 = vst [vmem:[%s2099_s28 + $0x154] sm:$0xf] %v423_v27  ;;  %v427_v29 = vld [vmem:[%s2094_s27 + $0x2b8] sm:$0xf] }
  0x6e   : > { %426 = vst [vmem:[%s2099_s28 + $0x158] sm:$0xf] %v425_v28  ;;  %v429_v30 = vld [vmem:[%s2094_s27 + $0x2c0] sm:$0xf]  ;;  %v431_v31 = vld [vmem:[%s2094_s27 + $0x2c8] sm:$0xf] }
  0x6f   : > { %428 = vst [vmem:[%s2099_s28 + $0x15c] sm:$0xf] %v427_v29  ;;  %430 = vst [vmem:[%s2099_s28 + $0x160] sm:$0xf] %v429_v30  ;;  %v433_v32 = vld [vmem:[%s2094_s27 + $0x2d0] sm:$0xf] }
  0x70   : > { %432 = vst [vmem:[%s2099_s28 + $0x164] sm:$0xf] %v431_v31  ;;  %v435_v33 = vld [vmem:[%s2094_s27 + $0x2d8] sm:$0xf]  ;;  %v437_v34 = vld [vmem:[%s2094_s27 + $0x2e0] sm:$0xf] }
  0x71   : > { %434 = vst [vmem:[%s2099_s28 + $0x168] sm:$0xf] %v433_v32  ;;  %436 = vst [vmem:[%s2099_s28 + $0x16c] sm:$0xf] %v435_v33  ;;  %v439_v35 = vld [vmem:[%s2094_s27 + $0x2e8] sm:$0xf] }
  0x72   : > { %438 = vst [vmem:[%s2099_s28 + $0x170] sm:$0xf] %v437_v34  ;;  %v441_v36 = vld [vmem:[%s2094_s27 + $0x2f0] sm:$0xf]  ;;  %v443_v37 = vld [vmem:[%s2094_s27 + $0x2f8] sm:$0xf] }
  0x73   : > { %440 = vst [vmem:[%s2099_s28 + $0x174] sm:$0xf] %v439_v35  ;;  %442 = vst [vmem:[%s2099_s28 + $0x178] sm:$0xf] %v441_v36 }
  0x74   : > { %444 = vst [vmem:[%s2099_s28 + $0x17c] sm:$0xf] %v443_v37 }
  0x75 PF: > { %665 = sbr.rel (!%p2070_p11) target bundleno = 124 (0x7c), region = 88  ;;  %s667_s0 = sand.u32 (%p2070_p11), 1, %s1906_s16  }
  0x76   : > { %s1560_s10 = sshll.u32 (%p2070_p11), %s1938_s24, 2  ;;  %s1559_s26 = sshll.u32 (%p2070_p11), %s667_s0, 3 }
  0x77   : > { %s674_s6 = scalar_lea.vmem (%p2070_p11), %s2428_s3, %s1560_s10  ;;  %s669_s8 = scalar_lea.vmem (%p2070_p11), [#allocation5], %s1559_s26 }
  0x78   : > { %v690_v38 = vld [vmem:[%s674_s6] sm:$0xf] (%p2070_p11)  ;;  %v692_v39 = vld [vmem:[%s674_s6 + $0x8] sm:$0xf] (%p2070_p11) }
  0x79   : > { %691 = vst [vmem:[%s669_s8] sm:$0xf] (%p2070_p11), %v690_v38  ;;  %693 = vst [vmem:[%s669_s8 + $0x4] sm:$0xf] (%p2070_p11), %v692_v39 }
  0x7c PF: > { %p1561_p1 = scmp.ge.s32.totalorder %s1942_s25, 1  ;;  %p719_p2 = scmp.lt.s32.totalorder %s1942_s25, 7 }
  0x7e   : > { %p720_p3 = pnand %p1561_p1, %p719_p2 }
  0x7f   : > { %s726_s27 = sand.u32 (!%p720_p3), 1, %s1918_s19   ;;  %s733_s14 = sand.u32 (!%p720_p3), 1, %s1910_s17  }
  0x80   : > { %723 = sbr.rel (%p720_p3) target bundleno = 455 (0x1c7), region = 129  ;;  %s740_s11 = sand.u32 (!%p720_p3), 1, %s1902_s15  }
  0x81   : > { %s1708_s9 = smul.u32 (!%p720_p3), 48, %s726_s27  ;;  %s2302_s0 = sshll.u32 (!%p720_p3), %s740_s11, 3 }
  0x82   : > { %s1709_s28 = smul.u32 (!%p720_p3), 384, %s733_s14  ;;  %p778_p4 = scmp.lt.s32.totalorder (!%p720_p3), %s1930_s22, 1 }
  0x83   : > { %s2312_s6 = scalar_lea.vmem (!%p720_p3), [#allocation3], %s1708_s9  ;;  %s742_s17 = scalar_lea.vmem (!%p720_p3), [#allocation5], %s2302_s0 }
  0x84   : > { %s2314_s8 = scalar_lea.vmem (!%p720_p3), [#allocation4], %s1709_s28  ;;  %s2318_s19 = scalar_lea.vmem (!%p720_p3), [#allocation6], %s2302_s0 }
  0x85   : > { %p1564_p5 = scmp.ne.s32.totalorder (!%p720_p3), %s1926_s21, 0 }
  0x87   : > { %s2306_s10 = scalar_select %p778_p4, %s1930_s22, 1 }
  0x88   : > { %787 = sbr.rel (%p1564_p5) target bundleno = 143 (0x8f), region = 145  ;;  %v1944_v40 = vmov (!%p1564_p5), 0.0  }
  0x89   : > { %s780_s30 = scalar_lea.vmem %s2427_s2, %s2306_s10  ;;  %788 = vst [vmem:[#allocation2] sm:$0xff] (!%p1564_p5), %v1944_v40  ;;  %789 = vst [vmem:[#allocation2 + $0x8] sm:$0xff] (!%p1564_p5), %v1944_v40 }
  0x8f PF: > { %v1799_v41 = vld [vmem:[%s2314_s8 + $0x40] sm:$0xff]   ;;  %v1803_v45 = vld [vmem:[%s2314_s8 + $0x48] sm:$0xff]   ;;  %v1807_v49 = vld [vmem:[%s2314_s8 + $0x50] sm:$0xff]   ;;  %p1619_p6 = scmp.ne.s32.totalorder %s1926_s21, 2 }
  0x90   : > { %v1800_v42 = vld [vmem:[%s2314_s8 + $0xc0] sm:$0xff]   ;;  %1640 = vmatprep.subr.bf16.mxu0 %v1799_v41  ;;  %v1804_v46 = vld [vmem:[%s2314_s8 + $0xc8] sm:$0xff]   ;;  %v1808_v50 = vld [vmem:[%s2314_s8 + $0xd0] sm:$0xff]  }
  0x91   : > { %v1801_v43 = vld [vmem:[%s2314_s8] sm:$0xff]   ;;  %1662 = vmatprep.subr.bf16.mxu1 %v1800_v42  ;;  %v1805_v47 = vld [vmem:[%s2314_s8 + $0x8] sm:$0xff]   ;;  %v1809_v51 = vld [vmem:[%s2314_s8 + $0x10] sm:$0xff]  }
  0x92   : > { %v1802_v44 = vld [vmem:[%s2314_s8 + $0x80] sm:$0xff]   ;;  %1641 = vmatpush3.bf16.msra.mxu0 %v1801_v43  ;;  %v1806_v48 = vld [vmem:[%s2314_s8 + $0x88] sm:$0xff]   ;;  %v1810_v52 = vld [vmem:[%s2314_s8 + $0x90] sm:$0xff]  }
  0x93   : > { %1663 = vmatpush3.bf16.msra.mxu1 %v1802_v44  ;;  %1642 = vmatprep.subr.bf16.mxu0 %v1803_v45  ;;  %v1811_v53 = vld [vmem:[%s2314_s8 + $0x58] sm:$0xff]   ;;  %v1815_v57 = vld [vmem:[%s2314_s8 + $0x60] sm:$0xff]   ;;  %v1819_v61 = vld [vmem:[%s2314_s8 + $0x68] sm:$0xff]  }
  0x94   : > { %1664 = vmatprep.subr.bf16.mxu1 %v1804_v46  ;;  %v1812_v54 = vld [vmem:[%s2314_s8 + $0xd8] sm:$0xff]   ;;  %v1816_v58 = vld [vmem:[%s2314_s8 + $0xe0] sm:$0xff]   ;;  %v1820_v62 = vld [vmem:[%s2314_s8 + $0xe8] sm:$0xff]  }
  0x95   : > { %v1813_v55 = vld [vmem:[%s2314_s8 + $0x18] sm:$0xff]   ;;  %v1817_v59 = vld [vmem:[%s2314_s8 + $0x20] sm:$0xff]   ;;  %v1821_v63 = vld [vmem:[%s2314_s8 + $0x28] sm:$0xff]  }
  0x96   : > { %1643 = vmatpush3.bf16.msra.mxu0 %v1805_v47  ;;  %v1814_v56 = vld [vmem:[%s2314_s8 + $0x98] sm:$0xff]   ;;  %v1818_v60 = vld [vmem:[%s2314_s8 + $0xa0] sm:$0xff]   ;;  %v1822_v0 = vld [vmem:[%s2314_s8 + $0xa8] sm:$0xff]  }
  0x97   : > { %1665 = vmatpush3.bf16.msra.mxu1 %v1806_v48  ;;  %1644 = vmatprep.subr.bf16.mxu0 %v1807_v49  ;;  %v1823_v1 = vld [vmem:[%s2314_s8 + $0x70] sm:$0xff]   ;;  %v1827_v5 = vld [vmem:[%s2314_s8 + $0x78] sm:$0xff]   ;;  %v1837_v13 = vld [vmem:[%s2314_s8 + $0x140] sm:$0xff]  }
  0x98   : > { %1666 = vmatprep.subr.bf16.mxu1 %v1808_v50  ;;  %v1824_v2 = vld [vmem:[%s2314_s8 + $0xf0] sm:$0xff]   ;;  %v1828_v6 = vld [vmem:[%s2314_s8 + $0xf8] sm:$0xff]   ;;  %v1838_v14 = vld [vmem:[%s2314_s8 + $0x100] sm:$0xff]  }
  0x99   : > { %v1825_v3 = vld [vmem:[%s2314_s8 + $0x30] sm:$0xff]   ;;  %v1829_v7 = vld [vmem:[%s2314_s8 + $0x38] sm:$0xff]   ;;  %v1839_v15 = vld [vmem:[%s2314_s8 + $0x148] sm:$0xff]  }
  0x9a   : > { %1645 = vmatpush3.bf16.msra.mxu0 %v1809_v51  ;;  %v1826_v4 = vld [vmem:[%s2314_s8 + $0xb0] sm:$0xff]   ;;  %v1830_v8 = vld [vmem:[%s2314_s8 + $0xb8] sm:$0xff]   ;;  %v1840_v16 = vld [vmem:[%s2314_s8 + $0x108] sm:$0xff]  }
  0x9b   : > { %1667 = vmatpush3.bf16.msra.mxu1 %v1810_v52  ;;  %1646 = vmatprep.subr.bf16.mxu0 %v1811_v53  ;;  %v1831_v9 = vld [vmem:[%s2312_s6] ss:$24 sps:$4 sm:$0xff]   ;;  %v1833_v10 = vld [vmem:[%s2312_s6 + $0x4] ss:$24 sps:$4 sm:$0xff]   ;;  %v1855_v24 = vld [vmem:[%s2312_s6 + $0x14] ss:$24 sps:$4 sm:$0xff]  }
  0x9c   : > { %1668 = vmatprep.subr.bf16.mxu1 %v1812_v54  ;;  %v1834_v11 = vld [vmem:[%s2312_s6 + $0x8] ss:$24 sps:$4 sm:$0xff]   ;;  %v1836_v12 = vld [vmem:[%s2312_s6 + $0xc] ss:$24 sps:$4 sm:$0xff]   ;;  %1244 = vmatprep.mubr.bf16.mxu0 %v1833_v10 }
  0x9d   : > { %1285 = vmatprep.mubr.bf16.mxu1 %v1836_v12  ;;  %v1841_v17 = vld [vmem:[%s2314_s8 + $0x150] sm:$0xff]   ;;  %v1843_v19 = vld [vmem:[%s2314_s8 + $0x158] sm:$0xff]   ;;  %v1845_v21 = vld [vmem:[%s2314_s8 + $0x160] sm:$0xff]  }
  0x9e   : > { %1647 = vmatpush3.bf16.msra.mxu0 %v1813_v55  ;;  %v1842_v18 = vld [vmem:[%s2314_s8 + $0x110] sm:$0xff]   ;;  %v1844_v20 = vld [vmem:[%s2314_s8 + $0x118] sm:$0xff]   ;;  %v1846_v22 = vld [vmem:[%s2314_s8 + $0x120] sm:$0xff]  }
  0x9f   : > { %1669 = vmatpush3.bf16.msra.mxu1 %v1814_v56  ;;  %1648 = vmatprep.subr.bf16.mxu0 %v1815_v57  ;;  %v1847_v23 = vld [vmem:[%s2314_s8 + $0x168] sm:$0xff]   ;;  %v1849_v26 = vld [vmem:[%s2314_s8 + $0x170] sm:$0xff]   ;;  %v1851_v28 = vld [vmem:[%s2314_s8 + $0x178] sm:$0xff]  }
  0xa0   : > { %1670 = vmatprep.subr.bf16.mxu1 %v1816_v58  ;;  %v1848_v25 = vld [vmem:[%s2314_s8 + $0x128] sm:$0xff]   ;;  %v1850_v27 = vld [vmem:[%s2314_s8 + $0x130] sm:$0xff]   ;;  %v1852_v29 = vld [vmem:[%s2314_s8 + $0x138] sm:$0xff]  }
  0xa1   : > { %v1853_v30 = vld [vmem:[%s2312_s6 + $0x10] ss:$24 sps:$4 sm:$0xff]  }
  0xa2   : > { %1649 = vmatpush3.bf16.msra.mxu0 %v1817_v59  ;;  %v790_v49 = vld [vmem:[#allocation2] sm:$0xff]  ;;  %v791_v53 = vld [vmem:[#allocation2 + $0x8] sm:$0xff] }
  0xa3   : > { %1671 = vmatpush3.bf16.msra.mxu1 %v1818_v60  ;;  %1650 = vmatprep.subr.bf16.mxu0 %v1819_v61  ;;  %v1620_v59 = vld [vmem:[%s780_s30] ss:$0 sm:$0xff] (!%p1619_p6) }
  0xa4   : > { %1672 = vmatprep.subr.bf16.mxu1 %v1820_v62  ;;  %v1632_v62 = vld [vmem:[%s742_s17] sm:$0xff] (!%p1619_p6)  }
  0xa6   : > { %1651 = vmatpush3.bf16.msra.mxu0 %v1821_v63  ;;  %v1633_v63 = vunpack.c.l.bf16 (!%p1619_p6), %v1632_v62 }
  0xa7   : > { %1673 = vmatpush3.bf16.msra.mxu1 %v1822_v0  ;;  %1652 = vmatprep.subr.bf16.mxu0 %v1823_v1  ;;  %v1634_v0 = vunpack.c.h.bf16 (!%p1619_p6), %v1632_v62 }
  0xa8   : > { %1674 = vmatprep.subr.bf16.mxu1 %v1824_v2 }
  0xaa   : > { %1653 = vmatpush3.bf16.msra.mxu0 %v1825_v3 }
  0xab   : > { %1675 = vmatpush3.bf16.msra.mxu1 %v1826_v4  ;;  %1654 = vmatprep.subr.bf16.mxu0 %v1827_v5 }
  0xac   : > { %1676 = vmatprep.subr.bf16.mxu1 %v1828_v6 }
  0xae   : > { %1655 = vmatpush3.bf16.msra.mxu0 %v1829_v7 }
  0xaf   : > { %1677 = vmatpush3.bf16.msra.mxu1 %v1830_v8  ;;  %1684 = vmatprep.subr.bf16.mxu0 %v1837_v13 }
  0xb1   : > { %1245 = vmatmul.mubr.bf16.vlgmr.msra.gmra.mrb[0].mxu0 %v1831_v9 }
  0xb2   : > { %1286 = vmatmul.mubr.bf16.vlgmr.msra.gmra.mrb[0].mxu1 %v1834_v11  ;;  %1685 = vmatpush3.bf16.msra.mxu0 %v1838_v14 }
  0xb3   : > { %1686 = vmatprep.subr.bf16.mxu0 %v1839_v15  ;;  %1326 = vmatprep.mubr.bf16.mxu0 %v1855_v24 }
  0xb6   : > { %1687 = vmatpush3.bf16.msra.mxu0 %v1840_v16 }
  0xb7   : > { %1688 = vmatprep.subr.bf16.mxu0 %v1841_v17 }
  0xba   : > { %1689 = vmatpush3.bf16.msra.mxu0 %v1842_v18 }
  0xbb   : > { %1690 = vmatprep.subr.bf16.mxu0 %v1843_v19 }
  0xbe   : > { %1691 = vmatpush3.bf16.msra.mxu0 %v1844_v20 }
  0xbf   : > { %1692 = vmatprep.subr.bf16.mxu0 %v1845_v21 }
  0xc2   : > { %1693 = vmatpush3.bf16.msra.mxu0 %v1846_v22 }
  0xc3   : > { %1694 = vmatprep.subr.bf16.mxu0 %v1847_v23 }
  0xc6   : > { %1695 = vmatpush3.bf16.msra.mxu0 %v1848_v25 }
  0xc7   : > { %1696 = vmatprep.subr.bf16.mxu0 %v1849_v26 }
  0xca   : > { %1697 = vmatpush3.bf16.msra.mxu0 %v1850_v27 }
  0xcb   : > { %1698 = vmatprep.subr.bf16.mxu0 %v1851_v28 }
  0xce   : > { %1699 = vmatpush3.bf16.msra.mxu0 %v1852_v29 }
  0xd1   : > { %1327 = vmatmul.mubr.bf16.vlgmr.msra.gmra.mrb[4].mxu0 %v1853_v30 }
 0x184   : > { %v1656_v31 = vpop.f32.mrb[0].mxu0 }
 0x185   : > { %v1678_v32 = vpop.f32.mrb[0].mxu1  ;;  %v1657_v33 = vpop.f32.mrb[1].mxu0 }
 0x186   : > { %v1658_v34 = vadd.f32 %v1657_v33, %v1656_v31  ;;  %v1679_v35 = vpop.f32.mrb[1].mxu1  ;;  %v1659_v36 = vpop.f32.mrb[2].mxu0 }
 0x187   : > { %v1680_v37 = vadd.f32 %v1679_v35, %v1678_v32  ;;  %v1681_v38 = vpop.f32.mrb[2].mxu1  ;;  %v1660_v39 = vpop.f32.mrb[3].mxu0 }
 0x188   : > { %v1661_v40 = vadd.f32 %v1660_v39, %v1659_v36  ;;  %v1682_v41 = vpop.f32.mrb[3].mxu1 }
 0x189   : > { %v1288_v42 = vadd.f32 %v1680_v37, %v1658_v34  ;;  %v1683_v43 = vadd.f32 %v1682_v41, %v1681_v38 }
 0x18b   : > { %v1291_v44 = vadd.f32 %v1683_v43, %v1661_v40 }
 0x1a4   : > { %v1700_v45 = vpop.f32.mrb[4].mxu0 }
 0x1a5   : > { %v1701_v46 = vpop.f32.mrb[5].mxu0 }
 0x1a6   : > { %v1702_v47 = vadd.f32 %v1701_v46, %v1700_v45  ;;  %v1703_v48 = vpop.f32.mrb[6].mxu0 }
 0x1a7   : > { %v1704_v50 = vpop.f32.mrb[7].mxu0 }
 0x1a8   : > { %v1329_v51 = vadd.f32 %v1702_v47, %v1288_v42  ;;  %v1705_v52 = vadd.f32 %v1704_v50, %v1703_v48  ;;  %1342 = sbr.rel (%p1619_p6) target bundleno = 447 (0x1bf), region = 149 }
 0x1aa   : > { %v1335_v54 = vadd.f32 %v1329_v51, %v790_v49  ;;  %v1332_v55 = vadd.f32 %v1705_v52, %v1291_v44 }
 0x1ac   : > { %1337 = vst [vmem:[#allocation2] sm:$0xff] %v1335_v54  ;;  %v1336_v56 = vadd.f32 %v1332_v55, %v791_v53 }
 0x1ae   : > { %1338 = vst [vmem:[#allocation2 + $0x8] sm:$0xff] %v1336_v56 }
 0x1b3   : > { %v1343_v57 = vld [vmem:[#allocation2] sm:$0xff] }
 0x1b4   : > { %v1352_v60 = vadd.f32 %v1620_v59, %v1343_v57 }
 0x1b5   : > { %v1344_v58 = vld [vmem:[#allocation2 + $0x8] sm:$0xff] }
 0x1b6   : > { %v1353_v61 = vadd.f32 %v1620_v59, %v1344_v58  ;;  %v1358_v1 = vadd.f32 %v1633_v63, %v1352_v60 }
 0x1b8   : > { %v1359_v2 = vadd.f32 %v1634_v0, %v1353_v61  ;;  %v1360_v3 = vmax.f32 %v1358_v1, 0.0 }
 0x1ba   : > { %v1361_v4 = vmax.f32 %v1359_v2, 0.0 }
 0x1bc   : > { %v1638_v5 = vpack.c.bf16 %v1361_v4, %v1360_v3 }
 0x1be   : > { %1639 = vst [vmem:[%s2318_s19] sm:$0xff] %v1638_v5  }
 0x1bf PF: > { %1378 = sbr.rel (!%p2074_p13) target bundleno = 455 (0x1c7), region = 153  ;;  %s1624_s21 = sshll.u32 (%p2074_p13), %s1930_s22, 2 }
 0x1c0   : > { %s1383_s11 = scalar_lea.vmem (%p2074_p13), %s2429_s4, %s1624_s21 }
 0x1c5   : > { %v1399_v6 = vld [vmem:[%s2318_s19] sm:$0xf] (%p2074_p13)  ;;  %v1401_v7 = vld [vmem:[%s2318_s19 + $0x4] sm:$0xf] (%p2074_p13) }
 0x1c6   : > { %1400 = vst [vmem:[%s1383_s11] sm:$0xf] %v1399_v6  ;;  %1402 = vst [vmem:[%s1383_s11 + $0x8] sm:$0xf] %v1401_v7 }
 0x1c7 PF: > { %s14_s25 = sadd.s32 1, %s1942_s25   ;;  %s2440_s29 = sld [smem:[#allocation7_spill]] }
 0x1c8   : > { %p11_p7 = scmp.ge.s32.totalorder %s14_s25, 8   ;;  %s2441_s28 = sld [smem:[#allocation8_spill]] }
 0x1c9   : > { %s2442_s15 = smov %s1906_s16  ;;  %s2443_s16 = smov %s2066_s13 }
 0x1ca   : > { %s2444_s17 = smov %s1914_s18  ;;  %s2445_s18 = smov %s2063_s12 }
 0x1cb   : > { %s2446_s19 = smov %s1922_s20  ;;  %s2447_s20 = smov %s2047_s7 }
 0x1cc   : > { %s2448_s21 = smov %s1934_s23  ;;  %s2449_s22 = smov %s1938_s24 }
 0x1cd   : > { %s2450_s23 = smov %s2440_s29  ;;  %13 = sbr.rel (!%p11_p7) target bundleno = 8 (0x8), region = 244 }
 0x1ce   : > { %s2451_s24 = smov %s2441_s28 }

// kernel: resnet18_forward.34
= control target key start
LH: loop header
LB: loop body
LE: loop exit
PB: predicated region body
PF: predicated region fallthrough
CT: control target
= control target key end

     0   :  { %s2266_s0 = inlined_call_operand.vmem [shape: bf16[16,2304], index: 0, kind: input, shape index: {}]   ;;  %s2267_s1 = inlined_call_operand.vmem [shape: bf16[2304,256], index: 1, kind: input, shape index: {}]   ;;  %s2268_s2 = inlined_call_operand.vmem [shape: f32[1,256], index: 2, kind: input, shape index: {}]   ;;  %s2269_s3 = inlined_call_operand.vmem [shape: bf16[16,256], index: 3, kind: output, shape index: {}]  }
   0x1   :  { %2271 = sst [smem:[#allocation7_spill]] %s2266_s0 }
   0x2   :  { %2272 = sst [smem:[#allocation8_spill]] %s2267_s1 }
   0x3   :  { %s1834_s12 = smov 0   ;;  %s1836_s13 = smov 0  }
   0x4   :  { %s1838_s14 = smov 0   ;;  %s1840_s15 = smov 0  }
   0x5   :  { %s1842_s16 = smov 0   ;;  %s1844_s17 = smov 0  }
   0x6   :  { %s1846_s18 = smov 0   ;;  %s1848_s19 = smov 0  }
   0x7   :  { %s1850_s20 = smov 0   ;;  %s1852_s21 = smov 0  }
   0x8   :  { %s1854_s22 = smov 0  }
   0x9 LB: > { %s1428_s23 = sadd.s32 4294967295, %s1811_s22   ;;  %s25_s24 = sadd.s32 1, %s1803_s20  ;;  %s1811_s22 = sphi %s1854_s22, %s13_s22   ;;  %s1807_s21 = sphi %s1852_s21, %s2289_s21   ;;  %s1803_s20 = sphi %s1850_s20, %s2288_s20   ;;  %s1799_s19 = sphi %s1848_s19, %s2287_s19   ;;  %s1795_s18 = sphi %s1846_s18, %s2286_s18   ;;  %s1791_s17 = sphi %s1844_s17, %s2285_s17   ;;  %s1787_s16 = sphi %s1842_s16, %s2284_s16   ;;  %s1783_s15 = sphi %s1840_s15, %s2283_s15   ;;  %s1779_s14 = sphi %s1838_s14, %s2282_s14   ;;  %s1775_s13 = sphi %s1836_s13, %s2281_s13   ;;  %s1771_s12 = sphi %s1834_s12, %s2280_s12  }
   0xa   : > { %p26_p0 = scmp.ge.s32.totalorder %s25_s24, 3  ;;  %s28_s25 = sadd.s32 1, %s1807_s21 }
   0xb   : > { %s41_s26 = sadd.s32 1, %s1791_s17  ;;  %p48_p1 = scmp.ne.s32.totalorder %s1791_s17, %s1787_s16 }
   0xc   : > { %s2291_s24 = smov (%p26_p0, %s25_s24), 0  ;;  %s2293_s25 = smov (!%p26_p0, %s28_s25), %s1807_s21 }
   0xd   : > { %s37_s27 = ssub.s32 %s1803_s20, %s2291_s24  ;;  %p49_p2 = scmp.eq.s32.totalorder %s1811_s22, 0 }
   0xe   : > { %p30_p3 = scmp.ge.s32.totalorder %s2293_s25, 2  ;;  %p39_p4 = scmp.eq.s32.totalorder %s37_s27, 0 }
   0xf   : > { %p1901_p5 = por %p49_p2, %p48_p1  ;;  %s69_s29 = sadd.s32 1, %s1783_s15 }
  0x10   : > { %s2295_s25 = smov (%p30_p3, %s2293_s25), 0  ;;  %p76_p6 = scmp.ne.s32.totalorder %s1783_s15, %s1779_s14 }
  0x11   : > { %2274 = sst [smem:[#allocation6_spill]] %s2295_s25  ;;  %s65_s4 = ssub.s32 %s1807_s21, %s2295_s25 }
  0x12   : > { %s1909_s30 = scalar_select %p39_p4, %s1791_s17, %s41_s26  }
  0x13   : > { %s66_s5 = sor.u32 %s65_s4, %s37_s27  ;;  %p121_p7 = scmp.eq.s32.totalorder %s65_s4, 0 }
  0x14   : > { %p67_p8 = scmp.eq.s32.totalorder %s66_s5, 0  ;;  %p1915_p9 = por %p76_p6, %p49_p2 }
  0x15   : > { %s123_s7 = sadd.s32 1, %s1775_s13  ;;  %p133_p10 = scmp.ne.s32.totalorder %s1775_s13, %s1771_s12 }
  0x16   : > { %s1923_s8 = scalar_select %p67_p8, %s1783_s15, %s69_s29  }
  0x17   : > { %s1926_s9 = scalar_select %p121_p7, %s1775_s13, %s123_s7  }
  0x18   : > { %p134_p11 = scmp.eq.s32.totalorder %s1428_s23, 5  ;;  %p1431_p13 = scmp.ge.s32.totalorder %s1811_s22, 6 }
  0x1a   : > { %p1928_p12 = por %p134_p11, %p133_p10  ;;  %156 = sbr.rel (%p1431_p13) target bundleno = 118 (0x76), region = 16 }
  0x21   : > { %159 = sbr.rel (!%p1901_p5) target bundleno = 45 (0x2d), region = 20  ;;  %s161_s11 = sand.u32 (%p1901_p5), 1, %s1791_s17  }
  0x22   : > { %s1500_s26 = smul.u32 (%p1901_p5), 24, %s1803_s20  ;;  %s2277_s0 = sld [smem:[#allocation7_spill]] (%p1901_p5) }
  0x23   : > { %s1575_s27 = smul.u32 (%p1901_p5), 48, %s161_s11 }
  0x25   : > { %s163_s23 = scalar_lea.vmem (%p1901_p5), [#allocation3], %s1575_s27 }
  0x28   : > { %s169_s5 = scalar_lea.vmem %s2277_s0, %s1500_s26 }
  0x29   : > { %v182_v0 = vld [vmem:[%s169_s5] sm:$0xff]  ;;  %v184_v1 = vld [vmem:[%s169_s5 + $0x8] sm:$0xff]  ;;  %v186_v2 = vld [vmem:[%s169_s5 + $0x10] sm:$0xff] }
  0x2a   : > { %183 = vst [vmem:[%s163_s23] sm:$0xff] %v182_v0  ;;  %185 = vst [vmem:[%s163_s23 + $0x8] sm:$0xff] %v184_v1  ;;  %v188_v3 = vld [vmem:[%s169_s5 + $0x48] sm:$0xff]  ;;  %v190_v4 = vld [vmem:[%s169_s5 + $0x50] sm:$0xff] }
  0x2b   : > { %187 = vst [vmem:[%s163_s23 + $0x10] sm:$0xff] %v186_v2  ;;  %v192_v5 = vld [vmem:[%s169_s5 + $0x58] sm:$0xff]  ;;  %189 = vst [vmem:[%s163_s23 + $0x18] sm:$0xff] %v188_v3 }
  0x2c   : > { %191 = vst [vmem:[%s163_s23 + $0x20] sm:$0xff] %v190_v4  ;;  %193 = vst [vmem:[%s163_s23 + $0x28] sm:$0xff] %v192_v5 }
  0x2d PF: > { %199 = sbr.rel (!%p1915_p9) target bundleno = 118 (0x76), region = 43  ;;  %s201_s28 = sand.u32 (%p1915_p9), 1, %s1783_s15  }
  0x2e   : > { %s1501_s7 = smul.u32 (%p1915_p9), 192, %s1803_s20  ;;  %s2278_s1 = sld [smem:[#allocation8_spill]] (%p1915_p9) }
  0x2f   : > { %s1576_s11 = smul.u32 (%p1915_p9), 384, %s201_s28 }
  0x30   : > { %s206_s26 = sadd.s32 (%p1915_p9), %s1807_s21, %s1501_s7 }
  0x31   : > { %s1434_s27 = sshll.u32 (%p1915_p9), %s206_s26, 2  ;;  %s1953_s6 = scalar_lea.vmem (%p1915_p9), [#allocation4], %s1576_s11 }
  0x34   : > { %s1948_s0 = scalar_lea.vmem %s2278_s1, %s1434_s27 }
  0x35   : > { %v224_v6 = vld [vmem:[%s1948_s0] sm:$0xf]  ;;  %v226_v7 = vld [vmem:[%s1948_s0 + $0x8] sm:$0xf]  ;;  %v228_v8 = vld [vmem:[%s1948_s0 + $0x10] sm:$0xf] }
  0x36   : > { %225 = vst [vmem:[%s1953_s6] sm:$0xf] %v224_v6  ;;  %227 = vst [vmem:[%s1953_s6 + $0x4] sm:$0xf] %v226_v7  ;;  %v230_v9 = vld [vmem:[%s1948_s0 + $0x18] sm:$0xf] }
  0x37   : > { %229 = vst [vmem:[%s1953_s6 + $0x8] sm:$0xf] %v228_v8  ;;  %v232_v10 = vld [vmem:[%s1948_s0 + $0x20] sm:$0xf]  ;;  %v234_v11 = vld [vmem:[%s1948_s0 + $0x28] sm:$0xf] }
  0x38   : > { %231 = vst [vmem:[%s1953_s6 + $0xc] sm:$0xf] %v230_v9  ;;  %233 = vst [vmem:[%s1953_s6 + $0x10] sm:$0xf] %v232_v10  ;;  %v236_v12 = vld [vmem:[%s1948_s0 + $0x30] sm:$0xf] }
  0x39   : > { %235 = vst [vmem:[%s1953_s6 + $0x14] sm:$0xf] %v234_v11  ;;  %v238_v13 = vld [vmem:[%s1948_s0 + $0x38] sm:$0xf]  ;;  %v240_v14 = vld [vmem:[%s1948_s0 + $0x40] sm:$0xf] }
  0x3a   : > { %237 = vst [vmem:[%s1953_s6 + $0x18] sm:$0xf] %v236_v12  ;;  %239 = vst [vmem:[%s1953_s6 + $0x1c] sm:$0xf] %v238_v13  ;;  %v242_v15 = vld [vmem:[%s1948_s0 + $0x48] sm:$0xf] }
  0x3b   : > { %241 = vst [vmem:[%s1953_s6 + $0x20] sm:$0xf] %v240_v14  ;;  %v244_v16 = vld [vmem:[%s1948_s0 + $0x50] sm:$0xf]  ;;  %v246_v17 = vld [vmem:[%s1948_s0 + $0x58] sm:$0xf] }
  0x3c   : > { %243 = vst [vmem:[%s1953_s6 + $0x24] sm:$0xf] %v242_v15  ;;  %245 = vst [vmem:[%s1953_s6 + $0x28] sm:$0xf] %v244_v16  ;;  %v248_v18 = vld [vmem:[%s1948_s0 + $0x60] sm:$0xf] }
  0x3d   : > { %247 = vst [vmem:[%s1953_s6 + $0x2c] sm:$0xf] %v246_v17  ;;  %v250_v19 = vld [vmem:[%s1948_s0 + $0x68] sm:$0xf]  ;;  %v252_v20 = vld [vmem:[%s1948_s0 + $0x70] sm:$0xf] }
  0x3e   : > { %249 = vst [vmem:[%s1953_s6 + $0x30] sm:$0xf] %v248_v18  ;;  %251 = vst [vmem:[%s1953_s6 + $0x34] sm:$0xf] %v250_v19  ;;  %v254_v21 = vld [vmem:[%s1948_s0 + $0x78] sm:$0xf] }
  0x3f   : > { %253 = vst [vmem:[%s1953_s6 + $0x38] sm:$0xf] %v252_v20  ;;  %v256_v22 = vld [vmem:[%s1948_s0 + $0x80] sm:$0xf]  ;;  %v258_v23 = vld [vmem:[%s1948_s0 + $0x88] sm:$0xf] }
  0x40   : > { %255 = vst [vmem:[%s1953_s6 + $0x3c] sm:$0xf] %v254_v21  ;;  %257 = vst [vmem:[%s1953_s6 + $0x40] sm:$0xf] %v256_v22  ;;  %v260_v24 = vld [vmem:[%s1948_s0 + $0x90] sm:$0xf] }
  0x41   : > { %259 = vst [vmem:[%s1953_s6 + $0x44] sm:$0xf] %v258_v23  ;;  %v262_v25 = vld [vmem:[%s1948_s0 + $0x98] sm:$0xf]  ;;  %v264_v26 = vld [vmem:[%s1948_s0 + $0xa0] sm:$0xf] }
  0x42   : > { %261 = vst [vmem:[%s1953_s6 + $0x48] sm:$0xf] %v260_v24  ;;  %263 = vst [vmem:[%s1953_s6 + $0x4c] sm:$0xf] %v262_v25  ;;  %v266_v27 = vld [vmem:[%s1948_s0 + $0xa8] sm:$0xf] }
  0x43   : > { %265 = vst [vmem:[%s1953_s6 + $0x50] sm:$0xf] %v264_v26  ;;  %v268_v28 = vld [vmem:[%s1948_s0 + $0xb0] sm:$0xf]  ;;  %v270_v29 = vld [vmem:[%s1948_s0 + $0xb8] sm:$0xf] }
  0x44   : > { %267 = vst [vmem:[%s1953_s6 + $0x54] sm:$0xf] %v266_v27  ;;  %269 = vst [vmem:[%s1953_s6 + $0x58] sm:$0xf] %v268_v28  ;;  %v272_v30 = vld [vmem:[%s1948_s0 + $0xc0] sm:$0xf] }
  0x45   : > { %271 = vst [vmem:[%s1953_s6 + $0x5c] sm:$0xf] %v270_v29  ;;  %v274_v31 = vld [vmem:[%s1948_s0 + $0xc8] sm:$0xf]  ;;  %v276_v32 = vld [vmem:[%s1948_s0 + $0xd0] sm:$0xf] }
  0x46   : > { %273 = vst [vmem:[%s1953_s6 + $0x60] sm:$0xf] %v272_v30  ;;  %275 = vst [vmem:[%s1953_s6 + $0x64] sm:$0xf] %v274_v31  ;;  %v278_v33 = vld [vmem:[%s1948_s0 + $0xd8] sm:$0xf] }
  0x47   : > { %277 = vst [vmem:[%s1953_s6 + $0x68] sm:$0xf] %v276_v32  ;;  %v280_v34 = vld [vmem:[%s1948_s0 + $0xe0] sm:$0xf]  ;;  %v282_v35 = vld [vmem:[%s1948_s0 + $0xe8] sm:$0xf] }
  0x48   : > { %279 = vst [vmem:[%s1953_s6 + $0x6c] sm:$0xf] %v278_v33  ;;  %281 = vst [vmem:[%s1953_s6 + $0x70] sm:$0xf] %v280_v34  ;;  %v284_v36 = vld [vmem:[%s1948_s0 + $0xf0] sm:$0xf] }
  0x49   : > { %283 = vst [vmem:[%s1953_s6 + $0x74] sm:$0xf] %v282_v35  ;;  %v286_v37 = vld [vmem:[%s1948_s0 + $0xf8] sm:$0xf]  ;;  %v288_v38 = vld [vmem:[%s1948_s0 + $0x100] sm:$0xf] }
  0x4a   : > { %285 = vst [vmem:[%s1953_s6 + $0x78] sm:$0xf] %v284_v36  ;;  %287 = vst [vmem:[%s1953_s6 + $0x7c] sm:$0xf] %v286_v37  ;;  %v290_v39 = vld [vmem:[%s1948_s0 + $0x108] sm:$0xf] }
  0x4b   : > { %289 = vst [vmem:[%s1953_s6 + $0x80] sm:$0xf] %v288_v38  ;;  %v292_v40 = vld [vmem:[%s1948_s0 + $0x110] sm:$0xf]  ;;  %v294_v41 = vld [vmem:[%s1948_s0 + $0x118] sm:$0xf] }
  0x4c   : > { %291 = vst [vmem:[%s1953_s6 + $0x84] sm:$0xf] %v290_v39  ;;  %293 = vst [vmem:[%s1953_s6 + $0x88] sm:$0xf] %v292_v40  ;;  %v296_v42 = vld [vmem:[%s1948_s0 + $0x120] sm:$0xf] }
  0x4d   : > { %295 = vst [vmem:[%s1953_s6 + $0x8c] sm:$0xf] %v294_v41  ;;  %v298_v43 = vld [vmem:[%s1948_s0 + $0x128] sm:$0xf]  ;;  %v300_v44 = vld [vmem:[%s1948_s0 + $0x130] sm:$0xf] }
  0x4e   : > { %297 = vst [vmem:[%s1953_s6 + $0x90] sm:$0xf] %v296_v42  ;;  %299 = vst [vmem:[%s1953_s6 + $0x94] sm:$0xf] %v298_v43  ;;  %v302_v45 = vld [vmem:[%s1948_s0 + $0x138] sm:$0xf] }
  0x4f   : > { %301 = vst [vmem:[%s1953_s6 + $0x98] sm:$0xf] %v300_v44  ;;  %v304_v46 = vld [vmem:[%s1948_s0 + $0x140] sm:$0xf]  ;;  %v306_v47 = vld [vmem:[%s1948_s0 + $0x148] sm:$0xf] }
  0x50   : > { %303 = vst [vmem:[%s1953_s6 + $0x9c] sm:$0xf] %v302_v45  ;;  %305 = vst [vmem:[%s1953_s6 + $0xa0] sm:$0xf] %v304_v46  ;;  %v308_v48 = vld [vmem:[%s1948_s0 + $0x150] sm:$0xf] }
  0x51   : > { %307 = vst [vmem:[%s1953_s6 + $0xa4] sm:$0xf] %v306_v47  ;;  %v310_v49 = vld [vmem:[%s1948_s0 + $0x158] sm:$0xf]  ;;  %v312_v50 = vld [vmem:[%s1948_s0 + $0x160] sm:$0xf] }
  0x52   : > { %309 = vst [vmem:[%s1953_s6 + $0xa8] sm:$0xf] %v308_v48  ;;  %311 = vst [vmem:[%s1953_s6 + $0xac] sm:$0xf] %v310_v49  ;;  %v314_v51 = vld [vmem:[%s1948_s0 + $0x168] sm:$0xf] }
  0x53   : > { %313 = vst [vmem:[%s1953_s6 + $0xb0] sm:$0xf] %v312_v50  ;;  %v316_v52 = vld [vmem:[%s1948_s0 + $0x170] sm:$0xf]  ;;  %v318_v53 = vld [vmem:[%s1948_s0 + $0x178] sm:$0xf] }
  0x54   : > { %315 = vst [vmem:[%s1953_s6 + $0xb4] sm:$0xf] %v314_v51  ;;  %317 = vst [vmem:[%s1953_s6 + $0xb8] sm:$0xf] %v316_v52  ;;  %v320_v54 = vld [vmem:[%s1948_s0 + $0x180] sm:$0xf] }
  0x55   : > { %319 = vst [vmem:[%s1953_s6 + $0xbc] sm:$0xf] %v318_v53  ;;  %v322_v55 = vld [vmem:[%s1948_s0 + $0x188] sm:$0xf]  ;;  %v324_v56 = vld [vmem:[%s1948_s0 + $0x190] sm:$0xf] }
  0x56   : > { %321 = vst [vmem:[%s1953_s6 + $0xc0] sm:$0xf] %v320_v54  ;;  %323 = vst [vmem:[%s1953_s6 + $0xc4] sm:$0xf] %v322_v55  ;;  %v326_v57 = vld [vmem:[%s1948_s0 + $0x198] sm:$0xf] }
  0x57   : > { %325 = vst [vmem:[%s1953_s6 + $0xc8] sm:$0xf] %v324_v56  ;;  %v328_v58 = vld [vmem:[%s1948_s0 + $0x1a0] sm:$0xf]  ;;  %v330_v59 = vld [vmem:[%s1948_s0 + $0x1a8] sm:$0xf] }
  0x58   : > { %327 = vst [vmem:[%s1953_s6 + $0xcc] sm:$0xf] %v326_v57  ;;  %329 = vst [vmem:[%s1953_s6 + $0xd0] sm:$0xf] %v328_v58  ;;  %v332_v60 = vld [vmem:[%s1948_s0 + $0x1b0] sm:$0xf] }
  0x59   : > { %331 = vst [vmem:[%s1953_s6 + $0xd4] sm:$0xf] %v330_v59  ;;  %v334_v61 = vld [vmem:[%s1948_s0 + $0x1b8] sm:$0xf]  ;;  %v336_v62 = vld [vmem:[%s1948_s0 + $0x1c0] sm:$0xf] }
  0x5a   : > { %333 = vst [vmem:[%s1953_s6 + $0xd8] sm:$0xf] %v332_v60  ;;  %335 = vst [vmem:[%s1953_s6 + $0xdc] sm:$0xf] %v334_v61  ;;  %v338_v63 = vld [vmem:[%s1948_s0 + $0x1c8] sm:$0xf] }
  0x5b   : > { %337 = vst [vmem:[%s1953_s6 + $0xe0] sm:$0xf] %v336_v62  ;;  %v340_v0 = vld [vmem:[%s1948_s0 + $0x1d0] sm:$0xf]  ;;  %v342_v1 = vld [vmem:[%s1948_s0 + $0x1d8] sm:$0xf] }
  0x5c   : > { %339 = vst [vmem:[%s1953_s6 + $0xe4] sm:$0xf] %v338_v63  ;;  %341 = vst [vmem:[%s1953_s6 + $0xe8] sm:$0xf] %v340_v0  ;;  %v344_v2 = vld [vmem:[%s1948_s0 + $0x1e0] sm:$0xf] }
  0x5d   : > { %343 = vst [vmem:[%s1953_s6 + $0xec] sm:$0xf] %v342_v1  ;;  %v346_v3 = vld [vmem:[%s1948_s0 + $0x1e8] sm:$0xf]  ;;  %v348_v4 = vld [vmem:[%s1948_s0 + $0x1f0] sm:$0xf] }
  0x5e   : > { %345 = vst [vmem:[%s1953_s6 + $0xf0] sm:$0xf] %v344_v2  ;;  %347 = vst [vmem:[%s1953_s6 + $0xf4] sm:$0xf] %v346_v3  ;;  %v350_v5 = vld [vmem:[%s1948_s0 + $0x1f8] sm:$0xf] }
  0x5f   : > { %349 = vst [vmem:[%s1953_s6 + $0xf8] sm:$0xf] %v348_v4  ;;  %v352_v6 = vld [vmem:[%s1948_s0 + $0x200] sm:$0xf]  ;;  %v354_v7 = vld [vmem:[%s1948_s0 + $0x208] sm:$0xf] }
  0x60   : > { %351 = vst [vmem:[%s1953_s6 + $0xfc] sm:$0xf] %v350_v5  ;;  %353 = vst [vmem:[%s1953_s6 + $0x100] sm:$0xf] %v352_v6  ;;  %v356_v8 = vld [vmem:[%s1948_s0 + $0x210] sm:$0xf] }
  0x61   : > { %355 = vst [vmem:[%s1953_s6 + $0x104] sm:$0xf] %v354_v7  ;;  %v358_v9 = vld [vmem:[%s1948_s0 + $0x218] sm:$0xf]  ;;  %v360_v10 = vld [vmem:[%s1948_s0 + $0x220] sm:$0xf] }
  0x62   : > { %357 = vst [vmem:[%s1953_s6 + $0x108] sm:$0xf] %v356_v8  ;;  %359 = vst [vmem:[%s1953_s6 + $0x10c] sm:$0xf] %v358_v9  ;;  %v362_v11 = vld [vmem:[%s1948_s0 + $0x228] sm:$0xf] }
  0x63   : > { %361 = vst [vmem:[%s1953_s6 + $0x110] sm:$0xf] %v360_v10  ;;  %v364_v12 = vld [vmem:[%s1948_s0 + $0x230] sm:$0xf]  ;;  %v366_v13 = vld [vmem:[%s1948_s0 + $0x238] sm:$0xf] }
  0x64   : > { %363 = vst [vmem:[%s1953_s6 + $0x114] sm:$0xf] %v362_v11  ;;  %365 = vst [vmem:[%s1953_s6 + $0x118] sm:$0xf] %v364_v12  ;;  %v368_v14 = vld [vmem:[%s1948_s0 + $0x240] sm:$0xf] }
  0x65   : > { %367 = vst [vmem:[%s1953_s6 + $0x11c] sm:$0xf] %v366_v13  ;;  %v370_v15 = vld [vmem:[%s1948_s0 + $0x248] sm:$0xf]  ;;  %v372_v16 = vld [vmem:[%s1948_s0 + $0x250] sm:$0xf] }
  0x66   : > { %369 = vst [vmem:[%s1953_s6 + $0x120] sm:$0xf] %v368_v14  ;;  %371 = vst [vmem:[%s1953_s6 + $0x124] sm:$0xf] %v370_v15  ;;  %v374_v17 = vld [vmem:[%s1948_s0 + $0x258] sm:$0xf] }
  0x67   : > { %373 = vst [vmem:[%s1953_s6 + $0x128] sm:$0xf] %v372_v16  ;;  %v376_v18 = vld [vmem:[%s1948_s0 + $0x260] sm:$0xf]  ;;  %v378_v19 = vld [vmem:[%s1948_s0 + $0x268] sm:$0xf] }
  0x68   : > { %375 = vst [vmem:[%s1953_s6 + $0x12c] sm:$0xf] %v374_v17  ;;  %377 = vst [vmem:[%s1953_s6 + $0x130] sm:$0xf] %v376_v18  ;;  %v380_v20 = vld [vmem:[%s1948_s0 + $0x270] sm:$0xf] }
  0x69   : > { %379 = vst [vmem:[%s1953_s6 + $0x134] sm:$0xf] %v378_v19  ;;  %v382_v21 = vld [vmem:[%s1948_s0 + $0x278] sm:$0xf]  ;;  %v384_v22 = vld [vmem:[%s1948_s0 + $0x280] sm:$0xf] }
  0x6a   : > { %381 = vst [vmem:[%s1953_s6 + $0x138] sm:$0xf] %v380_v20  ;;  %383 = vst [vmem:[%s1953_s6 + $0x13c] sm:$0xf] %v382_v21  ;;  %v386_v23 = vld [vmem:[%s1948_s0 + $0x288] sm:$0xf] }
  0x6b   : > { %385 = vst [vmem:[%s1953_s6 + $0x140] sm:$0xf] %v384_v22  ;;  %v388_v24 = vld [vmem:[%s1948_s0 + $0x290] sm:$0xf]  ;;  %v390_v25 = vld [vmem:[%s1948_s0 + $0x298] sm:$0xf] }
  0x6c   : > { %387 = vst [vmem:[%s1953_s6 + $0x144] sm:$0xf] %v386_v23  ;;  %389 = vst [vmem:[%s1953_s6 + $0x148] sm:$0xf] %v388_v24  ;;  %v392_v26 = vld [vmem:[%s1948_s0 + $0x2a0] sm:$0xf] }
  0x6d   : > { %391 = vst [vmem:[%s1953_s6 + $0x14c] sm:$0xf] %v390_v25  ;;  %v394_v27 = vld [vmem:[%s1948_s0 + $0x2a8] sm:$0xf]  ;;  %v396_v28 = vld [vmem:[%s1948_s0 + $0x2b0] sm:$0xf] }
  0x6e   : > { %393 = vst [vmem:[%s1953_s6 + $0x150] sm:$0xf] %v392_v26  ;;  %395 = vst [vmem:[%s1953_s6 + $0x154] sm:$0xf] %v394_v27  ;;  %v398_v29 = vld [vmem:[%s1948_s0 + $0x2b8] sm:$0xf] }
  0x6f   : > { %397 = vst [vmem:[%s1953_s6 + $0x158] sm:$0xf] %v396_v28  ;;  %v400_v30 = vld [vmem:[%s1948_s0 + $0x2c0] sm:$0xf]  ;;  %v402_v31 = vld [vmem:[%s1948_s0 + $0x2c8] sm:$0xf] }
  0x70   : > { %399 = vst [vmem:[%s1953_s6 + $0x15c] sm:$0xf] %v398_v29  ;;  %401 = vst [vmem:[%s1953_s6 + $0x160] sm:$0xf] %v400_v30  ;;  %v404_v32 = vld [vmem:[%s1948_s0 + $0x2d0] sm:$0xf] }
  0x71   : > { %403 = vst [vmem:[%s1953_s6 + $0x164] sm:$0xf] %v402_v31  ;;  %v406_v33 = vld [vmem:[%s1948_s0 + $0x2d8] sm:$0xf]  ;;  %v408_v34 = vld [vmem:[%s1948_s0 + $0x2e0] sm:$0xf] }
  0x72   : > { %405 = vst [vmem:[%s1953_s6 + $0x168] sm:$0xf] %v404_v32  ;;  %407 = vst [vmem:[%s1953_s6 + $0x16c] sm:$0xf] %v406_v33  ;;  %v410_v35 = vld [vmem:[%s1948_s0 + $0x2e8] sm:$0xf] }
  0x73   : > { %409 = vst [vmem:[%s1953_s6 + $0x170] sm:$0xf] %v408_v34  ;;  %v412_v36 = vld [vmem:[%s1948_s0 + $0x2f0] sm:$0xf]  ;;  %v414_v37 = vld [vmem:[%s1948_s0 + $0x2f8] sm:$0xf] }
  0x74   : > { %411 = vst [vmem:[%s1953_s6 + $0x174] sm:$0xf] %v410_v35  ;;  %413 = vst [vmem:[%s1953_s6 + $0x178] sm:$0xf] %v412_v36 }
  0x75   : > { %415 = vst [vmem:[%s1953_s6 + $0x17c] sm:$0xf] %v414_v37 }
  0x76 PF: > { %p1435_p0 = scmp.ge.s32.totalorder %s1811_s22, 1  ;;  %p635_p1 = scmp.lt.s32.totalorder %s1811_s22, 7 }
  0x78   : > { %p636_p2 = pnand %p1435_p0, %p635_p1 }
  0x79   : > { %s642_s5 = sand.u32 (!%p636_p2), 1, %s1787_s16   ;;  %s649_s23 = sand.u32 (!%p636_p2), 1, %s1779_s14  }
  0x7a   : > { %639 = sbr.rel (%p636_p2) target bundleno = 447 (0x1bf), region = 88  ;;  %s675_s0 = sand.u32 (!%p636_p2), 1, %s1771_s12  }
  0x7b   : > { %s1577_s28 = smul.u32 (!%p636_p2), 48, %s642_s5  ;;  %s1436_s11 = sshll.u32 (!%p636_p2), %s675_s0, 3 }
  0x7c   : > { %s1578_s7 = smul.u32 (!%p636_p2), 384, %s649_s23  ;;  %p681_p3 = scmp.lt.s32.totalorder (!%p636_p2), %s1799_s19, 1 }
  0x7d   : > { %s2157_s6 = scalar_lea.vmem (!%p636_p2), [#allocation3], %s1577_s28  ;;  %s2161_s25 = scalar_lea.vmem (!%p636_p2), [#allocation5], %s1436_s11 }
  0x7e   : > { %s2159_s1 = scalar_lea.vmem (!%p636_p2), [#allocation4], %s1578_s7  ;;  %p1437_p4 = scmp.ne.s32.totalorder (!%p636_p2), %s1795_s18, 0 }
  0x81   : > { %s2151_s26 = scalar_select %p681_p3, %s1799_s19, 1 }
  0x82   : > { %689 = sbr.rel (%p1437_p4) target bundleno = 137 (0x89), region = 100  ;;  %v1813_v38 = vmov (!%p1437_p4), 0.0  }
  0x83   : > { %s683_s4 = scalar_lea.vmem %s2268_s2, %s2151_s26  ;;  %690 = vst [vmem:[#allocation2] sm:$0xff] (!%p1437_p4), %v1813_v38  ;;  %691 = vst [vmem:[#allocation2 + $0x8] sm:$0xff] (!%p1437_p4), %v1813_v38 }
  0x89 PF: > { %v1668_v39 = vld [vmem:[%s2159_s1 + $0x40] sm:$0xff]   ;;  %v1672_v43 = vld [vmem:[%s2159_s1 + $0x48] sm:$0xff]   ;;  %v1676_v47 = vld [vmem:[%s2159_s1 + $0x50] sm:$0xff]   ;;  %p1492_p5 = scmp.ne.s32.totalorder %s1795_s18, 2 }
  0x8a   : > { %v1669_v40 = vld [vmem:[%s2159_s1 + $0xc0] sm:$0xff]   ;;  %1509 = vmatprep.subr.bf16.mxu0 %v1668_v39  ;;  %v1673_v44 = vld [vmem:[%s2159_s1 + $0xc8] sm:$0xff]   ;;  %v1677_v48 = vld [vmem:[%s2159_s1 + $0xd0] sm:$0xff]  }
  0x8b   : > { %v1670_v41 = vld [vmem:[%s2159_s1] sm:$0xff]   ;;  %1531 = vmatprep.subr.bf16.mxu1 %v1669_v40  ;;  %v1674_v45 = vld [vmem:[%s2159_s1 + $0x8] sm:$0xff]   ;;  %v1678_v49 = vld [vmem:[%s2159_s1 + $0x10] sm:$0xff]  }
  0x8c   : > { %v1671_v42 = vld [vmem:[%s2159_s1 + $0x80] sm:$0xff]   ;;  %1510 = vmatpush3.bf16.msra.mxu0 %v1670_v41  ;;  %v1675_v46 = vld [vmem:[%s2159_s1 + $0x88] sm:$0xff]   ;;  %v1679_v50 = vld [vmem:[%s2159_s1 + $0x90] sm:$0xff]  }
  0x8d   : > { %1532 = vmatpush3.bf16.msra.mxu1 %v1671_v42  ;;  %1511 = vmatprep.subr.bf16.mxu0 %v1672_v43  ;;  %v1680_v51 = vld [vmem:[%s2159_s1 + $0x58] sm:$0xff]   ;;  %v1684_v55 = vld [vmem:[%s2159_s1 + $0x60] sm:$0xff]   ;;  %v1688_v59 = vld [vmem:[%s2159_s1 + $0x68] sm:$0xff]  }
  0x8e   : > { %1533 = vmatprep.subr.bf16.mxu1 %v1673_v44  ;;  %v1681_v52 = vld [vmem:[%s2159_s1 + $0xd8] sm:$0xff]   ;;  %v1685_v56 = vld [vmem:[%s2159_s1 + $0xe0] sm:$0xff]   ;;  %v1689_v60 = vld [vmem:[%s2159_s1 + $0xe8] sm:$0xff]  }
  0x8f   : > { %v1682_v53 = vld [vmem:[%s2159_s1 + $0x18] sm:$0xff]   ;;  %v1686_v57 = vld [vmem:[%s2159_s1 + $0x20] sm:$0xff]   ;;  %v1690_v61 = vld [vmem:[%s2159_s1 + $0x28] sm:$0xff]  }
  0x90   : > { %1512 = vmatpush3.bf16.msra.mxu0 %v1674_v45  ;;  %v1683_v54 = vld [vmem:[%s2159_s1 + $0x98] sm:$0xff]   ;;  %v1687_v58 = vld [vmem:[%s2159_s1 + $0xa0] sm:$0xff]   ;;  %v1691_v62 = vld [vmem:[%s2159_s1 + $0xa8] sm:$0xff]  }
  0x91   : > { %1534 = vmatpush3.bf16.msra.mxu1 %v1675_v46  ;;  %1513 = vmatprep.subr.bf16.mxu0 %v1676_v47  ;;  %v1692_v63 = vld [vmem:[%s2159_s1 + $0x70] sm:$0xff]   ;;  %v1696_v3 = vld [vmem:[%s2159_s1 + $0x78] sm:$0xff]   ;;  %v1706_v11 = vld [vmem:[%s2159_s1 + $0x140] sm:$0xff]  }
  0x92   : > { %1535 = vmatprep.subr.bf16.mxu1 %v1677_v48  ;;  %v1693_v0 = vld [vmem:[%s2159_s1 + $0xf0] sm:$0xff]   ;;  %v1697_v4 = vld [vmem:[%s2159_s1 + $0xf8] sm:$0xff]   ;;  %v1707_v12 = vld [vmem:[%s2159_s1 + $0x100] sm:$0xff]  }
  0x93   : > { %v1694_v1 = vld [vmem:[%s2159_s1 + $0x30] sm:$0xff]   ;;  %v1698_v5 = vld [vmem:[%s2159_s1 + $0x38] sm:$0xff]   ;;  %v1708_v13 = vld [vmem:[%s2159_s1 + $0x148] sm:$0xff]  }
  0x94   : > { %1514 = vmatpush3.bf16.msra.mxu0 %v1678_v49  ;;  %v1695_v2 = vld [vmem:[%s2159_s1 + $0xb0] sm:$0xff]   ;;  %v1699_v6 = vld [vmem:[%s2159_s1 + $0xb8] sm:$0xff]   ;;  %v1709_v14 = vld [vmem:[%s2159_s1 + $0x108] sm:$0xff]  }
  0x95   : > { %1536 = vmatpush3.bf16.msra.mxu1 %v1679_v50  ;;  %1515 = vmatprep.subr.bf16.mxu0 %v1680_v51  ;;  %v1700_v7 = vld [vmem:[%s2157_s6] ss:$24 sps:$4 sm:$0xff]   ;;  %v1702_v8 = vld [vmem:[%s2157_s6 + $0x4] ss:$24 sps:$4 sm:$0xff]   ;;  %v1724_v22 = vld [vmem:[%s2157_s6 + $0x14] ss:$24 sps:$4 sm:$0xff]  }
  0x96   : > { %1537 = vmatprep.subr.bf16.mxu1 %v1681_v52  ;;  %v1703_v9 = vld [vmem:[%s2157_s6 + $0x8] ss:$24 sps:$4 sm:$0xff]   ;;  %v1705_v10 = vld [vmem:[%s2157_s6 + $0xc] ss:$24 sps:$4 sm:$0xff]   ;;  %1146 = vmatprep.mubr.bf16.mxu0 %v1702_v8 }
  0x97   : > { %1187 = vmatprep.mubr.bf16.mxu1 %v1705_v10  ;;  %v1710_v15 = vld [vmem:[%s2159_s1 + $0x150] sm:$0xff]   ;;  %v1712_v17 = vld [vmem:[%s2159_s1 + $0x158] sm:$0xff]   ;;  %v1714_v19 = vld [vmem:[%s2159_s1 + $0x160] sm:$0xff]  }
  0x98   : > { %1516 = vmatpush3.bf16.msra.mxu0 %v1682_v53  ;;  %v1711_v16 = vld [vmem:[%s2159_s1 + $0x110] sm:$0xff]   ;;  %v1713_v18 = vld [vmem:[%s2159_s1 + $0x118] sm:$0xff]   ;;  %v1715_v20 = vld [vmem:[%s2159_s1 + $0x120] sm:$0xff]  }
  0x99   : > { %1538 = vmatpush3.bf16.msra.mxu1 %v1683_v54  ;;  %1517 = vmatprep.subr.bf16.mxu0 %v1684_v55  ;;  %v1716_v21 = vld [vmem:[%s2159_s1 + $0x168] sm:$0xff]   ;;  %v1718_v24 = vld [vmem:[%s2159_s1 + $0x170] sm:$0xff]   ;;  %v1720_v26 = vld [vmem:[%s2159_s1 + $0x178] sm:$0xff]  }
  0x9a   : > { %1539 = vmatprep.subr.bf16.mxu1 %v1685_v56  ;;  %v1717_v23 = vld [vmem:[%s2159_s1 + $0x128] sm:$0xff]   ;;  %v1719_v25 = vld [vmem:[%s2159_s1 + $0x130] sm:$0xff]   ;;  %v1721_v27 = vld [vmem:[%s2159_s1 + $0x138] sm:$0xff]  }
  0x9b   : > { %v1722_v28 = vld [vmem:[%s2157_s6 + $0x10] ss:$24 sps:$4 sm:$0xff]  }
  0x9c   : > { %1518 = vmatpush3.bf16.msra.mxu0 %v1686_v57  ;;  %v692_v47 = vld [vmem:[#allocation2] sm:$0xff]  ;;  %v693_v51 = vld [vmem:[#allocation2 + $0x8] sm:$0xff] }
  0x9d   : > { %1540 = vmatpush3.bf16.msra.mxu1 %v1687_v58  ;;  %1519 = vmatprep.subr.bf16.mxu0 %v1688_v59  ;;  %v1493_v57 = vld [vmem:[%s683_s4] ss:$0 sm:$0xff] (!%p1492_p5) }
  0x9e   : > { %1541 = vmatprep.subr.bf16.mxu1 %v1689_v60 }
  0xa0   : > { %1520 = vmatpush3.bf16.msra.mxu0 %v1690_v61 }
  0xa1   : > { %1542 = vmatpush3.bf16.msra.mxu1 %v1691_v62  ;;  %1521 = vmatprep.subr.bf16.mxu0 %v1692_v63 }
  0xa2   : > { %1543 = vmatprep.subr.bf16.mxu1 %v1693_v0 }
  0xa4   : > { %1522 = vmatpush3.bf16.msra.mxu0 %v1694_v1 }
  0xa5   : > { %1544 = vmatpush3.bf16.msra.mxu1 %v1695_v2  ;;  %1523 = vmatprep.subr.bf16.mxu0 %v1696_v3 }
  0xa6   : > { %1545 = vmatprep.subr.bf16.mxu1 %v1697_v4 }
  0xa8   : > { %1524 = vmatpush3.bf16.msra.mxu0 %v1698_v5 }
  0xa9   : > { %1546 = vmatpush3.bf16.msra.mxu1 %v1699_v6  ;;  %1553 = vmatprep.subr.bf16.mxu0 %v1706_v11 }
  0xab   : > { %1147 = vmatmul.mubr.bf16.vlgmr.msra.gmra.mrb[0].mxu0 %v1700_v7 }
  0xac   : > { %1188 = vmatmul.mubr.bf16.vlgmr.msra.gmra.mrb[0].mxu1 %v1703_v9  ;;  %1554 = vmatpush3.bf16.msra.mxu0 %v1707_v12 }
  0xad   : > { %1555 = vmatprep.subr.bf16.mxu0 %v1708_v13  ;;  %1228 = vmatprep.mubr.bf16.mxu0 %v1724_v22 }
  0xb0   : > { %1556 = vmatpush3.bf16.msra.mxu0 %v1709_v14 }
  0xb1   : > { %1557 = vmatprep.subr.bf16.mxu0 %v1710_v15 }
  0xb4   : > { %1558 = vmatpush3.bf16.msra.mxu0 %v1711_v16 }
  0xb5   : > { %1559 = vmatprep.subr.bf16.mxu0 %v1712_v17 }
  0xb8   : > { %1560 = vmatpush3.bf16.msra.mxu0 %v1713_v18 }
  0xb9   : > { %1561 = vmatprep.subr.bf16.mxu0 %v1714_v19 }
  0xbc   : > { %1562 = vmatpush3.bf16.msra.mxu0 %v1715_v20 }
  0xbd   : > { %1563 = vmatprep.subr.bf16.mxu0 %v1716_v21 }
  0xc0   : > { %1564 = vmatpush3.bf16.msra.mxu0 %v1717_v23 }
  0xc1   : > { %1565 = vmatprep.subr.bf16.mxu0 %v1718_v24 }
  0xc4   : > { %1566 = vmatpush3.bf16.msra.mxu0 %v1719_v25 }
  0xc5   : > { %1567 = vmatprep.subr.bf16.mxu0 %v1720_v26 }
  0xc8   : > { %1568 = vmatpush3.bf16.msra.mxu0 %v1721_v27 }
  0xcb   : > { %1229 = vmatmul.mubr.bf16.vlgmr.msra.gmra.mrb[4].mxu0 %v1722_v28 }
 0x17e   : > { %v1525_v29 = vpop.f32.mrb[0].mxu0 }
 0x17f   : > { %v1547_v30 = vpop.f32.mrb[0].mxu1  ;;  %v1526_v31 = vpop.f32.mrb[1].mxu0 }
 0x180   : > { %v1527_v32 = vadd.f32 %v1526_v31, %v1525_v29  ;;  %v1548_v33 = vpop.f32.mrb[1].mxu1  ;;  %v1528_v34 = vpop.f32.mrb[2].mxu0 }
 0x181   : > { %v1549_v35 = vadd.f32 %v1548_v33, %v1547_v30  ;;  %v1550_v36 = vpop.f32.mrb[2].mxu1  ;;  %v1529_v37 = vpop.f32.mrb[3].mxu0 }
 0x182   : > { %v1530_v38 = vadd.f32 %v1529_v37, %v1528_v34  ;;  %v1551_v39 = vpop.f32.mrb[3].mxu1 }
 0x183   : > { %v1190_v40 = vadd.f32 %v1549_v35, %v1527_v32  ;;  %v1552_v41 = vadd.f32 %v1551_v39, %v1550_v36 }
 0x185   : > { %v1193_v42 = vadd.f32 %v1552_v41, %v1530_v38 }
 0x19e   : > { %v1569_v43 = vpop.f32.mrb[4].mxu0 }
 0x19f   : > { %v1570_v44 = vpop.f32.mrb[5].mxu0 }
 0x1a0   : > { %v1571_v45 = vadd.f32 %v1570_v44, %v1569_v43  ;;  %v1572_v46 = vpop.f32.mrb[6].mxu0 }
 0x1a1   : > { %v1573_v48 = vpop.f32.mrb[7].mxu0 }
 0x1a2   : > { %v1231_v49 = vadd.f32 %v1571_v45, %v1190_v40  ;;  %v1574_v50 = vadd.f32 %v1573_v48, %v1572_v46  ;;  %1244 = sbr.rel (%p1492_p5) target bundleno = 439 (0x1b7), region = 104 }
 0x1a4   : > { %v1237_v52 = vadd.f32 %v1231_v49, %v692_v47  ;;  %v1234_v53 = vadd.f32 %v1574_v50, %v1193_v42 }
 0x1a6   : > { %1239 = vst [vmem:[#allocation2] sm:$0xff] %v1237_v52  ;;  %v1238_v54 = vadd.f32 %v1234_v53, %v693_v51 }
 0x1a8   : > { %1240 = vst [vmem:[#allocation2 + $0x8] sm:$0xff] %v1238_v54 }
 0x1ad   : > { %v1245_v55 = vld [vmem:[#allocation2] sm:$0xff] }
 0x1ae   : > { %v1254_v58 = vadd.f32 %v1493_v57, %v1245_v55 }
 0x1af   : > { %v1246_v56 = vld [vmem:[#allocation2 + $0x8] sm:$0xff] }
 0x1b0   : > { %v1255_v59 = vadd.f32 %v1493_v57, %v1246_v56  ;;  %v1256_v60 = vmax.f32 %v1254_v58, 0.0 }
 0x1b2   : > { %v1257_v61 = vmax.f32 %v1255_v59, 0.0 }
 0x1b4   : > { %v1507_v62 = vpack.c.bf16 %v1257_v61, %v1256_v60 }
 0x1b6   : > { %1508 = vst [vmem:[%s2161_s25] sm:$0xff] %v1507_v62  }
 0x1b7 PF: > { %1274 = sbr.rel (!%p1928_p12) target bundleno = 447 (0x1bf), region = 108  ;;  %s1497_s14 = sshll.u32 (%p1928_p12), %s1799_s19, 2 }
 0x1b8   : > { %s1279_s5 = scalar_lea.vmem (%p1928_p12), %s2269_s3, %s1497_s14 }
 0x1bd   : > { %v1295_v63 = vld [vmem:[%s2161_s25] sm:$0xf] (%p1928_p12)  ;;  %v1297_v0 = vld [vmem:[%s2161_s25 + $0x4] sm:$0xf] (%p1928_p12) }
 0x1be   : > { %1296 = vst [vmem:[%s1279_s5] sm:$0xf] %v1295_v63  ;;  %1298 = vst [vmem:[%s1279_s5 + $0x8] sm:$0xf] %v1297_v0 }
 0x1bf PF: > { %s13_s22 = sadd.s32 1, %s1811_s22   ;;  %s2279_s25 = sld [smem:[#allocation6_spill]] }
 0x1c0   : > { %p10_p6 = scmp.ge.s32.totalorder %s13_s22, 8   ;;  %s2280_s12 = smov %s1775_s13 }
 0x1c1   : > { %s2281_s13 = smov %s1926_s9  ;;  %s2282_s14 = smov %s1783_s15 }
 0x1c2   : > { %s2283_s15 = smov %s1923_s8  ;;  %s2284_s16 = smov %s1791_s17 }
 0x1c3   : > { %s2285_s17 = smov %s1909_s30  ;;  %s2286_s18 = smov %s1803_s20 }
 0x1c4   : > { %s2287_s19 = smov %s1807_s21  ;;  %s2288_s20 = smov %s2291_s24 }
 0x1c5   : > { %s2289_s21 = smov %s2279_s25  ;;  %12 = sbr.rel (!%p10_p6) target bundleno = 9 (0x9), region = 191 }

// kernel: resnet18_forward.37
= control target key start
LH: loop header
LB: loop body
LE: loop exit
PB: predicated region body
PF: predicated region fallthrough
CT: control target
= control target key end

     0   :  { %s2615_s0 = inlined_call_operand.vmem [shape: bf16[16,2304], index: 0, kind: input, shape index: {}]   ;;  %s2616_s1 = inlined_call_operand.vmem [shape: bf16[2304,512], index: 1, kind: input, shape index: {}]   ;;  %s2617_s2 = inlined_call_operand.vmem [shape: f32[1,512], index: 2, kind: input, shape index: {}]   ;;  %s2618_s3 = inlined_call_operand.vmem [shape: bf16[16,512], index: 3, kind: output, shape index: {}]  }
   0x1   :  { %2620 = sst [smem:[#allocation7_spill]] %s2615_s0 }
   0x2   :  { %2621 = sst [smem:[#allocation8_spill]] %s2616_s1 }
   0x3   :  { %s2135_s12 = smov 0   ;;  %s2137_s13 = smov 0  }
   0x4   :  { %s2139_s14 = smov 0   ;;  %s2141_s15 = smov 0  }
   0x5   :  { %s2143_s16 = smov 0   ;;  %s2145_s17 = smov 0  }
   0x6   :  { %s2147_s18 = smov 0   ;;  %s2149_s19 = smov 0  }
   0x7   :  { %s2151_s20 = smov 0   ;;  %s2153_s21 = smov 0  }
   0x8   :  { %s2155_s22 = smov 0  }
   0x9 LB: > { %s1645_s23 = sadd.s32 4294967295, %s2112_s22   ;;  %s25_s24 = sadd.s32 1, %s2104_s20  ;;  %s2112_s22 = sphi %s2155_s22, %s13_s22   ;;  %s2108_s21 = sphi %s2153_s21, %s2638_s21   ;;  %s2104_s20 = sphi %s2151_s20, %s2637_s20   ;;  %s2100_s19 = sphi %s2149_s19, %s2636_s19   ;;  %s2096_s18 = sphi %s2147_s18, %s2635_s18   ;;  %s2092_s17 = sphi %s2145_s17, %s2634_s17   ;;  %s2088_s16 = sphi %s2143_s16, %s2633_s16   ;;  %s2084_s15 = sphi %s2141_s15, %s2632_s15   ;;  %s2080_s14 = sphi %s2139_s14, %s2631_s14   ;;  %s2076_s13 = sphi %s2137_s13, %s2630_s13   ;;  %s2072_s12 = sphi %s2135_s12, %s2629_s12  }
   0xa   : > { %p26_p0 = scmp.ge.s32.totalorder %s25_s24, 3  ;;  %s28_s25 = sadd.s32 1, %s2108_s21 }
   0xb   : > { %s41_s26 = sadd.s32 1, %s2092_s17  ;;  %p48_p1 = scmp.ne.s32.totalorder %s2092_s17, %s2088_s16 }
   0xc   : > { %s2640_s24 = smov (%p26_p0, %s25_s24), 0  ;;  %s2642_s25 = smov (!%p26_p0, %s28_s25), %s2108_s21 }
   0xd   : > { %s37_s27 = ssub.s32 %s2104_s20, %s2640_s24  ;;  %p49_p2 = scmp.eq.s32.totalorder %s2112_s22, 0 }
   0xe   : > { %p30_p3 = scmp.ge.s32.totalorder %s2642_s25, 2  ;;  %p39_p4 = scmp.eq.s32.totalorder %s37_s27, 0 }
   0xf   : > { %p2202_p5 = por %p49_p2, %p48_p1  ;;  %s69_s29 = sadd.s32 1, %s2084_s15 }
  0x10   : > { %s2644_s25 = smov (%p30_p3, %s2642_s25), 0  ;;  %p76_p6 = scmp.ne.s32.totalorder %s2084_s15, %s2080_s14 }
  0x11   : > { %2623 = sst [smem:[#allocation6_spill]] %s2644_s25  ;;  %s65_s4 = ssub.s32 %s2108_s21, %s2644_s25 }
  0x12   : > { %s2210_s30 = scalar_select %p39_p4, %s2092_s17, %s41_s26  }
  0x13   : > { %s66_s5 = sor.u32 %s65_s4, %s37_s27  ;;  %p121_p7 = scmp.eq.s32.totalorder %s65_s4, 0 }
  0x14   : > { %p67_p8 = scmp.eq.s32.totalorder %s66_s5, 0  ;;  %p2216_p9 = por %p76_p6, %p49_p2 }
  0x15   : > { %s123_s7 = sadd.s32 1, %s2076_s13  ;;  %p133_p10 = scmp.ne.s32.totalorder %s2076_s13, %s2072_s12 }
  0x16   : > { %s2224_s8 = scalar_select %p67_p8, %s2084_s15, %s69_s29  }
  0x17   : > { %s2227_s9 = scalar_select %p121_p7, %s2076_s13, %s123_s7  }
  0x18   : > { %p134_p11 = scmp.eq.s32.totalorder %s1645_s23, 5  ;;  %p1648_p13 = scmp.ge.s32.totalorder %s2112_s22, 6 }
  0x1a   : > { %p2229_p12 = por %p134_p11, %p133_p10  ;;  %156 = sbr.rel (%p1648_p13) target bundleno = 103 (0x67), region = 16 }
  0x21   : > { %159 = sbr.rel (!%p2202_p5) target bundleno = 45 (0x2d), region = 20  ;;  %s161_s11 = sand.u32 (%p2202_p5), 1, %s2092_s17  }
  0x22   : > { %s1767_s26 = smul.u32 (%p2202_p5), 24, %s2104_s20  ;;  %s2626_s0 = sld [smem:[#allocation7_spill]] (%p2202_p5) }
  0x23   : > { %s1780_s27 = smul.u32 (%p2202_p5), 48, %s161_s11 }
  0x25   : > { %s163_s23 = scalar_lea.vmem (%p2202_p5), [#allocation3], %s1780_s27 }
  0x28   : > { %s169_s5 = scalar_lea.vmem %s2626_s0, %s1767_s26 }
  0x29   : > { %v182_v0 = vld [vmem:[%s169_s5] sm:$0xff]  ;;  %v184_v1 = vld [vmem:[%s169_s5 + $0x8] sm:$0xff]  ;;  %v186_v2 = vld [vmem:[%s169_s5 + $0x10] sm:$0xff] }
  0x2a   : > { %183 = vst [vmem:[%s163_s23] sm:$0xff] %v182_v0  ;;  %185 = vst [vmem:[%s163_s23 + $0x8] sm:$0xff] %v184_v1  ;;  %v188_v3 = vld [vmem:[%s169_s5 + $0x48] sm:$0xff]  ;;  %v190_v4 = vld [vmem:[%s169_s5 + $0x50] sm:$0xff] }
  0x2b   : > { %187 = vst [vmem:[%s163_s23 + $0x10] sm:$0xff] %v186_v2  ;;  %v192_v5 = vld [vmem:[%s169_s5 + $0x58] sm:$0xff]  ;;  %189 = vst [vmem:[%s163_s23 + $0x18] sm:$0xff] %v188_v3 }
  0x2c   : > { %191 = vst [vmem:[%s163_s23 + $0x20] sm:$0xff] %v190_v4  ;;  %193 = vst [vmem:[%s163_s23 + $0x28] sm:$0xff] %v192_v5 }
  0x2d PF: > { %199 = sbr.rel (!%p2216_p9) target bundleno = 103 (0x67), region = 43  ;;  %s201_s28 = sand.u32 (%p2216_p9), 1, %s2084_s15  }
  0x2e   : > { %s1781_s7 = smul.u32 (%p2216_p9), 768, %s201_s28  ;;  %s1650_s11 = sshll.u32 (%p2216_p9), %s2108_s21, 1 }
  0x2f   : > { %s1768_s26 = smul.u32 (%p2216_p9), 384, %s2104_s20  ;;  %s2627_s1 = sld [smem:[#allocation8_spill]] (%p2216_p9) }
  0x30   : > { %s2254_s6 = scalar_lea.vmem (%p2216_p9), [#allocation4], %s1781_s7 }
  0x31   : > { %s207_s27 = sadd.s32 (%p2216_p9), %s1768_s26, %s1650_s11 }
  0x32   : > { %s1652_s29 = sshll.u32 (%p2216_p9), %s207_s27, 2 }
  0x35   : > { %s2249_s5 = scalar_lea.vmem %s2627_s1, %s1652_s29 }
  0x36   : > { %v427_v6 = vld [vmem:[%s2249_s5] sm:$0xff]  ;;  %v429_v7 = vld [vmem:[%s2249_s5 + $0x10] sm:$0xff] }
  0x37   : > { %v431_v8 = vld [vmem:[%s2249_s5 + $0x20] sm:$0xff]  ;;  %428 = vst [vmem:[%s2254_s6] sm:$0xff] %v427_v6  ;;  %430 = vst [vmem:[%s2254_s6 + $0x8] sm:$0xff] %v429_v7  ;;  %v433_v9 = vld [vmem:[%s2249_s5 + $0x30] sm:$0xff] }
  0x38   : > { %432 = vst [vmem:[%s2254_s6 + $0x10] sm:$0xff] %v431_v8  ;;  %v435_v10 = vld [vmem:[%s2249_s5 + $0x40] sm:$0xff]  ;;  %v437_v11 = vld [vmem:[%s2249_s5 + $0x50] sm:$0xff]  ;;  %434 = vst [vmem:[%s2254_s6 + $0x18] sm:$0xff] %v433_v9 }
  0x39   : > { %436 = vst [vmem:[%s2254_s6 + $0x20] sm:$0xff] %v435_v10  ;;  %438 = vst [vmem:[%s2254_s6 + $0x28] sm:$0xff] %v437_v11  ;;  %v439_v12 = vld [vmem:[%s2249_s5 + $0x60] sm:$0xff]  ;;  %v441_v13 = vld [vmem:[%s2249_s5 + $0x70] sm:$0xff] }
  0x3a   : > { %v443_v14 = vld [vmem:[%s2249_s5 + $0x80] sm:$0xff]  ;;  %440 = vst [vmem:[%s2254_s6 + $0x30] sm:$0xff] %v439_v12  ;;  %442 = vst [vmem:[%s2254_s6 + $0x38] sm:$0xff] %v441_v13  ;;  %v445_v15 = vld [vmem:[%s2249_s5 + $0x90] sm:$0xff] }
  0x3b   : > { %444 = vst [vmem:[%s2254_s6 + $0x40] sm:$0xff] %v443_v14  ;;  %v447_v16 = vld [vmem:[%s2249_s5 + $0xa0] sm:$0xff]  ;;  %v449_v17 = vld [vmem:[%s2249_s5 + $0xb0] sm:$0xff]  ;;  %446 = vst [vmem:[%s2254_s6 + $0x48] sm:$0xff] %v445_v15 }
  0x3c   : > { %448 = vst [vmem:[%s2254_s6 + $0x50] sm:$0xff] %v447_v16  ;;  %450 = vst [vmem:[%s2254_s6 + $0x58] sm:$0xff] %v449_v17  ;;  %v451_v18 = vld [vmem:[%s2249_s5 + $0xc0] sm:$0xff]  ;;  %v453_v19 = vld [vmem:[%s2249_s5 + $0xd0] sm:$0xff] }
  0x3d   : > { %v455_v20 = vld [vmem:[%s2249_s5 + $0xe0] sm:$0xff]  ;;  %452 = vst [vmem:[%s2254_s6 + $0x60] sm:$0xff] %v451_v18  ;;  %454 = vst [vmem:[%s2254_s6 + $0x68] sm:$0xff] %v453_v19  ;;  %v457_v21 = vld [vmem:[%s2249_s5 + $0xf0] sm:$0xff] }
  0x3e   : > { %456 = vst [vmem:[%s2254_s6 + $0x70] sm:$0xff] %v455_v20  ;;  %v459_v22 = vld [vmem:[%s2249_s5 + $0x100] sm:$0xff]  ;;  %v461_v23 = vld [vmem:[%s2249_s5 + $0x110] sm:$0xff]  ;;  %458 = vst [vmem:[%s2254_s6 + $0x78] sm:$0xff] %v457_v21 }
  0x3f   : > { %460 = vst [vmem:[%s2254_s6 + $0x80] sm:$0xff] %v459_v22  ;;  %462 = vst [vmem:[%s2254_s6 + $0x88] sm:$0xff] %v461_v23  ;;  %v463_v24 = vld [vmem:[%s2249_s5 + $0x120] sm:$0xff]  ;;  %v465_v25 = vld [vmem:[%s2249_s5 + $0x130] sm:$0xff] }
  0x40   : > { %v467_v26 = vld [vmem:[%s2249_s5 + $0x140] sm:$0xff]  ;;  %464 = vst [vmem:[%s2254_s6 + $0x90] sm:$0xff] %v463_v24  ;;  %466 = vst [vmem:[%s2254_s6 + $0x98] sm:$0xff] %v465_v25  ;;  %v469_v27 = vld [vmem:[%s2249_s5 + $0x150] sm:$0xff] }
  0x41   : > { %468 = vst [vmem:[%s2254_s6 + $0xa0] sm:$0xff] %v467_v26  ;;  %v471_v28 = vld [vmem:[%s2249_s5 + $0x160] sm:$0xff]  ;;  %v473_v29 = vld [vmem:[%s2249_s5 + $0x170] sm:$0xff]  ;;  %470 = vst [vmem:[%s2254_s6 + $0xa8] sm:$0xff] %v469_v27 }
  0x42   : > { %472 = vst [vmem:[%s2254_s6 + $0xb0] sm:$0xff] %v471_v28  ;;  %474 = vst [vmem:[%s2254_s6 + $0xb8] sm:$0xff] %v473_v29  ;;  %v475_v30 = vld [vmem:[%s2249_s5 + $0x180] sm:$0xff]  ;;  %v477_v31 = vld [vmem:[%s2249_s5 + $0x190] sm:$0xff] }
  0x43   : > { %v479_v32 = vld [vmem:[%s2249_s5 + $0x1a0] sm:$0xff]  ;;  %476 = vst [vmem:[%s2254_s6 + $0xc0] sm:$0xff] %v475_v30  ;;  %478 = vst [vmem:[%s2254_s6 + $0xc8] sm:$0xff] %v477_v31  ;;  %v481_v33 = vld [vmem:[%s2249_s5 + $0x1b0] sm:$0xff] }
  0x44   : > { %480 = vst [vmem:[%s2254_s6 + $0xd0] sm:$0xff] %v479_v32  ;;  %v483_v34 = vld [vmem:[%s2249_s5 + $0x1c0] sm:$0xff]  ;;  %v485_v35 = vld [vmem:[%s2249_s5 + $0x1d0] sm:$0xff]  ;;  %482 = vst [vmem:[%s2254_s6 + $0xd8] sm:$0xff] %v481_v33 }
  0x45   : > { %484 = vst [vmem:[%s2254_s6 + $0xe0] sm:$0xff] %v483_v34  ;;  %486 = vst [vmem:[%s2254_s6 + $0xe8] sm:$0xff] %v485_v35  ;;  %v487_v36 = vld [vmem:[%s2249_s5 + $0x1e0] sm:$0xff]  ;;  %v489_v37 = vld [vmem:[%s2249_s5 + $0x1f0] sm:$0xff] }
  0x46   : > { %v491_v38 = vld [vmem:[%s2249_s5 + $0x200] sm:$0xff]  ;;  %488 = vst [vmem:[%s2254_s6 + $0xf0] sm:$0xff] %v487_v36  ;;  %490 = vst [vmem:[%s2254_s6 + $0xf8] sm:$0xff] %v489_v37  ;;  %v493_v39 = vld [vmem:[%s2249_s5 + $0x210] sm:$0xff] }
  0x47   : > { %492 = vst [vmem:[%s2254_s6 + $0x100] sm:$0xff] %v491_v38  ;;  %v495_v40 = vld [vmem:[%s2249_s5 + $0x220] sm:$0xff]  ;;  %v497_v41 = vld [vmem:[%s2249_s5 + $0x230] sm:$0xff]  ;;  %494 = vst [vmem:[%s2254_s6 + $0x108] sm:$0xff] %v493_v39 }
  0x48   : > { %496 = vst [vmem:[%s2254_s6 + $0x110] sm:$0xff] %v495_v40  ;;  %498 = vst [vmem:[%s2254_s6 + $0x118] sm:$0xff] %v497_v41  ;;  %v499_v42 = vld [vmem:[%s2249_s5 + $0x240] sm:$0xff]  ;;  %v501_v43 = vld [vmem:[%s2249_s5 + $0x250] sm:$0xff] }
  0x49   : > { %v503_v44 = vld [vmem:[%s2249_s5 + $0x260] sm:$0xff]  ;;  %500 = vst [vmem:[%s2254_s6 + $0x120] sm:$0xff] %v499_v42  ;;  %502 = vst [vmem:[%s2254_s6 + $0x128] sm:$0xff] %v501_v43  ;;  %v505_v45 = vld [vmem:[%s2249_s5 + $0x270] sm:$0xff] }
  0x4a   : > { %504 = vst [vmem:[%s2254_s6 + $0x130] sm:$0xff] %v503_v44  ;;  %v507_v46 = vld [vmem:[%s2249_s5 + $0x280] sm:$0xff]  ;;  %v509_v47 = vld [vmem:[%s2249_s5 + $0x290] sm:$0xff]  ;;  %506 = vst [vmem:[%s2254_s6 + $0x138] sm:$0xff] %v505_v45 }
  0x4b   : > { %508 = vst [vmem:[%s2254_s6 + $0x140] sm:$0xff] %v507_v46  ;;  %510 = vst [vmem:[%s2254_s6 + $0x148] sm:$0xff] %v509_v47  ;;  %v511_v48 = vld [vmem:[%s2249_s5 + $0x2a0] sm:$0xff]  ;;  %v513_v49 = vld [vmem:[%s2249_s5 + $0x2b0] sm:$0xff] }
  0x4c   : > { %v515_v50 = vld [vmem:[%s2249_s5 + $0x2c0] sm:$0xff]  ;;  %512 = vst [vmem:[%s2254_s6 + $0x150] sm:$0xff] %v511_v48  ;;  %514 = vst [vmem:[%s2254_s6 + $0x158] sm:$0xff] %v513_v49  ;;  %v517_v51 = vld [vmem:[%s2249_s5 + $0x2d0] sm:$0xff] }
  0x4d   : > { %516 = vst [vmem:[%s2254_s6 + $0x160] sm:$0xff] %v515_v50  ;;  %v519_v52 = vld [vmem:[%s2249_s5 + $0x2e0] sm:$0xff]  ;;  %v521_v53 = vld [vmem:[%s2249_s5 + $0x2f0] sm:$0xff]  ;;  %518 = vst [vmem:[%s2254_s6 + $0x168] sm:$0xff] %v517_v51 }
  0x4e   : > { %520 = vst [vmem:[%s2254_s6 + $0x170] sm:$0xff] %v519_v52  ;;  %522 = vst [vmem:[%s2254_s6 + $0x178] sm:$0xff] %v521_v53  ;;  %v523_v54 = vld [vmem:[%s2249_s5 + $0x300] sm:$0xff]  ;;  %v525_v55 = vld [vmem:[%s2249_s5 + $0x310] sm:$0xff] }
  0x4f   : > { %v527_v56 = vld [vmem:[%s2249_s5 + $0x320] sm:$0xff]  ;;  %524 = vst [vmem:[%s2254_s6 + $0x180] sm:$0xff] %v523_v54  ;;  %526 = vst [vmem:[%s2254_s6 + $0x188] sm:$0xff] %v525_v55  ;;  %v529_v57 = vld [vmem:[%s2249_s5 + $0x330] sm:$0xff] }
  0x50   : > { %528 = vst [vmem:[%s2254_s6 + $0x190] sm:$0xff] %v527_v56  ;;  %v531_v58 = vld [vmem:[%s2249_s5 + $0x340] sm:$0xff]  ;;  %v533_v59 = vld [vmem:[%s2249_s5 + $0x350] sm:$0xff]  ;;  %530 = vst [vmem:[%s2254_s6 + $0x198] sm:$0xff] %v529_v57 }
  0x51   : > { %532 = vst [vmem:[%s2254_s6 + $0x1a0] sm:$0xff] %v531_v58  ;;  %534 = vst [vmem:[%s2254_s6 + $0x1a8] sm:$0xff] %v533_v59  ;;  %v535_v60 = vld [vmem:[%s2249_s5 + $0x360] sm:$0xff]  ;;  %v537_v61 = vld [vmem:[%s2249_s5 + $0x370] sm:$0xff] }
  0x52   : > { %v539_v62 = vld [vmem:[%s2249_s5 + $0x380] sm:$0xff]  ;;  %536 = vst [vmem:[%s2254_s6 + $0x1b0] sm:$0xff] %v535_v60  ;;  %538 = vst [vmem:[%s2254_s6 + $0x1b8] sm:$0xff] %v537_v61  ;;  %v541_v63 = vld [vmem:[%s2249_s5 + $0x390] sm:$0xff] }
  0x53   : > { %540 = vst [vmem:[%s2254_s6 + $0x1c0] sm:$0xff] %v539_v62  ;;  %v543_v0 = vld [vmem:[%s2249_s5 + $0x3a0] sm:$0xff]  ;;  %v545_v1 = vld [vmem:[%s2249_s5 + $0x3b0] sm:$0xff]  ;;  %542 = vst [vmem:[%s2254_s6 + $0x1c8] sm:$0xff] %v541_v63 }
  0x54   : > { %544 = vst [vmem:[%s2254_s6 + $0x1d0] sm:$0xff] %v543_v0  ;;  %546 = vst [vmem:[%s2254_s6 + $0x1d8] sm:$0xff] %v545_v1  ;;  %v547_v2 = vld [vmem:[%s2249_s5 + $0x3c0] sm:$0xff]  ;;  %v549_v3 = vld [vmem:[%s2249_s5 + $0x3d0] sm:$0xff] }
  0x55   : > { %v551_v4 = vld [vmem:[%s2249_s5 + $0x3e0] sm:$0xff]  ;;  %548 = vst [vmem:[%s2254_s6 + $0x1e0] sm:$0xff] %v547_v2  ;;  %550 = vst [vmem:[%s2254_s6 + $0x1e8] sm:$0xff] %v549_v3  ;;  %v553_v5 = vld [vmem:[%s2249_s5 + $0x3f0] sm:$0xff] }
  0x56   : > { %552 = vst [vmem:[%s2254_s6 + $0x1f0] sm:$0xff] %v551_v4  ;;  %v555_v6 = vld [vmem:[%s2249_s5 + $0x400] sm:$0xff]  ;;  %v557_v7 = vld [vmem:[%s2249_s5 + $0x410] sm:$0xff]  ;;  %554 = vst [vmem:[%s2254_s6 + $0x1f8] sm:$0xff] %v553_v5 }
  0x57   : > { %556 = vst [vmem:[%s2254_s6 + $0x200] sm:$0xff] %v555_v6  ;;  %558 = vst [vmem:[%s2254_s6 + $0x208] sm:$0xff] %v557_v7  ;;  %v559_v8 = vld [vmem:[%s2249_s5 + $0x420] sm:$0xff]  ;;  %v561_v9 = vld [vmem:[%s2249_s5 + $0x430] sm:$0xff] }
  0x58   : > { %v563_v10 = vld [vmem:[%s2249_s5 + $0x440] sm:$0xff]  ;;  %560 = vst [vmem:[%s2254_s6 + $0x210] sm:$0xff] %v559_v8  ;;  %562 = vst [vmem:[%s2254_s6 + $0x218] sm:$0xff] %v561_v9  ;;  %v565_v11 = vld [vmem:[%s2249_s5 + $0x450] sm:$0xff] }
  0x59   : > { %564 = vst [vmem:[%s2254_s6 + $0x220] sm:$0xff] %v563_v10  ;;  %v567_v12 = vld [vmem:[%s2249_s5 + $0x460] sm:$0xff]  ;;  %v569_v13 = vld [vmem:[%s2249_s5 + $0x470] sm:$0xff]  ;;  %566 = vst [vmem:[%s2254_s6 + $0x228] sm:$0xff] %v565_v11 }
  0x5a   : > { %568 = vst [vmem:[%s2254_s6 + $0x230] sm:$0xff] %v567_v12  ;;  %570 = vst [vmem:[%s2254_s6 + $0x238] sm:$0xff] %v569_v13  ;;  %v571_v14 = vld [vmem:[%s2249_s5 + $0x480] sm:$0xff]  ;;  %v573_v15 = vld [vmem:[%s2249_s5 + $0x490] sm:$0xff] }
  0x5b   : > { %v575_v16 = vld [vmem:[%s2249_s5 + $0x4a0] sm:$0xff]  ;;  %572 = vst [vmem:[%s2254_s6 + $0x240] sm:$0xff] %v571_v14  ;;  %574 = vst [vmem:[%s2254_s6 + $0x248] sm:$0xff] %v573_v15  ;;  %v577_v17 = vld [vmem:[%s2249_s5 + $0x4b0] sm:$0xff] }
  0x5c   : > { %576 = vst [vmem:[%s2254_s6 + $0x250] sm:$0xff] %v575_v16  ;;  %v579_v18 = vld [vmem:[%s2249_s5 + $0x4c0] sm:$0xff]  ;;  %v581_v19 = vld [vmem:[%s2249_s5 + $0x4d0] sm:$0xff]  ;;  %578 = vst [vmem:[%s2254_s6 + $0x258] sm:$0xff] %v577_v17 }
  0x5d   : > { %580 = vst [vmem:[%s2254_s6 + $0x260] sm:$0xff] %v579_v18  ;;  %582 = vst [vmem:[%s2254_s6 + $0x268] sm:$0xff] %v581_v19  ;;  %v583_v20 = vld [vmem:[%s2249_s5 + $0x4e0] sm:$0xff]  ;;  %v585_v21 = vld [vmem:[%s2249_s5 + $0x4f0] sm:$0xff] }
  0x5e   : > { %v587_v22 = vld [vmem:[%s2249_s5 + $0x500] sm:$0xff]  ;;  %584 = vst [vmem:[%s2254_s6 + $0x270] sm:$0xff] %v583_v20  ;;  %586 = vst [vmem:[%s2254_s6 + $0x278] sm:$0xff] %v585_v21  ;;  %v589_v23 = vld [vmem:[%s2249_s5 + $0x510] sm:$0xff] }
  0x5f   : > { %588 = vst [vmem:[%s2254_s6 + $0x280] sm:$0xff] %v587_v22  ;;  %v591_v24 = vld [vmem:[%s2249_s5 + $0x520] sm:$0xff]  ;;  %v593_v25 = vld [vmem:[%s2249_s5 + $0x530] sm:$0xff]  ;;  %590 = vst [vmem:[%s2254_s6 + $0x288] sm:$0xff] %v589_v23 }
  0x60   : > { %592 = vst [vmem:[%s2254_s6 + $0x290] sm:$0xff] %v591_v24  ;;  %594 = vst [vmem:[%s2254_s6 + $0x298] sm:$0xff] %v593_v25  ;;  %v595_v26 = vld [vmem:[%s2249_s5 + $0x540] sm:$0xff]  ;;  %v597_v27 = vld [vmem:[%s2249_s5 + $0x550] sm:$0xff] }
  0x61   : > { %v599_v28 = vld [vmem:[%s2249_s5 + $0x560] sm:$0xff]  ;;  %596 = vst [vmem:[%s2254_s6 + $0x2a0] sm:$0xff] %v595_v26  ;;  %598 = vst [vmem:[%s2254_s6 + $0x2a8] sm:$0xff] %v597_v27  ;;  %v601_v29 = vld [vmem:[%s2249_s5 + $0x570] sm:$0xff] }
  0x62   : > { %600 = vst [vmem:[%s2254_s6 + $0x2b0] sm:$0xff] %v599_v28  ;;  %v603_v30 = vld [vmem:[%s2249_s5 + $0x580] sm:$0xff]  ;;  %v605_v31 = vld [vmem:[%s2249_s5 + $0x590] sm:$0xff]  ;;  %602 = vst [vmem:[%s2254_s6 + $0x2b8] sm:$0xff] %v601_v29 }
  0x63   : > { %604 = vst [vmem:[%s2254_s6 + $0x2c0] sm:$0xff] %v603_v30  ;;  %606 = vst [vmem:[%s2254_s6 + $0x2c8] sm:$0xff] %v605_v31  ;;  %v607_v32 = vld [vmem:[%s2249_s5 + $0x5a0] sm:$0xff]  ;;  %v609_v33 = vld [vmem:[%s2249_s5 + $0x5b0] sm:$0xff] }
  0x64   : > { %v611_v34 = vld [vmem:[%s2249_s5 + $0x5c0] sm:$0xff]  ;;  %608 = vst [vmem:[%s2254_s6 + $0x2d0] sm:$0xff] %v607_v32  ;;  %610 = vst [vmem:[%s2254_s6 + $0x2d8] sm:$0xff] %v609_v33  ;;  %v613_v35 = vld [vmem:[%s2249_s5 + $0x5d0] sm:$0xff] }
  0x65   : > { %612 = vst [vmem:[%s2254_s6 + $0x2e0] sm:$0xff] %v611_v34  ;;  %v615_v36 = vld [vmem:[%s2249_s5 + $0x5e0] sm:$0xff]  ;;  %v617_v37 = vld [vmem:[%s2249_s5 + $0x5f0] sm:$0xff]  ;;  %614 = vst [vmem:[%s2254_s6 + $0x2e8] sm:$0xff] %v613_v35 }
  0x66   : > { %616 = vst [vmem:[%s2254_s6 + $0x2f0] sm:$0xff] %v615_v36  ;;  %618 = vst [vmem:[%s2254_s6 + $0x2f8] sm:$0xff] %v617_v37 }
  0x67 PF: > { %p1653_p0 = scmp.ge.s32.totalorder %s2112_s22, 1  ;;  %p631_p1 = scmp.lt.s32.totalorder %s2112_s22, 7 }
  0x69   : > { %p632_p2 = pnand %p1653_p0, %p631_p1 }
  0x6a   : > { %s638_s0 = sand.u32 (!%p632_p2), 1, %s2088_s16   ;;  %s645_s23 = sand.u32 (!%p632_p2), 1, %s2080_s14  }
  0x6b   : > { %635 = sbr.rel (%p632_p2) target bundleno = 492 (0x1ec), region = 85  ;;  %s672_s7 = sand.u32 (!%p632_p2), 1, %s2072_s12  }
  0x6c   : > { %s1782_s28 = smul.u32 (!%p632_p2), 48, %s638_s0  ;;  %s1654_s26 = sshll.u32 (!%p632_p2), %s672_s7, 4 }
  0x6d   : > { %s1783_s11 = smul.u32 (!%p632_p2), 768, %s645_s23  ;;  %s1655_s27 = sshll.u32 (!%p632_p2), %s2100_s19, 1 }
  0x6e   : > { %p680_p3 = scmp.lt.s32.totalorder (!%p632_p2), %s1655_s27, 3  ;;  %s2457_s6 = scalar_lea.vmem (!%p632_p2), [#allocation3], %s1782_s28 }
  0x6f   : > { %s2459_s1 = scalar_lea.vmem (!%p632_p2), [#allocation4], %s1783_s11  ;;  %s2461_s25 = scalar_lea.vmem (!%p632_p2), [#allocation5], %s1654_s26 }
  0x70   : > { %p1656_p4 = scmp.ne.s32.totalorder (!%p632_p2), %s2096_s18, 0 }
  0x72   : > { %s2646_s27 = smov (!%p680_p3, %s1655_s27), 3  ;;  %689 = sbr.rel (%p1656_p4) target bundleno = 121 (0x79), region = 97 }
  0x73   : > { %s682_s5 = scalar_lea.vmem %s2617_s2, %s2646_s27  ;;  %v2114_v38 = vmov (!%p1656_p4), 0.0  }
  0x74   : > { %690 = vst [vmem:[#allocation2] sm:$0xff] (!%p1656_p4), %v2114_v38  ;;  %691 = vst [vmem:[#allocation2 + $0x8] sm:$0xff] (!%p1656_p4), %v2114_v38 }
  0x75   : > { %692 = vst [vmem:[#allocation2 + $0x10] sm:$0xff] (!%p1656_p4), %v2114_v38  ;;  %693 = vst [vmem:[#allocation2 + $0x18] sm:$0xff] (!%p1656_p4), %v2114_v38 }
  0x79 PF: > { %v1873_v39 = vld [vmem:[%s2459_s1 + $0x104] ss:$8 sps:$4 sm:$0xff]   ;;  %v1875_v40 = vld [vmem:[%s2459_s1 + $0x100] ss:$8 sps:$4 sm:$0xff]   ;;  %v1876_v41 = vld [vmem:[%s2459_s1 + $0x114] ss:$8 sps:$4 sm:$0xff]  }
  0x7a   : > { %1353 = vmatprep.subr.bf16.mxu0 %v1873_v39  ;;  %v1878_v42 = vld [vmem:[%s2459_s1 + $0x110] ss:$8 sps:$4 sm:$0xff]   ;;  %v1879_v43 = vld [vmem:[%s2459_s1 + $0x124] ss:$8 sps:$4 sm:$0xff]   ;;  %v1881_v44 = vld [vmem:[%s2459_s1 + $0x120] ss:$8 sps:$4 sm:$0xff]  }
  0x7b   : > { %1354 = vmatpush1.bf16.msra.mxu0 %v1875_v40  ;;  %v1882_v45 = vld [vmem:[%s2459_s1 + $0x134] ss:$8 sps:$4 sm:$0xff]   ;;  %v1884_v46 = vld [vmem:[%s2459_s1 + $0x130] ss:$8 sps:$4 sm:$0xff]   ;;  %v1885_v47 = vld [vmem:[%s2459_s1 + $0x144] ss:$8 sps:$4 sm:$0xff]  }
  0x7c   : > { %1355 = vmatprep.subr.bf16.mxu0 %v1876_v41  ;;  %v1887_v48 = vld [vmem:[%s2459_s1 + $0x140] ss:$8 sps:$4 sm:$0xff]   ;;  %v1888_v49 = vld [vmem:[%s2459_s1 + $0x154] ss:$8 sps:$4 sm:$0xff]   ;;  %v1890_v50 = vld [vmem:[%s2459_s1 + $0x150] ss:$8 sps:$4 sm:$0xff]  }
  0x7d   : > { %v1891_v51 = vld [vmem:[%s2459_s1 + $0x164] ss:$8 sps:$4 sm:$0xff]   ;;  %v1923_v53 = vld [vmem:[%s2459_s1] ss:$8 sps:$4 sm:$0xff]   ;;  %v1894_v56 = vld [vmem:[%s2459_s1 + $0x174] ss:$8 sps:$4 sm:$0xff]  }
  0x7e   : > { %v1920_v52 = vld [vmem:[%s2459_s1 + $0x4] ss:$8 sps:$4 sm:$0xff]   ;;  %v1893_v54 = vld [vmem:[%s2459_s1 + $0x160] ss:$8 sps:$4 sm:$0xff]   ;;  %v1930_v57 = vld [vmem:[%s2459_s1 + $0x14] ss:$8 sps:$4 sm:$0xff]  }
  0x7f   : > { %1356 = vmatpush1.bf16.msra.mxu0 %v1878_v42  ;;  %1310 = vmatprep.subr.bf16.mxu1 %v1920_v52  ;;  %v1926_v55 = vld [vmem:[%s2457_s6 + $0xc] ss:$24 sps:$4 sm:$0xff]   ;;  %v1932_v58 = vld [vmem:[%s2459_s1 + $0x10] ss:$8 sps:$4 sm:$0xff]   ;;  %v1938_v62 = vld [vmem:[%s2459_s1 + $0x20] ss:$8 sps:$4 sm:$0xff]  }
  0x80   : > { %1357 = vmatprep.subr.bf16.mxu0 %v1879_v43  ;;  %1311 = vmatpush1.bf16.msra.mxu1 %v1923_v53  ;;  %v1896_v59 = vld [vmem:[%s2459_s1 + $0x170] ss:$8 sps:$4 sm:$0xff]   ;;  %v1897_v60 = vld [vmem:[%s2459_s1 + $0x184] ss:$8 sps:$4 sm:$0xff]   ;;  %v1899_v63 = vld [vmem:[%s2459_s1 + $0x180] ss:$8 sps:$4 sm:$0xff]  }
  0x81   : > { %1385 = vmatprep.mubr.bf16.mxu0 %v1926_v55  ;;  %1312 = vmatprep.subr.bf16.mxu1 %v1930_v57  ;;  %v1936_v61 = vld [vmem:[%s2459_s1 + $0x24] ss:$8 sps:$4 sm:$0xff]   ;;  %v1942_v0 = vld [vmem:[%s2459_s1 + $0x34] ss:$8 sps:$4 sm:$0xff]   ;;  %v1944_v2 = vld [vmem:[%s2459_s1 + $0x30] ss:$8 sps:$4 sm:$0xff]  }
  0x82   : > { %v1900_v1 = vld [vmem:[%s2459_s1 + $0x194] ss:$8 sps:$4 sm:$0xff]   ;;  %v1948_v3 = vld [vmem:[%s2459_s1 + $0x44] ss:$8 sps:$4 sm:$0xff]   ;;  %v1902_v4 = vld [vmem:[%s2459_s1 + $0x190] ss:$8 sps:$4 sm:$0xff]  }
  0x83   : > { %1358 = vmatpush1.bf16.msra.mxu0 %v1881_v44  ;;  %v1903_v5 = vld [vmem:[%s2459_s1 + $0x1a4] ss:$8 sps:$4 sm:$0xff]   ;;  %v1950_v6 = vld [vmem:[%s2459_s1 + $0x40] ss:$8 sps:$4 sm:$0xff]   ;;  %v1954_v7 = vld [vmem:[%s2459_s1 + $0x54] ss:$8 sps:$4 sm:$0xff]  }
  0x84   : > { %1359 = vmatprep.subr.bf16.mxu0 %v1882_v45  ;;  %1313 = vmatpush1.bf16.msra.mxu1 %v1932_v58  ;;  %v1905_v8 = vld [vmem:[%s2459_s1 + $0x1a0] ss:$8 sps:$4 sm:$0xff]   ;;  %v1906_v9 = vld [vmem:[%s2459_s1 + $0x1b4] ss:$8 sps:$4 sm:$0xff]   ;;  %v1956_v10 = vld [vmem:[%s2459_s1 + $0x50] ss:$8 sps:$4 sm:$0xff]  }
  0x85   : > { %1314 = vmatprep.subr.bf16.mxu1 %v1936_v61  ;;  %v1960_v11 = vld [vmem:[%s2459_s1 + $0x64] ss:$8 sps:$4 sm:$0xff]   ;;  %v1908_v12 = vld [vmem:[%s2459_s1 + $0x1b0] ss:$8 sps:$4 sm:$0xff]   ;;  %v1962_v14 = vld [vmem:[%s2459_s1 + $0x60] ss:$8 sps:$4 sm:$0xff]  }
  0x86   : > { %v1909_v13 = vld [vmem:[%s2459_s1 + $0x1c4] ss:$8 sps:$4 sm:$0xff]   ;;  %v1966_v15 = vld [vmem:[%s2459_s1 + $0x74] ss:$8 sps:$4 sm:$0xff]   ;;  %v1911_v16 = vld [vmem:[%s2459_s1 + $0x1c0] ss:$8 sps:$4 sm:$0xff]  }
  0x87   : > { %1360 = vmatpush1.bf16.msra.mxu0 %v1884_v46  ;;  %v1912_v17 = vld [vmem:[%s2459_s1 + $0x1d4] ss:$8 sps:$4 sm:$0xff]   ;;  %v1968_v18 = vld [vmem:[%s2459_s1 + $0x70] ss:$8 sps:$4 sm:$0xff]   ;;  %v1972_v19 = vld [vmem:[%s2459_s1 + $0x84] ss:$8 sps:$4 sm:$0xff]  }
  0x88   : > { %1361 = vmatprep.subr.bf16.mxu0 %v1885_v47  ;;  %1315 = vmatpush1.bf16.msra.mxu1 %v1938_v62  ;;  %v1914_v20 = vld [vmem:[%s2459_s1 + $0x1d0] ss:$8 sps:$4 sm:$0xff]   ;;  %v1915_v21 = vld [vmem:[%s2459_s1 + $0x1e4] ss:$8 sps:$4 sm:$0xff]   ;;  %v1974_v22 = vld [vmem:[%s2459_s1 + $0x80] ss:$8 sps:$4 sm:$0xff]  }
  0x89   : > { %1316 = vmatprep.subr.bf16.mxu1 %v1942_v0  ;;  %v1978_v23 = vld [vmem:[%s2459_s1 + $0x94] ss:$8 sps:$4 sm:$0xff]   ;;  %v1917_v24 = vld [vmem:[%s2459_s1 + $0x1e0] ss:$8 sps:$4 sm:$0xff]   ;;  %v1980_v26 = vld [vmem:[%s2459_s1 + $0x90] ss:$8 sps:$4 sm:$0xff]  }
  0x8a   : > { %v1918_v25 = vld [vmem:[%s2459_s1 + $0x1f4] ss:$8 sps:$4 sm:$0xff]   ;;  %v1984_v27 = vld [vmem:[%s2459_s1 + $0xa4] ss:$8 sps:$4 sm:$0xff]   ;;  %v1922_v28 = vld [vmem:[%s2459_s1 + $0x1f0] ss:$8 sps:$4 sm:$0xff]  }
  0x8b   : > { %1362 = vmatpush1.bf16.msra.mxu0 %v1887_v48  ;;  %v1929_v29 = vld [vmem:[%s2459_s1 + $0x204] ss:$8 sps:$4 sm:$0xff]   ;;  %v1986_v30 = vld [vmem:[%s2459_s1 + $0xa0] ss:$8 sps:$4 sm:$0xff]   ;;  %v1990_v32 = vld [vmem:[%s2459_s1 + $0xb4] ss:$8 sps:$4 sm:$0xff]  }
  0x8c   : > { %1363 = vmatprep.subr.bf16.mxu0 %v1888_v49  ;;  %1317 = vmatpush1.bf16.msra.mxu1 %v1944_v2  ;;  %v1924_v31 = vld [vmem:[%s2457_s6 + $0x8] ss:$24 sps:$4 sm:$0xff]   ;;  %v1935_v34 = vld [vmem:[%s2459_s1 + $0x214] ss:$8 sps:$4 sm:$0xff]   ;;  %v1996_v37 = vld [vmem:[%s2459_s1 + $0xc4] ss:$8 sps:$4 sm:$0xff]  }
  0x8d   : > { %1318 = vmatprep.subr.bf16.mxu1 %v1948_v3  ;;  %v1927_v33 = vld [vmem:[%s2459_s1 + $0x200] ss:$8 sps:$4 sm:$0xff]   ;;  %v1992_v35 = vld [vmem:[%s2459_s1 + $0xb0] ss:$8 sps:$4 sm:$0xff]   ;;  %v2019_v36 = vld [vmem:[%s2457_s6 + $0x4] ss:$24 sps:$4 sm:$0xff]  }
  0x8e   : > { %v1933_v38 = vld [vmem:[%s2459_s1 + $0x210] ss:$8 sps:$4 sm:$0xff]   ;;  %1342 = vmatprep.mubr.bf16.mxu1 %v2019_v36  ;;  %v2025_v39 = vld [vmem:[%s2457_s6 + $0x14] ss:$24 sps:$4 sm:$0xff]   ;;  %v1998_v41 = vld [vmem:[%s2459_s1 + $0xc0] ss:$8 sps:$4 sm:$0xff]  }
  0x8f   : > { %1364 = vmatpush1.bf16.msra.mxu0 %v1890_v50  ;;  %v1941_v40 = vld [vmem:[%s2459_s1 + $0x224] ss:$8 sps:$4 sm:$0xff]   ;;  %v2002_v42 = vld [vmem:[%s2459_s1 + $0xd4] ss:$8 sps:$4 sm:$0xff]   ;;  %v1939_v43 = vld [vmem:[%s2459_s1 + $0x220] ss:$8 sps:$4 sm:$0xff]  }
  0x90   : > { %1365 = vmatprep.subr.bf16.mxu0 %v1891_v51  ;;  %1319 = vmatpush1.bf16.msra.mxu1 %v1950_v6  ;;  %v1947_v44 = vld [vmem:[%s2459_s1 + $0x234] ss:$8 sps:$4 sm:$0xff]   ;;  %v2004_v45 = vld [vmem:[%s2459_s1 + $0xd0] ss:$8 sps:$4 sm:$0xff]   ;;  %v2008_v46 = vld [vmem:[%s2459_s1 + $0xe4] ss:$8 sps:$4 sm:$0xff]  }
  0x91   : > { %1320 = vmatprep.subr.bf16.mxu1 %v1954_v7  ;;  %v1945_v47 = vld [vmem:[%s2459_s1 + $0x230] ss:$8 sps:$4 sm:$0xff]   ;;  %v1953_v48 = vld [vmem:[%s2459_s1 + $0x244] ss:$8 sps:$4 sm:$0xff]   ;;  %v2010_v49 = vld [vmem:[%s2459_s1 + $0xe0] ss:$8 sps:$4 sm:$0xff]  }
  0x92   : > { %v2014_v50 = vld [vmem:[%s2459_s1 + $0xf4] ss:$8 sps:$4 sm:$0xff]   ;;  %v1951_v51 = vld [vmem:[%s2459_s1 + $0x240] ss:$8 sps:$4 sm:$0xff]   ;;  %v2016_v53 = vld [vmem:[%s2459_s1 + $0xf0] ss:$8 sps:$4 sm:$0xff]  }
  0x93   : > { %1366 = vmatpush1.bf16.msra.mxu0 %v1893_v54  ;;  %v1959_v52 = vld [vmem:[%s2459_s1 + $0x254] ss:$8 sps:$4 sm:$0xff]   ;;  %v1957_v54 = vld [vmem:[%s2459_s1 + $0x250] ss:$8 sps:$4 sm:$0xff]   ;;  %v1965_v55 = vld [vmem:[%s2459_s1 + $0x264] ss:$8 sps:$4 sm:$0xff]  }
  0x94   : > { %1367 = vmatprep.subr.bf16.mxu0 %v1894_v56  ;;  %1321 = vmatpush1.bf16.msra.mxu1 %v1956_v10  ;;  %v2017_v56 = vld [vmem:[%s2457_s6] ss:$24 sps:$4 sm:$0xff]   ;;  %v1971_v58 = vld [vmem:[%s2459_s1 + $0x274] ss:$8 sps:$4 sm:$0xff]   ;;  %v1989_v0 = vld [vmem:[%s2459_s1 + $0x2a4] ss:$8 sps:$4 sm:$0xff]  }
  0x95   : > { %1322 = vmatprep.subr.bf16.mxu1 %v1960_v11  ;;  %v1963_v57 = vld [vmem:[%s2459_s1 + $0x260] ss:$8 sps:$4 sm:$0xff]   ;;  %v1983_v62 = vld [vmem:[%s2459_s1 + $0x294] ss:$8 sps:$4 sm:$0xff]   ;;  %v1993_v3 = vld [vmem:[%s2459_s1 + $0x2b0] ss:$8 sps:$4 sm:$0xff]  }
  0x96   : > { %v1975_v61 = vld [vmem:[%s2459_s1 + $0x280] ss:$8 sps:$4 sm:$0xff]   ;;  %v1995_v2 = vld [vmem:[%s2459_s1 + $0x2b4] ss:$8 sps:$4 sm:$0xff]   ;;  %v2005_v7 = vld [vmem:[%s2459_s1 + $0x2d0] ss:$8 sps:$4 sm:$0xff]  }
  0x97   : > { %1368 = vmatpush1.bf16.msra.mxu0 %v1896_v59  ;;  %v1969_v59 = vld [vmem:[%s2459_s1 + $0x270] ss:$8 sps:$4 sm:$0xff]   ;;  %v2007_v6 = vld [vmem:[%s2459_s1 + $0x2d4] ss:$8 sps:$4 sm:$0xff]   ;;  %p1759_p5 = scmp.ne.s32.totalorder %s2096_s18, 2 }
  0x98   : > { %1369 = vmatprep.subr.bf16.mxu0 %v1897_v60  ;;  %1323 = vmatpush1.bf16.msra.mxu1 %v1962_v14  ;;  %v1977_v60 = vld [vmem:[%s2459_s1 + $0x284] ss:$8 sps:$4 sm:$0xff]   ;;  %v2022_v10 = vld [vmem:[%s2459_s1 + $0x2f4] ss:$8 sps:$4 sm:$0xff]   ;;  %v2020_v11 = vld [vmem:[%s2459_s1 + $0x2f0] ss:$8 sps:$4 sm:$0xff]  }
  0x99   : > { %1324 = vmatprep.subr.bf16.mxu1 %v1966_v15 }
  0x9b   : > { %1370 = vmatpush1.bf16.msra.mxu0 %v1899_v63  ;;  %v1981_v63 = vld [vmem:[%s2459_s1 + $0x290] ss:$8 sps:$4 sm:$0xff]  }
  0x9c   : > { %1371 = vmatprep.subr.bf16.mxu0 %v1900_v1  ;;  %1325 = vmatpush1.bf16.msra.mxu1 %v1968_v18  ;;  %v1987_v1 = vld [vmem:[%s2459_s1 + $0x2a0] ss:$8 sps:$4 sm:$0xff]  }
  0x9d   : > { %1326 = vmatprep.subr.bf16.mxu1 %v1972_v19 }
  0x9f   : > { %1372 = vmatpush1.bf16.msra.mxu0 %v1902_v4  ;;  %v2001_v4 = vld [vmem:[%s2459_s1 + $0x2c4] ss:$8 sps:$4 sm:$0xff]  }
  0xa0   : > { %1373 = vmatprep.subr.bf16.mxu0 %v1903_v5  ;;  %1327 = vmatpush1.bf16.msra.mxu1 %v1974_v22  ;;  %v1999_v5 = vld [vmem:[%s2459_s1 + $0x2c0] ss:$8 sps:$4 sm:$0xff]  }
  0xa1   : > { %1328 = vmatprep.subr.bf16.mxu1 %v1978_v23  ;;  %v696_v23 = vld [vmem:[#allocation2 + $0x10] sm:$0xff] }
  0xa3   : > { %1374 = vmatpush1.bf16.msra.mxu0 %v1905_v8  ;;  %v2013_v8 = vld [vmem:[%s2459_s1 + $0x2e4] ss:$8 sps:$4 sm:$0xff]  }
  0xa4   : > { %1375 = vmatprep.subr.bf16.mxu0 %v1906_v9  ;;  %1329 = vmatpush1.bf16.msra.mxu1 %v1980_v26  ;;  %v2011_v9 = vld [vmem:[%s2459_s1 + $0x2e0] ss:$8 sps:$4 sm:$0xff]  }
  0xa5   : > { %1330 = vmatprep.subr.bf16.mxu1 %v1984_v27  ;;  %v697_v27 = vld [vmem:[#allocation2 + $0x18] sm:$0xff] }
  0xa7   : > { %1376 = vmatpush1.bf16.msra.mxu0 %v1908_v12  ;;  %v2023_v12 = vld [vmem:[%s2457_s6 + $0x10] ss:$24 sps:$4 sm:$0xff]  }
  0xa8   : > { %1377 = vmatprep.subr.bf16.mxu0 %v1909_v13  ;;  %1331 = vmatpush1.bf16.msra.mxu1 %v1986_v30 }
  0xa9   : > { %1332 = vmatprep.subr.bf16.mxu1 %v1990_v32 }
  0xab   : > { %1378 = vmatpush1.bf16.msra.mxu0 %v1911_v16 }
  0xac   : > { %1379 = vmatprep.subr.bf16.mxu0 %v1912_v17  ;;  %1333 = vmatpush1.bf16.msra.mxu1 %v1992_v35  ;;  %v694_v17 = vld [vmem:[#allocation2] sm:$0xff] }
  0xad   : > { %1334 = vmatprep.subr.bf16.mxu1 %v1996_v37  ;;  %v1455_v35 = vld [vmem:[%s682_s5] sm:$0x3] (!%p1759_p5) }
  0xaf   : > { %1380 = vmatpush1.bf16.msra.mxu0 %v1914_v20  ;;  %v695_v20 = vld [vmem:[#allocation2 + $0x8] sm:$0xff] }
  0xb0   : > { %1381 = vmatprep.subr.bf16.mxu0 %v1915_v21  ;;  %1335 = vmatpush1.bf16.msra.mxu1 %v1998_v41 }
  0xb1   : > { %1336 = vmatprep.subr.bf16.mxu1 %v2002_v42 }
  0xb3   : > { %1382 = vmatpush1.bf16.msra.mxu0 %v1917_v24 }
  0xb4   : > { %1383 = vmatprep.subr.bf16.mxu0 %v1918_v25  ;;  %1337 = vmatpush1.bf16.msra.mxu1 %v2004_v45 }
  0xb5   : > { %1338 = vmatprep.subr.bf16.mxu1 %v2008_v46 }
  0xb7   : > { %1384 = vmatpush1.bf16.msra.mxu0 %v1922_v28 }
  0xb8   : > { %1396 = vmatprep.subr.bf16.mxu0 %v1929_v29  ;;  %1339 = vmatpush1.bf16.msra.mxu1 %v2010_v49 }
  0xb9   : > { %1340 = vmatprep.subr.bf16.mxu1 %v2014_v50 }
  0xba   : > { %1386 = vmatmul.mubr.bf16.vlgmr.msra.gmra.mrb[0].mxu0 %v1924_v31 }
  0xbb   : > { %1397 = vmatpush1.bf16.msra.mxu0 %v1927_v33  ;;  %1428 = vmatprep.mubr.bf16.mxu0 %v2025_v39  ;;  %v1457_v33 = vlaneseq (!%p1759_p5) }
  0xbc   : > { %1398 = vmatprep.subr.bf16.mxu0 %v1935_v34  ;;  %1341 = vmatpush1.bf16.msra.mxu1 %v2016_v53 }
  0xbd   : > { %v1458_v34 = vshrl.u32 (!%p1759_p5), %v1457_v33, 7 }
  0xbf   : > { %1399 = vmatpush1.bf16.msra.mxu0 %v1933_v38  ;;  %1343 = vmatmul.mubr.bf16.vlgmr.msra.gmra.mrb[0].mxu1 %v2017_v56  ;;  %v1459_v37 = vsub.s32 (!%p1759_p5), 0, %v1458_v34  ;;  %v1463_v38 = vsub.s32 (!%p1759_p5), 1, %v1458_v34 }
  0xc0   : > { %1400 = vmatprep.subr.bf16.mxu0 %v1941_v40 }
  0xc1   : > { %v1460_v42 = vrot.slane (!%p1759_p5), %v1455_v35, %v1459_v37 }
  0xc3   : > { %1401 = vmatpush1.bf16.msra.mxu0 %v1939_v43  ;;  %v1464_v43 = vrot.slane (!%p1759_p5), %v1455_v35, %v1463_v38 }
  0xc4   : > { %1402 = vmatprep.subr.bf16.mxu0 %v1947_v44 }
  0xc7   : > { %1403 = vmatpush1.bf16.msra.mxu0 %v1945_v47 }
  0xc8   : > { %1404 = vmatprep.subr.bf16.mxu0 %v1953_v48 }
  0xcb   : > { %1405 = vmatpush1.bf16.msra.mxu0 %v1951_v51 }
  0xcc   : > { %1406 = vmatprep.subr.bf16.mxu0 %v1959_v52 }
  0xcf   : > { %1407 = vmatpush1.bf16.msra.mxu0 %v1957_v54 }
  0xd0   : > { %1408 = vmatprep.subr.bf16.mxu0 %v1965_v55 }
  0xd3   : > { %1409 = vmatpush1.bf16.msra.mxu0 %v1963_v57 }
  0xd4   : > { %1410 = vmatprep.subr.bf16.mxu0 %v1971_v58 }
  0xd7   : > { %1411 = vmatpush1.bf16.msra.mxu0 %v1969_v59 }
  0xd8   : > { %1412 = vmatprep.subr.bf16.mxu0 %v1977_v60 }
  0xdb   : > { %1413 = vmatpush1.bf16.msra.mxu0 %v1975_v61 }
  0xdc   : > { %1414 = vmatprep.subr.bf16.mxu0 %v1983_v62 }
  0xdf   : > { %1415 = vmatpush1.bf16.msra.mxu0 %v1981_v63 }
  0xe0   : > { %1416 = vmatprep.subr.bf16.mxu0 %v1989_v0 }
  0xe3   : > { %1417 = vmatpush1.bf16.msra.mxu0 %v1987_v1 }
  0xe4   : > { %1418 = vmatprep.subr.bf16.mxu0 %v1995_v2 }
  0xe7   : > { %1419 = vmatpush1.bf16.msra.mxu0 %v1993_v3 }
  0xe8   : > { %1420 = vmatprep.subr.bf16.mxu0 %v2001_v4 }
  0xeb   : > { %1421 = vmatpush1.bf16.msra.mxu0 %v1999_v5 }
  0xec   : > { %1422 = vmatprep.subr.bf16.mxu0 %v2007_v6 }
  0xef   : > { %1423 = vmatpush1.bf16.msra.mxu0 %v2005_v7 }
  0xf0   : > { %1424 = vmatprep.subr.bf16.mxu0 %v2013_v8 }
  0xf3   : > { %1425 = vmatpush1.bf16.msra.mxu0 %v2011_v9 }
  0xf4   : > { %1426 = vmatprep.subr.bf16.mxu0 %v2022_v10 }
  0xf7   : > { %1427 = vmatpush1.bf16.msra.mxu0 %v2020_v11 }
  0xfa   : > { %1429 = vmatmul.mubr.bf16.vlgmr.msra.gmra.mrb[0].mxu0 %v2023_v12 }
 0x192   : > { %v1344_v13 = vpop.f32.mrb[0].mxu1 }
 0x193   : > { %v1346_v14 = vpop.f32.mrb[1].mxu1 }
 0x194   : > { %v1348_v15 = vpop.f32.mrb[2].mxu1 }
 0x195   : > { %v1350_v16 = vpop.f32.mrb[3].mxu1 }
 0x1cd   : > { %v1430_v18 = vpop.f32.mrb[0].mxu0 }
 0x1ce   : > { %v1772_v19 = vadd.f32 %v1430_v18, %v1344_v13  ;;  %v1432_v21 = vpop.f32.mrb[1].mxu0 }
 0x1cf   : > { %v1773_v22 = vadd.f32 %v1432_v21, %v1346_v14  ;;  %v1434_v24 = vpop.f32.mrb[2].mxu0  ;;  %1450 = sbr.rel (%p1759_p5) target bundleno = 484 (0x1e4), region = 101 }
 0x1d0   : > { %v1439_v25 = vadd.f32 %v1772_v19, %v694_v17  ;;  %v1774_v26 = vadd.f32 %v1434_v24, %v1348_v15  ;;  %v1436_v28 = vpop.f32.mrb[3].mxu0 }
 0x1d1   : > { %v1440_v29 = vadd.f32 %v1773_v22, %v695_v20  ;;  %v1775_v30 = vadd.f32 %v1436_v28, %v1350_v16 }
 0x1d2   : > { %1443 = vst [vmem:[#allocation2] sm:$0xff] %v1439_v25  ;;  %v1441_v31 = vadd.f32 %v1774_v26, %v696_v23 }
 0x1d3   : > { %1444 = vst [vmem:[#allocation2 + $0x8] sm:$0xff] %v1440_v29  ;;  %v1442_v32 = vadd.f32 %v1775_v30, %v697_v27 }
 0x1d4   : > { %1445 = vst [vmem:[#allocation2 + $0x10] sm:$0xff] %v1441_v31 }
 0x1d5   : > { %1446 = vst [vmem:[#allocation2 + $0x18] sm:$0xff] %v1442_v32 }
 0x1d9   : > { %v1451_v36 = vld [vmem:[#allocation2] sm:$0xff] }
 0x1da   : > { %v1452_v39 = vld [vmem:[#allocation2 + $0x8] sm:$0xff]  ;;  %v1467_v44 = vadd.f32 %v1460_v42, %v1451_v36 }
 0x1db   : > { %v1453_v40 = vld [vmem:[#allocation2 + $0x10] sm:$0xff]  ;;  %v1468_v45 = vadd.f32 %v1464_v43, %v1452_v39 }
 0x1dc   : > { %v1454_v41 = vld [vmem:[#allocation2 + $0x18] sm:$0xff]  ;;  %v1469_v46 = vadd.f32 %v1460_v42, %v1453_v40  ;;  %v1471_v48 = vmax.f32 %v1467_v44, 0.0 }
 0x1dd   : > { %v1470_v47 = vadd.f32 %v1464_v43, %v1454_v41  ;;  %v1472_v49 = vmax.f32 %v1468_v45, 0.0 }
 0x1de   : > { %v1473_v50 = vmax.f32 %v1469_v46, 0.0 }
 0x1df   : > { %v1474_v51 = vmax.f32 %v1470_v47, 0.0  ;;  %v1769_v52 = vpack.c.bf16 %v1472_v49, %v1471_v48 }
 0x1e1   : > { %v1770_v53 = vpack.c.bf16 %v1474_v51, %v1473_v50  ;;  %1487 = vst [vmem:[%s2461_s25] sm:$0xff] %v1769_v52 }
 0x1e3   : > { %1488 = vst [vmem:[%s2461_s25 + $0x8] sm:$0xff] %v1770_v53 }
 0x1e4 PF: > { %1495 = sbr.rel (!%p2229_p12) target bundleno = 492 (0x1ec), region = 105  ;;  %s1771_s14 = sshll.u32 (%p2229_p12), %s2100_s19, 3 }
 0x1e5   : > { %s1501_s0 = scalar_lea.vmem (%p2229_p12), %s2618_s3, %s1771_s14 }
 0x1e8   : > { %v1531_v54 = vld [vmem:[%s2461_s25] sm:$0xff] (%p2229_p12) }
 0x1e9   : > { %1532 = vst [vmem:[%s1501_s0] sm:$0xff] (%p2229_p12), %v1531_v54 }
 0x1ea   : > { %v1533_v55 = vld [vmem:[%s2461_s25 + $0x8] sm:$0xff] (%p2229_p12) }
 0x1eb   : > { %1534 = vst [vmem:[%s1501_s0 + $0x10] sm:$0xff] %v1533_v55 }
 0x1ec PF: > { %s13_s22 = sadd.s32 1, %s2112_s22   ;;  %s2628_s25 = sld [smem:[#allocation6_spill]] }
 0x1ed   : > { %p10_p6 = scmp.ge.s32.totalorder %s13_s22, 8   ;;  %s2629_s12 = smov %s2076_s13 }
 0x1ee   : > { %s2630_s13 = smov %s2227_s9  ;;  %s2631_s14 = smov %s2084_s15 }
 0x1ef   : > { %s2632_s15 = smov %s2224_s8  ;;  %s2633_s16 = smov %s2092_s17 }
 0x1f0   : > { %s2634_s17 = smov %s2210_s30  ;;  %s2635_s18 = smov %s2104_s20 }
 0x1f1   : > { %s2636_s19 = smov %s2108_s21  ;;  %s2637_s20 = smov %s2640_s24 }
 0x1f2   : > { %s2638_s21 = smov %s2628_s25  ;;  %12 = sbr.rel (!%p10_p6) target bundleno = 9 (0x9), region = 185 }

// kernel: resnet18_forward.36
= control target key start
LH: loop header
LB: loop body
LE: loop exit
PB: predicated region body
PF: predicated region fallthrough
CT: control target
= control target key end

     0   :  { %s1007_s12 = smov 0   ;;  %s1009_s13 = smov 0   ;;  %s1195_s0 = inlined_call_operand.vmem [shape: bf16[16,256], index: 0, kind: input, shape index: {}]   ;;  %s1196_s1 = inlined_call_operand.vmem [shape: bf16[256,512], index: 1, kind: input, shape index: {}]   ;;  %s1197_s2 = inlined_call_operand.vmem [shape: f32[1,512], index: 2, kind: input, shape index: {}]   ;;  %s1198_s3 = inlined_call_operand.vmem [shape: bf16[16,512], index: 3, kind: output, shape index: {}]  }
   0x1   :  { %s1011_s14 = smov 0   ;;  %s1013_s15 = smov 0  }
   0x2   :  { %s1015_s16 = smov 0  }
   0x3 LB: > { %s22_s17 = sadd.s32 1, %s981_s15  ;;  %s799_s18 = sadd.s32 4294967295, %s985_s16   ;;  %s985_s16 = sphi %s1015_s16, %s13_s16   ;;  %s981_s15 = sphi %s1013_s15, %s1203_s15   ;;  %s977_s14 = sphi %s1011_s14, %s1202_s14   ;;  %s973_s13 = sphi %s1009_s13, %s1201_s13   ;;  %s969_s12 = sphi %s1007_s12, %s1200_s12  }
   0x4   : > { %p23_p0 = scmp.ge.s32.totalorder %s22_s17, 2  ;;  %p65_p1 = scmp.ne.s32.totalorder %s973_s13, %s969_s12 }
   0x5   : > { %p66_p2 = scmp.eq.s32.totalorder %s985_s16, 0  ;;  %p123_p4 = scmp.eq.s32.totalorder %s799_s18, 1 }
   0x6   : > { %s1205_s17 = smov (%p23_p0, %s22_s17), 0  ;;  %s58_s20 = sadd.s32 1, %s973_s13 }
   0x7   : > { %p67_p3 = por %p66_p2, %p65_p1  ;;  %s55_s19 = ssub.s32 %s981_s15, %s1205_s17 }
   0x8   : > { %p56_p5 = scmp.eq.s32.totalorder %s55_s19, 0  ;;  %p1042_p6 = por %p123_p4, %p65_p1 }
   0x9   : > { %p803_p7 = scmp.ge.s32.totalorder %s985_s16, 2 }
   0xa   : > { %s1047_s22 = scalar_select %p56_p5, %s973_s13, %s58_s20  }
   0xb   : > { %155 = sbr.rel (%p803_p7) target bundleno = 38 (0x26), region = 20 }
  0x12   : > { %158 = sbr.rel (!%p67_p3) target bundleno = 38 (0x26), region = 24  ;;  %s160_s23 = sand.u32 (%p67_p3), 1, %s973_s13  }
  0x13   : > { %s852_s24 = sshll.u32 (%p67_p3), %s981_s15, 3  ;;  %s804_s25 = sshll.u32 (%p67_p3), %s160_s23, 8 }
  0x14   : > { %s1055_s28 = scalar_lea.vmem (%p67_p3), %s1196_s1, %s852_s24  ;;  %s1060_s29 = scalar_lea.vmem (%p67_p3), [#allocation2], %s804_s25 }
  0x15   : > { %v255_v0 = vld [vmem:[%s1055_s28] sm:$0xff] (%p67_p3)  ;;  %v257_v1 = vld [vmem:[%s1055_s28 + $0x10] sm:$0xff] (%p67_p3) }
  0x16   : > { %v259_v2 = vld [vmem:[%s1055_s28 + $0x20] sm:$0xff] (%p67_p3)  ;;  %256 = vst [vmem:[%s1060_s29] sm:$0xff] (%p67_p3), %v255_v0  ;;  %258 = vst [vmem:[%s1060_s29 + $0x8] sm:$0xff] (%p67_p3), %v257_v1  ;;  %v261_v3 = vld [vmem:[%s1055_s28 + $0x30] sm:$0xff] (%p67_p3) }
  0x17   : > { %260 = vst [vmem:[%s1060_s29 + $0x10] sm:$0xff] (%p67_p3), %v259_v2  ;;  %v263_v4 = vld [vmem:[%s1055_s28 + $0x40] sm:$0xff] (%p67_p3)  ;;  %v265_v5 = vld [vmem:[%s1055_s28 + $0x50] sm:$0xff] (%p67_p3)  ;;  %262 = vst [vmem:[%s1060_s29 + $0x18] sm:$0xff] (%p67_p3), %v261_v3 }
  0x18   : > { %264 = vst [vmem:[%s1060_s29 + $0x20] sm:$0xff] (%p67_p3), %v263_v4  ;;  %266 = vst [vmem:[%s1060_s29 + $0x28] sm:$0xff] (%p67_p3), %v265_v5  ;;  %v267_v6 = vld [vmem:[%s1055_s28 + $0x60] sm:$0xff] (%p67_p3)  ;;  %v269_v7 = vld [vmem:[%s1055_s28 + $0x70] sm:$0xff] (%p67_p3) }
  0x19   : > { %v271_v8 = vld [vmem:[%s1055_s28 + $0x80] sm:$0xff]  ;;  %268 = vst [vmem:[%s1060_s29 + $0x30] sm:$0xff] %v267_v6  ;;  %270 = vst [vmem:[%s1060_s29 + $0x38] sm:$0xff] %v269_v7  ;;  %v273_v9 = vld [vmem:[%s1055_s28 + $0x90] sm:$0xff] }
  0x1a   : > { %272 = vst [vmem:[%s1060_s29 + $0x40] sm:$0xff] %v271_v8  ;;  %v275_v10 = vld [vmem:[%s1055_s28 + $0xa0] sm:$0xff]  ;;  %v277_v11 = vld [vmem:[%s1055_s28 + $0xb0] sm:$0xff]  ;;  %274 = vst [vmem:[%s1060_s29 + $0x48] sm:$0xff] %v273_v9 }
  0x1b   : > { %276 = vst [vmem:[%s1060_s29 + $0x50] sm:$0xff] %v275_v10  ;;  %278 = vst [vmem:[%s1060_s29 + $0x58] sm:$0xff] %v277_v11  ;;  %v279_v12 = vld [vmem:[%s1055_s28 + $0xc0] sm:$0xff]  ;;  %v281_v13 = vld [vmem:[%s1055_s28 + $0xd0] sm:$0xff] }
  0x1c   : > { %v283_v14 = vld [vmem:[%s1055_s28 + $0xe0] sm:$0xff]  ;;  %280 = vst [vmem:[%s1060_s29 + $0x60] sm:$0xff] %v279_v12  ;;  %282 = vst [vmem:[%s1060_s29 + $0x68] sm:$0xff] %v281_v13  ;;  %v285_v15 = vld [vmem:[%s1055_s28 + $0xf0] sm:$0xff] }
  0x1d   : > { %284 = vst [vmem:[%s1060_s29 + $0x70] sm:$0xff] %v283_v14  ;;  %v287_v16 = vld [vmem:[%s1055_s28 + $0x100] sm:$0xff]  ;;  %v289_v17 = vld [vmem:[%s1055_s28 + $0x110] sm:$0xff]  ;;  %286 = vst [vmem:[%s1060_s29 + $0x78] sm:$0xff] %v285_v15 }
  0x1e   : > { %288 = vst [vmem:[%s1060_s29 + $0x80] sm:$0xff] %v287_v16  ;;  %290 = vst [vmem:[%s1060_s29 + $0x88] sm:$0xff] %v289_v17  ;;  %v291_v18 = vld [vmem:[%s1055_s28 + $0x120] sm:$0xff]  ;;  %v293_v19 = vld [vmem:[%s1055_s28 + $0x130] sm:$0xff] }
  0x1f   : > { %v295_v20 = vld [vmem:[%s1055_s28 + $0x140] sm:$0xff]  ;;  %292 = vst [vmem:[%s1060_s29 + $0x90] sm:$0xff] %v291_v18  ;;  %294 = vst [vmem:[%s1060_s29 + $0x98] sm:$0xff] %v293_v19  ;;  %v297_v21 = vld [vmem:[%s1055_s28 + $0x150] sm:$0xff] }
  0x20   : > { %296 = vst [vmem:[%s1060_s29 + $0xa0] sm:$0xff] %v295_v20  ;;  %v299_v22 = vld [vmem:[%s1055_s28 + $0x160] sm:$0xff]  ;;  %v301_v23 = vld [vmem:[%s1055_s28 + $0x170] sm:$0xff]  ;;  %298 = vst [vmem:[%s1060_s29 + $0xa8] sm:$0xff] %v297_v21 }
  0x21   : > { %300 = vst [vmem:[%s1060_s29 + $0xb0] sm:$0xff] %v299_v22  ;;  %302 = vst [vmem:[%s1060_s29 + $0xb8] sm:$0xff] %v301_v23  ;;  %v303_v24 = vld [vmem:[%s1055_s28 + $0x180] sm:$0xff]  ;;  %v305_v25 = vld [vmem:[%s1055_s28 + $0x190] sm:$0xff] }
  0x22   : > { %v307_v26 = vld [vmem:[%s1055_s28 + $0x1a0] sm:$0xff]  ;;  %304 = vst [vmem:[%s1060_s29 + $0xc0] sm:$0xff] %v303_v24  ;;  %306 = vst [vmem:[%s1060_s29 + $0xc8] sm:$0xff] %v305_v25  ;;  %v309_v27 = vld [vmem:[%s1055_s28 + $0x1b0] sm:$0xff] }
  0x23   : > { %308 = vst [vmem:[%s1060_s29 + $0xd0] sm:$0xff] %v307_v26  ;;  %v311_v28 = vld [vmem:[%s1055_s28 + $0x1c0] sm:$0xff]  ;;  %v313_v29 = vld [vmem:[%s1055_s28 + $0x1d0] sm:$0xff]  ;;  %310 = vst [vmem:[%s1060_s29 + $0xd8] sm:$0xff] %v309_v27 }
  0x24   : > { %312 = vst [vmem:[%s1060_s29 + $0xe0] sm:$0xff] %v311_v28  ;;  %314 = vst [vmem:[%s1060_s29 + $0xe8] sm:$0xff] %v313_v29  ;;  %v315_v30 = vld [vmem:[%s1055_s28 + $0x1e0] sm:$0xff]  ;;  %v317_v31 = vld [vmem:[%s1055_s28 + $0x1f0] sm:$0xff] }
  0x25   : > { %316 = vst [vmem:[%s1060_s29 + $0xf0] sm:$0xff] %v315_v30  ;;  %318 = vst [vmem:[%s1060_s29 + $0xf8] sm:$0xff] %v317_v31 }
  0x26 PF: > { %p807_p8 = scmp.ge.s32.totalorder %s985_s16, 1  ;;  %p331_p9 = scmp.lt.s32.totalorder %s985_s16, 3 }
  0x28   : > { %p332_p10 = pnand %p807_p8, %p331_p9 }
  0x29   : > { %s338_s30 = sand.u32 (!%p332_p10), 1, %s969_s12   ;;  %v946_v32 = vld [vmem:[%s1195_s0 + $0x4] ss:$8 sps:$4 sm:$0xff] (!%p332_p10)   ;;  %v944_v1 = vld [vmem:[%s1195_s0] ss:$8 sps:$4 sm:$0xff] (!%p332_p10)   ;;  %s810_s10 = sshll.u32 (!%p332_p10), %s977_s14, 1  ;;  %v421_v2 = vlaneseq (!%p332_p10) }
  0x2a   : > { %335 = sbr.rel (%p332_p10) target bundleno = 337 (0x151), region = 66  ;;  %s808_s4 = sshll.u32 (!%p332_p10), %s338_s30, 8  ;;  %633 = vmatprep.mubr.bf16.mxu0 (!%p332_p10), %v946_v32 }
  0x2b   : > { %s1131_s7 = scalar_lea.vmem (!%p332_p10), [#allocation2], %s808_s4  ;;  %p379_p11 = scmp.lt.s32.totalorder (!%p332_p10), %s810_s10, 3  ;;  %v422_v3 = vshrl.u32 (!%p332_p10), %v421_v2, 7 }
  0x2c   : > { %v896_v33 = vld [vmem:[%s1131_s7 + $0x4] ss:$8 sps:$4 sm:$0xff] (!%p332_p10)   ;;  %v898_v34 = vld [vmem:[%s1131_s7] ss:$8 sps:$4 sm:$0xff] (!%p332_p10)   ;;  %v899_v35 = vld [vmem:[%s1131_s7 + $0x14] ss:$8 sps:$4 sm:$0xff] (!%p332_p10)  }
  0x2d   : > { %601 = vmatprep.subr.bf16.mxu0 (!%p332_p10), %v896_v33  ;;  %v901_v36 = vld [vmem:[%s1131_s7 + $0x10] ss:$8 sps:$4 sm:$0xff] (!%p332_p10)   ;;  %v902_v37 = vld [vmem:[%s1131_s7 + $0x24] ss:$8 sps:$4 sm:$0xff] (!%p332_p10)   ;;  %v904_v38 = vld [vmem:[%s1131_s7 + $0x20] ss:$8 sps:$4 sm:$0xff] (!%p332_p10)  }
  0x2e   : > { %602 = vmatpush1.bf16.msra.mxu0 (!%p332_p10), %v898_v34  ;;  %v905_v39 = vld [vmem:[%s1131_s7 + $0x34] ss:$8 sps:$4 sm:$0xff] (!%p332_p10)   ;;  %v907_v40 = vld [vmem:[%s1131_s7 + $0x30] ss:$8 sps:$4 sm:$0xff] (!%p332_p10)   ;;  %v908_v41 = vld [vmem:[%s1131_s7 + $0x44] ss:$8 sps:$4 sm:$0xff] (!%p332_p10)  }
  0x2f   : > { %603 = vmatprep.subr.bf16.mxu0 (!%p332_p10), %v899_v35  ;;  %v910_v42 = vld [vmem:[%s1131_s7 + $0x40] ss:$8 sps:$4 sm:$0xff] (!%p332_p10)   ;;  %v911_v43 = vld [vmem:[%s1131_s7 + $0x54] ss:$8 sps:$4 sm:$0xff] (!%p332_p10)   ;;  %v913_v44 = vld [vmem:[%s1131_s7 + $0x50] ss:$8 sps:$4 sm:$0xff] (!%p332_p10)  }
  0x30   : > { %v914_v45 = vld [vmem:[%s1131_s7 + $0x64] ss:$8 sps:$4 sm:$0xff] (!%p332_p10)   ;;  %v916_v46 = vld [vmem:[%s1131_s7 + $0x60] ss:$8 sps:$4 sm:$0xff] (!%p332_p10)   ;;  %v917_v47 = vld [vmem:[%s1131_s7 + $0x74] ss:$8 sps:$4 sm:$0xff] (!%p332_p10)  }
  0x31   : > { %v919_v48 = vld [vmem:[%s1131_s7 + $0x70] ss:$8 sps:$4 sm:$0xff]   ;;  %v920_v49 = vld [vmem:[%s1131_s7 + $0x84] ss:$8 sps:$4 sm:$0xff]   ;;  %v922_v50 = vld [vmem:[%s1131_s7 + $0x80] ss:$8 sps:$4 sm:$0xff]  }
  0x32   : > { %604 = vmatpush1.bf16.msra.mxu0 %v901_v36  ;;  %v923_v51 = vld [vmem:[%s1131_s7 + $0x94] ss:$8 sps:$4 sm:$0xff]   ;;  %v925_v52 = vld [vmem:[%s1131_s7 + $0x90] ss:$8 sps:$4 sm:$0xff]   ;;  %v926_v53 = vld [vmem:[%s1131_s7 + $0xa4] ss:$8 sps:$4 sm:$0xff]  }
  0x33   : > { %605 = vmatprep.subr.bf16.mxu0 %v902_v37  ;;  %v928_v54 = vld [vmem:[%s1131_s7 + $0xa0] ss:$8 sps:$4 sm:$0xff]   ;;  %v929_v55 = vld [vmem:[%s1131_s7 + $0xb4] ss:$8 sps:$4 sm:$0xff]   ;;  %v931_v56 = vld [vmem:[%s1131_s7 + $0xb0] ss:$8 sps:$4 sm:$0xff]  }
  0x34   : > { %v932_v57 = vld [vmem:[%s1131_s7 + $0xc4] ss:$8 sps:$4 sm:$0xff]   ;;  %v934_v58 = vld [vmem:[%s1131_s7 + $0xc0] ss:$8 sps:$4 sm:$0xff]   ;;  %v935_v59 = vld [vmem:[%s1131_s7 + $0xd4] ss:$8 sps:$4 sm:$0xff]  }
  0x35   : > { %v937_v60 = vld [vmem:[%s1131_s7 + $0xd0] ss:$8 sps:$4 sm:$0xff]   ;;  %v938_v61 = vld [vmem:[%s1131_s7 + $0xe4] ss:$8 sps:$4 sm:$0xff]   ;;  %v940_v62 = vld [vmem:[%s1131_s7 + $0xe0] ss:$8 sps:$4 sm:$0xff]  }
  0x36   : > { %606 = vmatpush1.bf16.msra.mxu0 %v904_v38  ;;  %v941_v63 = vld [vmem:[%s1131_s7 + $0xf4] ss:$8 sps:$4 sm:$0xff]   ;;  %v943_v0 = vld [vmem:[%s1131_s7 + $0xf0] ss:$8 sps:$4 sm:$0xff]   ;;  %s1207_s10 = smov (!%p379_p11, %s810_s10), 3  ;;  %v423_v4 = vsub.s32 0, %v422_v3 }
  0x37   : > { %607 = vmatprep.subr.bf16.mxu0 %v905_v39  ;;  %s381_s19 = scalar_lea.vmem %s1197_s2, %s1207_s10  ;;  %v427_v6 = vsub.s32 1, %v422_v3  ;;  %s809_s20 = sshll.u32 %s338_s30, 4 }
  0x38   : > { %v419_v5 = vld [vmem:[%s381_s19] sm:$0x3]  ;;  %s369_s23 = scalar_lea.vmem [#allocation3], %s809_s20  ;;  %s855_s24 = sshll.u32 (%p1042_p6), %s977_s14, 3 }
  0x39   : > { %v424_v7 = vrot.slane %v419_v5, %v423_v4  ;;  %v428_v8 = vrot.slane %v419_v5, %v427_v6  ;;  %s670_s26 = scalar_lea.vmem (%p1042_p6), %s1198_s3, %s855_s24 }
  0x3a   : > { %608 = vmatpush1.bf16.msra.mxu0 %v907_v40 }
  0x3b   : > { %609 = vmatprep.subr.bf16.mxu0 %v908_v41 }
  0x3e   : > { %610 = vmatpush1.bf16.msra.mxu0 %v910_v42 }
  0x3f   : > { %611 = vmatprep.subr.bf16.mxu0 %v911_v43 }
  0x42   : > { %612 = vmatpush1.bf16.msra.mxu0 %v913_v44 }
  0x43   : > { %613 = vmatprep.subr.bf16.mxu0 %v914_v45 }
  0x46   : > { %614 = vmatpush1.bf16.msra.mxu0 %v916_v46 }
  0x47   : > { %615 = vmatprep.subr.bf16.mxu0 %v917_v47 }
  0x4a   : > { %616 = vmatpush1.bf16.msra.mxu0 %v919_v48 }
  0x4b   : > { %617 = vmatprep.subr.bf16.mxu0 %v920_v49 }
  0x4e   : > { %618 = vmatpush1.bf16.msra.mxu0 %v922_v50 }
  0x4f   : > { %619 = vmatprep.subr.bf16.mxu0 %v923_v51 }
  0x52   : > { %620 = vmatpush1.bf16.msra.mxu0 %v925_v52 }
  0x53   : > { %621 = vmatprep.subr.bf16.mxu0 %v926_v53 }
  0x56   : > { %622 = vmatpush1.bf16.msra.mxu0 %v928_v54 }
  0x57   : > { %623 = vmatprep.subr.bf16.mxu0 %v929_v55 }
  0x5a   : > { %624 = vmatpush1.bf16.msra.mxu0 %v931_v56 }
  0x5b   : > { %625 = vmatprep.subr.bf16.mxu0 %v932_v57 }
  0x5e   : > { %626 = vmatpush1.bf16.msra.mxu0 %v934_v58 }
  0x5f   : > { %627 = vmatprep.subr.bf16.mxu0 %v935_v59 }
  0x62   : > { %628 = vmatpush1.bf16.msra.mxu0 %v937_v60 }
  0x63   : > { %629 = vmatprep.subr.bf16.mxu0 %v938_v61 }
  0x66   : > { %630 = vmatpush1.bf16.msra.mxu0 %v940_v62 }
  0x67   : > { %631 = vmatprep.subr.bf16.mxu0 %v941_v63 }
  0x6a   : > { %632 = vmatpush1.bf16.msra.mxu0 %v943_v0 }
  0x6d   : > { %634 = vmatmul.mubr.bf16.vlgmr.msra.gmra.mrb[0].mxu0 %v944_v1 }
 0x140   : > { %v635_v9 = vpop.f32.mrb[0].mxu0 }
 0x141   : > { %v636_v10 = vadd.f32 %v635_v9, %v424_v7  ;;  %v637_v11 = vpop.f32.mrb[1].mxu0 }
 0x142   : > { %v638_v12 = vadd.f32 %v637_v11, %v428_v8  ;;  %v639_v13 = vpop.f32.mrb[2].mxu0  ;;  %664 = sbr.rel (!%p1042_p6) target bundleno = 337 (0x151), region = 74 }
 0x143   : > { %v640_v14 = vadd.f32 %v639_v13, %v424_v7  ;;  %v641_v15 = vpop.f32.mrb[3].mxu0 }
 0x144   : > { %v853_v16 = vpack.c.bf16 %v638_v12, %v636_v10  ;;  %v642_v17 = vadd.f32 %v641_v15, %v428_v8 }
 0x146   : > { %656 = vst [vmem:[%s369_s23] sm:$0xff] %v853_v16  ;;  %v854_v18 = vpack.c.bf16 %v642_v17, %v640_v14 }
 0x148   : > { %657 = vst [vmem:[%s369_s23 + $0x8] sm:$0xff] %v854_v18 }
 0x14d   : > { %v700_v19 = vld [vmem:[%s369_s23] sm:$0xff] }
 0x14e   : > { %701 = vst [vmem:[%s670_s26] sm:$0xff] %v700_v19 }
 0x14f   : > { %v702_v20 = vld [vmem:[%s369_s23 + $0x8] sm:$0xff] }
 0x150   : > { %703 = vst [vmem:[%s670_s26 + $0x10] sm:$0xff] %v702_v20 }
 0x151 PF: > { %s13_s16 = sadd.s32 1, %s985_s16   ;;  %s1200_s12 = smov %s973_s13 }
 0x152   : > { %p10_p12 = scmp.ge.s32.totalorder %s13_s16, 4   ;;  %s1201_s13 = smov %s1047_s22 }
 0x153   : > { %s1202_s14 = smov %s981_s15  ;;  %s1203_s15 = smov %s1205_s17 }
 0x154   :  { %12 = sbr.rel (!%p10_p12) target bundleno = 3 (0x3), region = 149 }

// kernel: resnet18_forward.38
= control target key start
LH: loop header
LB: loop body
LE: loop exit
PB: predicated region body
PF: predicated region fallthrough
CT: control target
= control target key end

     0   :  { %s2774_s0 = inlined_call_operand.vmem [shape: bf16[16,4608], index: 0, kind: input, shape index: {}]   ;;  %s2775_s1 = inlined_call_operand.vmem [shape: bf16[4608,512], index: 1, kind: input, shape index: {}]   ;;  %s2776_s2 = inlined_call_operand.vmem [shape: f32[1,512], index: 2, kind: input, shape index: {}]   ;;  %s2777_s3 = inlined_call_operand.vmem [shape: bf16[16,512], index: 3, kind: input, shape index: {}]   ;;  %s2778_s4 = inlined_call_operand.vmem [shape: bf16[16,512], index: 4, kind: output, shape index: {}]  }
   0x1   :  { %2781 = sst [smem:[#allocation9_spill]] %s2774_s0 }
   0x2   :  { %s2269_s15 = smov 0   ;;  %s2271_s16 = smov 0  }
   0x3   :  { %s2273_s17 = smov 0   ;;  %s2275_s18 = smov 0  }
   0x4   :  { %s2277_s19 = smov 0   ;;  %s2279_s20 = smov 0  }
   0x5   :  { %s2281_s21 = smov 0   ;;  %s2283_s22 = smov 0  }
   0x6   :  { %s2285_s23 = smov 0   ;;  %s2287_s24 = smov 0  }
   0x7   :  { %s2289_s25 = smov 0  }
   0x8 LB: > { %s1769_s26 = sadd.s32 4294967295, %s2241_s25   ;;  %s26_s27 = sadd.s32 1, %s2233_s23  ;;  %s2241_s25 = sphi %s2289_s25, %s14_s25   ;;  %s2237_s24 = sphi %s2287_s24, %s2800_s24   ;;  %s2233_s23 = sphi %s2285_s23, %s2799_s23   ;;  %s2229_s22 = sphi %s2283_s22, %s2798_s22   ;;  %s2225_s21 = sphi %s2281_s21, %s2797_s21   ;;  %s2221_s20 = sphi %s2279_s20, %s2796_s20   ;;  %s2217_s19 = sphi %s2277_s19, %s2795_s19   ;;  %s2213_s18 = sphi %s2275_s18, %s2794_s18   ;;  %s2209_s17 = sphi %s2273_s17, %s2793_s17   ;;  %s2205_s16 = sphi %s2271_s16, %s2792_s16   ;;  %s2201_s15 = sphi %s2269_s15, %s2791_s15  }
   0x9   : > { %p27_p0 = scmp.ge.s32.totalorder %s26_s27, 6  ;;  %s29_s28 = sadd.s32 1, %s2237_s24 }
   0xa   : > { %s42_s29 = sadd.s32 1, %s2221_s20  ;;  %p49_p1 = scmp.ne.s32.totalorder %s2221_s20, %s2217_s19 }
   0xb   : > { %s2802_s27 = smov (%p27_p0, %s26_s27), 0  ;;  %s2804_s28 = smov (!%p27_p0, %s29_s28), %s2237_s24 }
   0xc   : > { %2782 = sst [smem:[#allocation7_spill]] %s2802_s27  ;;  %s38_s30 = ssub.s32 %s2233_s23, %s2802_s27 }
   0xd   : > { %p50_p2 = scmp.eq.s32.totalorder %s2241_s25, 0  ;;  %p31_p3 = scmp.ge.s32.totalorder %s2804_s28, 2 }
   0xe   : > { %p40_p4 = scmp.eq.s32.totalorder %s38_s30, 0  ;;  %s70_s6 = sadd.s32 1, %s2213_s18 }
   0xf   : > { %p2338_p5 = por %p50_p2, %p49_p1  ;;  %s2806_s28 = smov (%p31_p3, %s2804_s28), 0 }
  0x10   : > { %2784 = sst [smem:[#allocation8_spill]] %s2806_s28  ;;  %s66_s8 = ssub.s32 %s2237_s24, %s2806_s28 }
  0x11   : > { %s2346_s7 = scalar_select %p40_p4, %s2221_s20, %s42_s29  }
  0x12   : > { %p77_p6 = scmp.ne.s32.totalorder %s2213_s18, %s2209_s17  ;;  %s67_s9 = sor.u32 %s66_s8, %s38_s30 }
  0x13   : > { %p122_p7 = scmp.eq.s32.totalorder %s66_s8, 0  ;;  %p68_p8 = scmp.eq.s32.totalorder %s67_s9, 0 }
  0x14   : > { %p2354_p9 = por %p77_p6, %p50_p2  ;;  %s124_s11 = sadd.s32 1, %s2205_s16 }
  0x15   : > { %p131_p10 = scmp.ne.s32.totalorder %s2205_s16, %s2201_s15  ;;  %p163_p12 = scmp.eq.s32.totalorder %s1769_s26, 11 }
  0x16   : > { %s2362_s12 = scalar_select %p68_p8, %s2213_s18, %s70_s6  }
  0x17   : > { %s2365_s13 = scalar_select %p122_p7, %s2205_s16, %s124_s11  }
  0x18   : > { %p2369_p11 = por %p131_p10, %p50_p2  ;;  %p2373_p13 = por %p163_p12, %p131_p10 }
  0x19   : > { %p1772_p0 = scmp.ge.s32.totalorder %s2241_s25, 12 }
  0x1b   : > { %185 = sbr.rel (%p1772_p0) target bundleno = 109 (0x6d), region = 16 }
  0x22   : > { %188 = sbr.rel (!%p2338_p5) target bundleno = 46 (0x2e), region = 20  ;;  %s190_s30 = sand.u32 (%p2338_p5), 1, %s2221_s20  }
  0x23   : > { %s1895_s6 = smul.u32 (%p2338_p5), 24, %s2233_s23  ;;  %s2788_s0 = sld [smem:[#allocation9_spill]] (%p2338_p5) }
  0x24   : > { %s1909_s8 = smul.u32 (%p2338_p5), 48, %s190_s30 }
  0x26   : > { %s192_s26 = scalar_lea.vmem (%p2338_p5), [#allocation3], %s1909_s8 }
  0x29   : > { %s198_s28 = scalar_lea.vmem %s2788_s0, %s1895_s6 }
  0x2a   : > { %v211_v0 = vld [vmem:[%s198_s28] sm:$0xff]  ;;  %v213_v1 = vld [vmem:[%s198_s28 + $0x8] sm:$0xff]  ;;  %v215_v2 = vld [vmem:[%s198_s28 + $0x10] sm:$0xff] }
  0x2b   : > { %212 = vst [vmem:[%s192_s26] sm:$0xff] %v211_v0  ;;  %214 = vst [vmem:[%s192_s26 + $0x8] sm:$0xff] %v213_v1  ;;  %v217_v3 = vld [vmem:[%s198_s28 + $0x90] sm:$0xff]  ;;  %v219_v4 = vld [vmem:[%s198_s28 + $0x98] sm:$0xff] }
  0x2c   : > { %216 = vst [vmem:[%s192_s26 + $0x10] sm:$0xff] %v215_v2  ;;  %v221_v5 = vld [vmem:[%s198_s28 + $0xa0] sm:$0xff]  ;;  %218 = vst [vmem:[%s192_s26 + $0x18] sm:$0xff] %v217_v3 }
  0x2d   : > { %220 = vst [vmem:[%s192_s26 + $0x20] sm:$0xff] %v219_v4  ;;  %222 = vst [vmem:[%s192_s26 + $0x28] sm:$0xff] %v221_v5 }
  0x2e PF: > { %228 = sbr.rel (!%p2354_p9) target bundleno = 102 (0x66), region = 43  ;;  %s230_s5 = sand.u32 (%p2354_p9), 1, %s2213_s18  }
  0x2f   : > { %s1910_s30 = smul.u32 (%p2354_p9), 768, %s230_s5  ;;  %s1774_s6 = sshll.u32 (%p2354_p9), %s2237_s24, 1 }
  0x30   : > { %s1896_s8 = smul.u32 (%p2354_p9), 384, %s2233_s23 }
  0x31   : > { %s2398_s10 = scalar_lea.vmem (%p2354_p9), [#allocation4], %s1910_s30 }
  0x32   : > { %s236_s9 = sadd.s32 (%p2354_p9), %s1896_s8, %s1774_s6 }
  0x33   : > { %s1776_s11 = sshll.u32 (%p2354_p9), %s236_s9, 2 }
  0x34   : > { %s2393_s28 = scalar_lea.vmem (%p2354_p9), %s2775_s1, %s1776_s11 }
  0x35   : > { %v456_v6 = vld [vmem:[%s2393_s28] sm:$0xff]  ;;  %v458_v7 = vld [vmem:[%s2393_s28 + $0x10] sm:$0xff] }
  0x36   : > { %v460_v8 = vld [vmem:[%s2393_s28 + $0x20] sm:$0xff]  ;;  %457 = vst [vmem:[%s2398_s10] sm:$0xff] %v456_v6  ;;  %459 = vst [vmem:[%s2398_s10 + $0x8] sm:$0xff] %v458_v7  ;;  %v462_v9 = vld [vmem:[%s2393_s28 + $0x30] sm:$0xff] }
  0x37   : > { %461 = vst [vmem:[%s2398_s10 + $0x10] sm:$0xff] %v460_v8  ;;  %v464_v10 = vld [vmem:[%s2393_s28 + $0x40] sm:$0xff]  ;;  %v466_v11 = vld [vmem:[%s2393_s28 + $0x50] sm:$0xff]  ;;  %463 = vst [vmem:[%s2398_s10 + $0x18] sm:$0xff] %v462_v9 }
  0x38   : > { %465 = vst [vmem:[%s2398_s10 + $0x20] sm:$0xff] %v464_v10  ;;  %467 = vst [vmem:[%s2398_s10 + $0x28] sm:$0xff] %v466_v11  ;;  %v468_v12 = vld [vmem:[%s2393_s28 + $0x60] sm:$0xff]  ;;  %v470_v13 = vld [vmem:[%s2393_s28 + $0x70] sm:$0xff] }
  0x39   : > { %v472_v14 = vld [vmem:[%s2393_s28 + $0x80] sm:$0xff]  ;;  %469 = vst [vmem:[%s2398_s10 + $0x30] sm:$0xff] %v468_v12  ;;  %471 = vst [vmem:[%s2398_s10 + $0x38] sm:$0xff] %v470_v13  ;;  %v474_v15 = vld [vmem:[%s2393_s28 + $0x90] sm:$0xff] }
  0x3a   : > { %473 = vst [vmem:[%s2398_s10 + $0x40] sm:$0xff] %v472_v14  ;;  %v476_v16 = vld [vmem:[%s2393_s28 + $0xa0] sm:$0xff]  ;;  %v478_v17 = vld [vmem:[%s2393_s28 + $0xb0] sm:$0xff]  ;;  %475 = vst [vmem:[%s2398_s10 + $0x48] sm:$0xff] %v474_v15 }
  0x3b   : > { %477 = vst [vmem:[%s2398_s10 + $0x50] sm:$0xff] %v476_v16  ;;  %479 = vst [vmem:[%s2398_s10 + $0x58] sm:$0xff] %v478_v17  ;;  %v480_v18 = vld [vmem:[%s2393_s28 + $0xc0] sm:$0xff]  ;;  %v482_v19 = vld [vmem:[%s2393_s28 + $0xd0] sm:$0xff] }
  0x3c   : > { %v484_v20 = vld [vmem:[%s2393_s28 + $0xe0] sm:$0xff]  ;;  %481 = vst [vmem:[%s2398_s10 + $0x60] sm:$0xff] %v480_v18  ;;  %483 = vst [vmem:[%s2398_s10 + $0x68] sm:$0xff] %v482_v19  ;;  %v486_v21 = vld [vmem:[%s2393_s28 + $0xf0] sm:$0xff] }
  0x3d   : > { %485 = vst [vmem:[%s2398_s10 + $0x70] sm:$0xff] %v484_v20  ;;  %v488_v22 = vld [vmem:[%s2393_s28 + $0x100] sm:$0xff]  ;;  %v490_v23 = vld [vmem:[%s2393_s28 + $0x110] sm:$0xff]  ;;  %487 = vst [vmem:[%s2398_s10 + $0x78] sm:$0xff] %v486_v21 }
  0x3e   : > { %489 = vst [vmem:[%s2398_s10 + $0x80] sm:$0xff] %v488_v22  ;;  %491 = vst [vmem:[%s2398_s10 + $0x88] sm:$0xff] %v490_v23  ;;  %v492_v24 = vld [vmem:[%s2393_s28 + $0x120] sm:$0xff]  ;;  %v494_v25 = vld [vmem:[%s2393_s28 + $0x130] sm:$0xff] }
  0x3f   : > { %v496_v26 = vld [vmem:[%s2393_s28 + $0x140] sm:$0xff]  ;;  %493 = vst [vmem:[%s2398_s10 + $0x90] sm:$0xff] %v492_v24  ;;  %495 = vst [vmem:[%s2398_s10 + $0x98] sm:$0xff] %v494_v25  ;;  %v498_v27 = vld [vmem:[%s2393_s28 + $0x150] sm:$0xff] }
  0x40   : > { %497 = vst [vmem:[%s2398_s10 + $0xa0] sm:$0xff] %v496_v26  ;;  %v500_v28 = vld [vmem:[%s2393_s28 + $0x160] sm:$0xff]  ;;  %v502_v29 = vld [vmem:[%s2393_s28 + $0x170] sm:$0xff]  ;;  %499 = vst [vmem:[%s2398_s10 + $0xa8] sm:$0xff] %v498_v27 }
  0x41   : > { %501 = vst [vmem:[%s2398_s10 + $0xb0] sm:$0xff] %v500_v28  ;;  %503 = vst [vmem:[%s2398_s10 + $0xb8] sm:$0xff] %v502_v29  ;;  %v504_v30 = vld [vmem:[%s2393_s28 + $0x180] sm:$0xff]  ;;  %v506_v31 = vld [vmem:[%s2393_s28 + $0x190] sm:$0xff] }
  0x42   : > { %v508_v32 = vld [vmem:[%s2393_s28 + $0x1a0] sm:$0xff]  ;;  %505 = vst [vmem:[%s2398_s10 + $0xc0] sm:$0xff] %v504_v30  ;;  %507 = vst [vmem:[%s2398_s10 + $0xc8] sm:$0xff] %v506_v31  ;;  %v510_v33 = vld [vmem:[%s2393_s28 + $0x1b0] sm:$0xff] }
  0x43   : > { %509 = vst [vmem:[%s2398_s10 + $0xd0] sm:$0xff] %v508_v32  ;;  %v512_v34 = vld [vmem:[%s2393_s28 + $0x1c0] sm:$0xff]  ;;  %v514_v35 = vld [vmem:[%s2393_s28 + $0x1d0] sm:$0xff]  ;;  %511 = vst [vmem:[%s2398_s10 + $0xd8] sm:$0xff] %v510_v33 }
  0x44   : > { %513 = vst [vmem:[%s2398_s10 + $0xe0] sm:$0xff] %v512_v34  ;;  %515 = vst [vmem:[%s2398_s10 + $0xe8] sm:$0xff] %v514_v35  ;;  %v516_v36 = vld [vmem:[%s2393_s28 + $0x1e0] sm:$0xff]  ;;  %v518_v37 = vld [vmem:[%s2393_s28 + $0x1f0] sm:$0xff] }
  0x45   : > { %v520_v38 = vld [vmem:[%s2393_s28 + $0x200] sm:$0xff]  ;;  %517 = vst [vmem:[%s2398_s10 + $0xf0] sm:$0xff] %v516_v36  ;;  %519 = vst [vmem:[%s2398_s10 + $0xf8] sm:$0xff] %v518_v37  ;;  %v522_v39 = vld [vmem:[%s2393_s28 + $0x210] sm:$0xff] }
  0x46   : > { %521 = vst [vmem:[%s2398_s10 + $0x100] sm:$0xff] %v520_v38  ;;  %v524_v40 = vld [vmem:[%s2393_s28 + $0x220] sm:$0xff]  ;;  %v526_v41 = vld [vmem:[%s2393_s28 + $0x230] sm:$0xff]  ;;  %523 = vst [vmem:[%s2398_s10 + $0x108] sm:$0xff] %v522_v39 }
  0x47   : > { %525 = vst [vmem:[%s2398_s10 + $0x110] sm:$0xff] %v524_v40  ;;  %527 = vst [vmem:[%s2398_s10 + $0x118] sm:$0xff] %v526_v41  ;;  %v528_v42 = vld [vmem:[%s2393_s28 + $0x240] sm:$0xff]  ;;  %v530_v43 = vld [vmem:[%s2393_s28 + $0x250] sm:$0xff] }
  0x48   : > { %v532_v44 = vld [vmem:[%s2393_s28 + $0x260] sm:$0xff]  ;;  %529 = vst [vmem:[%s2398_s10 + $0x120] sm:$0xff] %v528_v42  ;;  %531 = vst [vmem:[%s2398_s10 + $0x128] sm:$0xff] %v530_v43  ;;  %v534_v45 = vld [vmem:[%s2393_s28 + $0x270] sm:$0xff] }
  0x49   : > { %533 = vst [vmem:[%s2398_s10 + $0x130] sm:$0xff] %v532_v44  ;;  %v536_v46 = vld [vmem:[%s2393_s28 + $0x280] sm:$0xff]  ;;  %v538_v47 = vld [vmem:[%s2393_s28 + $0x290] sm:$0xff]  ;;  %535 = vst [vmem:[%s2398_s10 + $0x138] sm:$0xff] %v534_v45 }
  0x4a   : > { %537 = vst [vmem:[%s2398_s10 + $0x140] sm:$0xff] %v536_v46  ;;  %539 = vst [vmem:[%s2398_s10 + $0x148] sm:$0xff] %v538_v47  ;;  %v540_v48 = vld [vmem:[%s2393_s28 + $0x2a0] sm:$0xff]  ;;  %v542_v49 = vld [vmem:[%s2393_s28 + $0x2b0] sm:$0xff] }
  0x4b   : > { %v544_v50 = vld [vmem:[%s2393_s28 + $0x2c0] sm:$0xff]  ;;  %541 = vst [vmem:[%s2398_s10 + $0x150] sm:$0xff] %v540_v48  ;;  %543 = vst [vmem:[%s2398_s10 + $0x158] sm:$0xff] %v542_v49  ;;  %v546_v51 = vld [vmem:[%s2393_s28 + $0x2d0] sm:$0xff] }
  0x4c   : > { %545 = vst [vmem:[%s2398_s10 + $0x160] sm:$0xff] %v544_v50  ;;  %v548_v52 = vld [vmem:[%s2393_s28 + $0x2e0] sm:$0xff]  ;;  %v550_v53 = vld [vmem:[%s2393_s28 + $0x2f0] sm:$0xff]  ;;  %547 = vst [vmem:[%s2398_s10 + $0x168] sm:$0xff] %v546_v51 }
  0x4d   : > { %549 = vst [vmem:[%s2398_s10 + $0x170] sm:$0xff] %v548_v52  ;;  %551 = vst [vmem:[%s2398_s10 + $0x178] sm:$0xff] %v550_v53  ;;  %v552_v54 = vld [vmem:[%s2393_s28 + $0x300] sm:$0xff]  ;;  %v554_v55 = vld [vmem:[%s2393_s28 + $0x310] sm:$0xff] }
  0x4e   : > { %v556_v56 = vld [vmem:[%s2393_s28 + $0x320] sm:$0xff]  ;;  %553 = vst [vmem:[%s2398_s10 + $0x180] sm:$0xff] %v552_v54  ;;  %555 = vst [vmem:[%s2398_s10 + $0x188] sm:$0xff] %v554_v55  ;;  %v558_v57 = vld [vmem:[%s2393_s28 + $0x330] sm:$0xff] }
  0x4f   : > { %557 = vst [vmem:[%s2398_s10 + $0x190] sm:$0xff] %v556_v56  ;;  %v560_v58 = vld [vmem:[%s2393_s28 + $0x340] sm:$0xff]  ;;  %v562_v59 = vld [vmem:[%s2393_s28 + $0x350] sm:$0xff]  ;;  %559 = vst [vmem:[%s2398_s10 + $0x198] sm:$0xff] %v558_v57 }
  0x50   : > { %561 = vst [vmem:[%s2398_s10 + $0x1a0] sm:$0xff] %v560_v58  ;;  %563 = vst [vmem:[%s2398_s10 + $0x1a8] sm:$0xff] %v562_v59  ;;  %v564_v60 = vld [vmem:[%s2393_s28 + $0x360] sm:$0xff]  ;;  %v566_v61 = vld [vmem:[%s2393_s28 + $0x370] sm:$0xff] }
  0x51   : > { %v568_v62 = vld [vmem:[%s2393_s28 + $0x380] sm:$0xff]  ;;  %565 = vst [vmem:[%s2398_s10 + $0x1b0] sm:$0xff] %v564_v60  ;;  %567 = vst [vmem:[%s2398_s10 + $0x1b8] sm:$0xff] %v566_v61  ;;  %v570_v63 = vld [vmem:[%s2393_s28 + $0x390] sm:$0xff] }
  0x52   : > { %569 = vst [vmem:[%s2398_s10 + $0x1c0] sm:$0xff] %v568_v62  ;;  %v572_v0 = vld [vmem:[%s2393_s28 + $0x3a0] sm:$0xff]  ;;  %v574_v1 = vld [vmem:[%s2393_s28 + $0x3b0] sm:$0xff]  ;;  %571 = vst [vmem:[%s2398_s10 + $0x1c8] sm:$0xff] %v570_v63 }
  0x53   : > { %573 = vst [vmem:[%s2398_s10 + $0x1d0] sm:$0xff] %v572_v0  ;;  %575 = vst [vmem:[%s2398_s10 + $0x1d8] sm:$0xff] %v574_v1  ;;  %v576_v2 = vld [vmem:[%s2393_s28 + $0x3c0] sm:$0xff]  ;;  %v578_v3 = vld [vmem:[%s2393_s28 + $0x3d0] sm:$0xff] }
  0x54   : > { %v580_v4 = vld [vmem:[%s2393_s28 + $0x3e0] sm:$0xff]  ;;  %577 = vst [vmem:[%s2398_s10 + $0x1e0] sm:$0xff] %v576_v2  ;;  %579 = vst [vmem:[%s2398_s10 + $0x1e8] sm:$0xff] %v578_v3  ;;  %v582_v5 = vld [vmem:[%s2393_s28 + $0x3f0] sm:$0xff] }
  0x55   : > { %581 = vst [vmem:[%s2398_s10 + $0x1f0] sm:$0xff] %v580_v4  ;;  %v584_v6 = vld [vmem:[%s2393_s28 + $0x400] sm:$0xff]  ;;  %v586_v7 = vld [vmem:[%s2393_s28 + $0x410] sm:$0xff]  ;;  %583 = vst [vmem:[%s2398_s10 + $0x1f8] sm:$0xff] %v582_v5 }
  0x56   : > { %585 = vst [vmem:[%s2398_s10 + $0x200] sm:$0xff] %v584_v6  ;;  %587 = vst [vmem:[%s2398_s10 + $0x208] sm:$0xff] %v586_v7  ;;  %v588_v8 = vld [vmem:[%s2393_s28 + $0x420] sm:$0xff]  ;;  %v590_v9 = vld [vmem:[%s2393_s28 + $0x430] sm:$0xff] }
  0x57   : > { %v592_v10 = vld [vmem:[%s2393_s28 + $0x440] sm:$0xff]  ;;  %589 = vst [vmem:[%s2398_s10 + $0x210] sm:$0xff] %v588_v8  ;;  %591 = vst [vmem:[%s2398_s10 + $0x218] sm:$0xff] %v590_v9  ;;  %v594_v11 = vld [vmem:[%s2393_s28 + $0x450] sm:$0xff] }
  0x58   : > { %593 = vst [vmem:[%s2398_s10 + $0x220] sm:$0xff] %v592_v10  ;;  %v596_v12 = vld [vmem:[%s2393_s28 + $0x460] sm:$0xff]  ;;  %v598_v13 = vld [vmem:[%s2393_s28 + $0x470] sm:$0xff]  ;;  %595 = vst [vmem:[%s2398_s10 + $0x228] sm:$0xff] %v594_v11 }
  0x59   : > { %597 = vst [vmem:[%s2398_s10 + $0x230] sm:$0xff] %v596_v12  ;;  %599 = vst [vmem:[%s2398_s10 + $0x238] sm:$0xff] %v598_v13  ;;  %v600_v14 = vld [vmem:[%s2393_s28 + $0x480] sm:$0xff]  ;;  %v602_v15 = vld [vmem:[%s2393_s28 + $0x490] sm:$0xff] }
  0x5a   : > { %v604_v16 = vld [vmem:[%s2393_s28 + $0x4a0] sm:$0xff]  ;;  %601 = vst [vmem:[%s2398_s10 + $0x240] sm:$0xff] %v600_v14  ;;  %603 = vst [vmem:[%s2398_s10 + $0x248] sm:$0xff] %v602_v15  ;;  %v606_v17 = vld [vmem:[%s2393_s28 + $0x4b0] sm:$0xff] }
  0x5b   : > { %605 = vst [vmem:[%s2398_s10 + $0x250] sm:$0xff] %v604_v16  ;;  %v608_v18 = vld [vmem:[%s2393_s28 + $0x4c0] sm:$0xff]  ;;  %v610_v19 = vld [vmem:[%s2393_s28 + $0x4d0] sm:$0xff]  ;;  %607 = vst [vmem:[%s2398_s10 + $0x258] sm:$0xff] %v606_v17 }
  0x5c   : > { %609 = vst [vmem:[%s2398_s10 + $0x260] sm:$0xff] %v608_v18  ;;  %611 = vst [vmem:[%s2398_s10 + $0x268] sm:$0xff] %v610_v19  ;;  %v612_v20 = vld [vmem:[%s2393_s28 + $0x4e0] sm:$0xff]  ;;  %v614_v21 = vld [vmem:[%s2393_s28 + $0x4f0] sm:$0xff] }
  0x5d   : > { %v616_v22 = vld [vmem:[%s2393_s28 + $0x500] sm:$0xff]  ;;  %613 = vst [vmem:[%s2398_s10 + $0x270] sm:$0xff] %v612_v20  ;;  %615 = vst [vmem:[%s2398_s10 + $0x278] sm:$0xff] %v614_v21  ;;  %v618_v23 = vld [vmem:[%s2393_s28 + $0x510] sm:$0xff] }
  0x5e   : > { %617 = vst [vmem:[%s2398_s10 + $0x280] sm:$0xff] %v616_v22  ;;  %v620_v24 = vld [vmem:[%s2393_s28 + $0x520] sm:$0xff]  ;;  %v622_v25 = vld [vmem:[%s2393_s28 + $0x530] sm:$0xff]  ;;  %619 = vst [vmem:[%s2398_s10 + $0x288] sm:$0xff] %v618_v23 }
  0x5f   : > { %621 = vst [vmem:[%s2398_s10 + $0x290] sm:$0xff] %v620_v24  ;;  %623 = vst [vmem:[%s2398_s10 + $0x298] sm:$0xff] %v622_v25  ;;  %v624_v26 = vld [vmem:[%s2393_s28 + $0x540] sm:$0xff]  ;;  %v626_v27 = vld [vmem:[%s2393_s28 + $0x550] sm:$0xff] }
  0x60   : > { %v628_v28 = vld [vmem:[%s2393_s28 + $0x560] sm:$0xff]  ;;  %625 = vst [vmem:[%s2398_s10 + $0x2a0] sm:$0xff] %v624_v26  ;;  %627 = vst [vmem:[%s2398_s10 + $0x2a8] sm:$0xff] %v626_v27  ;;  %v630_v29 = vld [vmem:[%s2393_s28 + $0x570] sm:$0xff] }
  0x61   : > { %629 = vst [vmem:[%s2398_s10 + $0x2b0] sm:$0xff] %v628_v28  ;;  %v632_v30 = vld [vmem:[%s2393_s28 + $0x580] sm:$0xff]  ;;  %v634_v31 = vld [vmem:[%s2393_s28 + $0x590] sm:$0xff]  ;;  %631 = vst [vmem:[%s2398_s10 + $0x2b8] sm:$0xff] %v630_v29 }
  0x62   : > { %633 = vst [vmem:[%s2398_s10 + $0x2c0] sm:$0xff] %v632_v30  ;;  %635 = vst [vmem:[%s2398_s10 + $0x2c8] sm:$0xff] %v634_v31  ;;  %v636_v32 = vld [vmem:[%s2393_s28 + $0x5a0] sm:$0xff]  ;;  %v638_v33 = vld [vmem:[%s2393_s28 + $0x5b0] sm:$0xff] }
  0x63   : > { %v640_v34 = vld [vmem:[%s2393_s28 + $0x5c0] sm:$0xff]  ;;  %637 = vst [vmem:[%s2398_s10 + $0x2d0] sm:$0xff] %v636_v32  ;;  %639 = vst [vmem:[%s2398_s10 + $0x2d8] sm:$0xff] %v638_v33  ;;  %v642_v35 = vld [vmem:[%s2393_s28 + $0x5d0] sm:$0xff] }
  0x64   : > { %641 = vst [vmem:[%s2398_s10 + $0x2e0] sm:$0xff] %v640_v34  ;;  %v644_v36 = vld [vmem:[%s2393_s28 + $0x5e0] sm:$0xff]  ;;  %v646_v37 = vld [vmem:[%s2393_s28 + $0x5f0] sm:$0xff]  ;;  %643 = vst [vmem:[%s2398_s10 + $0x2e8] sm:$0xff] %v642_v35 }
  0x65   : > { %645 = vst [vmem:[%s2398_s10 + $0x2f0] sm:$0xff] %v644_v36  ;;  %647 = vst [vmem:[%s2398_s10 + $0x2f8] sm:$0xff] %v646_v37 }
  0x66 PF: > { %661 = sbr.rel (!%p2369_p11) target bundleno = 109 (0x6d), region = 85  ;;  %s663_s0 = sand.u32 (%p2369_p11), 1, %s2205_s16  }
  0x67   : > { %s1897_s27 = sshll.u32 (%p2369_p11), %s2237_s24, 3  ;;  %s1777_s26 = sshll.u32 (%p2369_p11), %s663_s0, 4 }
  0x68   : > { %s671_s6 = scalar_lea.vmem (%p2369_p11), %s2777_s3, %s1897_s27  ;;  %s665_s8 = scalar_lea.vmem (%p2369_p11), [#allocation5], %s1777_s26 }
  0x69   : > { %v701_v38 = vld [vmem:[%s671_s6] sm:$0xff] (%p2369_p11)  ;;  %v703_v39 = vld [vmem:[%s671_s6 + $0x10] sm:$0xff] (%p2369_p11) }
  0x6a   : > { %702 = vst [vmem:[%s665_s8] sm:$0xff] (%p2369_p11), %v701_v38  ;;  %704 = vst [vmem:[%s665_s8 + $0x8] sm:$0xff] (%p2369_p11), %v703_v39 }
  0x6d PF: > { %p1780_p1 = scmp.ge.s32.totalorder %s2241_s25, 1  ;;  %p709_p2 = scmp.lt.s32.totalorder %s2241_s25, 13 }
  0x6f   : > { %p710_p3 = pnand %p1780_p1, %p709_p2 }
  0x70   : > { %s716_s14 = sand.u32 (!%p710_p3), 1, %s2217_s19   ;;  %s723_s9 = sand.u32 (!%p710_p3), 1, %s2209_s17  }
  0x71   : > { %713 = sbr.rel (%p710_p3) target bundleno = 500 (0x1f4), region = 123  ;;  %s730_s28 = sand.u32 (!%p710_p3), 1, %s2201_s15  }
  0x72   : > { %s1911_s11 = smul.u32 (!%p710_p3), 48, %s716_s14  ;;  %s2601_s0 = sshll.u32 (!%p710_p3), %s730_s28, 4 }
  0x73   : > { %s1912_s10 = smul.u32 (!%p710_p3), 768, %s723_s9  ;;  %s1783_s27 = sshll.u32 (!%p710_p3), %s2229_s22, 1 }
  0x74   : > { %p771_p4 = scmp.lt.s32.totalorder (!%p710_p3), %s1783_s27, 3  ;;  %s2610_s6 = scalar_lea.vmem (!%p710_p3), [#allocation3], %s1911_s11 }
  0x75   : > { %s2612_s19 = scalar_lea.vmem (!%p710_p3), [#allocation4], %s1912_s10  ;;  %s732_s17 = scalar_lea.vmem (!%p710_p3), [#allocation5], %s2601_s0 }
  0x76   : > { %s2616_s15 = scalar_lea.vmem (!%p710_p3), [#allocation6], %s2601_s0  ;;  %p1784_p5 = scmp.ne.s32.totalorder (!%p710_p3), %s2225_s21, 0 }
  0x78   : > { %s2808_s27 = smov (!%p771_p4, %s1783_s27), 3  ;;  %782 = sbr.rel (%p1784_p5) target bundleno = 127 (0x7f), region = 139 }
  0x79   : > { %s773_s30 = scalar_lea.vmem %s2776_s2, %s2808_s27  ;;  %v2243_v40 = vmov (!%p1784_p5), 0.0  }
  0x7a   : > { %783 = vst [vmem:[#allocation2] sm:$0xff] (!%p1784_p5), %v2243_v40  ;;  %784 = vst [vmem:[#allocation2 + $0x8] sm:$0xff] (!%p1784_p5), %v2243_v40 }
  0x7b   : > { %785 = vst [vmem:[#allocation2 + $0x10] sm:$0xff] (!%p1784_p5), %v2243_v40  ;;  %786 = vst [vmem:[#allocation2 + $0x18] sm:$0xff] (!%p1784_p5), %v2243_v40 }
  0x7f PF: > { %v2002_v41 = vld [vmem:[%s2612_s19 + $0x104] ss:$8 sps:$4 sm:$0xff]   ;;  %v2004_v42 = vld [vmem:[%s2612_s19 + $0x100] ss:$8 sps:$4 sm:$0xff]   ;;  %v2005_v43 = vld [vmem:[%s2612_s19 + $0x114] ss:$8 sps:$4 sm:$0xff]  }
  0x80   : > { %1446 = vmatprep.subr.bf16.mxu0 %v2002_v41  ;;  %v2007_v44 = vld [vmem:[%s2612_s19 + $0x110] ss:$8 sps:$4 sm:$0xff]   ;;  %v2008_v45 = vld [vmem:[%s2612_s19 + $0x124] ss:$8 sps:$4 sm:$0xff]   ;;  %v2010_v46 = vld [vmem:[%s2612_s19 + $0x120] ss:$8 sps:$4 sm:$0xff]  }
  0x81   : > { %1447 = vmatpush1.bf16.msra.mxu0 %v2004_v42  ;;  %v2011_v47 = vld [vmem:[%s2612_s19 + $0x134] ss:$8 sps:$4 sm:$0xff]   ;;  %v2013_v48 = vld [vmem:[%s2612_s19 + $0x130] ss:$8 sps:$4 sm:$0xff]   ;;  %v2014_v49 = vld [vmem:[%s2612_s19 + $0x144] ss:$8 sps:$4 sm:$0xff]  }
  0x82   : > { %1448 = vmatprep.subr.bf16.mxu0 %v2005_v43  ;;  %v2016_v50 = vld [vmem:[%s2612_s19 + $0x140] ss:$8 sps:$4 sm:$0xff]   ;;  %v2017_v51 = vld [vmem:[%s2612_s19 + $0x154] ss:$8 sps:$4 sm:$0xff]   ;;  %v2019_v52 = vld [vmem:[%s2612_s19 + $0x150] ss:$8 sps:$4 sm:$0xff]  }
  0x83   : > { %v2020_v53 = vld [vmem:[%s2612_s19 + $0x164] ss:$8 sps:$4 sm:$0xff]   ;;  %v2052_v55 = vld [vmem:[%s2612_s19] ss:$8 sps:$4 sm:$0xff]   ;;  %v2023_v58 = vld [vmem:[%s2612_s19 + $0x174] ss:$8 sps:$4 sm:$0xff]  }
  0x84   : > { %v2049_v54 = vld [vmem:[%s2612_s19 + $0x4] ss:$8 sps:$4 sm:$0xff]   ;;  %v2022_v56 = vld [vmem:[%s2612_s19 + $0x160] ss:$8 sps:$4 sm:$0xff]   ;;  %v2059_v59 = vld [vmem:[%s2612_s19 + $0x14] ss:$8 sps:$4 sm:$0xff]  }
  0x85   : > { %1449 = vmatpush1.bf16.msra.mxu0 %v2007_v44  ;;  %1403 = vmatprep.subr.bf16.mxu1 %v2049_v54  ;;  %v2055_v57 = vld [vmem:[%s2610_s6 + $0xc] ss:$24 sps:$4 sm:$0xff]   ;;  %v2061_v60 = vld [vmem:[%s2612_s19 + $0x10] ss:$8 sps:$4 sm:$0xff]   ;;  %v2067_v0 = vld [vmem:[%s2612_s19 + $0x20] ss:$8 sps:$4 sm:$0xff]  }
  0x86   : > { %1450 = vmatprep.subr.bf16.mxu0 %v2008_v45  ;;  %1404 = vmatpush1.bf16.msra.mxu1 %v2052_v55  ;;  %v2025_v61 = vld [vmem:[%s2612_s19 + $0x170] ss:$8 sps:$4 sm:$0xff]   ;;  %v2026_v62 = vld [vmem:[%s2612_s19 + $0x184] ss:$8 sps:$4 sm:$0xff]   ;;  %v2028_v1 = vld [vmem:[%s2612_s19 + $0x180] ss:$8 sps:$4 sm:$0xff]  }
  0x87   : > { %1478 = vmatprep.mubr.bf16.mxu0 %v2055_v57  ;;  %1405 = vmatprep.subr.bf16.mxu1 %v2059_v59  ;;  %v2065_v63 = vld [vmem:[%s2612_s19 + $0x24] ss:$8 sps:$4 sm:$0xff]   ;;  %v2071_v2 = vld [vmem:[%s2612_s19 + $0x34] ss:$8 sps:$4 sm:$0xff]   ;;  %v2073_v4 = vld [vmem:[%s2612_s19 + $0x30] ss:$8 sps:$4 sm:$0xff]  }
  0x88   : > { %v2029_v3 = vld [vmem:[%s2612_s19 + $0x194] ss:$8 sps:$4 sm:$0xff]   ;;  %v2077_v5 = vld [vmem:[%s2612_s19 + $0x44] ss:$8 sps:$4 sm:$0xff]   ;;  %v2031_v6 = vld [vmem:[%s2612_s19 + $0x190] ss:$8 sps:$4 sm:$0xff]  }
  0x89   : > { %1451 = vmatpush1.bf16.msra.mxu0 %v2010_v46  ;;  %v2032_v7 = vld [vmem:[%s2612_s19 + $0x1a4] ss:$8 sps:$4 sm:$0xff]   ;;  %v2079_v8 = vld [vmem:[%s2612_s19 + $0x40] ss:$8 sps:$4 sm:$0xff]   ;;  %v2083_v9 = vld [vmem:[%s2612_s19 + $0x54] ss:$8 sps:$4 sm:$0xff]  }
  0x8a   : > { %1452 = vmatprep.subr.bf16.mxu0 %v2011_v47  ;;  %1406 = vmatpush1.bf16.msra.mxu1 %v2061_v60  ;;  %v2034_v10 = vld [vmem:[%s2612_s19 + $0x1a0] ss:$8 sps:$4 sm:$0xff]   ;;  %v2035_v11 = vld [vmem:[%s2612_s19 + $0x1b4] ss:$8 sps:$4 sm:$0xff]   ;;  %v2085_v12 = vld [vmem:[%s2612_s19 + $0x50] ss:$8 sps:$4 sm:$0xff]  }
  0x8b   : > { %1407 = vmatprep.subr.bf16.mxu1 %v2065_v63  ;;  %v2089_v13 = vld [vmem:[%s2612_s19 + $0x64] ss:$8 sps:$4 sm:$0xff]   ;;  %v2037_v14 = vld [vmem:[%s2612_s19 + $0x1b0] ss:$8 sps:$4 sm:$0xff]   ;;  %v2091_v16 = vld [vmem:[%s2612_s19 + $0x60] ss:$8 sps:$4 sm:$0xff]  }
  0x8c   : > { %v2038_v15 = vld [vmem:[%s2612_s19 + $0x1c4] ss:$8 sps:$4 sm:$0xff]   ;;  %v2095_v17 = vld [vmem:[%s2612_s19 + $0x74] ss:$8 sps:$4 sm:$0xff]   ;;  %v2040_v18 = vld [vmem:[%s2612_s19 + $0x1c0] ss:$8 sps:$4 sm:$0xff]  }
  0x8d   : > { %1453 = vmatpush1.bf16.msra.mxu0 %v2013_v48  ;;  %v2041_v19 = vld [vmem:[%s2612_s19 + $0x1d4] ss:$8 sps:$4 sm:$0xff]   ;;  %v2097_v20 = vld [vmem:[%s2612_s19 + $0x70] ss:$8 sps:$4 sm:$0xff]   ;;  %v2101_v21 = vld [vmem:[%s2612_s19 + $0x84] ss:$8 sps:$4 sm:$0xff]  }
  0x8e   : > { %1454 = vmatprep.subr.bf16.mxu0 %v2014_v49  ;;  %1408 = vmatpush1.bf16.msra.mxu1 %v2067_v0  ;;  %v2043_v22 = vld [vmem:[%s2612_s19 + $0x1d0] ss:$8 sps:$4 sm:$0xff]   ;;  %v2044_v23 = vld [vmem:[%s2612_s19 + $0x1e4] ss:$8 sps:$4 sm:$0xff]   ;;  %v2103_v24 = vld [vmem:[%s2612_s19 + $0x80] ss:$8 sps:$4 sm:$0xff]  }
  0x8f   : > { %1409 = vmatprep.subr.bf16.mxu1 %v2071_v2  ;;  %v2107_v25 = vld [vmem:[%s2612_s19 + $0x94] ss:$8 sps:$4 sm:$0xff]   ;;  %v2046_v26 = vld [vmem:[%s2612_s19 + $0x1e0] ss:$8 sps:$4 sm:$0xff]   ;;  %v2109_v28 = vld [vmem:[%s2612_s19 + $0x90] ss:$8 sps:$4 sm:$0xff]  }
  0x90   : > { %v2047_v27 = vld [vmem:[%s2612_s19 + $0x1f4] ss:$8 sps:$4 sm:$0xff]   ;;  %v2113_v29 = vld [vmem:[%s2612_s19 + $0xa4] ss:$8 sps:$4 sm:$0xff]   ;;  %v2051_v30 = vld [vmem:[%s2612_s19 + $0x1f0] ss:$8 sps:$4 sm:$0xff]  }
  0x91   : > { %1455 = vmatpush1.bf16.msra.mxu0 %v2016_v50  ;;  %v2058_v31 = vld [vmem:[%s2612_s19 + $0x204] ss:$8 sps:$4 sm:$0xff]   ;;  %v2115_v32 = vld [vmem:[%s2612_s19 + $0xa0] ss:$8 sps:$4 sm:$0xff]   ;;  %v2119_v34 = vld [vmem:[%s2612_s19 + $0xb4] ss:$8 sps:$4 sm:$0xff]  }
  0x92   : > { %1456 = vmatprep.subr.bf16.mxu0 %v2017_v51  ;;  %1410 = vmatpush1.bf16.msra.mxu1 %v2073_v4  ;;  %v2053_v33 = vld [vmem:[%s2610_s6 + $0x8] ss:$24 sps:$4 sm:$0xff]   ;;  %v2064_v36 = vld [vmem:[%s2612_s19 + $0x214] ss:$8 sps:$4 sm:$0xff]   ;;  %v2125_v39 = vld [vmem:[%s2612_s19 + $0xc4] ss:$8 sps:$4 sm:$0xff]  }
  0x93   : > { %1411 = vmatprep.subr.bf16.mxu1 %v2077_v5  ;;  %v2056_v35 = vld [vmem:[%s2612_s19 + $0x200] ss:$8 sps:$4 sm:$0xff]   ;;  %v2121_v37 = vld [vmem:[%s2612_s19 + $0xb0] ss:$8 sps:$4 sm:$0xff]   ;;  %v2148_v38 = vld [vmem:[%s2610_s6 + $0x4] ss:$24 sps:$4 sm:$0xff]  }
  0x94   : > { %v2062_v40 = vld [vmem:[%s2612_s19 + $0x210] ss:$8 sps:$4 sm:$0xff]   ;;  %1435 = vmatprep.mubr.bf16.mxu1 %v2148_v38  ;;  %v2154_v41 = vld [vmem:[%s2610_s6 + $0x14] ss:$24 sps:$4 sm:$0xff]   ;;  %v2127_v43 = vld [vmem:[%s2612_s19 + $0xc0] ss:$8 sps:$4 sm:$0xff]  }
  0x95   : > { %1457 = vmatpush1.bf16.msra.mxu0 %v2019_v52  ;;  %v2070_v42 = vld [vmem:[%s2612_s19 + $0x224] ss:$8 sps:$4 sm:$0xff]   ;;  %v2131_v44 = vld [vmem:[%s2612_s19 + $0xd4] ss:$8 sps:$4 sm:$0xff]   ;;  %v2068_v45 = vld [vmem:[%s2612_s19 + $0x220] ss:$8 sps:$4 sm:$0xff]  }
  0x96   : > { %1458 = vmatprep.subr.bf16.mxu0 %v2020_v53  ;;  %1412 = vmatpush1.bf16.msra.mxu1 %v2079_v8  ;;  %v2076_v46 = vld [vmem:[%s2612_s19 + $0x234] ss:$8 sps:$4 sm:$0xff]   ;;  %v2133_v47 = vld [vmem:[%s2612_s19 + $0xd0] ss:$8 sps:$4 sm:$0xff]   ;;  %v2137_v48 = vld [vmem:[%s2612_s19 + $0xe4] ss:$8 sps:$4 sm:$0xff]  }
  0x97   : > { %1413 = vmatprep.subr.bf16.mxu1 %v2083_v9  ;;  %v2074_v49 = vld [vmem:[%s2612_s19 + $0x230] ss:$8 sps:$4 sm:$0xff]   ;;  %v2082_v50 = vld [vmem:[%s2612_s19 + $0x244] ss:$8 sps:$4 sm:$0xff]   ;;  %v2139_v51 = vld [vmem:[%s2612_s19 + $0xe0] ss:$8 sps:$4 sm:$0xff]  }
  0x98   : > { %v2143_v52 = vld [vmem:[%s2612_s19 + $0xf4] ss:$8 sps:$4 sm:$0xff]   ;;  %v2080_v53 = vld [vmem:[%s2612_s19 + $0x240] ss:$8 sps:$4 sm:$0xff]   ;;  %v2145_v55 = vld [vmem:[%s2612_s19 + $0xf0] ss:$8 sps:$4 sm:$0xff]  }
  0x99   : > { %1459 = vmatpush1.bf16.msra.mxu0 %v2022_v56  ;;  %v2088_v54 = vld [vmem:[%s2612_s19 + $0x254] ss:$8 sps:$4 sm:$0xff]   ;;  %v2086_v56 = vld [vmem:[%s2612_s19 + $0x250] ss:$8 sps:$4 sm:$0xff]   ;;  %v2094_v57 = vld [vmem:[%s2612_s19 + $0x264] ss:$8 sps:$4 sm:$0xff]  }
  0x9a   : > { %1460 = vmatprep.subr.bf16.mxu0 %v2023_v58  ;;  %1414 = vmatpush1.bf16.msra.mxu1 %v2085_v12  ;;  %v2146_v58 = vld [vmem:[%s2610_s6] ss:$24 sps:$4 sm:$0xff]   ;;  %v2100_v60 = vld [vmem:[%s2612_s19 + $0x274] ss:$8 sps:$4 sm:$0xff]   ;;  %v2118_v2 = vld [vmem:[%s2612_s19 + $0x2a4] ss:$8 sps:$4 sm:$0xff]  }
  0x9b   : > { %1415 = vmatprep.subr.bf16.mxu1 %v2089_v13  ;;  %v2092_v59 = vld [vmem:[%s2612_s19 + $0x260] ss:$8 sps:$4 sm:$0xff]   ;;  %v2112_v0 = vld [vmem:[%s2612_s19 + $0x294] ss:$8 sps:$4 sm:$0xff]   ;;  %v2122_v5 = vld [vmem:[%s2612_s19 + $0x2b0] ss:$8 sps:$4 sm:$0xff]  }
  0x9c   : > { %v2104_v63 = vld [vmem:[%s2612_s19 + $0x280] ss:$8 sps:$4 sm:$0xff]   ;;  %v2124_v4 = vld [vmem:[%s2612_s19 + $0x2b4] ss:$8 sps:$4 sm:$0xff]   ;;  %v2134_v9 = vld [vmem:[%s2612_s19 + $0x2d0] ss:$8 sps:$4 sm:$0xff]  }
  0x9d   : > { %1461 = vmatpush1.bf16.msra.mxu0 %v2025_v61  ;;  %v2098_v61 = vld [vmem:[%s2612_s19 + $0x270] ss:$8 sps:$4 sm:$0xff]   ;;  %v2136_v8 = vld [vmem:[%s2612_s19 + $0x2d4] ss:$8 sps:$4 sm:$0xff]   ;;  %p1887_p6 = scmp.ne.s32.totalorder %s2225_s21, 5 }
  0x9e   : > { %1462 = vmatprep.subr.bf16.mxu0 %v2026_v62  ;;  %1416 = vmatpush1.bf16.msra.mxu1 %v2091_v16  ;;  %v2106_v62 = vld [vmem:[%s2612_s19 + $0x284] ss:$8 sps:$4 sm:$0xff]   ;;  %v2151_v12 = vld [vmem:[%s2612_s19 + $0x2f4] ss:$8 sps:$4 sm:$0xff]   ;;  %v2149_v13 = vld [vmem:[%s2612_s19 + $0x2f0] ss:$8 sps:$4 sm:$0xff]  }
  0x9f   : > { %1417 = vmatprep.subr.bf16.mxu1 %v2095_v17  ;;  %v1548_v38 = vld [vmem:[%s773_s30] sm:$0x3] (!%p1887_p6) }
  0xa1   : > { %1463 = vmatpush1.bf16.msra.mxu0 %v2028_v1  ;;  %v2110_v1 = vld [vmem:[%s2612_s19 + $0x290] ss:$8 sps:$4 sm:$0xff]  }
  0xa2   : > { %1464 = vmatprep.subr.bf16.mxu0 %v2029_v3  ;;  %1418 = vmatpush1.bf16.msra.mxu1 %v2097_v20  ;;  %v2116_v3 = vld [vmem:[%s2612_s19 + $0x2a0] ss:$8 sps:$4 sm:$0xff]  }
  0xa3   : > { %1419 = vmatprep.subr.bf16.mxu1 %v2101_v21 }
  0xa5   : > { %1465 = vmatpush1.bf16.msra.mxu0 %v2031_v6  ;;  %v2130_v6 = vld [vmem:[%s2612_s19 + $0x2c4] ss:$8 sps:$4 sm:$0xff]  }
  0xa6   : > { %1466 = vmatprep.subr.bf16.mxu0 %v2032_v7  ;;  %1420 = vmatpush1.bf16.msra.mxu1 %v2103_v24  ;;  %v2128_v7 = vld [vmem:[%s2612_s19 + $0x2c0] ss:$8 sps:$4 sm:$0xff]  }
  0xa7   : > { %1421 = vmatprep.subr.bf16.mxu1 %v2107_v25  ;;  %v789_v25 = vld [vmem:[#allocation2 + $0x10] sm:$0xff] }
  0xa9   : > { %1467 = vmatpush1.bf16.msra.mxu0 %v2034_v10  ;;  %v2142_v10 = vld [vmem:[%s2612_s19 + $0x2e4] ss:$8 sps:$4 sm:$0xff]  }
  0xaa   : > { %1468 = vmatprep.subr.bf16.mxu0 %v2035_v11  ;;  %1422 = vmatpush1.bf16.msra.mxu1 %v2109_v28  ;;  %v2140_v11 = vld [vmem:[%s2612_s19 + $0x2e0] ss:$8 sps:$4 sm:$0xff]  }
  0xab   : > { %1423 = vmatprep.subr.bf16.mxu1 %v2113_v29  ;;  %v790_v29 = vld [vmem:[#allocation2 + $0x18] sm:$0xff] }
  0xad   : > { %1469 = vmatpush1.bf16.msra.mxu0 %v2037_v14  ;;  %v2152_v14 = vld [vmem:[%s2610_s6 + $0x10] ss:$24 sps:$4 sm:$0xff]  }
  0xae   : > { %1470 = vmatprep.subr.bf16.mxu0 %v2038_v15  ;;  %1424 = vmatpush1.bf16.msra.mxu1 %v2115_v32 }
  0xaf   : > { %1425 = vmatprep.subr.bf16.mxu1 %v2119_v34 }
  0xb1   : > { %1471 = vmatpush1.bf16.msra.mxu0 %v2040_v18 }
  0xb2   : > { %1472 = vmatprep.subr.bf16.mxu0 %v2041_v19  ;;  %1426 = vmatpush1.bf16.msra.mxu1 %v2121_v37  ;;  %v787_v19 = vld [vmem:[#allocation2] sm:$0xff] }
  0xb3   : > { %1427 = vmatprep.subr.bf16.mxu1 %v2125_v39  ;;  %v1564_v37 = vld [vmem:[%s732_s17] sm:$0xff] (!%p1887_p6)  ;;  %v1565_v39 = vld [vmem:[%s732_s17 + $0x8] sm:$0xff] (!%p1887_p6) }
  0xb5   : > { %1473 = vmatpush1.bf16.msra.mxu0 %v2043_v22  ;;  %v788_v22 = vld [vmem:[#allocation2 + $0x8] sm:$0xff] }
  0xb6   : > { %1474 = vmatprep.subr.bf16.mxu0 %v2044_v23  ;;  %1428 = vmatpush1.bf16.msra.mxu1 %v2127_v43 }
  0xb7   : > { %1429 = vmatprep.subr.bf16.mxu1 %v2131_v44  ;;  %v1566_v44 = vunpack.c.l.bf16 (!%p1887_p6), %v1564_v37 }
  0xb9   : > { %1475 = vmatpush1.bf16.msra.mxu0 %v2046_v26 }
  0xba   : > { %1476 = vmatprep.subr.bf16.mxu0 %v2047_v27  ;;  %1430 = vmatpush1.bf16.msra.mxu1 %v2133_v47 }
  0xbb   : > { %1431 = vmatprep.subr.bf16.mxu1 %v2137_v48 }
  0xbd   : > { %1477 = vmatpush1.bf16.msra.mxu0 %v2051_v30 }
  0xbe   : > { %1489 = vmatprep.subr.bf16.mxu0 %v2058_v31  ;;  %1432 = vmatpush1.bf16.msra.mxu1 %v2139_v51  ;;  %v1569_v51 = vunpack.c.h.bf16 (!%p1887_p6), %v1565_v39 }
  0xbf   : > { %1433 = vmatprep.subr.bf16.mxu1 %v2143_v52 }
  0xc0   : > { %1479 = vmatmul.mubr.bf16.vlgmr.msra.gmra.mrb[0].mxu0 %v2053_v33 }
  0xc1   : > { %1490 = vmatpush1.bf16.msra.mxu0 %v2056_v35  ;;  %1521 = vmatprep.mubr.bf16.mxu0 %v2154_v41  ;;  %v1550_v35 = vlaneseq (!%p1887_p6) }
  0xc2   : > { %1491 = vmatprep.subr.bf16.mxu0 %v2064_v36  ;;  %1434 = vmatpush1.bf16.msra.mxu1 %v2145_v55 }
  0xc3   : > { %v1551_v36 = vshrl.u32 (!%p1887_p6), %v1550_v35, 7 }
  0xc5   : > { %1492 = vmatpush1.bf16.msra.mxu0 %v2062_v40  ;;  %1436 = vmatmul.mubr.bf16.vlgmr.msra.gmra.mrb[0].mxu1 %v2146_v58  ;;  %v1552_v41 = vsub.s32 (!%p1887_p6), 0, %v1551_v36 }
  0xc6   : > { %1493 = vmatprep.subr.bf16.mxu0 %v2070_v42  ;;  %v1556_v42 = vsub.s32 (!%p1887_p6), 1, %v1551_v36 }
  0xc7   : > { %v1553_v48 = vrot.slane (!%p1887_p6), %v1548_v38, %v1552_v41 }
  0xc9   : > { %1494 = vmatpush1.bf16.msra.mxu0 %v2068_v45  ;;  %v1567_v45 = vunpack.c.h.bf16 (!%p1887_p6), %v1564_v37 }
  0xca   : > { %1495 = vmatprep.subr.bf16.mxu0 %v2076_v46 }
  0xcd   : > { %1496 = vmatpush1.bf16.msra.mxu0 %v2074_v49  ;;  %v1557_v49 = vrot.slane (!%p1887_p6), %v1548_v38, %v1556_v42 }
  0xce   : > { %1497 = vmatprep.subr.bf16.mxu0 %v2082_v50  ;;  %v1568_v50 = vunpack.c.l.bf16 (!%p1887_p6), %v1565_v39 }
  0xd1   : > { %1498 = vmatpush1.bf16.msra.mxu0 %v2080_v53 }
  0xd2   : > { %1499 = vmatprep.subr.bf16.mxu0 %v2088_v54 }
  0xd5   : > { %1500 = vmatpush1.bf16.msra.mxu0 %v2086_v56 }
  0xd6   : > { %1501 = vmatprep.subr.bf16.mxu0 %v2094_v57 }
  0xd9   : > { %1502 = vmatpush1.bf16.msra.mxu0 %v2092_v59 }
  0xda   : > { %1503 = vmatprep.subr.bf16.mxu0 %v2100_v60 }
  0xdd   : > { %1504 = vmatpush1.bf16.msra.mxu0 %v2098_v61 }
  0xde   : > { %1505 = vmatprep.subr.bf16.mxu0 %v2106_v62 }
  0xe1   : > { %1506 = vmatpush1.bf16.msra.mxu0 %v2104_v63 }
  0xe2   : > { %1507 = vmatprep.subr.bf16.mxu0 %v2112_v0 }
  0xe5   : > { %1508 = vmatpush1.bf16.msra.mxu0 %v2110_v1 }
  0xe6   : > { %1509 = vmatprep.subr.bf16.mxu0 %v2118_v2 }
  0xe9   : > { %1510 = vmatpush1.bf16.msra.mxu0 %v2116_v3 }
  0xea   : > { %1511 = vmatprep.subr.bf16.mxu0 %v2124_v4 }
  0xed   : > { %1512 = vmatpush1.bf16.msra.mxu0 %v2122_v5 }
  0xee   : > { %1513 = vmatprep.subr.bf16.mxu0 %v2130_v6 }
  0xf1   : > { %1514 = vmatpush1.bf16.msra.mxu0 %v2128_v7 }
  0xf2   : > { %1515 = vmatprep.subr.bf16.mxu0 %v2136_v8 }
  0xf5   : > { %1516 = vmatpush1.bf16.msra.mxu0 %v2134_v9 }
  0xf6   : > { %1517 = vmatprep.subr.bf16.mxu0 %v2142_v10 }
  0xf9   : > { %1518 = vmatpush1.bf16.msra.mxu0 %v2140_v11 }
  0xfa   : > { %1519 = vmatprep.subr.bf16.mxu0 %v2151_v12 }
  0xfd   : > { %1520 = vmatpush1.bf16.msra.mxu0 %v2149_v13 }
 0x100   : > { %1522 = vmatmul.mubr.bf16.vlgmr.msra.gmra.mrb[0].mxu0 %v2152_v14 }
 0x198   : > { %v1437_v15 = vpop.f32.mrb[0].mxu1 }
 0x199   : > { %v1439_v16 = vpop.f32.mrb[1].mxu1 }
 0x19a   : > { %v1441_v17 = vpop.f32.mrb[2].mxu1 }
 0x19b   : > { %v1443_v18 = vpop.f32.mrb[3].mxu1 }
 0x1d3   : > { %v1523_v20 = vpop.f32.mrb[0].mxu0 }
 0x1d4   : > { %v1901_v21 = vadd.f32 %v1523_v20, %v1437_v15  ;;  %v1525_v23 = vpop.f32.mrb[1].mxu0 }
 0x1d5   : > { %v1902_v24 = vadd.f32 %v1525_v23, %v1439_v16  ;;  %v1527_v26 = vpop.f32.mrb[2].mxu0  ;;  %1543 = sbr.rel (%p1887_p6) target bundleno = 492 (0x1ec), region = 143 }
 0x1d6   : > { %v1532_v27 = vadd.f32 %v1901_v21, %v787_v19  ;;  %v1903_v28 = vadd.f32 %v1527_v26, %v1441_v17  ;;  %v1529_v30 = vpop.f32.mrb[3].mxu0 }
 0x1d7   : > { %v1533_v31 = vadd.f32 %v1902_v24, %v788_v22  ;;  %v1904_v32 = vadd.f32 %v1529_v30, %v1443_v18 }
 0x1d8   : > { %1536 = vst [vmem:[#allocation2] sm:$0xff] %v1532_v27  ;;  %v1534_v33 = vadd.f32 %v1903_v28, %v789_v25 }
 0x1d9   : > { %1537 = vst [vmem:[#allocation2 + $0x8] sm:$0xff] %v1533_v31  ;;  %v1535_v34 = vadd.f32 %v1904_v32, %v790_v29 }
 0x1da   : > { %1538 = vst [vmem:[#allocation2 + $0x10] sm:$0xff] %v1534_v33 }
 0x1db   : > { %1539 = vst [vmem:[#allocation2 + $0x18] sm:$0xff] %v1535_v34 }
 0x1df   : > { %v1544_v40 = vld [vmem:[#allocation2] sm:$0xff] }
 0x1e0   : > { %v1545_v43 = vld [vmem:[#allocation2 + $0x8] sm:$0xff]  ;;  %v1560_v52 = vadd.f32 %v1553_v48, %v1544_v40 }
 0x1e1   : > { %v1546_v46 = vld [vmem:[#allocation2 + $0x10] sm:$0xff]  ;;  %v1561_v53 = vadd.f32 %v1557_v49, %v1545_v43 }
 0x1e2   : > { %v1547_v47 = vld [vmem:[#allocation2 + $0x18] sm:$0xff]  ;;  %v1562_v54 = vadd.f32 %v1553_v48, %v1546_v46  ;;  %v1570_v56 = vadd.f32 %v1566_v44, %v1560_v52 }
 0x1e3   : > { %v1563_v55 = vadd.f32 %v1557_v49, %v1547_v47  ;;  %v1571_v57 = vadd.f32 %v1567_v45, %v1561_v53 }
 0x1e4   : > { %v1572_v58 = vadd.f32 %v1568_v50, %v1562_v54  ;;  %v1574_v60 = vmax.f32 %v1570_v56, 0.0 }
 0x1e5   : > { %v1573_v59 = vadd.f32 %v1569_v51, %v1563_v55  ;;  %v1575_v61 = vmax.f32 %v1571_v57, 0.0 }
 0x1e6   : > { %v1576_v62 = vmax.f32 %v1572_v58, 0.0 }
 0x1e7   : > { %v1577_v63 = vmax.f32 %v1573_v59, 0.0  ;;  %v1898_v0 = vpack.c.bf16 %v1575_v61, %v1574_v60 }
 0x1e9   : > { %v1899_v1 = vpack.c.bf16 %v1577_v63, %v1576_v62  ;;  %1590 = vst [vmem:[%s2616_s15] sm:$0xff] %v1898_v0 }
 0x1eb   : > { %1591 = vst [vmem:[%s2616_s15 + $0x8] sm:$0xff] %v1899_v1 }
 0x1ec PF: > { %1598 = sbr.rel (!%p2373_p13) target bundleno = 500 (0x1f4), region = 147  ;;  %s1900_s21 = sshll.u32 (%p2373_p13), %s2229_s22, 3 }
 0x1ed   : > { %s1604_s28 = scalar_lea.vmem (%p2373_p13), %s2778_s4, %s1900_s21 }
 0x1f0   : > { %v1634_v2 = vld [vmem:[%s2616_s15] sm:$0xff] (%p2373_p13) }
 0x1f1   : > { %1635 = vst [vmem:[%s1604_s28] sm:$0xff] (%p2373_p13), %v1634_v2 }
 0x1f2   : > { %v1636_v3 = vld [vmem:[%s2616_s15 + $0x8] sm:$0xff] (%p2373_p13) }
 0x1f3   : > { %1637 = vst [vmem:[%s1604_s28 + $0x10] sm:$0xff] %v1636_v3 }
 0x1f4 PF: > { %s14_s25 = sadd.s32 1, %s2241_s25   ;;  %s2789_s29 = sld [smem:[#allocation7_spill]] }
 0x1f5   : > { %p11_p7 = scmp.ge.s32.totalorder %s14_s25, 14   ;;  %s2790_s10 = sld [smem:[#allocation8_spill]] }
 0x1f6   : > { %s2791_s15 = smov %s2205_s16  ;;  %s2792_s16 = smov %s2365_s13 }
 0x1f7   : > { %s2793_s17 = smov %s2213_s18  ;;  %s2794_s18 = smov %s2362_s12 }
 0x1f8   : > { %s2795_s19 = smov %s2221_s20  ;;  %s2796_s20 = smov %s2346_s7 }
 0x1f9   : > { %s2797_s21 = smov %s2233_s23  ;;  %s2798_s22 = smov %s2237_s24 }
 0x1fa   : > { %s2799_s23 = smov %s2789_s29  ;;  %13 = sbr.rel (!%p11_p7) target bundleno = 8 (0x8), region = 235 }
 0x1fb   : > { %s2800_s24 = smov %s2790_s10 }

// kernel: resnet18_forward.39
= control target key start
LH: loop header
LB: loop body
LE: loop exit
PB: predicated region body
PF: predicated region fallthrough
CT: control target
= control target key end

     0   :  { %s2615_s0 = inlined_call_operand.vmem [shape: bf16[16,4608], index: 0, kind: input, shape index: {}]   ;;  %s2616_s1 = inlined_call_operand.vmem [shape: bf16[4608,512], index: 1, kind: input, shape index: {}]   ;;  %s2617_s2 = inlined_call_operand.vmem [shape: f32[1,512], index: 2, kind: input, shape index: {}]   ;;  %s2618_s3 = inlined_call_operand.vmem [shape: bf16[16,512], index: 3, kind: output, shape index: {}]  }
   0x1   :  { %2620 = sst [smem:[#allocation7_spill]] %s2615_s0 }
   0x2   :  { %2621 = sst [smem:[#allocation8_spill]] %s2616_s1 }
   0x3   :  { %s2135_s12 = smov 0   ;;  %s2137_s13 = smov 0  }
   0x4   :  { %s2139_s14 = smov 0   ;;  %s2141_s15 = smov 0  }
   0x5   :  { %s2143_s16 = smov 0   ;;  %s2145_s17 = smov 0  }
   0x6   :  { %s2147_s18 = smov 0   ;;  %s2149_s19 = smov 0  }
   0x7   :  { %s2151_s20 = smov 0   ;;  %s2153_s21 = smov 0  }
   0x8   :  { %s2155_s22 = smov 0  }
   0x9 LB: > { %s1645_s23 = sadd.s32 4294967295, %s2112_s22   ;;  %s25_s24 = sadd.s32 1, %s2104_s20  ;;  %s2112_s22 = sphi %s2155_s22, %s13_s22   ;;  %s2108_s21 = sphi %s2153_s21, %s2638_s21   ;;  %s2104_s20 = sphi %s2151_s20, %s2637_s20   ;;  %s2100_s19 = sphi %s2149_s19, %s2636_s19   ;;  %s2096_s18 = sphi %s2147_s18, %s2635_s18   ;;  %s2092_s17 = sphi %s2145_s17, %s2634_s17   ;;  %s2088_s16 = sphi %s2143_s16, %s2633_s16   ;;  %s2084_s15 = sphi %s2141_s15, %s2632_s15   ;;  %s2080_s14 = sphi %s2139_s14, %s2631_s14   ;;  %s2076_s13 = sphi %s2137_s13, %s2630_s13   ;;  %s2072_s12 = sphi %s2135_s12, %s2629_s12  }
   0xa   : > { %p26_p0 = scmp.ge.s32.totalorder %s25_s24, 6  ;;  %s28_s25 = sadd.s32 1, %s2108_s21 }
   0xb   : > { %s41_s26 = sadd.s32 1, %s2092_s17  ;;  %p48_p1 = scmp.ne.s32.totalorder %s2092_s17, %s2088_s16 }
   0xc   : > { %s2640_s24 = smov (%p26_p0, %s25_s24), 0  ;;  %s2642_s25 = smov (!%p26_p0, %s28_s25), %s2108_s21 }
   0xd   : > { %s37_s27 = ssub.s32 %s2104_s20, %s2640_s24  ;;  %p49_p2 = scmp.eq.s32.totalorder %s2112_s22, 0 }
   0xe   : > { %p30_p3 = scmp.ge.s32.totalorder %s2642_s25, 2  ;;  %p39_p4 = scmp.eq.s32.totalorder %s37_s27, 0 }
   0xf   : > { %p2202_p5 = por %p49_p2, %p48_p1  ;;  %s69_s29 = sadd.s32 1, %s2084_s15 }
  0x10   : > { %s2644_s25 = smov (%p30_p3, %s2642_s25), 0  ;;  %p76_p6 = scmp.ne.s32.totalorder %s2084_s15, %s2080_s14 }
  0x11   : > { %2623 = sst [smem:[#allocation6_spill]] %s2644_s25  ;;  %s65_s4 = ssub.s32 %s2108_s21, %s2644_s25 }
  0x12   : > { %s2210_s30 = scalar_select %p39_p4, %s2092_s17, %s41_s26  }
  0x13   : > { %s66_s5 = sor.u32 %s65_s4, %s37_s27  ;;  %p121_p7 = scmp.eq.s32.totalorder %s65_s4, 0 }
  0x14   : > { %p67_p8 = scmp.eq.s32.totalorder %s66_s5, 0  ;;  %p2216_p9 = por %p76_p6, %p49_p2 }
  0x15   : > { %s123_s7 = sadd.s32 1, %s2076_s13  ;;  %p133_p10 = scmp.ne.s32.totalorder %s2076_s13, %s2072_s12 }
  0x16   : > { %s2224_s8 = scalar_select %p67_p8, %s2084_s15, %s69_s29  }
  0x17   : > { %s2227_s9 = scalar_select %p121_p7, %s2076_s13, %s123_s7  }
  0x18   : > { %p134_p11 = scmp.eq.s32.totalorder %s1645_s23, 11  ;;  %p1648_p13 = scmp.ge.s32.totalorder %s2112_s22, 12 }
  0x1a   : > { %p2229_p12 = por %p134_p11, %p133_p10  ;;  %156 = sbr.rel (%p1648_p13) target bundleno = 103 (0x67), region = 16 }
  0x21   : > { %159 = sbr.rel (!%p2202_p5) target bundleno = 45 (0x2d), region = 20  ;;  %s161_s11 = sand.u32 (%p2202_p5), 1, %s2092_s17  }
  0x22   : > { %s1767_s26 = smul.u32 (%p2202_p5), 24, %s2104_s20  ;;  %s2626_s0 = sld [smem:[#allocation7_spill]] (%p2202_p5) }
  0x23   : > { %s1780_s27 = smul.u32 (%p2202_p5), 48, %s161_s11 }
  0x25   : > { %s163_s23 = scalar_lea.vmem (%p2202_p5), [#allocation3], %s1780_s27 }
  0x28   : > { %s169_s5 = scalar_lea.vmem %s2626_s0, %s1767_s26 }
  0x29   : > { %v182_v0 = vld [vmem:[%s169_s5] sm:$0xff]  ;;  %v184_v1 = vld [vmem:[%s169_s5 + $0x8] sm:$0xff]  ;;  %v186_v2 = vld [vmem:[%s169_s5 + $0x10] sm:$0xff] }
  0x2a   : > { %183 = vst [vmem:[%s163_s23] sm:$0xff] %v182_v0  ;;  %185 = vst [vmem:[%s163_s23 + $0x8] sm:$0xff] %v184_v1  ;;  %v188_v3 = vld [vmem:[%s169_s5 + $0x90] sm:$0xff]  ;;  %v190_v4 = vld [vmem:[%s169_s5 + $0x98] sm:$0xff] }
  0x2b   : > { %187 = vst [vmem:[%s163_s23 + $0x10] sm:$0xff] %v186_v2  ;;  %v192_v5 = vld [vmem:[%s169_s5 + $0xa0] sm:$0xff]  ;;  %189 = vst [vmem:[%s163_s23 + $0x18] sm:$0xff] %v188_v3 }
  0x2c   : > { %191 = vst [vmem:[%s163_s23 + $0x20] sm:$0xff] %v190_v4  ;;  %193 = vst [vmem:[%s163_s23 + $0x28] sm:$0xff] %v192_v5 }
  0x2d PF: > { %199 = sbr.rel (!%p2216_p9) target bundleno = 103 (0x67), region = 43  ;;  %s201_s28 = sand.u32 (%p2216_p9), 1, %s2084_s15  }
  0x2e   : > { %s1781_s7 = smul.u32 (%p2216_p9), 768, %s201_s28  ;;  %s1650_s11 = sshll.u32 (%p2216_p9), %s2108_s21, 1 }
  0x2f   : > { %s1768_s26 = smul.u32 (%p2216_p9), 384, %s2104_s20  ;;  %s2627_s1 = sld [smem:[#allocation8_spill]] (%p2216_p9) }
  0x30   : > { %s2254_s6 = scalar_lea.vmem (%p2216_p9), [#allocation4], %s1781_s7 }
  0x31   : > { %s207_s27 = sadd.s32 (%p2216_p9), %s1768_s26, %s1650_s11 }
  0x32   : > { %s1652_s29 = sshll.u32 (%p2216_p9), %s207_s27, 2 }
  0x35   : > { %s2249_s5 = scalar_lea.vmem %s2627_s1, %s1652_s29 }
  0x36   : > { %v427_v6 = vld [vmem:[%s2249_s5] sm:$0xff]  ;;  %v429_v7 = vld [vmem:[%s2249_s5 + $0x10] sm:$0xff] }
  0x37   : > { %v431_v8 = vld [vmem:[%s2249_s5 + $0x20] sm:$0xff]  ;;  %428 = vst [vmem:[%s2254_s6] sm:$0xff] %v427_v6  ;;  %430 = vst [vmem:[%s2254_s6 + $0x8] sm:$0xff] %v429_v7  ;;  %v433_v9 = vld [vmem:[%s2249_s5 + $0x30] sm:$0xff] }
  0x38   : > { %432 = vst [vmem:[%s2254_s6 + $0x10] sm:$0xff] %v431_v8  ;;  %v435_v10 = vld [vmem:[%s2249_s5 + $0x40] sm:$0xff]  ;;  %v437_v11 = vld [vmem:[%s2249_s5 + $0x50] sm:$0xff]  ;;  %434 = vst [vmem:[%s2254_s6 + $0x18] sm:$0xff] %v433_v9 }
  0x39   : > { %436 = vst [vmem:[%s2254_s6 + $0x20] sm:$0xff] %v435_v10  ;;  %438 = vst [vmem:[%s2254_s6 + $0x28] sm:$0xff] %v437_v11  ;;  %v439_v12 = vld [vmem:[%s2249_s5 + $0x60] sm:$0xff]  ;;  %v441_v13 = vld [vmem:[%s2249_s5 + $0x70] sm:$0xff] }
  0x3a   : > { %v443_v14 = vld [vmem:[%s2249_s5 + $0x80] sm:$0xff]  ;;  %440 = vst [vmem:[%s2254_s6 + $0x30] sm:$0xff] %v439_v12  ;;  %442 = vst [vmem:[%s2254_s6 + $0x38] sm:$0xff] %v441_v13  ;;  %v445_v15 = vld [vmem:[%s2249_s5 + $0x90] sm:$0xff] }
  0x3b   : > { %444 = vst [vmem:[%s2254_s6 + $0x40] sm:$0xff] %v443_v14  ;;  %v447_v16 = vld [vmem:[%s2249_s5 + $0xa0] sm:$0xff]  ;;  %v449_v17 = vld [vmem:[%s2249_s5 + $0xb0] sm:$0xff]  ;;  %446 = vst [vmem:[%s2254_s6 + $0x48] sm:$0xff] %v445_v15 }
  0x3c   : > { %448 = vst [vmem:[%s2254_s6 + $0x50] sm:$0xff] %v447_v16  ;;  %450 = vst [vmem:[%s2254_s6 + $0x58] sm:$0xff] %v449_v17  ;;  %v451_v18 = vld [vmem:[%s2249_s5 + $0xc0] sm:$0xff]  ;;  %v453_v19 = vld [vmem:[%s2249_s5 + $0xd0] sm:$0xff] }
  0x3d   : > { %v455_v20 = vld [vmem:[%s2249_s5 + $0xe0] sm:$0xff]  ;;  %452 = vst [vmem:[%s2254_s6 + $0x60] sm:$0xff] %v451_v18  ;;  %454 = vst [vmem:[%s2254_s6 + $0x68] sm:$0xff] %v453_v19  ;;  %v457_v21 = vld [vmem:[%s2249_s5 + $0xf0] sm:$0xff] }
  0x3e   : > { %456 = vst [vmem:[%s2254_s6 + $0x70] sm:$0xff] %v455_v20  ;;  %v459_v22 = vld [vmem:[%s2249_s5 + $0x100] sm:$0xff]  ;;  %v461_v23 = vld [vmem:[%s2249_s5 + $0x110] sm:$0xff]  ;;  %458 = vst [vmem:[%s2254_s6 + $0x78] sm:$0xff] %v457_v21 }
  0x3f   : > { %460 = vst [vmem:[%s2254_s6 + $0x80] sm:$0xff] %v459_v22  ;;  %462 = vst [vmem:[%s2254_s6 + $0x88] sm:$0xff] %v461_v23  ;;  %v463_v24 = vld [vmem:[%s2249_s5 + $0x120] sm:$0xff]  ;;  %v465_v25 = vld [vmem:[%s2249_s5 + $0x130] sm:$0xff] }
  0x40   : > { %v467_v26 = vld [vmem:[%s2249_s5 + $0x140] sm:$0xff]  ;;  %464 = vst [vmem:[%s2254_s6 + $0x90] sm:$0xff] %v463_v24  ;;  %466 = vst [vmem:[%s2254_s6 + $0x98] sm:$0xff] %v465_v25  ;;  %v469_v27 = vld [vmem:[%s2249_s5 + $0x150] sm:$0xff] }
  0x41   : > { %468 = vst [vmem:[%s2254_s6 + $0xa0] sm:$0xff] %v467_v26  ;;  %v471_v28 = vld [vmem:[%s2249_s5 + $0x160] sm:$0xff]  ;;  %v473_v29 = vld [vmem:[%s2249_s5 + $0x170] sm:$0xff]  ;;  %470 = vst [vmem:[%s2254_s6 + $0xa8] sm:$0xff] %v469_v27 }
  0x42   : > { %472 = vst [vmem:[%s2254_s6 + $0xb0] sm:$0xff] %v471_v28  ;;  %474 = vst [vmem:[%s2254_s6 + $0xb8] sm:$0xff] %v473_v29  ;;  %v475_v30 = vld [vmem:[%s2249_s5 + $0x180] sm:$0xff]  ;;  %v477_v31 = vld [vmem:[%s2249_s5 + $0x190] sm:$0xff] }
  0x43   : > { %v479_v32 = vld [vmem:[%s2249_s5 + $0x1a0] sm:$0xff]  ;;  %476 = vst [vmem:[%s2254_s6 + $0xc0] sm:$0xff] %v475_v30  ;;  %478 = vst [vmem:[%s2254_s6 + $0xc8] sm:$0xff] %v477_v31  ;;  %v481_v33 = vld [vmem:[%s2249_s5 + $0x1b0] sm:$0xff] }
  0x44   : > { %480 = vst [vmem:[%s2254_s6 + $0xd0] sm:$0xff] %v479_v32  ;;  %v483_v34 = vld [vmem:[%s2249_s5 + $0x1c0] sm:$0xff]  ;;  %v485_v35 = vld [vmem:[%s2249_s5 + $0x1d0] sm:$0xff]  ;;  %482 = vst [vmem:[%s2254_s6 + $0xd8] sm:$0xff] %v481_v33 }
  0x45   : > { %484 = vst [vmem:[%s2254_s6 + $0xe0] sm:$0xff] %v483_v34  ;;  %486 = vst [vmem:[%s2254_s6 + $0xe8] sm:$0xff] %v485_v35  ;;  %v487_v36 = vld [vmem:[%s2249_s5 + $0x1e0] sm:$0xff]  ;;  %v489_v37 = vld [vmem:[%s2249_s5 + $0x1f0] sm:$0xff] }
  0x46   : > { %v491_v38 = vld [vmem:[%s2249_s5 + $0x200] sm:$0xff]  ;;  %488 = vst [vmem:[%s2254_s6 + $0xf0] sm:$0xff] %v487_v36  ;;  %490 = vst [vmem:[%s2254_s6 + $0xf8] sm:$0xff] %v489_v37  ;;  %v493_v39 = vld [vmem:[%s2249_s5 + $0x210] sm:$0xff] }
  0x47   : > { %492 = vst [vmem:[%s2254_s6 + $0x100] sm:$0xff] %v491_v38  ;;  %v495_v40 = vld [vmem:[%s2249_s5 + $0x220] sm:$0xff]  ;;  %v497_v41 = vld [vmem:[%s2249_s5 + $0x230] sm:$0xff]  ;;  %494 = vst [vmem:[%s2254_s6 + $0x108] sm:$0xff] %v493_v39 }
  0x48   : > { %496 = vst [vmem:[%s2254_s6 + $0x110] sm:$0xff] %v495_v40  ;;  %498 = vst [vmem:[%s2254_s6 + $0x118] sm:$0xff] %v497_v41  ;;  %v499_v42 = vld [vmem:[%s2249_s5 + $0x240] sm:$0xff]  ;;  %v501_v43 = vld [vmem:[%s2249_s5 + $0x250] sm:$0xff] }
  0x49   : > { %v503_v44 = vld [vmem:[%s2249_s5 + $0x260] sm:$0xff]  ;;  %500 = vst [vmem:[%s2254_s6 + $0x120] sm:$0xff] %v499_v42  ;;  %502 = vst [vmem:[%s2254_s6 + $0x128] sm:$0xff] %v501_v43  ;;  %v505_v45 = vld [vmem:[%s2249_s5 + $0x270] sm:$0xff] }
  0x4a   : > { %504 = vst [vmem:[%s2254_s6 + $0x130] sm:$0xff] %v503_v44  ;;  %v507_v46 = vld [vmem:[%s2249_s5 + $0x280] sm:$0xff]  ;;  %v509_v47 = vld [vmem:[%s2249_s5 + $0x290] sm:$0xff]  ;;  %506 = vst [vmem:[%s2254_s6 + $0x138] sm:$0xff] %v505_v45 }
  0x4b   : > { %508 = vst [vmem:[%s2254_s6 + $0x140] sm:$0xff] %v507_v46  ;;  %510 = vst [vmem:[%s2254_s6 + $0x148] sm:$0xff] %v509_v47  ;;  %v511_v48 = vld [vmem:[%s2249_s5 + $0x2a0] sm:$0xff]  ;;  %v513_v49 = vld [vmem:[%s2249_s5 + $0x2b0] sm:$0xff] }
  0x4c   : > { %v515_v50 = vld [vmem:[%s2249_s5 + $0x2c0] sm:$0xff]  ;;  %512 = vst [vmem:[%s2254_s6 + $0x150] sm:$0xff] %v511_v48  ;;  %514 = vst [vmem:[%s2254_s6 + $0x158] sm:$0xff] %v513_v49  ;;  %v517_v51 = vld [vmem:[%s2249_s5 + $0x2d0] sm:$0xff] }
  0x4d   : > { %516 = vst [vmem:[%s2254_s6 + $0x160] sm:$0xff] %v515_v50  ;;  %v519_v52 = vld [vmem:[%s2249_s5 + $0x2e0] sm:$0xff]  ;;  %v521_v53 = vld [vmem:[%s2249_s5 + $0x2f0] sm:$0xff]  ;;  %518 = vst [vmem:[%s2254_s6 + $0x168] sm:$0xff] %v517_v51 }
  0x4e   : > { %520 = vst [vmem:[%s2254_s6 + $0x170] sm:$0xff] %v519_v52  ;;  %522 = vst [vmem:[%s2254_s6 + $0x178] sm:$0xff] %v521_v53  ;;  %v523_v54 = vld [vmem:[%s2249_s5 + $0x300] sm:$0xff]  ;;  %v525_v55 = vld [vmem:[%s2249_s5 + $0x310] sm:$0xff] }
  0x4f   : > { %v527_v56 = vld [vmem:[%s2249_s5 + $0x320] sm:$0xff]  ;;  %524 = vst [vmem:[%s2254_s6 + $0x180] sm:$0xff] %v523_v54  ;;  %526 = vst [vmem:[%s2254_s6 + $0x188] sm:$0xff] %v525_v55  ;;  %v529_v57 = vld [vmem:[%s2249_s5 + $0x330] sm:$0xff] }
  0x50   : > { %528 = vst [vmem:[%s2254_s6 + $0x190] sm:$0xff] %v527_v56  ;;  %v531_v58 = vld [vmem:[%s2249_s5 + $0x340] sm:$0xff]  ;;  %v533_v59 = vld [vmem:[%s2249_s5 + $0x350] sm:$0xff]  ;;  %530 = vst [vmem:[%s2254_s6 + $0x198] sm:$0xff] %v529_v57 }
  0x51   : > { %532 = vst [vmem:[%s2254_s6 + $0x1a0] sm:$0xff] %v531_v58  ;;  %534 = vst [vmem:[%s2254_s6 + $0x1a8] sm:$0xff] %v533_v59  ;;  %v535_v60 = vld [vmem:[%s2249_s5 + $0x360] sm:$0xff]  ;;  %v537_v61 = vld [vmem:[%s2249_s5 + $0x370] sm:$0xff] }
  0x52   : > { %v539_v62 = vld [vmem:[%s2249_s5 + $0x380] sm:$0xff]  ;;  %536 = vst [vmem:[%s2254_s6 + $0x1b0] sm:$0xff] %v535_v60  ;;  %538 = vst [vmem:[%s2254_s6 + $0x1b8] sm:$0xff] %v537_v61  ;;  %v541_v63 = vld [vmem:[%s2249_s5 + $0x390] sm:$0xff] }
  0x53   : > { %540 = vst [vmem:[%s2254_s6 + $0x1c0] sm:$0xff] %v539_v62  ;;  %v543_v0 = vld [vmem:[%s2249_s5 + $0x3a0] sm:$0xff]  ;;  %v545_v1 = vld [vmem:[%s2249_s5 + $0x3b0] sm:$0xff]  ;;  %542 = vst [vmem:[%s2254_s6 + $0x1c8] sm:$0xff] %v541_v63 }
  0x54   : > { %544 = vst [vmem:[%s2254_s6 + $0x1d0] sm:$0xff] %v543_v0  ;;  %546 = vst [vmem:[%s2254_s6 + $0x1d8] sm:$0xff] %v545_v1  ;;  %v547_v2 = vld [vmem:[%s2249_s5 + $0x3c0] sm:$0xff]  ;;  %v549_v3 = vld [vmem:[%s2249_s5 + $0x3d0] sm:$0xff] }
  0x55   : > { %v551_v4 = vld [vmem:[%s2249_s5 + $0x3e0] sm:$0xff]  ;;  %548 = vst [vmem:[%s2254_s6 + $0x1e0] sm:$0xff] %v547_v2  ;;  %550 = vst [vmem:[%s2254_s6 + $0x1e8] sm:$0xff] %v549_v3  ;;  %v553_v5 = vld [vmem:[%s2249_s5 + $0x3f0] sm:$0xff] }
  0x56   : > { %552 = vst [vmem:[%s2254_s6 + $0x1f0] sm:$0xff] %v551_v4  ;;  %v555_v6 = vld [vmem:[%s2249_s5 + $0x400] sm:$0xff]  ;;  %v557_v7 = vld [vmem:[%s2249_s5 + $0x410] sm:$0xff]  ;;  %554 = vst [vmem:[%s2254_s6 + $0x1f8] sm:$0xff] %v553_v5 }
  0x57   : > { %556 = vst [vmem:[%s2254_s6 + $0x200] sm:$0xff] %v555_v6  ;;  %558 = vst [vmem:[%s2254_s6 + $0x208] sm:$0xff] %v557_v7  ;;  %v559_v8 = vld [vmem:[%s2249_s5 + $0x420] sm:$0xff]  ;;  %v561_v9 = vld [vmem:[%s2249_s5 + $0x430] sm:$0xff] }
  0x58   : > { %v563_v10 = vld [vmem:[%s2249_s5 + $0x440] sm:$0xff]  ;;  %560 = vst [vmem:[%s2254_s6 + $0x210] sm:$0xff] %v559_v8  ;;  %562 = vst [vmem:[%s2254_s6 + $0x218] sm:$0xff] %v561_v9  ;;  %v565_v11 = vld [vmem:[%s2249_s5 + $0x450] sm:$0xff] }
  0x59   : > { %564 = vst [vmem:[%s2254_s6 + $0x220] sm:$0xff] %v563_v10  ;;  %v567_v12 = vld [vmem:[%s2249_s5 + $0x460] sm:$0xff]  ;;  %v569_v13 = vld [vmem:[%s2249_s5 + $0x470] sm:$0xff]  ;;  %566 = vst [vmem:[%s2254_s6 + $0x228] sm:$0xff] %v565_v11 }
  0x5a   : > { %568 = vst [vmem:[%s2254_s6 + $0x230] sm:$0xff] %v567_v12  ;;  %570 = vst [vmem:[%s2254_s6 + $0x238] sm:$0xff] %v569_v13  ;;  %v571_v14 = vld [vmem:[%s2249_s5 + $0x480] sm:$0xff]  ;;  %v573_v15 = vld [vmem:[%s2249_s5 + $0x490] sm:$0xff] }
  0x5b   : > { %v575_v16 = vld [vmem:[%s2249_s5 + $0x4a0] sm:$0xff]  ;;  %572 = vst [vmem:[%s2254_s6 + $0x240] sm:$0xff] %v571_v14  ;;  %574 = vst [vmem:[%s2254_s6 + $0x248] sm:$0xff] %v573_v15  ;;  %v577_v17 = vld [vmem:[%s2249_s5 + $0x4b0] sm:$0xff] }
  0x5c   : > { %576 = vst [vmem:[%s2254_s6 + $0x250] sm:$0xff] %v575_v16  ;;  %v579_v18 = vld [vmem:[%s2249_s5 + $0x4c0] sm:$0xff]  ;;  %v581_v19 = vld [vmem:[%s2249_s5 + $0x4d0] sm:$0xff]  ;;  %578 = vst [vmem:[%s2254_s6 + $0x258] sm:$0xff] %v577_v17 }
  0x5d   : > { %580 = vst [vmem:[%s2254_s6 + $0x260] sm:$0xff] %v579_v18  ;;  %582 = vst [vmem:[%s2254_s6 + $0x268] sm:$0xff] %v581_v19  ;;  %v583_v20 = vld [vmem:[%s2249_s5 + $0x4e0] sm:$0xff]  ;;  %v585_v21 = vld [vmem:[%s2249_s5 + $0x4f0] sm:$0xff] }
  0x5e   : > { %v587_v22 = vld [vmem:[%s2249_s5 + $0x500] sm:$0xff]  ;;  %584 = vst [vmem:[%s2254_s6 + $0x270] sm:$0xff] %v583_v20  ;;  %586 = vst [vmem:[%s2254_s6 + $0x278] sm:$0xff] %v585_v21  ;;  %v589_v23 = vld [vmem:[%s2249_s5 + $0x510] sm:$0xff] }
  0x5f   : > { %588 = vst [vmem:[%s2254_s6 + $0x280] sm:$0xff] %v587_v22  ;;  %v591_v24 = vld [vmem:[%s2249_s5 + $0x520] sm:$0xff]  ;;  %v593_v25 = vld [vmem:[%s2249_s5 + $0x530] sm:$0xff]  ;;  %590 = vst [vmem:[%s2254_s6 + $0x288] sm:$0xff] %v589_v23 }
  0x60   : > { %592 = vst [vmem:[%s2254_s6 + $0x290] sm:$0xff] %v591_v24  ;;  %594 = vst [vmem:[%s2254_s6 + $0x298] sm:$0xff] %v593_v25  ;;  %v595_v26 = vld [vmem:[%s2249_s5 + $0x540] sm:$0xff]  ;;  %v597_v27 = vld [vmem:[%s2249_s5 + $0x550] sm:$0xff] }
  0x61   : > { %v599_v28 = vld [vmem:[%s2249_s5 + $0x560] sm:$0xff]  ;;  %596 = vst [vmem:[%s2254_s6 + $0x2a0] sm:$0xff] %v595_v26  ;;  %598 = vst [vmem:[%s2254_s6 + $0x2a8] sm:$0xff] %v597_v27  ;;  %v601_v29 = vld [vmem:[%s2249_s5 + $0x570] sm:$0xff] }
  0x62   : > { %600 = vst [vmem:[%s2254_s6 + $0x2b0] sm:$0xff] %v599_v28  ;;  %v603_v30 = vld [vmem:[%s2249_s5 + $0x580] sm:$0xff]  ;;  %v605_v31 = vld [vmem:[%s2249_s5 + $0x590] sm:$0xff]  ;;  %602 = vst [vmem:[%s2254_s6 + $0x2b8] sm:$0xff] %v601_v29 }
  0x63   : > { %604 = vst [vmem:[%s2254_s6 + $0x2c0] sm:$0xff] %v603_v30  ;;  %606 = vst [vmem:[%s2254_s6 + $0x2c8] sm:$0xff] %v605_v31  ;;  %v607_v32 = vld [vmem:[%s2249_s5 + $0x5a0] sm:$0xff]  ;;  %v609_v33 = vld [vmem:[%s2249_s5 + $0x5b0] sm:$0xff] }
  0x64   : > { %v611_v34 = vld [vmem:[%s2249_s5 + $0x5c0] sm:$0xff]  ;;  %608 = vst [vmem:[%s2254_s6 + $0x2d0] sm:$0xff] %v607_v32  ;;  %610 = vst [vmem:[%s2254_s6 + $0x2d8] sm:$0xff] %v609_v33  ;;  %v613_v35 = vld [vmem:[%s2249_s5 + $0x5d0] sm:$0xff] }
  0x65   : > { %612 = vst [vmem:[%s2254_s6 + $0x2e0] sm:$0xff] %v611_v34  ;;  %v615_v36 = vld [vmem:[%s2249_s5 + $0x5e0] sm:$0xff]  ;;  %v617_v37 = vld [vmem:[%s2249_s5 + $0x5f0] sm:$0xff]  ;;  %614 = vst [vmem:[%s2254_s6 + $0x2e8] sm:$0xff] %v613_v35 }
  0x66   : > { %616 = vst [vmem:[%s2254_s6 + $0x2f0] sm:$0xff] %v615_v36  ;;  %618 = vst [vmem:[%s2254_s6 + $0x2f8] sm:$0xff] %v617_v37 }
  0x67 PF: > { %p1653_p0 = scmp.ge.s32.totalorder %s2112_s22, 1  ;;  %p631_p1 = scmp.lt.s32.totalorder %s2112_s22, 13 }
  0x69   : > { %p632_p2 = pnand %p1653_p0, %p631_p1 }
  0x6a   : > { %s638_s0 = sand.u32 (!%p632_p2), 1, %s2088_s16   ;;  %s645_s23 = sand.u32 (!%p632_p2), 1, %s2080_s14  }
  0x6b   : > { %635 = sbr.rel (%p632_p2) target bundleno = 492 (0x1ec), region = 85  ;;  %s672_s7 = sand.u32 (!%p632_p2), 1, %s2072_s12  }
  0x6c   : > { %s1782_s28 = smul.u32 (!%p632_p2), 48, %s638_s0  ;;  %s1654_s26 = sshll.u32 (!%p632_p2), %s672_s7, 4 }
  0x6d   : > { %s1783_s11 = smul.u32 (!%p632_p2), 768, %s645_s23  ;;  %s1655_s27 = sshll.u32 (!%p632_p2), %s2100_s19, 1 }
  0x6e   : > { %p680_p3 = scmp.lt.s32.totalorder (!%p632_p2), %s1655_s27, 3  ;;  %s2457_s6 = scalar_lea.vmem (!%p632_p2), [#allocation3], %s1782_s28 }
  0x6f   : > { %s2459_s1 = scalar_lea.vmem (!%p632_p2), [#allocation4], %s1783_s11  ;;  %s2461_s25 = scalar_lea.vmem (!%p632_p2), [#allocation5], %s1654_s26 }
  0x70   : > { %p1656_p4 = scmp.ne.s32.totalorder (!%p632_p2), %s2096_s18, 0 }
  0x72   : > { %s2646_s27 = smov (!%p680_p3, %s1655_s27), 3  ;;  %689 = sbr.rel (%p1656_p4) target bundleno = 121 (0x79), region = 97 }
  0x73   : > { %s682_s5 = scalar_lea.vmem %s2617_s2, %s2646_s27  ;;  %v2114_v38 = vmov (!%p1656_p4), 0.0  }
  0x74   : > { %690 = vst [vmem:[#allocation2] sm:$0xff] (!%p1656_p4), %v2114_v38  ;;  %691 = vst [vmem:[#allocation2 + $0x8] sm:$0xff] (!%p1656_p4), %v2114_v38 }
  0x75   : > { %692 = vst [vmem:[#allocation2 + $0x10] sm:$0xff] (!%p1656_p4), %v2114_v38  ;;  %693 = vst [vmem:[#allocation2 + $0x18] sm:$0xff] (!%p1656_p4), %v2114_v38 }
  0x79 PF: > { %v1873_v39 = vld [vmem:[%s2459_s1 + $0x104] ss:$8 sps:$4 sm:$0xff]   ;;  %v1875_v40 = vld [vmem:[%s2459_s1 + $0x100] ss:$8 sps:$4 sm:$0xff]   ;;  %v1876_v41 = vld [vmem:[%s2459_s1 + $0x114] ss:$8 sps:$4 sm:$0xff]  }
  0x7a   : > { %1353 = vmatprep.subr.bf16.mxu0 %v1873_v39  ;;  %v1878_v42 = vld [vmem:[%s2459_s1 + $0x110] ss:$8 sps:$4 sm:$0xff]   ;;  %v1879_v43 = vld [vmem:[%s2459_s1 + $0x124] ss:$8 sps:$4 sm:$0xff]   ;;  %v1881_v44 = vld [vmem:[%s2459_s1 + $0x120] ss:$8 sps:$4 sm:$0xff]  }
  0x7b   : > { %1354 = vmatpush1.bf16.msra.mxu0 %v1875_v40  ;;  %v1882_v45 = vld [vmem:[%s2459_s1 + $0x134] ss:$8 sps:$4 sm:$0xff]   ;;  %v1884_v46 = vld [vmem:[%s2459_s1 + $0x130] ss:$8 sps:$4 sm:$0xff]   ;;  %v1885_v47 = vld [vmem:[%s2459_s1 + $0x144] ss:$8 sps:$4 sm:$0xff]  }
  0x7c   : > { %1355 = vmatprep.subr.bf16.mxu0 %v1876_v41  ;;  %v1887_v48 = vld [vmem:[%s2459_s1 + $0x140] ss:$8 sps:$4 sm:$0xff]   ;;  %v1888_v49 = vld [vmem:[%s2459_s1 + $0x154] ss:$8 sps:$4 sm:$0xff]   ;;  %v1890_v50 = vld [vmem:[%s2459_s1 + $0x150] ss:$8 sps:$4 sm:$0xff]  }
  0x7d   : > { %v1891_v51 = vld [vmem:[%s2459_s1 + $0x164] ss:$8 sps:$4 sm:$0xff]   ;;  %v1923_v53 = vld [vmem:[%s2459_s1] ss:$8 sps:$4 sm:$0xff]   ;;  %v1894_v56 = vld [vmem:[%s2459_s1 + $0x174] ss:$8 sps:$4 sm:$0xff]  }
  0x7e   : > { %v1920_v52 = vld [vmem:[%s2459_s1 + $0x4] ss:$8 sps:$4 sm:$0xff]   ;;  %v1893_v54 = vld [vmem:[%s2459_s1 + $0x160] ss:$8 sps:$4 sm:$0xff]   ;;  %v1930_v57 = vld [vmem:[%s2459_s1 + $0x14] ss:$8 sps:$4 sm:$0xff]  }
  0x7f   : > { %1356 = vmatpush1.bf16.msra.mxu0 %v1878_v42  ;;  %1310 = vmatprep.subr.bf16.mxu1 %v1920_v52  ;;  %v1926_v55 = vld [vmem:[%s2457_s6 + $0xc] ss:$24 sps:$4 sm:$0xff]   ;;  %v1932_v58 = vld [vmem:[%s2459_s1 + $0x10] ss:$8 sps:$4 sm:$0xff]   ;;  %v1938_v62 = vld [vmem:[%s2459_s1 + $0x20] ss:$8 sps:$4 sm:$0xff]  }
  0x80   : > { %1357 = vmatprep.subr.bf16.mxu0 %v1879_v43  ;;  %1311 = vmatpush1.bf16.msra.mxu1 %v1923_v53  ;;  %v1896_v59 = vld [vmem:[%s2459_s1 + $0x170] ss:$8 sps:$4 sm:$0xff]   ;;  %v1897_v60 = vld [vmem:[%s2459_s1 + $0x184] ss:$8 sps:$4 sm:$0xff]   ;;  %v1899_v63 = vld [vmem:[%s2459_s1 + $0x180] ss:$8 sps:$4 sm:$0xff]  }
  0x81   : > { %1385 = vmatprep.mubr.bf16.mxu0 %v1926_v55  ;;  %1312 = vmatprep.subr.bf16.mxu1 %v1930_v57  ;;  %v1936_v61 = vld [vmem:[%s2459_s1 + $0x24] ss:$8 sps:$4 sm:$0xff]   ;;  %v1942_v0 = vld [vmem:[%s2459_s1 + $0x34] ss:$8 sps:$4 sm:$0xff]   ;;  %v1944_v2 = vld [vmem:[%s2459_s1 + $0x30] ss:$8 sps:$4 sm:$0xff]  }
  0x82   : > { %v1900_v1 = vld [vmem:[%s2459_s1 + $0x194] ss:$8 sps:$4 sm:$0xff]   ;;  %v1948_v3 = vld [vmem:[%s2459_s1 + $0x44] ss:$8 sps:$4 sm:$0xff]   ;;  %v1902_v4 = vld [vmem:[%s2459_s1 + $0x190] ss:$8 sps:$4 sm:$0xff]  }
  0x83   : > { %1358 = vmatpush1.bf16.msra.mxu0 %v1881_v44  ;;  %v1903_v5 = vld [vmem:[%s2459_s1 + $0x1a4] ss:$8 sps:$4 sm:$0xff]   ;;  %v1950_v6 = vld [vmem:[%s2459_s1 + $0x40] ss:$8 sps:$4 sm:$0xff]   ;;  %v1954_v7 = vld [vmem:[%s2459_s1 + $0x54] ss:$8 sps:$4 sm:$0xff]  }
  0x84   : > { %1359 = vmatprep.subr.bf16.mxu0 %v1882_v45  ;;  %1313 = vmatpush1.bf16.msra.mxu1 %v1932_v58  ;;  %v1905_v8 = vld [vmem:[%s2459_s1 + $0x1a0] ss:$8 sps:$4 sm:$0xff]   ;;  %v1906_v9 = vld [vmem:[%s2459_s1 + $0x1b4] ss:$8 sps:$4 sm:$0xff]   ;;  %v1956_v10 = vld [vmem:[%s2459_s1 + $0x50] ss:$8 sps:$4 sm:$0xff]  }
  0x85   : > { %1314 = vmatprep.subr.bf16.mxu1 %v1936_v61  ;;  %v1960_v11 = vld [vmem:[%s2459_s1 + $0x64] ss:$8 sps:$4 sm:$0xff]   ;;  %v1908_v12 = vld [vmem:[%s2459_s1 + $0x1b0] ss:$8 sps:$4 sm:$0xff]   ;;  %v1962_v14 = vld [vmem:[%s2459_s1 + $0x60] ss:$8 sps:$4 sm:$0xff]  }
  0x86   : > { %v1909_v13 = vld [vmem:[%s2459_s1 + $0x1c4] ss:$8 sps:$4 sm:$0xff]   ;;  %v1966_v15 = vld [vmem:[%s2459_s1 + $0x74] ss:$8 sps:$4 sm:$0xff]   ;;  %v1911_v16 = vld [vmem:[%s2459_s1 + $0x1c0] ss:$8 sps:$4 sm:$0xff]  }
  0x87   : > { %1360 = vmatpush1.bf16.msra.mxu0 %v1884_v46  ;;  %v1912_v17 = vld [vmem:[%s2459_s1 + $0x1d4] ss:$8 sps:$4 sm:$0xff]   ;;  %v1968_v18 = vld [vmem:[%s2459_s1 + $0x70] ss:$8 sps:$4 sm:$0xff]   ;;  %v1972_v19 = vld [vmem:[%s2459_s1 + $0x84] ss:$8 sps:$4 sm:$0xff]  }
  0x88   : > { %1361 = vmatprep.subr.bf16.mxu0 %v1885_v47  ;;  %1315 = vmatpush1.bf16.msra.mxu1 %v1938_v62  ;;  %v1914_v20 = vld [vmem:[%s2459_s1 + $0x1d0] ss:$8 sps:$4 sm:$0xff]   ;;  %v1915_v21 = vld [vmem:[%s2459_s1 + $0x1e4] ss:$8 sps:$4 sm:$0xff]   ;;  %v1974_v22 = vld [vmem:[%s2459_s1 + $0x80] ss:$8 sps:$4 sm:$0xff]  }
  0x89   : > { %1316 = vmatprep.subr.bf16.mxu1 %v1942_v0  ;;  %v1978_v23 = vld [vmem:[%s2459_s1 + $0x94] ss:$8 sps:$4 sm:$0xff]   ;;  %v1917_v24 = vld [vmem:[%s2459_s1 + $0x1e0] ss:$8 sps:$4 sm:$0xff]   ;;  %v1980_v26 = vld [vmem:[%s2459_s1 + $0x90] ss:$8 sps:$4 sm:$0xff]  }
  0x8a   : > { %v1918_v25 = vld [vmem:[%s2459_s1 + $0x1f4] ss:$8 sps:$4 sm:$0xff]   ;;  %v1984_v27 = vld [vmem:[%s2459_s1 + $0xa4] ss:$8 sps:$4 sm:$0xff]   ;;  %v1922_v28 = vld [vmem:[%s2459_s1 + $0x1f0] ss:$8 sps:$4 sm:$0xff]  }
  0x8b   : > { %1362 = vmatpush1.bf16.msra.mxu0 %v1887_v48  ;;  %v1929_v29 = vld [vmem:[%s2459_s1 + $0x204] ss:$8 sps:$4 sm:$0xff]   ;;  %v1986_v30 = vld [vmem:[%s2459_s1 + $0xa0] ss:$8 sps:$4 sm:$0xff]   ;;  %v1990_v32 = vld [vmem:[%s2459_s1 + $0xb4] ss:$8 sps:$4 sm:$0xff]  }
  0x8c   : > { %1363 = vmatprep.subr.bf16.mxu0 %v1888_v49  ;;  %1317 = vmatpush1.bf16.msra.mxu1 %v1944_v2  ;;  %v1924_v31 = vld [vmem:[%s2457_s6 + $0x8] ss:$24 sps:$4 sm:$0xff]   ;;  %v1935_v34 = vld [vmem:[%s2459_s1 + $0x214] ss:$8 sps:$4 sm:$0xff]   ;;  %v1996_v37 = vld [vmem:[%s2459_s1 + $0xc4] ss:$8 sps:$4 sm:$0xff]  }
  0x8d   : > { %1318 = vmatprep.subr.bf16.mxu1 %v1948_v3  ;;  %v1927_v33 = vld [vmem:[%s2459_s1 + $0x200] ss:$8 sps:$4 sm:$0xff]   ;;  %v1992_v35 = vld [vmem:[%s2459_s1 + $0xb0] ss:$8 sps:$4 sm:$0xff]   ;;  %v2019_v36 = vld [vmem:[%s2457_s6 + $0x4] ss:$24 sps:$4 sm:$0xff]  }
  0x8e   : > { %v1933_v38 = vld [vmem:[%s2459_s1 + $0x210] ss:$8 sps:$4 sm:$0xff]   ;;  %1342 = vmatprep.mubr.bf16.mxu1 %v2019_v36  ;;  %v2025_v39 = vld [vmem:[%s2457_s6 + $0x14] ss:$24 sps:$4 sm:$0xff]   ;;  %v1998_v41 = vld [vmem:[%s2459_s1 + $0xc0] ss:$8 sps:$4 sm:$0xff]  }
  0x8f   : > { %1364 = vmatpush1.bf16.msra.mxu0 %v1890_v50  ;;  %v1941_v40 = vld [vmem:[%s2459_s1 + $0x224] ss:$8 sps:$4 sm:$0xff]   ;;  %v2002_v42 = vld [vmem:[%s2459_s1 + $0xd4] ss:$8 sps:$4 sm:$0xff]   ;;  %v1939_v43 = vld [vmem:[%s2459_s1 + $0x220] ss:$8 sps:$4 sm:$0xff]  }
  0x90   : > { %1365 = vmatprep.subr.bf16.mxu0 %v1891_v51  ;;  %1319 = vmatpush1.bf16.msra.mxu1 %v1950_v6  ;;  %v1947_v44 = vld [vmem:[%s2459_s1 + $0x234] ss:$8 sps:$4 sm:$0xff]   ;;  %v2004_v45 = vld [vmem:[%s2459_s1 + $0xd0] ss:$8 sps:$4 sm:$0xff]   ;;  %v2008_v46 = vld [vmem:[%s2459_s1 + $0xe4] ss:$8 sps:$4 sm:$0xff]  }
  0x91   : > { %1320 = vmatprep.subr.bf16.mxu1 %v1954_v7  ;;  %v1945_v47 = vld [vmem:[%s2459_s1 + $0x230] ss:$8 sps:$4 sm:$0xff]   ;;  %v1953_v48 = vld [vmem:[%s2459_s1 + $0x244] ss:$8 sps:$4 sm:$0xff]   ;;  %v2010_v49 = vld [vmem:[%s2459_s1 + $0xe0] ss:$8 sps:$4 sm:$0xff]  }
  0x92   : > { %v2014_v50 = vld [vmem:[%s2459_s1 + $0xf4] ss:$8 sps:$4 sm:$0xff]   ;;  %v1951_v51 = vld [vmem:[%s2459_s1 + $0x240] ss:$8 sps:$4 sm:$0xff]   ;;  %v2016_v53 = vld [vmem:[%s2459_s1 + $0xf0] ss:$8 sps:$4 sm:$0xff]  }
  0x93   : > { %1366 = vmatpush1.bf16.msra.mxu0 %v1893_v54  ;;  %v1959_v52 = vld [vmem:[%s2459_s1 + $0x254] ss:$8 sps:$4 sm:$0xff]   ;;  %v1957_v54 = vld [vmem:[%s2459_s1 + $0x250] ss:$8 sps:$4 sm:$0xff]   ;;  %v1965_v55 = vld [vmem:[%s2459_s1 + $0x264] ss:$8 sps:$4 sm:$0xff]  }
  0x94   : > { %1367 = vmatprep.subr.bf16.mxu0 %v1894_v56  ;;  %1321 = vmatpush1.bf16.msra.mxu1 %v1956_v10  ;;  %v2017_v56 = vld [vmem:[%s2457_s6] ss:$24 sps:$4 sm:$0xff]   ;;  %v1971_v58 = vld [vmem:[%s2459_s1 + $0x274] ss:$8 sps:$4 sm:$0xff]   ;;  %v1989_v0 = vld [vmem:[%s2459_s1 + $0x2a4] ss:$8 sps:$4 sm:$0xff]  }
  0x95   : > { %1322 = vmatprep.subr.bf16.mxu1 %v1960_v11  ;;  %v1963_v57 = vld [vmem:[%s2459_s1 + $0x260] ss:$8 sps:$4 sm:$0xff]   ;;  %v1983_v62 = vld [vmem:[%s2459_s1 + $0x294] ss:$8 sps:$4 sm:$0xff]   ;;  %v1993_v3 = vld [vmem:[%s2459_s1 + $0x2b0] ss:$8 sps:$4 sm:$0xff]  }
  0x96   : > { %v1975_v61 = vld [vmem:[%s2459_s1 + $0x280] ss:$8 sps:$4 sm:$0xff]   ;;  %v1995_v2 = vld [vmem:[%s2459_s1 + $0x2b4] ss:$8 sps:$4 sm:$0xff]   ;;  %v2005_v7 = vld [vmem:[%s2459_s1 + $0x2d0] ss:$8 sps:$4 sm:$0xff]  }
  0x97   : > { %1368 = vmatpush1.bf16.msra.mxu0 %v1896_v59  ;;  %v1969_v59 = vld [vmem:[%s2459_s1 + $0x270] ss:$8 sps:$4 sm:$0xff]   ;;  %v2007_v6 = vld [vmem:[%s2459_s1 + $0x2d4] ss:$8 sps:$4 sm:$0xff]   ;;  %p1759_p5 = scmp.ne.s32.totalorder %s2096_s18, 5 }
  0x98   : > { %1369 = vmatprep.subr.bf16.mxu0 %v1897_v60  ;;  %1323 = vmatpush1.bf16.msra.mxu1 %v1962_v14  ;;  %v1977_v60 = vld [vmem:[%s2459_s1 + $0x284] ss:$8 sps:$4 sm:$0xff]   ;;  %v2022_v10 = vld [vmem:[%s2459_s1 + $0x2f4] ss:$8 sps:$4 sm:$0xff]   ;;  %v2020_v11 = vld [vmem:[%s2459_s1 + $0x2f0] ss:$8 sps:$4 sm:$0xff]  }
  0x99   : > { %1324 = vmatprep.subr.bf16.mxu1 %v1966_v15 }
  0x9b   : > { %1370 = vmatpush1.bf16.msra.mxu0 %v1899_v63  ;;  %v1981_v63 = vld [vmem:[%s2459_s1 + $0x290] ss:$8 sps:$4 sm:$0xff]  }
  0x9c   : > { %1371 = vmatprep.subr.bf16.mxu0 %v1900_v1  ;;  %1325 = vmatpush1.bf16.msra.mxu1 %v1968_v18  ;;  %v1987_v1 = vld [vmem:[%s2459_s1 + $0x2a0] ss:$8 sps:$4 sm:$0xff]  }
  0x9d   : > { %1326 = vmatprep.subr.bf16.mxu1 %v1972_v19 }
  0x9f   : > { %1372 = vmatpush1.bf16.msra.mxu0 %v1902_v4  ;;  %v2001_v4 = vld [vmem:[%s2459_s1 + $0x2c4] ss:$8 sps:$4 sm:$0xff]  }
  0xa0   : > { %1373 = vmatprep.subr.bf16.mxu0 %v1903_v5  ;;  %1327 = vmatpush1.bf16.msra.mxu1 %v1974_v22  ;;  %v1999_v5 = vld [vmem:[%s2459_s1 + $0x2c0] ss:$8 sps:$4 sm:$0xff]  }
  0xa1   : > { %1328 = vmatprep.subr.bf16.mxu1 %v1978_v23  ;;  %v696_v23 = vld [vmem:[#allocation2 + $0x10] sm:$0xff] }
  0xa3   : > { %1374 = vmatpush1.bf16.msra.mxu0 %v1905_v8  ;;  %v2013_v8 = vld [vmem:[%s2459_s1 + $0x2e4] ss:$8 sps:$4 sm:$0xff]  }
  0xa4   : > { %1375 = vmatprep.subr.bf16.mxu0 %v1906_v9  ;;  %1329 = vmatpush1.bf16.msra.mxu1 %v1980_v26  ;;  %v2011_v9 = vld [vmem:[%s2459_s1 + $0x2e0] ss:$8 sps:$4 sm:$0xff]  }
  0xa5   : > { %1330 = vmatprep.subr.bf16.mxu1 %v1984_v27  ;;  %v697_v27 = vld [vmem:[#allocation2 + $0x18] sm:$0xff] }
  0xa7   : > { %1376 = vmatpush1.bf16.msra.mxu0 %v1908_v12  ;;  %v2023_v12 = vld [vmem:[%s2457_s6 + $0x10] ss:$24 sps:$4 sm:$0xff]  }
  0xa8   : > { %1377 = vmatprep.subr.bf16.mxu0 %v1909_v13  ;;  %1331 = vmatpush1.bf16.msra.mxu1 %v1986_v30 }
  0xa9   : > { %1332 = vmatprep.subr.bf16.mxu1 %v1990_v32 }
  0xab   : > { %1378 = vmatpush1.bf16.msra.mxu0 %v1911_v16 }
  0xac   : > { %1379 = vmatprep.subr.bf16.mxu0 %v1912_v17  ;;  %1333 = vmatpush1.bf16.msra.mxu1 %v1992_v35  ;;  %v694_v17 = vld [vmem:[#allocation2] sm:$0xff] }
  0xad   : > { %1334 = vmatprep.subr.bf16.mxu1 %v1996_v37  ;;  %v1455_v35 = vld [vmem:[%s682_s5] sm:$0x3] (!%p1759_p5) }
  0xaf   : > { %1380 = vmatpush1.bf16.msra.mxu0 %v1914_v20  ;;  %v695_v20 = vld [vmem:[#allocation2 + $0x8] sm:$0xff] }
  0xb0   : > { %1381 = vmatprep.subr.bf16.mxu0 %v1915_v21  ;;  %1335 = vmatpush1.bf16.msra.mxu1 %v1998_v41 }
  0xb1   : > { %1336 = vmatprep.subr.bf16.mxu1 %v2002_v42 }
  0xb3   : > { %1382 = vmatpush1.bf16.msra.mxu0 %v1917_v24 }
  0xb4   : > { %1383 = vmatprep.subr.bf16.mxu0 %v1918_v25  ;;  %1337 = vmatpush1.bf16.msra.mxu1 %v2004_v45 }
  0xb5   : > { %1338 = vmatprep.subr.bf16.mxu1 %v2008_v46 }
  0xb7   : > { %1384 = vmatpush1.bf16.msra.mxu0 %v1922_v28 }
  0xb8   : > { %1396 = vmatprep.subr.bf16.mxu0 %v1929_v29  ;;  %1339 = vmatpush1.bf16.msra.mxu1 %v2010_v49 }
  0xb9   : > { %1340 = vmatprep.subr.bf16.mxu1 %v2014_v50 }
  0xba   : > { %1386 = vmatmul.mubr.bf16.vlgmr.msra.gmra.mrb[0].mxu0 %v1924_v31 }
  0xbb   : > { %1397 = vmatpush1.bf16.msra.mxu0 %v1927_v33  ;;  %1428 = vmatprep.mubr.bf16.mxu0 %v2025_v39  ;;  %v1457_v33 = vlaneseq (!%p1759_p5) }
  0xbc   : > { %1398 = vmatprep.subr.bf16.mxu0 %v1935_v34  ;;  %1341 = vmatpush1.bf16.msra.mxu1 %v2016_v53 }
  0xbd   : > { %v1458_v34 = vshrl.u32 (!%p1759_p5), %v1457_v33, 7 }
  0xbf   : > { %1399 = vmatpush1.bf16.msra.mxu0 %v1933_v38  ;;  %1343 = vmatmul.mubr.bf16.vlgmr.msra.gmra.mrb[0].mxu1 %v2017_v56  ;;  %v1459_v37 = vsub.s32 (!%p1759_p5), 0, %v1458_v34  ;;  %v1463_v38 = vsub.s32 (!%p1759_p5), 1, %v1458_v34 }
  0xc0   : > { %1400 = vmatprep.subr.bf16.mxu0 %v1941_v40 }
  0xc1   : > { %v1460_v42 = vrot.slane (!%p1759_p5), %v1455_v35, %v1459_v37 }
  0xc3   : > { %1401 = vmatpush1.bf16.msra.mxu0 %v1939_v43  ;;  %v1464_v43 = vrot.slane (!%p1759_p5), %v1455_v35, %v1463_v38 }
  0xc4   : > { %1402 = vmatprep.subr.bf16.mxu0 %v1947_v44 }
  0xc7   : > { %1403 = vmatpush1.bf16.msra.mxu0 %v1945_v47 }
  0xc8   : > { %1404 = vmatprep.subr.bf16.mxu0 %v1953_v48 }
  0xcb   : > { %1405 = vmatpush1.bf16.msra.mxu0 %v1951_v51 }
  0xcc   : > { %1406 = vmatprep.subr.bf16.mxu0 %v1959_v52 }
  0xcf   : > { %1407 = vmatpush1.bf16.msra.mxu0 %v1957_v54 }
  0xd0   : > { %1408 = vmatprep.subr.bf16.mxu0 %v1965_v55 }
  0xd3   : > { %1409 = vmatpush1.bf16.msra.mxu0 %v1963_v57 }
  0xd4   : > { %1410 = vmatprep.subr.bf16.mxu0 %v1971_v58 }
  0xd7   : > { %1411 = vmatpush1.bf16.msra.mxu0 %v1969_v59 }
  0xd8   : > { %1412 = vmatprep.subr.bf16.mxu0 %v1977_v60 }
  0xdb   : > { %1413 = vmatpush1.bf16.msra.mxu0 %v1975_v61 }
  0xdc   : > { %1414 = vmatprep.subr.bf16.mxu0 %v1983_v62 }
  0xdf   : > { %1415 = vmatpush1.bf16.msra.mxu0 %v1981_v63 }
  0xe0   : > { %1416 = vmatprep.subr.bf16.mxu0 %v1989_v0 }
  0xe3   : > { %1417 = vmatpush1.bf16.msra.mxu0 %v1987_v1 }
  0xe4   : > { %1418 = vmatprep.subr.bf16.mxu0 %v1995_v2 }
  0xe7   : > { %1419 = vmatpush1.bf16.msra.mxu0 %v1993_v3 }
  0xe8   : > { %1420 = vmatprep.subr.bf16.mxu0 %v2001_v4 }
  0xeb   : > { %1421 = vmatpush1.bf16.msra.mxu0 %v1999_v5 }
  0xec   : > { %1422 = vmatprep.subr.bf16.mxu0 %v2007_v6 }
  0xef   : > { %1423 = vmatpush1.bf16.msra.mxu0 %v2005_v7 }
  0xf0   : > { %1424 = vmatprep.subr.bf16.mxu0 %v2013_v8 }
  0xf3   : > { %1425 = vmatpush1.bf16.msra.mxu0 %v2011_v9 }
  0xf4   : > { %1426 = vmatprep.subr.bf16.mxu0 %v2022_v10 }
  0xf7   : > { %1427 = vmatpush1.bf16.msra.mxu0 %v2020_v11 }
  0xfa   : > { %1429 = vmatmul.mubr.bf16.vlgmr.msra.gmra.mrb[0].mxu0 %v2023_v12 }
 0x192   : > { %v1344_v13 = vpop.f32.mrb[0].mxu1 }
 0x193   : > { %v1346_v14 = vpop.f32.mrb[1].mxu1 }
 0x194   : > { %v1348_v15 = vpop.f32.mrb[2].mxu1 }
 0x195   : > { %v1350_v16 = vpop.f32.mrb[3].mxu1 }
 0x1cd   : > { %v1430_v18 = vpop.f32.mrb[0].mxu0 }
 0x1ce   : > { %v1772_v19 = vadd.f32 %v1430_v18, %v1344_v13  ;;  %v1432_v21 = vpop.f32.mrb[1].mxu0 }
 0x1cf   : > { %v1773_v22 = vadd.f32 %v1432_v21, %v1346_v14  ;;  %v1434_v24 = vpop.f32.mrb[2].mxu0  ;;  %1450 = sbr.rel (%p1759_p5) target bundleno = 484 (0x1e4), region = 101 }
 0x1d0   : > { %v1439_v25 = vadd.f32 %v1772_v19, %v694_v17  ;;  %v1774_v26 = vadd.f32 %v1434_v24, %v1348_v15  ;;  %v1436_v28 = vpop.f32.mrb[3].mxu0 }
 0x1d1   : > { %v1440_v29 = vadd.f32 %v1773_v22, %v695_v20  ;;  %v1775_v30 = vadd.f32 %v1436_v28, %v1350_v16 }
 0x1d2   : > { %1443 = vst [vmem:[#allocation2] sm:$0xff] %v1439_v25  ;;  %v1441_v31 = vadd.f32 %v1774_v26, %v696_v23 }
 0x1d3   : > { %1444 = vst [vmem:[#allocation2 + $0x8] sm:$0xff] %v1440_v29  ;;  %v1442_v32 = vadd.f32 %v1775_v30, %v697_v27 }
 0x1d4   : > { %1445 = vst [vmem:[#allocation2 + $0x10] sm:$0xff] %v1441_v31 }
 0x1d5   : > { %1446 = vst [vmem:[#allocation2 + $0x18] sm:$0xff] %v1442_v32 }
 0x1d9   : > { %v1451_v36 = vld [vmem:[#allocation2] sm:$0xff] }
 0x1da   : > { %v1452_v39 = vld [vmem:[#allocation2 + $0x8] sm:$0xff]  ;;  %v1467_v44 = vadd.f32 %v1460_v42, %v1451_v36 }
 0x1db   : > { %v1453_v40 = vld [vmem:[#allocation2 + $0x10] sm:$0xff]  ;;  %v1468_v45 = vadd.f32 %v1464_v43, %v1452_v39 }
 0x1dc   : > { %v1454_v41 = vld [vmem:[#allocation2 + $0x18] sm:$0xff]  ;;  %v1469_v46 = vadd.f32 %v1460_v42, %v1453_v40  ;;  %v1471_v48 = vmax.f32 %v1467_v44, 0.0 }
 0x1dd   : > { %v1470_v47 = vadd.f32 %v1464_v43, %v1454_v41  ;;  %v1472_v49 = vmax.f32 %v1468_v45, 0.0 }
 0x1de   : > { %v1473_v50 = vmax.f32 %v1469_v46, 0.0 }
 0x1df   : > { %v1474_v51 = vmax.f32 %v1470_v47, 0.0  ;;  %v1769_v52 = vpack.c.bf16 %v1472_v49, %v1471_v48 }
 0x1e1   : > { %v1770_v53 = vpack.c.bf16 %v1474_v51, %v1473_v50  ;;  %1487 = vst [vmem:[%s2461_s25] sm:$0xff] %v1769_v52 }
 0x1e3   : > { %1488 = vst [vmem:[%s2461_s25 + $0x8] sm:$0xff] %v1770_v53 }
 0x1e4 PF: > { %1495 = sbr.rel (!%p2229_p12) target bundleno = 492 (0x1ec), region = 105  ;;  %s1771_s14 = sshll.u32 (%p2229_p12), %s2100_s19, 3 }
 0x1e5   : > { %s1501_s0 = scalar_lea.vmem (%p2229_p12), %s2618_s3, %s1771_s14 }
 0x1e8   : > { %v1531_v54 = vld [vmem:[%s2461_s25] sm:$0xff] (%p2229_p12) }
 0x1e9   : > { %1532 = vst [vmem:[%s1501_s0] sm:$0xff] (%p2229_p12), %v1531_v54 }
 0x1ea   : > { %v1533_v55 = vld [vmem:[%s2461_s25 + $0x8] sm:$0xff] (%p2229_p12) }
 0x1eb   : > { %1534 = vst [vmem:[%s1501_s0 + $0x10] sm:$0xff] %v1533_v55 }
 0x1ec PF: > { %s13_s22 = sadd.s32 1, %s2112_s22   ;;  %s2628_s25 = sld [smem:[#allocation6_spill]] }
 0x1ed   : > { %p10_p6 = scmp.ge.s32.totalorder %s13_s22, 14   ;;  %s2629_s12 = smov %s2076_s13 }
 0x1ee   : > { %s2630_s13 = smov %s2227_s9  ;;  %s2631_s14 = smov %s2084_s15 }
 0x1ef   : > { %s2632_s15 = smov %s2224_s8  ;;  %s2633_s16 = smov %s2092_s17 }
 0x1f0   : > { %s2634_s17 = smov %s2210_s30  ;;  %s2635_s18 = smov %s2104_s20 }
 0x1f1   : > { %s2636_s19 = smov %s2108_s21  ;;  %s2637_s20 = smov %s2640_s24 }
 0x1f2   : > { %s2638_s21 = smov %s2628_s25  ;;  %12 = sbr.rel (!%p10_p6) target bundleno = 9 (0x9), region = 185 }

// kernel: resnet18_forward.41
= control target key start
LH: loop header
LB: loop body
LE: loop exit
PB: predicated region body
PF: predicated region fallthrough
CT: control target
= control target key end

     0   :  { %s646_s1 = inlined_call_operand.vmem [shape: bf16[512,128], index: 1, kind: input, shape index: {}]   ;;  %s647_s0 = inlined_call_operand.vmem [shape: bf16[16,512], index: 0, kind: input, shape index: {}]   ;;  %s648_s2 = inlined_call_operand.vmem [shape: f32[1,128], index: 2, kind: input, shape index: {}]   ;;  %s649_s3 = inlined_call_operand.vmem [shape: f32[16,128], index: 3, kind: output, shape index: {}]  }
   0x1   :  { %v471_v0 = vld [vmem:[%s646_s1 + $0x40] sm:$0xff]   ;;  %v475_v4 = vld [vmem:[%s646_s1 + $0x48] sm:$0xff]   ;;  %v479_v8 = vld [vmem:[%s646_s1 + $0x50] sm:$0xff]  }
   0x2   :  { %v472_v1 = vld [vmem:[%s646_s1 + $0xc0] sm:$0xff]   ;;  %427 = vmatprep.subr.bf16.mxu0 %v471_v0  ;;  %v476_v5 = vld [vmem:[%s646_s1 + $0xc8] sm:$0xff]   ;;  %v480_v9 = vld [vmem:[%s646_s1 + $0xd0] sm:$0xff]  }
   0x3   :  { %v473_v2 = vld [vmem:[%s646_s1] sm:$0xff]   ;;  %449 = vmatprep.subr.bf16.mxu1 %v472_v1  ;;  %v477_v6 = vld [vmem:[%s646_s1 + $0x8] sm:$0xff]   ;;  %v481_v10 = vld [vmem:[%s646_s1 + $0x10] sm:$0xff]  }
   0x4   :  { %v474_v3 = vld [vmem:[%s646_s1 + $0x80] sm:$0xff]   ;;  %428 = vmatpush3.bf16.msra.mxu0 %v473_v2  ;;  %v478_v7 = vld [vmem:[%s646_s1 + $0x88] sm:$0xff]   ;;  %v482_v11 = vld [vmem:[%s646_s1 + $0x90] sm:$0xff]  }
   0x5   :  { %450 = vmatpush3.bf16.msra.mxu1 %v474_v3  ;;  %429 = vmatprep.subr.bf16.mxu0 %v475_v4  ;;  %v483_v12 = vld [vmem:[%s646_s1 + $0x58] sm:$0xff]   ;;  %v487_v16 = vld [vmem:[%s646_s1 + $0x60] sm:$0xff]   ;;  %v491_v20 = vld [vmem:[%s646_s1 + $0x68] sm:$0xff]  }
   0x6   :  { %451 = vmatprep.subr.bf16.mxu1 %v476_v5  ;;  %v484_v13 = vld [vmem:[%s646_s1 + $0xd8] sm:$0xff]   ;;  %v488_v17 = vld [vmem:[%s646_s1 + $0xe0] sm:$0xff]   ;;  %v492_v21 = vld [vmem:[%s646_s1 + $0xe8] sm:$0xff]  }
   0x7   :  { %v485_v14 = vld [vmem:[%s646_s1 + $0x18] sm:$0xff]   ;;  %v489_v18 = vld [vmem:[%s646_s1 + $0x20] sm:$0xff]   ;;  %v493_v22 = vld [vmem:[%s646_s1 + $0x28] sm:$0xff]  }
   0x8   :  { %430 = vmatpush3.bf16.msra.mxu0 %v477_v6  ;;  %v486_v15 = vld [vmem:[%s646_s1 + $0x98] sm:$0xff]   ;;  %v490_v19 = vld [vmem:[%s646_s1 + $0xa0] sm:$0xff]   ;;  %v494_v23 = vld [vmem:[%s646_s1 + $0xa8] sm:$0xff]  }
   0x9   :  { %452 = vmatpush3.bf16.msra.mxu1 %v478_v7  ;;  %431 = vmatprep.subr.bf16.mxu0 %v479_v8  ;;  %v495_v24 = vld [vmem:[%s646_s1 + $0x70] sm:$0xff]   ;;  %v499_v28 = vld [vmem:[%s646_s1 + $0x78] sm:$0xff]   ;;  %v390_v38 = vld [vmem:[%s648_s2] ss:$0 sm:$0xff] }
   0xa   :  { %453 = vmatprep.subr.bf16.mxu1 %v480_v9  ;;  %v496_v25 = vld [vmem:[%s646_s1 + $0xf0] sm:$0xff]   ;;  %v500_v29 = vld [vmem:[%s646_s1 + $0xf8] sm:$0xff]  }
   0xb   :  { %v497_v26 = vld [vmem:[%s646_s1 + $0x30] sm:$0xff]   ;;  %v501_v30 = vld [vmem:[%s646_s1 + $0x38] sm:$0xff]  }
   0xc   :  { %432 = vmatpush3.bf16.msra.mxu0 %v481_v10  ;;  %v498_v27 = vld [vmem:[%s646_s1 + $0xb0] sm:$0xff]   ;;  %v502_v31 = vld [vmem:[%s646_s1 + $0xb8] sm:$0xff]  }
   0xd   :  { %454 = vmatpush3.bf16.msra.mxu1 %v482_v11  ;;  %433 = vmatprep.subr.bf16.mxu0 %v483_v12  ;;  %v503_v32 = vld [vmem:[%s647_s0] ss:$16 sps:$4 sm:$0xff]   ;;  %v505_v33 = vld [vmem:[%s647_s0 + $0x4] ss:$16 sps:$4 sm:$0xff]   ;;  %v506_v34 = vld [vmem:[%s647_s0 + $0x8] ss:$16 sps:$4 sm:$0xff]  }
   0xe   :  { %455 = vmatprep.subr.bf16.mxu1 %v484_v13  ;;  %v508_v35 = vld [vmem:[%s647_s0 + $0xc] ss:$16 sps:$4 sm:$0xff]   ;;  %334 = vmatprep.mubr.bf16.mxu0 %v505_v33 }
   0xf   :  { %375 = vmatprep.mubr.bf16.mxu1 %v508_v35 }
  0x10   :  { %434 = vmatpush3.bf16.msra.mxu0 %v485_v14 }
  0x11   :  { %456 = vmatpush3.bf16.msra.mxu1 %v486_v15  ;;  %435 = vmatprep.subr.bf16.mxu0 %v487_v16 }
  0x12   :  { %457 = vmatprep.subr.bf16.mxu1 %v488_v17 }
  0x14   :  { %436 = vmatpush3.bf16.msra.mxu0 %v489_v18 }
  0x15   :  { %458 = vmatpush3.bf16.msra.mxu1 %v490_v19  ;;  %437 = vmatprep.subr.bf16.mxu0 %v491_v20 }
  0x16   :  { %459 = vmatprep.subr.bf16.mxu1 %v492_v21 }
  0x18   :  { %438 = vmatpush3.bf16.msra.mxu0 %v493_v22 }
  0x19   :  { %460 = vmatpush3.bf16.msra.mxu1 %v494_v23  ;;  %439 = vmatprep.subr.bf16.mxu0 %v495_v24 }
  0x1a   :  { %461 = vmatprep.subr.bf16.mxu1 %v496_v25 }
  0x1c   :  { %440 = vmatpush3.bf16.msra.mxu0 %v497_v26 }
  0x1d   :  { %462 = vmatpush3.bf16.msra.mxu1 %v498_v27  ;;  %441 = vmatprep.subr.bf16.mxu0 %v499_v28 }
  0x1e   :  { %463 = vmatprep.subr.bf16.mxu1 %v500_v29 }
  0x20   :  { %442 = vmatpush3.bf16.msra.mxu0 %v501_v30 }
  0x21   :  { %464 = vmatpush3.bf16.msra.mxu1 %v502_v31 }
  0x23   :  { %335 = vmatmul.mubr.bf16.vlgmr.msra.gmra.mrb[0].mxu0 %v503_v32 }
  0x24   :  { %376 = vmatmul.mubr.bf16.vlgmr.msra.gmra.mrb[0].mxu1 %v506_v34 }
  0xf6   :  { %v443_v36 = vpop.f32.mrb[0].mxu0 }
  0xf7   :  { %v465_v37 = vpop.f32.mrb[0].mxu1  ;;  %v444_v39 = vpop.f32.mrb[1].mxu0 }
  0xf8   :  { %v445_v40 = vadd.f32 %v444_v39, %v443_v36  ;;  %v466_v41 = vpop.f32.mrb[1].mxu1  ;;  %v446_v42 = vpop.f32.mrb[2].mxu0 }
  0xf9   :  { %v467_v43 = vadd.f32 %v466_v41, %v465_v37  ;;  %v468_v44 = vpop.f32.mrb[2].mxu1  ;;  %v447_v45 = vpop.f32.mrb[3].mxu0 }
  0xfa   :  { %v337_v46 = vadd.f32 %v445_v40, %v390_v38  ;;  %v448_v47 = vadd.f32 %v447_v45, %v446_v42  ;;  %v469_v48 = vpop.f32.mrb[3].mxu1 }
  0xfb   :  { %v470_v49 = vadd.f32 %v469_v48, %v468_v44 }
  0xfc   :  { %v378_v50 = vadd.f32 %v467_v43, %v337_v46  ;;  %v340_v51 = vadd.f32 %v448_v47, %v390_v38 }
  0xfe   :  { %384 = vst [vmem:[%s649_s3] sm:$0xff] %v378_v50  ;;  %v381_v52 = vadd.f32 %v470_v49, %v340_v51 }
 0x100   :  { %385 = vst [vmem:[%s649_s3 + $0x8] sm:$0xff] %v381_v52 }

</bundles_post_ra>
